<compile_context>
chip_gen: v7x
topology: tpu7x:2x2x1
jax: 0.10.0
libtpu: 0.0.40
codegen_flags: <defaults>
</compile_context>

<pallas_src>
import jax
import jax.numpy as jnp
import numpy as np
from jax.experimental import pallas as pl
from jax.experimental.pallas import tpu as pltpu

_LANE = 128
_W_NAMES = ("w_in", "b_in", "wd", "bd", "w1", "b1", "w_out", "b_out")


def _round_up(n, m):
    return ((n + m - 1) // m) * m


def _pad_axis(a, axis, target):
    pad = target - a.shape[axis]
    if pad <= 0:
        return a
    widths = [(0, 0)] * a.ndim
    widths[axis] = (0, pad)
    return jnp.pad(a, widths)


def _full_spec(shape):
    n = len(shape)
    return pl.BlockSpec(shape, lambda b, _n=n: (0,) * _n)


# ----------------------------------------------------------------------------
# Fused kernel: tower (k3 + k5) + all refinement stages for one batch element.
# ----------------------------------------------------------------------------
def _make_fused_kernel(ks, num_layers, n_ref, halo_pad, seq_len, Cp, NCp):
    nb = len(ks)                       # 2 tower branches + n_ref refinement stages
    n_out = 2 + n_ref                  # middle + tower final + one final per refinement

    def kernel(*refs):
        x_ref, mask_ref = refs[0], refs[1]
        w_refs = refs[2:2 + 8 * nb]
        out_refs = refs[2 + 8 * nb: 2 + 8 * nb + n_out]
        pad_ref = refs[-1]                                 # (T + 2*halo, Cp) f32 scratch

        T = seq_len
        m = mask_ref[...].astype(jnp.float32)              # (T, 1)
        # Hoisted mask lane-broadcasts, reused by every residual / conv_out multiply.
        m_c = jnp.broadcast_to(m, (T, Cp))
        m_nc = jnp.broadcast_to(m, (T, NCp))

        # Zero ONLY the halo rows (centre rows are always overwritten before reads).
        # Per grid step on purpose: under 'parallel' megacore sharding core 1 never
        # sees grid step 0, so a one-time init would leave its halos uninitialized.
        zeros_halo = jnp.zeros((halo_pad, Cp), jnp.float32)
        pad_ref[pl.ds(0, halo_pad), :] = zeros_halo
        pad_ref[pl.ds(halo_pad + T, halo_pad), :] = zeros_halo

        def single_stage(x_bf, bi):
            """One SingleStageModel forward. x_bf: (T, Din_p) bf16 -> (out f32, final f32)."""
            K = ks[bi]
            (w_in, b_in, wd, bd, w1, b1, w_out, b_out) = w_refs[8 * bi: 8 * bi + 8]

            # input 1x1 conv
            out = jnp.dot(x_bf, w_in[...],
                          preferred_element_type=jnp.float32) + b_in[...]

            # dilated residual layers (dilation = 2**l)
            for l in range(num_layers):
                d = 2 ** l
                pad_ref[pl.ds(halo_pad, T), :] = out       # centre of zero-haloed scratch
                # K shifted taps -> K accumulating (T,Cp)@(Cp,Cp) MXU dots (no concat temp).
                acc = bd[l]
                for j in range(K):
                    off = halo_pad + (j - (K - 1) // 2) * d
                    tap = pad_ref[pl.ds(off, T), :].astype(jnp.bfloat16)
                    acc = acc + jnp.dot(tap, wd[l * K + j],
                                        preferred_element_type=jnp.float32)
                acc = jnp.maximum(acc, 0.0)                # ReLU; dropout = identity (eval)
                acc = jnp.dot(acc.astype(jnp.bfloat16), w1[l],
                              preferred_element_type=jnp.float32) + b1[l]
                out = (out + acc) * m_c                    # residual * mask

            fin = (jnp.dot(out.astype(jnp.bfloat16), w_out[...],
                           preferred_element_type=jnp.float32) + b_out[...]) * m_nc
            return out, fin

        # --- TowerModel: K=3 and K=5 branches share the (bf16) input, no f32 round-trip ---
        x_bf = x_ref[...]
        out3, fin3 = single_stage(x_bf, 0)
        out5, fin5 = single_stage(x_bf, 1)
        fin = fin3 + fin5
        middle = (out3 + out5) if n_ref == 0 else None     # tower middle only used if no refinements
        out_refs[1][...] = fin.astype(out_refs[1].dtype)

        # --- Refinement stages: fused softmax(prev_final) * mask feeds the next stage ---
        for s in range(n_ref):
            # Dead output lanes of b_out are pre-padded with -1e9, so exp() of the padded
            # lanes underflows to 0 and softmax over 128 lanes == softmax over the real
            # num_classes lanes (no iota / compare / select).  Masked rows are all-zero,
            # give 1/128 per lane, and are zeroed again by * m_nc (same as the reference).
            x_max = jnp.max(fin, axis=-1, keepdims=True)
            e = jnp.exp(fin - x_max)
            denom = jnp.sum(e, axis=-1, keepdims=True)
            sm = e * pl.reciprocal(denom, approx=True) * m_nc
            middle, fin = single_stage(sm.astype(jnp.bfloat16), 2 + s)
            out_refs[2 + s][...] = fin.astype(out_refs[2 + s].dtype)

        out_refs[0][...] = middle.astype(out_refs[0].dtype)

    return kernel


# ----------------------------------------------------------------------------
# Parameter preprocessing: pad channel dims to 128 lanes, flatten (L,K) tap axis,
# cast matmul weights to bf16 (biases stay f32), -1e9 in dead conv_out bias lanes.
# ----------------------------------------------------------------------------
def prepare_stage_params(p):
    L, K, C, _ = p["wd"].shape
    d_in = p["w_in"].shape[0]
    nc = p["w_out"].shape[1]
    Cp, NCp, Dp = _round_up(C, _LANE), _round_up(nc, _LANE), _round_up(d_in, _LANE)
    wd = _pad_axis(_pad_axis(p["wd"], 2, Cp), 3, Cp).reshape(L * K, Cp, Cp)
    b_out = _pad_axis(p["b_out"], 1, NCp)
    b_out = jnp.where(jnp.arange(NCp)[None, :] < nc, b_out, -1e9)   # softmax lane masking for free
    return dict(
        w_in=_pad_axis(_pad_axis(p["w_in"], 0, Dp), 1, Cp).astype(jnp.bfloat16),
        b_in=_pad_axis(p["b_in"], 1, Cp),
        wd=wd.astype(jnp.bfloat16),
        bd=_pad_axis(p["bd"], 2, Cp),
        w1=_pad_axis(_pad_axis(p["w1"], 1, Cp), 2, Cp).astype(jnp.bfloat16),
        b1=_pad_axis(p["b1"], 2, Cp),
        w_out=_pad_axis(_pad_axis(p["w_out"], 0, Cp), 1, NCp).astype(jnp.bfloat16),
        b_out=b_out,
        K=K, L=L, Cp=Cp, NCp=NCp, Dp=Dp)


def prepare_model_params(params, num_f_maps, num_classes):
    return dict(
        tower=[prepare_stage_params(params["tower_k3"]),
               prepare_stage_params(params["tower_k5"])],
        stages=[prepare_stage_params(p) for p in params["stages"]],
        num_f_maps=num_f_maps,
        num_classes=num_classes)


# ----------------------------------------------------------------------------
# MultiStageModel forward: ONE pallas_call for tower + all refinement stages.
# ----------------------------------------------------------------------------
def multi_stage_forward(x, mask, pp):
    """x: (B, T, dim) f32, mask: (B, T, 1).  Returns (middle (B,T,C), outputs (S,B,T,NC))."""
    B, T, D = x.shape
    C, NC = pp["num_f_maps"], pp["num_classes"]
    blocks = pp["tower"] + pp["stages"]          # [tower_k3, tower_k5, refinement...]
    n_ref = len(pp["stages"])
    L = blocks[0]["L"]
    Cp, NCp = blocks[0]["Cp"], blocks[0]["NCp"]
    Dp = pp["tower"][0]["Dp"]
    ks = tuple(bp["K"] for bp in blocks)

    x_p = _pad_axis(x, 2, Dp).astype(jnp.bfloat16)

    halo = max(2 ** (L - 1) * ((k - 1) // 2) for k in ks)
    halo_pad = _round_up(max(halo, 1), 8)        # sublane-aligned centre store

    kernel = _make_fused_kernel(ks, L, n_ref, halo_pad, T, Cp, NCp)

    in_specs = [pl.BlockSpec((None, T, Dp), lambda b: (b, 0, 0)),   # x (per-batch tile)
                pl.BlockSpec((None, T, 1), lambda b: (b, 0, 0))]    # mask
    args = [x_p, mask]
    for bp in blocks:
        for name in _W_NAMES:
            w = bp[name]
            in_specs.append(_full_spec(w.shape))
            args.append(w)

    n_stage_outputs = 1 + n_ref                  # tower final + one per refinement stage
    out_shapes = ([jax.ShapeDtypeStruct((B, T, Cp), jnp.float32)] +
                  [jax.ShapeDtypeStruct((B, T, NCp), jnp.float32)] * n_stage_outputs)
    out_specs = ([pl.BlockSpec((None, T, Cp), lambda b: (b, 0, 0))] +
                 [pl.BlockSpec((None, T, NCp), lambda b: (b, 0, 0))] * n_stage_outputs)

    res = pl.pallas_call(
        kernel,
        out_shape=tuple(out_shapes),
        grid=(B,),                               # parallel over batch -> both v7x TCs
        in_specs=in_specs,
        out_specs=tuple(out_specs),
        scratch_shapes=[pltpu.VMEM((T + 2 * halo_pad, Cp), jnp.float32)],
        compiler_params=pltpu.CompilerParams(
            dimension_semantics=("parallel",),
            vmem_limit_bytes=32 * 1024 * 1024),
    )(*args)

    middle = res[0][..., :C]
    outputs = jnp.stack([f[..., :NC] for f in res[1:]], axis=0)     # (S, B, T, NC)
    return middle, outputs


# ----------------------------------------------------------------------------
# Pure-JAX reference (same math, same bf16 operand rounding) for correctness.
# ----------------------------------------------------------------------------
def _mm(a, b):
    return jnp.matmul(a, b, precision=jax.lax.Precision.HIGHEST)


def _q(a):   # mirror the kernel's bf16 rounding of matmul operands (f32 accumulation)
    return a.astype(jnp.bfloat16).astype(jnp.float32)


def _shift_ref(x, s):
    if s == 0:
        return x
    T = x.shape[1]
    rolled = jnp.roll(x, -s, axis=1)
    t = jnp.arange(T)[None, :, None]
    valid = (t + s >= 0) & (t + s < T)
    return jnp.where(valid, rolled, 0.0)


def _ref_stage(x, mask, p, K, apply_softmax):
    if apply_softmax:
        x_max = jnp.max(x, axis=-1, keepdims=True)
        e = jnp.exp(x - x_max)
        x = (e / jnp.sum(e, axis=-1, keepdims=True)) * mask
    out = _mm(_q(x), _q(p["w_in"])) + p["b_in"]
    L = p["wd"].shape[0]
    for l in range(L):
        d = 2 ** l
        acc = jnp.zeros_like(out)
        for j in range(K):
            s = (j - (K - 1) // 2) * d
            acc = acc + _mm(_q(_shift_ref(out, s)), _q(p["wd"][l, j]))
        acc = jnp.maximum(acc + p["bd"][l], 0.0)
        acc = _mm(_q(acc), _q(p["w1"][l])) + p["b1"][l]
        out = (out + acc) * mask
    final = (_mm(_q(out), _q(p["w_out"])) + p["b_out"]) * mask
    return out, final


def _ref_model(x, mask, params):
    o1, f1 = _ref_stage(x, mask, params["tower_k3"], 3, False)
    o2, f2 = _ref_stage(x, mask, params["tower_k5"], 5, False)
    middle, out = o1 + o2, f1 + f2
    outputs = [out]
    for p in params["stages"]:
        middle, out = _ref_stage(out, mask, p, 3, True)
        outputs.append(out)
    return middle, jnp.stack(outputs, axis=0)


# ----------------------------------------------------------------------------
# Deterministic parameter init (shapes follow the PyTorch __init__).
# ----------------------------------------------------------------------------
def init_stage_params(key, d_in, C, NC, L, K):
    ks = jax.random.split(key, 8)
    sc = 0.1
    return dict(
        w_in=sc * jax.random.normal(ks[0], (d_in, C), jnp.float32),
        b_in=sc * jax.random.normal(ks[1], (1, C), jnp.float32),
        wd=sc * jax.random.normal(ks[2], (L, K, C, C), jnp.float32),
        bd=sc * jax.random.normal(ks[3], (L, 1, C), jnp.float32),
        w1=sc * jax.random.normal(ks[4], (L, C, C), jnp.float32),
        b1=sc * jax.random.normal(ks[5], (L, 1, C), jnp.float32),
        w_out=sc * jax.random.normal(ks[6], (C, NC), jnp.float32),
        b_out=sc * jax.random.normal(ks[7], (1, NC), jnp.float32),
    )


if __name__ == "__main__":
    # MultiStageModel(num_stages, num_layers, num_f_maps, dim, num_classes, arch='normal')
    num_stages, num_layers, num_f_maps, dim, num_classes = 3, 3, 32, 16, 8
    B, T = 2, 64

    key = jax.random.PRNGKey(0)
    k_x, k_t3, k_t5, k_st = jax.random.split(key, 4)

    x = jax.random.normal(k_x, (B, T, dim), jnp.float32)              # (B, T, dim)
    mask = jnp.ones((B, T, 1), jnp.float32).at[1, 48:, :].set(0.0)    # (B, T, 1)

    params = dict(
        tower_k3=init_stage_params(k_t3, dim, num_f_maps, num_classes, num_layers, 3),
        tower_k5=init_stage_params(k_t5, dim, num_f_maps, num_classes, num_layers, 5),
        stages=[init_stage_params(k, num_classes, num_f_maps, num_classes, num_layers, 3)
                for k in jax.random.split(k_st, num_stages - 1)],
    )

    pp = prepare_model_params(params, num_f_maps, num_classes)
    middle_out, outputs = multi_stage_forward(x, mask, pp)
    jax.block_until_ready((middle_out, outputs))

    # Correctness vs pure-JAX reference using the same bf16 operand rounding.
    # Tolerance covers accumulation-order differences and the approximate
    # EUP reciprocal used in the fused softmax.
    ref_middle, ref_outputs = _ref_model(x, mask, params)
    np.testing.assert_allclose(np.asarray(middle_out), np.asarray(ref_middle),
                               rtol=2e-2, atol=2e-2)
    np.testing.assert_allclose(np.asarray(outputs), np.asarray(ref_outputs),
                               rtol=2e-2, atol=2e-2)

    assert middle_out.shape == (B, T, num_f_maps)
    assert outputs.shape == (num_stages, B, T, num_classes)
    print("KERNEL_OK")
</pallas_src>

<mosaic_0001>
module attributes {stable_mosaic.version = 11 : i64} {
  func.func @kernel(%arg0: i32, %arg1: memref<1x64x128xbf16, #tpu.memory_space<vmem>>, %arg2: memref<1x64x1xf32, #tpu.memory_space<vmem>>, %arg3: memref<128x128xbf16, #tpu.memory_space<vmem>>, %arg4: memref<1x128xf32, #tpu.memory_space<vmem>>, %arg5: memref<9x128x128xbf16, #tpu.memory_space<vmem>>, %arg6: memref<3x1x128xf32, #tpu.memory_space<vmem>>, %arg7: memref<3x128x128xbf16, #tpu.memory_space<vmem>>, %arg8: memref<3x1x128xf32, #tpu.memory_space<vmem>>, %arg9: memref<128x128xbf16, #tpu.memory_space<vmem>>, %arg10: memref<1x128xf32, #tpu.memory_space<vmem>>, %arg11: memref<128x128xbf16, #tpu.memory_space<vmem>>, %arg12: memref<1x128xf32, #tpu.memory_space<vmem>>, %arg13: memref<15x128x128xbf16, #tpu.memory_space<vmem>>, %arg14: memref<3x1x128xf32, #tpu.memory_space<vmem>>, %arg15: memref<3x128x128xbf16, #tpu.memory_space<vmem>>, %arg16: memref<3x1x128xf32, #tpu.memory_space<vmem>>, %arg17: memref<128x128xbf16, #tpu.memory_space<vmem>>, %arg18: memref<1x128xf32, #tpu.memory_space<vmem>>, %arg19: memref<128x128xbf16, #tpu.memory_space<vmem>>, %arg20: memref<1x128xf32, #tpu.memory_space<vmem>>, %arg21: memref<9x128x128xbf16, #tpu.memory_space<vmem>>, %arg22: memref<3x1x128xf32, #tpu.memory_space<vmem>>, %arg23: memref<3x128x128xbf16, #tpu.memory_space<vmem>>, %arg24: memref<3x1x128xf32, #tpu.memory_space<vmem>>, %arg25: memref<128x128xbf16, #tpu.memory_space<vmem>>, %arg26: memref<1x128xf32, #tpu.memory_space<vmem>>, %arg27: memref<128x128xbf16, #tpu.memory_space<vmem>>, %arg28: memref<1x128xf32, #tpu.memory_space<vmem>>, %arg29: memref<9x128x128xbf16, #tpu.memory_space<vmem>>, %arg30: memref<3x1x128xf32, #tpu.memory_space<vmem>>, %arg31: memref<3x128x128xbf16, #tpu.memory_space<vmem>>, %arg32: memref<3x1x128xf32, #tpu.memory_space<vmem>>, %arg33: memref<128x128xbf16, #tpu.memory_space<vmem>>, %arg34: memref<1x128xf32, #tpu.memory_space<vmem>>, %arg35: memref<1x64x128xf32, #tpu.memory_space<vmem>>, %arg36: memref<1x64x128xf32, #tpu.memory_space<vmem>>, %arg37: memref<1x64x128xf32, #tpu.memory_space<vmem>>, %arg38: memref<1x64x128xf32, #tpu.memory_space<vmem>>, %arg39: memref<80x128xf32, #tpu.memory_space<vmem>>) attributes {dimension_semantics = [#tpu.dimension_semantics<parallel>], iteration_bounds = array<i64: 2>, scalar_prefetch = 0 : i64, scratch_operands = 1 : i64, tpu.core_type = #tpu.core_type<tc>, window_params = [{transform_indices = @transform_0, window_bounds = array<i64: 1, 64, 128>}, {transform_indices = @transform_1, window_bounds = array<i64: 1, 64, 1>}, {pipeline_mode = #tpu.pipeline_mode<synchronous>, transform_indices = @transform_2, window_bounds = array<i64: 128, 128>}, {pipeline_mode = #tpu.pipeline_mode<synchronous>, transform_indices = @transform_3, window_bounds = array<i64: 1, 128>}, {pipeline_mode = #tpu.pipeline_mode<synchronous>, transform_indices = @transform_4, window_bounds = array<i64: 9, 128, 128>}, {pipeline_mode = #tpu.pipeline_mode<synchronous>, transform_indices = @transform_5, window_bounds = array<i64: 3, 1, 128>}, {pipeline_mode = #tpu.pipeline_mode<synchronous>, transform_indices = @transform_6, window_bounds = array<i64: 3, 128, 128>}, {pipeline_mode = #tpu.pipeline_mode<synchronous>, transform_indices = @transform_7, window_bounds = array<i64: 3, 1, 128>}, {pipeline_mode = #tpu.pipeline_mode<synchronous>, transform_indices = @transform_8, window_bounds = array<i64: 128, 128>}, {pipeline_mode = #tpu.pipeline_mode<synchronous>, transform_indices = @transform_9, window_bounds = array<i64: 1, 128>}, {pipeline_mode = #tpu.pipeline_mode<synchronous>, transform_indices = @transform_10, window_bounds = array<i64: 128, 128>}, {pipeline_mode = #tpu.pipeline_mode<synchronous>, transform_indices = @transform_11, window_bounds = array<i64: 1, 128>}, {pipeline_mode = #tpu.pipeline_mode<synchronous>, transform_indices = @transform_12, window_bounds = array<i64: 15, 128, 128>}, {pipeline_mode = #tpu.pipeline_mode<synchronous>, transform_indices = @transform_13, window_bounds = array<i64: 3, 1, 128>}, {pipeline_mode = #tpu.pipeline_mode<synchronous>, transform_indices = @transform_14, window_bounds = array<i64: 3, 128, 128>}, {pipeline_mode = #tpu.pipeline_mode<synchronous>, transform_indices = @transform_15, window_bounds = array<i64: 3, 1, 128>}, {pipeline_mode = #tpu.pipeline_mode<synchronous>, transform_indices = @transform_16, window_bounds = array<i64: 128, 128>}, {pipeline_mode = #tpu.pipeline_mode<synchronous>, transform_indices = @transform_17, window_bounds = array<i64: 1, 128>}, {pipeline_mode = #tpu.pipeline_mode<synchronous>, transform_indices = @transform_18, window_bounds = array<i64: 128, 128>}, {pipeline_mode = #tpu.pipeline_mode<synchronous>, transform_indices = @transform_19, window_bounds = array<i64: 1, 128>}, {pipeline_mode = #tpu.pipeline_mode<synchronous>, transform_indices = @transform_20, window_bounds = array<i64: 9, 128, 128>}, {pipeline_mode = #tpu.pipeline_mode<synchronous>, transform_indices = @transform_21, window_bounds = array<i64: 3, 1, 128>}, {pipeline_mode = #tpu.pipeline_mode<synchronous>, transform_indices = @transform_22, window_bounds = array<i64: 3, 128, 128>}, {pipeline_mode = #tpu.pipeline_mode<synchronous>, transform_indices = @transform_23, window_bounds = array<i64: 3, 1, 128>}, {pipeline_mode = #tpu.pipeline_mode<synchronous>, transform_indices = @transform_24, window_bounds = array<i64: 128, 128>}, {pipeline_mode = #tpu.pipeline_mode<synchronous>, transform_indices = @transform_25, window_bounds = array<i64: 1, 128>}, {pipeline_mode = #tpu.pipeline_mode<synchronous>, transform_indices = @transform_26, window_bounds = array<i64: 128, 128>}, {pipeline_mode = #tpu.pipeline_mode<synchronous>, transform_indices = @transform_27, window_bounds = array<i64: 1, 128>}, {pipeline_mode = #tpu.pipeline_mode<synchronous>, transform_indices = @transform_28, window_bounds = array<i64: 9, 128, 128>}, {pipeline_mode = #tpu.pipeline_mode<synchronous>, transform_indices = @transform_29, window_bounds = array<i64: 3, 1, 128>}, {pipeline_mode = #tpu.pipeline_mode<synchronous>, transform_indices = @transform_30, window_bounds = array<i64: 3, 128, 128>}, {pipeline_mode = #tpu.pipeline_mode<synchronous>, transform_indices = @transform_31, window_bounds = array<i64: 3, 1, 128>}, {pipeline_mode = #tpu.pipeline_mode<synchronous>, transform_indices = @transform_32, window_bounds = array<i64: 128, 128>}, {pipeline_mode = #tpu.pipeline_mode<synchronous>, transform_indices = @transform_33, window_bounds = array<i64: 1, 128>}, {transform_indices = @transform_34, window_bounds = array<i64: 1, 64, 128>}, {transform_indices = @transform_35, window_bounds = array<i64: 1, 64, 128>}, {transform_indices = @transform_36, window_bounds = array<i64: 1, 64, 128>}, {transform_indices = @transform_37, window_bounds = array<i64: 1, 64, 128>}]} {
    %c0 = arith.constant 0 : index
    %c0_0 = arith.constant 0 : index
    %c0_1 = arith.constant 0 : index
    %0 = vector.load %arg2[%c0, %c0_0, %c0_1] : memref<1x64x1xf32, #tpu.memory_space<vmem>>, vector<1x64x1xf32>
    %1 = vector.shape_cast %0 : vector<1x64x1xf32> to vector<64x1xf32>
    %2 = vector.shape_cast %1 : vector<64x1xf32> to vector<64x1xf32>
    %3 = vector.broadcast %2 : vector<64x1xf32> to vector<64x128xf32>
    %4 = vector.shape_cast %1 : vector<64x1xf32> to vector<64x1xf32>
    %5 = vector.broadcast %4 : vector<64x1xf32> to vector<64x128xf32>
    %cst = arith.constant 0.000000e+00 : f32
    %6 = vector.broadcast %cst : f32 to vector<8x128xf32>
    %c0_2 = arith.constant 0 : index
    %c0_3 = arith.constant 0 : index
    %7 = vector.load %arg39[%c0_2, %c0_3] : memref<80x128xf32, #tpu.memory_space<vmem>>, vector<8x128xf32>
    tpu.vector_store %arg39[%c0_2, %c0_3], %6 {strides = array<i32>} : memref<80x128xf32, #tpu.memory_space<vmem>>, vector<8x128xf32>,
    %c72 = arith.constant 72 : index
    %c0_4 = arith.constant 0 : index
    %8 = vector.load %arg39[%c72, %c0_4] : memref<80x128xf32, #tpu.memory_space<vmem>>, vector<8x128xf32>
    tpu.vector_store %arg39[%c72, %c0_4], %6 {strides = array<i32>} : memref<80x128xf32, #tpu.memory_space<vmem>>, vector<8x128xf32>,
    %c0_5 = arith.constant 0 : index
    %c0_6 = arith.constant 0 : index
    %c0_7 = arith.constant 0 : index
    %9 = vector.load %arg1[%c0_5, %c0_6, %c0_7] : memref<1x64x128xbf16, #tpu.memory_space<vmem>>, vector<1x64x128xbf16>
    %10 = vector.shape_cast %9 : vector<1x64x128xbf16> to vector<64x128xbf16>
    %c0_8 = arith.constant 0 : index
    %c0_9 = arith.constant 0 : index
    %11 = vector.load %arg3[%c0_8, %c0_9] : memref<128x128xbf16, #tpu.memory_space<vmem>>, vector<128x128xbf16>
    %cst_10 = arith.constant dense<0.000000e+00> : vector<64x128xf32>
    %12 = tpu.matmul %10, %11, %cst_10 {dimension_numbers = #tpu.dot_dimension_numbers<[1], [0], [0], [1], [0, 0, 1, 1], [], []>} : vector<64x128xbf16>, vector<128x128xbf16>, vector<64x128xf32> -> vector<64x128xf32>
    %c0_11 = arith.constant 0 : index
    %c0_12 = arith.constant 0 : index
    %13 = vector.load %arg4[%c0_11, %c0_12] : memref<1x128xf32, #tpu.memory_space<vmem>>, vector<1x128xf32>
    %14 = vector.broadcast %13 : vector<1x128xf32> to vector<64x128xf32>
    %15 = arith.addf %12, %14 : vector<64x128xf32>
    %c8 = arith.constant 8 : index
    %c0_13 = arith.constant 0 : index
    %16 = vector.load %arg39[%c8, %c0_13] : memref<80x128xf32, #tpu.memory_space<vmem>>, vector<64x128xf32>
    tpu.vector_store %arg39[%c8, %c0_13], %15 {strides = array<i32>} : memref<80x128xf32, #tpu.memory_space<vmem>>, vector<64x128xf32>,
    %c0_14 = arith.constant 0 : index
    %c0_15 = arith.constant 0 : index
    %c0_16 = arith.constant 0 : index
    %17 = vector.load %arg6[%c0_14, %c0_15, %c0_16] : memref<3x1x128xf32, #tpu.memory_space<vmem>>, vector<1x1x128xf32>
    %18 = vector.shape_cast %17 : vector<1x1x128xf32> to vector<1x128xf32>
    %c7 = arith.constant 7 : index
    %c0_17 = arith.constant 0 : index
    %19 = vector.load %arg39[%c7, %c0_17] : memref<80x128xf32, #tpu.memory_space<vmem>>, vector<64x128xf32>
    %20 = arith.truncf %19 : vector<64x128xf32> to vector<64x128xbf16>
    %c0_18 = arith.constant 0 : index
    %c0_19 = arith.constant 0 : index
    %c0_20 = arith.constant 0 : index
    %21 = vector.load %arg5[%c0_18, %c0_19, %c0_20] : memref<9x128x128xbf16, #tpu.memory_space<vmem>>, vector<1x128x128xbf16>
    %22 = vector.shape_cast %21 : vector<1x128x128xbf16> to vector<128x128xbf16>
    %cst_21 = arith.constant dense<0.000000e+00> : vector<64x128xf32>
    %23 = tpu.matmul %20, %22, %cst_21 {dimension_numbers = #tpu.dot_dimension_numbers<[1], [0], [0], [1], [0, 0, 1, 1], [], []>} : vector<64x128xbf16>, vector<128x128xbf16>, vector<64x128xf32> -> vector<64x128xf32>
    %24 = vector.broadcast %18 : vector<1x128xf32> to vector<64x128xf32>
    %25 = arith.addf %24, %23 : vector<64x128xf32>
    %c8_22 = arith.constant 8 : index
    %c0_23 = arith.constant 0 : index
    %26 = vector.load %arg39[%c8_22, %c0_23] : memref<80x128xf32, #tpu.memory_space<vmem>>, vector<64x128xf32>
    %27 = arith.truncf %26 : vector<64x128xf32> to vector<64x128xbf16>
    %c1 = arith.constant 1 : index
    %c0_24 = arith.constant 0 : index
    %c0_25 = arith.constant 0 : index
    %28 = vector.load %arg5[%c1, %c0_24, %c0_25] : memref<9x128x128xbf16, #tpu.memory_space<vmem>>, vector<1x128x128xbf16>
    %29 = vector.shape_cast %28 : vector<1x128x128xbf16> to vector<128x128xbf16>
    %cst_26 = arith.constant dense<0.000000e+00> : vector<64x128xf32>
    %30 = tpu.matmul %27, %29, %cst_26 {dimension_numbers = #tpu.dot_dimension_numbers<[1], [0], [0], [1], [0, 0, 1, 1], [], []>} : vector<64x128xbf16>, vector<128x128xbf16>, vector<64x128xf32> -> vector<64x128xf32>
    %31 = arith.addf %25, %30 : vector<64x128xf32>
    %c9 = arith.constant 9 : index
    %c0_27 = arith.constant 0 : index
    %32 = vector.load %arg39[%c9, %c0_27] : memref<80x128xf32, #tpu.memory_space<vmem>>, vector<64x128xf32>
    %33 = arith.truncf %32 : vector<64x128xf32> to vector<64x128xbf16>
    %c2 = arith.constant 2 : index
    %c0_28 = arith.constant 0 : index
    %c0_29 = arith.constant 0 : index
    %34 = vector.load %arg5[%c2, %c0_28, %c0_29] : memref<9x128x128xbf16, #tpu.memory_space<vmem>>, vector<1x128x128xbf16>
    %35 = vector.shape_cast %34 : vector<1x128x128xbf16> to vector<128x128xbf16>
    %cst_30 = arith.constant dense<0.000000e+00> : vector<64x128xf32>
    %36 = tpu.matmul %33, %35, %cst_30 {dimension_numbers = #tpu.dot_dimension_numbers<[1], [0], [0], [1], [0, 0, 1, 1], [], []>} : vector<64x128xbf16>, vector<128x128xbf16>, vector<64x128xf32> -> vector<64x128xf32>
    %37 = arith.addf %31, %36 : vector<64x128xf32>
    %cst_31 = arith.constant 0.000000e+00 : f32
    %38 = vector.broadcast %cst_31 : f32 to vector<64x128xf32>
    %39 = arith.maximumf %37, %38 : vector<64x128xf32>
    %40 = arith.truncf %39 : vector<64x128xf32> to vector<64x128xbf16>
    %c0_32 = arith.constant 0 : index
    %c0_33 = arith.constant 0 : index
    %c0_34 = arith.constant 0 : index
    %41 = vector.load %arg7[%c0_32, %c0_33, %c0_34] : memref<3x128x128xbf16, #tpu.memory_space<vmem>>, vector<1x128x128xbf16>
    %42 = vector.shape_cast %41 : vector<1x128x128xbf16> to vector<128x128xbf16>
    %cst_35 = arith.constant dense<0.000000e+00> : vector<64x128xf32>
    %43 = tpu.matmul %40, %42, %cst_35 {dimension_numbers = #tpu.dot_dimension_numbers<[1], [0], [0], [1], [0, 0, 1, 1], [], []>} : vector<64x128xbf16>, vector<128x128xbf16>, vector<64x128xf32> -> vector<64x128xf32>
    %c0_36 = arith.constant 0 : index
    %c0_37 = arith.constant 0 : index
    %c0_38 = arith.constant 0 : index
    %44 = vector.load %arg8[%c0_36, %c0_37, %c0_38] : memref<3x1x128xf32, #tpu.memory_space<vmem>>, vector<1x1x128xf32>
    %45 = vector.shape_cast %44 : vector<1x1x128xf32> to vector<1x128xf32>
    %46 = vector.broadcast %45 : vector<1x128xf32> to vector<64x128xf32>
    %47 = arith.addf %43, %46 : vector<64x128xf32>
    %48 = arith.addf %15, %47 : vector<64x128xf32>
    %49 = arith.mulf %48, %3 : vector<64x128xf32>
    %c8_39 = arith.constant 8 : index
    %c0_40 = arith.constant 0 : index
    %50 = vector.load %arg39[%c8_39, %c0_40] : memref<80x128xf32, #tpu.memory_space<vmem>>, vector<64x128xf32>
    tpu.vector_store %arg39[%c8_39, %c0_40], %49 {strides = array<i32>} : memref<80x128xf32, #tpu.memory_space<vmem>>, vector<64x128xf32>,
    %c1_41 = arith.constant 1 : index
    %c0_42 = arith.constant 0 : index
    %c0_43 = arith.constant 0 : index
    %51 = vector.load %arg6[%c1_41, %c0_42, %c0_43] : memref<3x1x128xf32, #tpu.memory_space<vmem>>, vector<1x1x128xf32>
    %52 = vector.shape_cast %51 : vector<1x1x128xf32> to vector<1x128xf32>
    %c6 = arith.constant 6 : index
    %c0_44 = arith.constant 0 : index
    %53 = vector.load %arg39[%c6, %c0_44] : memref<80x128xf32, #tpu.memory_space<vmem>>, vector<64x128xf32>
    %54 = arith.truncf %53 : vector<64x128xf32> to vector<64x128xbf16>
    %c3 = arith.constant 3 : index
    %c0_45 = arith.constant 0 : index
    %c0_46 = arith.constant 0 : index
    %55 = vector.load %arg5[%c3, %c0_45, %c0_46] : memref<9x128x128xbf16, #tpu.memory_space<vmem>>, vector<1x128x128xbf16>
    %56 = vector.shape_cast %55 : vector<1x128x128xbf16> to vector<128x128xbf16>
    %cst_47 = arith.constant dense<0.000000e+00> : vector<64x128xf32>
    %57 = tpu.matmul %54, %56, %cst_47 {dimension_numbers = #tpu.dot_dimension_numbers<[1], [0], [0], [1], [0, 0, 1, 1], [], []>} : vector<64x128xbf16>, vector<128x128xbf16>, vector<64x128xf32> -> vector<64x128xf32>
    %58 = vector.broadcast %52 : vector<1x128xf32> to vector<64x128xf32>
    %59 = arith.addf %58, %57 : vector<64x128xf32>
    %c8_48 = arith.constant 8 : index
    %c0_49 = arith.constant 0 : index
    %60 = vector.load %arg39[%c8_48, %c0_49] : memref<80x128xf32, #tpu.memory_space<vmem>>, vector<64x128xf32>
    %61 = arith.truncf %60 : vector<64x128xf32> to vector<64x128xbf16>
    %c4 = arith.constant 4 : index
    %c0_50 = arith.constant 0 : index
    %c0_51 = arith.constant 0 : index
    %62 = vector.load %arg5[%c4, %c0_50, %c0_51] : memref<9x128x128xbf16, #tpu.memory_space<vmem>>, vector<1x128x128xbf16>
    %63 = vector.shape_cast %62 : vector<1x128x128xbf16> to vector<128x128xbf16>
    %cst_52 = arith.constant dense<0.000000e+00> : vector<64x128xf32>
    %64 = tpu.matmul %61, %63, %cst_52 {dimension_numbers = #tpu.dot_dimension_numbers<[1], [0], [0], [1], [0, 0, 1, 1], [], []>} : vector<64x128xbf16>, vector<128x128xbf16>, vector<64x128xf32> -> vector<64x128xf32>
    %65 = arith.addf %59, %64 : vector<64x128xf32>
    %c10 = arith.constant 10 : index
    %c0_53 = arith.constant 0 : index
    %66 = vector.load %arg39[%c10, %c0_53] : memref<80x128xf32, #tpu.memory_space<vmem>>, vector<64x128xf32>
    %67 = arith.truncf %66 : vector<64x128xf32> to vector<64x128xbf16>
    %c5 = arith.constant 5 : index
    %c0_54 = arith.constant 0 : index
    %c0_55 = arith.constant 0 : index
    %68 = vector.load %arg5[%c5, %c0_54, %c0_55] : memref<9x128x128xbf16, #tpu.memory_space<vmem>>, vector<1x128x128xbf16>
    %69 = vector.shape_cast %68 : vector<1x128x128xbf16> to vector<128x128xbf16>
    %cst_56 = arith.constant dense<0.000000e+00> : vector<64x128xf32>
    %70 = tpu.matmul %67, %69, %cst_56 {dimension_numbers = #tpu.dot_dimension_numbers<[1], [0], [0], [1], [0, 0, 1, 1], [], []>} : vector<64x128xbf16>, vector<128x128xbf16>, vector<64x128xf32> -> vector<64x128xf32>
    %71 = arith.addf %65, %70 : vector<64x128xf32>
    %cst_57 = arith.constant 0.000000e+00 : f32
    %72 = vector.broadcast %cst_57 : f32 to vector<64x128xf32>
    %73 = arith.maximumf %71, %72 : vector<64x128xf32>
    %74 = arith.truncf %73 : vector<64x128xf32> to vector<64x128xbf16>
    %c1_58 = arith.constant 1 : index
    %c0_59 = arith.constant 0 : index
    %c0_60 = arith.constant 0 : index
    %75 = vector.load %arg7[%c1_58, %c0_59, %c0_60] : memref<3x128x128xbf16, #tpu.memory_space<vmem>>, vector<1x128x128xbf16>
    %76 = vector.shape_cast %75 : vector<1x128x128xbf16> to vector<128x128xbf16>
    %cst_61 = arith.constant dense<0.000000e+00> : vector<64x128xf32>
    %77 = tpu.matmul %74, %76, %cst_61 {dimension_numbers = #tpu.dot_dimension_numbers<[1], [0], [0], [1], [0, 0, 1, 1], [], []>} : vector<64x128xbf16>, vector<128x128xbf16>, vector<64x128xf32> -> vector<64x128xf32>
    %c1_62 = arith.constant 1 : index
    %c0_63 = arith.constant 0 : index
    %c0_64 = arith.constant 0 : index
    %78 = vector.load %arg8[%c1_62, %c0_63, %c0_64] : memref<3x1x128xf32, #tpu.memory_space<vmem>>, vector<1x1x128xf32>
    %79 = vector.shape_cast %78 : vector<1x1x128xf32> to vector<1x128xf32>
    %80 = vector.broadcast %79 : vector<1x128xf32> to vector<64x128xf32>
    %81 = arith.addf %77, %80 : vector<64x128xf32>
    %82 = arith.addf %49, %81 : vector<64x128xf32>
    %83 = arith.mulf %82, %3 : vector<64x128xf32>
    %c8_65 = arith.constant 8 : index
    %c0_66 = arith.constant 0 : index
    %84 = vector.load %arg39[%c8_65, %c0_66] : memref<80x128xf32, #tpu.memory_space<vmem>>, vector<64x128xf32>
    tpu.vector_store %arg39[%c8_65, %c0_66], %83 {strides = array<i32>} : memref<80x128xf32, #tpu.memory_space<vmem>>, vector<64x128xf32>,
    %c2_67 = arith.constant 2 : index
    %c0_68 = arith.constant 0 : index
    %c0_69 = arith.constant 0 : index
    %85 = vector.load %arg6[%c2_67, %c0_68, %c0_69] : memref<3x1x128xf32, #tpu.memory_space<vmem>>, vector<1x1x128xf32>
    %86 = vector.shape_cast %85 : vector<1x1x128xf32> to vector<1x128xf32>
    %c4_70 = arith.constant 4 : index
    %c0_71 = arith.constant 0 : index
    %87 = vector.load %arg39[%c4_70, %c0_71] : memref<80x128xf32, #tpu.memory_space<vmem>>, vector<64x128xf32>
    %88 = arith.truncf %87 : vector<64x128xf32> to vector<64x128xbf16>
    %c6_72 = arith.constant 6 : index
    %c0_73 = arith.constant 0 : index
    %c0_74 = arith.constant 0 : index
    %89 = vector.load %arg5[%c6_72, %c0_73, %c0_74] : memref<9x128x128xbf16, #tpu.memory_space<vmem>>, vector<1x128x128xbf16>
    %90 = vector.shape_cast %89 : vector<1x128x128xbf16> to vector<128x128xbf16>
    %cst_75 = arith.constant dense<0.000000e+00> : vector<64x128xf32>
    %91 = tpu.matmul %88, %90, %cst_75 {dimension_numbers = #tpu.dot_dimension_numbers<[1], [0], [0], [1], [0, 0, 1, 1], [], []>} : vector<64x128xbf16>, vector<128x128xbf16>, vector<64x128xf32> -> vector<64x128xf32>
    %92 = vector.broadcast %86 : vector<1x128xf32> to vector<64x128xf32>
    %93 = arith.addf %92, %91 : vector<64x128xf32>
    %c8_76 = arith.constant 8 : index
    %c0_77 = arith.constant 0 : index
    %94 = vector.load %arg39[%c8_76, %c0_77] : memref<80x128xf32, #tpu.memory_space<vmem>>, vector<64x128xf32>
    %95 = arith.truncf %94 : vector<64x128xf32> to vector<64x128xbf16>
    %c7_78 = arith.constant 7 : index
    %c0_79 = arith.constant 0 : index
    %c0_80 = arith.constant 0 : index
    %96 = vector.load %arg5[%c7_78, %c0_79, %c0_80] : memref<9x128x128xbf16, #tpu.memory_space<vmem>>, vector<1x128x128xbf16>
    %97 = vector.shape_cast %96 : vector<1x128x128xbf16> to vector<128x128xbf16>
    %cst_81 = arith.constant dense<0.000000e+00> : vector<64x128xf32>
    %98 = tpu.matmul %95, %97, %cst_81 {dimension_numbers = #tpu.dot_dimension_numbers<[1], [0], [0], [1], [0, 0, 1, 1], [], []>} : vector<64x128xbf16>, vector<128x128xbf16>, vector<64x128xf32> -> vector<64x128xf32>
    %99 = arith.addf %93, %98 : vector<64x128xf32>
    %c12 = arith.constant 12 : index
    %c0_82 = arith.constant 0 : index
    %100 = vector.load %arg39[%c12, %c0_82] : memref<80x128xf32, #tpu.memory_space<vmem>>, vector<64x128xf32>
    %101 = arith.truncf %100 : vector<64x128xf32> to vector<64x128xbf16>
    %c8_83 = arith.constant 8 : index
    %c0_84 = arith.constant 0 : index
    %c0_85 = arith.constant 0 : index
    %102 = vector.load %arg5[%c8_83, %c0_84, %c0_85] : memref<9x128x128xbf16, #tpu.memory_space<vmem>>, vector<1x128x128xbf16>
    %103 = vector.shape_cast %102 : vector<1x128x128xbf16> to vector<128x128xbf16>
    %cst_86 = arith.constant dense<0.000000e+00> : vector<64x128xf32>
    %104 = tpu.matmul %101, %103, %cst_86 {dimension_numbers = #tpu.dot_dimension_numbers<[1], [0], [0], [1], [0, 0, 1, 1], [], []>} : vector<64x128xbf16>, vector<128x128xbf16>, vector<64x128xf32> -> vector<64x128xf32>
    %105 = arith.addf %99, %104 : vector<64x128xf32>
    %cst_87 = arith.constant 0.000000e+00 : f32
    %106 = vector.broadcast %cst_87 : f32 to vector<64x128xf32>
    %107 = arith.maximumf %105, %106 : vector<64x128xf32>
    %108 = arith.truncf %107 : vector<64x128xf32> to vector<64x128xbf16>
    %c2_88 = arith.constant 2 : index
    %c0_89 = arith.constant 0 : index
    %c0_90 = arith.constant 0 : index
    %109 = vector.load %arg7[%c2_88, %c0_89, %c0_90] : memref<3x128x128xbf16, #tpu.memory_space<vmem>>, vector<1x128x128xbf16>
    %110 = vector.shape_cast %109 : vector<1x128x128xbf16> to vector<128x128xbf16>
    %cst_91 = arith.constant dense<0.000000e+00> : vector<64x128xf32>
    %111 = tpu.matmul %108, %110, %cst_91 {dimension_numbers = #tpu.dot_dimension_numbers<[1], [0], [0], [1], [0, 0, 1, 1], [], []>} : vector<64x128xbf16>, vector<128x128xbf16>, vector<64x128xf32> -> vector<64x128xf32>
    %c2_92 = arith.constant 2 : index
    %c0_93 = arith.constant 0 : index
    %c0_94 = arith.constant 0 : index
    %112 = vector.load %arg8[%c2_92, %c0_93, %c0_94] : memref<3x1x128xf32, #tpu.memory_space<vmem>>, vector<1x1x128xf32>
    %113 = vector.shape_cast %112 : vector<1x1x128xf32> to vector<1x128xf32>
    %114 = vector.broadcast %113 : vector<1x128xf32> to vector<64x128xf32>
    %115 = arith.addf %111, %114 : vector<64x128xf32>
    %116 = arith.addf %83, %115 : vector<64x128xf32>
    %117 = arith.mulf %116, %3 : vector<64x128xf32>
    %118 = arith.truncf %117 : vector<64x128xf32> to vector<64x128xbf16>
    %c0_95 = arith.constant 0 : index
    %c0_96 = arith.constant 0 : index
    %119 = vector.load %arg9[%c0_95, %c0_96] : memref<128x128xbf16, #tpu.memory_space<vmem>>, vector<128x128xbf16>
    %cst_97 = arith.constant dense<0.000000e+00> : vector<64x128xf32>
    %120 = tpu.matmul %118, %119, %cst_97 {dimension_numbers = #tpu.dot_dimension_numbers<[1], [0], [0], [1], [0, 0, 1, 1], [], []>} : vector<64x128xbf16>, vector<128x128xbf16>, vector<64x128xf32> -> vector<64x128xf32>
    %c0_98 = arith.constant 0 : index
    %c0_99 = arith.constant 0 : index
    %121 = vector.load %arg10[%c0_98, %c0_99] : memref<1x128xf32, #tpu.memory_space<vmem>>, vector<1x128xf32>
    %122 = vector.broadcast %121 : vector<1x128xf32> to vector<64x128xf32>
    %123 = arith.addf %120, %122 : vector<64x128xf32>
    %124 = arith.mulf %123, %5 : vector<64x128xf32>
    %c0_100 = arith.constant 0 : index
    %c0_101 = arith.constant 0 : index
    %125 = vector.load %arg11[%c0_100, %c0_101] : memref<128x128xbf16, #tpu.memory_space<vmem>>, vector<128x128xbf16>
    %cst_102 = arith.constant dense<0.000000e+00> : vector<64x128xf32>
    %126 = tpu.matmul %10, %125, %cst_102 {dimension_numbers = #tpu.dot_dimension_numbers<[1], [0], [0], [1], [0, 0, 1, 1], [], []>} : vector<64x128xbf16>, vector<128x128xbf16>, vector<64x128xf32> -> vector<64x128xf32>
    %c0_103 = arith.constant 0 : index
    %c0_104 = arith.constant 0 : index
    %127 = vector.load %arg12[%c0_103, %c0_104] : memref<1x128xf32, #tpu.memory_space<vmem>>, vector<1x128xf32>
    %128 = vector.broadcast %127 : vector<1x128xf32> to vector<64x128xf32>
    %129 = arith.addf %126, %128 : vector<64x128xf32>
    %c8_105 = arith.constant 8 : index
    %c0_106 = arith.constant 0 : index
    %130 = vector.load %arg39[%c8_105, %c0_106] : memref<80x128xf32, #tpu.memory_space<vmem>>, vector<64x128xf32>
    tpu.vector_store %arg39[%c8_105, %c0_106], %129 {strides = array<i32>} : memref<80x128xf32, #tpu.memory_space<vmem>>, vector<64x128xf32>,
    %c0_107 = arith.constant 0 : index
    %c0_108 = arith.constant 0 : index
    %c0_109 = arith.constant 0 : index
    %131 = vector.load %arg14[%c0_107, %c0_108, %c0_109] : memref<3x1x128xf32, #tpu.memory_space<vmem>>, vector<1x1x128xf32>
    %132 = vector.shape_cast %131 : vector<1x1x128xf32> to vector<1x128xf32>
    %c6_110 = arith.constant 6 : index
    %c0_111 = arith.constant 0 : index
    %133 = vector.load %arg39[%c6_110, %c0_111] : memref<80x128xf32, #tpu.memory_space<vmem>>, vector<64x128xf32>
    %134 = arith.truncf %133 : vector<64x128xf32> to vector<64x128xbf16>
    %c0_112 = arith.constant 0 : index
    %c0_113 = arith.constant 0 : index
    %c0_114 = arith.constant 0 : index
    %135 = vector.load %arg13[%c0_112, %c0_113, %c0_114] : memref<15x128x128xbf16, #tpu.memory_space<vmem>>, vector<1x128x128xbf16>
    %136 = vector.shape_cast %135 : vector<1x128x128xbf16> to vector<128x128xbf16>
    %cst_115 = arith.constant dense<0.000000e+00> : vector<64x128xf32>
    %137 = tpu.matmul %134, %136, %cst_115 {dimension_numbers = #tpu.dot_dimension_numbers<[1], [0], [0], [1], [0, 0, 1, 1], [], []>} : vector<64x128xbf16>, vector<128x128xbf16>, vector<64x128xf32> -> vector<64x128xf32>
    %138 = vector.broadcast %132 : vector<1x128xf32> to vector<64x128xf32>
    %139 = arith.addf %138, %137 : vector<64x128xf32>
    %c7_116 = arith.constant 7 : index
    %c0_117 = arith.constant 0 : index
    %140 = vector.load %arg39[%c7_116, %c0_117] : memref<80x128xf32, #tpu.memory_space<vmem>>, vector<64x128xf32>
    %141 = arith.truncf %140 : vector<64x128xf32> to vector<64x128xbf16>
    %c1_118 = arith.constant 1 : index
    %c0_119 = arith.constant 0 : index
    %c0_120 = arith.constant 0 : index
    %142 = vector.load %arg13[%c1_118, %c0_119, %c0_120] : memref<15x128x128xbf16, #tpu.memory_space<vmem>>, vector<1x128x128xbf16>
    %143 = vector.shape_cast %142 : vector<1x128x128xbf16> to vector<128x128xbf16>
    %cst_121 = arith.constant dense<0.000000e+00> : vector<64x128xf32>
    %144 = tpu.matmul %141, %143, %cst_121 {dimension_numbers = #tpu.dot_dimension_numbers<[1], [0], [0], [1], [0, 0, 1, 1], [], []>} : vector<64x128xbf16>, vector<128x128xbf16>, vector<64x128xf32> -> vector<64x128xf32>
    %145 = arith.addf %139, %144 : vector<64x128xf32>
    %c8_122 = arith.constant 8 : index
    %c0_123 = arith.constant 0 : index
    %146 = vector.load %arg39[%c8_122, %c0_123] : memref<80x128xf32, #tpu.memory_space<vmem>>, vector<64x128xf32>
    %147 = arith.truncf %146 : vector<64x128xf32> to vector<64x128xbf16>
    %c2_124 = arith.constant 2 : index
    %c0_125 = arith.constant 0 : index
    %c0_126 = arith.constant 0 : index
    %148 = vector.load %arg13[%c2_124, %c0_125, %c0_126] : memref<15x128x128xbf16, #tpu.memory_space<vmem>>, vector<1x128x128xbf16>
    %149 = vector.shape_cast %148 : vector<1x128x128xbf16> to vector<128x128xbf16>
    %cst_127 = arith.constant dense<0.000000e+00> : vector<64x128xf32>
    %150 = tpu.matmul %147, %149, %cst_127 {dimension_numbers = #tpu.dot_dimension_numbers<[1], [0], [0], [1], [0, 0, 1, 1], [], []>} : vector<64x128xbf16>, vector<128x128xbf16>, vector<64x128xf32> -> vector<64x128xf32>
    %151 = arith.addf %145, %150 : vector<64x128xf32>
    %c9_128 = arith.constant 9 : index
    %c0_129 = arith.constant 0 : index
    %152 = vector.load %arg39[%c9_128, %c0_129] : memref<80x128xf32, #tpu.memory_space<vmem>>, vector<64x128xf32>
    %153 = arith.truncf %152 : vector<64x128xf32> to vector<64x128xbf16>
    %c3_130 = arith.constant 3 : index
    %c0_131 = arith.constant 0 : index
    %c0_132 = arith.constant 0 : index
    %154 = vector.load %arg13[%c3_130, %c0_131, %c0_132] : memref<15x128x128xbf16, #tpu.memory_space<vmem>>, vector<1x128x128xbf16>
    %155 = vector.shape_cast %154 : vector<1x128x128xbf16> to vector<128x128xbf16>
    %cst_133 = arith.constant dense<0.000000e+00> : vector<64x128xf32>
    %156 = tpu.matmul %153, %155, %cst_133 {dimension_numbers = #tpu.dot_dimension_numbers<[1], [0], [0], [1], [0, 0, 1, 1], [], []>} : vector<64x128xbf16>, vector<128x128xbf16>, vector<64x128xf32> -> vector<64x128xf32>
    %157 = arith.addf %151, %156 : vector<64x128xf32>
    %c10_134 = arith.constant 10 : index
    %c0_135 = arith.constant 0 : index
    %158 = vector.load %arg39[%c10_134, %c0_135] : memref<80x128xf32, #tpu.memory_space<vmem>>, vector<64x128xf32>
    %159 = arith.truncf %158 : vector<64x128xf32> to vector<64x128xbf16>
    %c4_136 = arith.constant 4 : index
    %c0_137 = arith.constant 0 : index
    %c0_138 = arith.constant 0 : index
    %160 = vector.load %arg13[%c4_136, %c0_137, %c0_138] : memref<15x128x128xbf16, #tpu.memory_space<vmem>>, vector<1x128x128xbf16>
    %161 = vector.shape_cast %160 : vector<1x128x128xbf16> to vector<128x128xbf16>
    %cst_139 = arith.constant dense<0.000000e+00> : vector<64x128xf32>
    %162 = tpu.matmul %159, %161, %cst_139 {dimension_numbers = #tpu.dot_dimension_numbers<[1], [0], [0], [1], [0, 0, 1, 1], [], []>} : vector<64x128xbf16>, vector<128x128xbf16>, vector<64x128xf32> -> vector<64x128xf32>
    %163 = arith.addf %157, %162 : vector<64x128xf32>
    %cst_140 = arith.constant 0.000000e+00 : f32
    %164 = vector.broadcast %cst_140 : f32 to vector<64x128xf32>
    %165 = arith.maximumf %163, %164 : vector<64x128xf32>
    %166 = arith.truncf %165 : vector<64x128xf32> to vector<64x128xbf16>
    %c0_141 = arith.constant 0 : index
    %c0_142 = arith.constant 0 : index
    %c0_143 = arith.constant 0 : index
    %167 = vector.load %arg15[%c0_141, %c0_142, %c0_143] : memref<3x128x128xbf16, #tpu.memory_space<vmem>>, vector<1x128x128xbf16>
    %168 = vector.shape_cast %167 : vector<1x128x128xbf16> to vector<128x128xbf16>
    %cst_144 = arith.constant dense<0.000000e+00> : vector<64x128xf32>
    %169 = tpu.matmul %166, %168, %cst_144 {dimension_numbers = #tpu.dot_dimension_numbers<[1], [0], [0], [1], [0, 0, 1, 1], [], []>} : vector<64x128xbf16>, vector<128x128xbf16>, vector<64x128xf32> -> vector<64x128xf32>
    %c0_145 = arith.constant 0 : index
    %c0_146 = arith.constant 0 : index
    %c0_147 = arith.constant 0 : index
    %170 = vector.load %arg16[%c0_145, %c0_146, %c0_147] : memref<3x1x128xf32, #tpu.memory_space<vmem>>, vector<1x1x128xf32>
    %171 = vector.shape_cast %170 : vector<1x1x128xf32> to vector<1x128xf32>
    %172 = vector.broadcast %171 : vector<1x128xf32> to vector<64x128xf32>
    %173 = arith.addf %169, %172 : vector<64x128xf32>
    %174 = arith.addf %129, %173 : vector<64x128xf32>
    %175 = arith.mulf %174, %3 : vector<64x128xf32>
    %c8_148 = arith.constant 8 : index
    %c0_149 = arith.constant 0 : index
    %176 = vector.load %arg39[%c8_148, %c0_149] : memref<80x128xf32, #tpu.memory_space<vmem>>, vector<64x128xf32>
    tpu.vector_store %arg39[%c8_148, %c0_149], %175 {strides = array<i32>} : memref<80x128xf32, #tpu.memory_space<vmem>>, vector<64x128xf32>,
    %c1_150 = arith.constant 1 : index
    %c0_151 = arith.constant 0 : index
    %c0_152 = arith.constant 0 : index
    %177 = vector.load %arg14[%c1_150, %c0_151, %c0_152] : memref<3x1x128xf32, #tpu.memory_space<vmem>>, vector<1x1x128xf32>
    %178 = vector.shape_cast %177 : vector<1x1x128xf32> to vector<1x128xf32>
    %c4_153 = arith.constant 4 : index
    %c0_154 = arith.constant 0 : index
    %179 = vector.load %arg39[%c4_153, %c0_154] : memref<80x128xf32, #tpu.memory_space<vmem>>, vector<64x128xf32>
    %180 = arith.truncf %179 : vector<64x128xf32> to vector<64x128xbf16>
    %c5_155 = arith.constant 5 : index
    %c0_156 = arith.constant 0 : index
    %c0_157 = arith.constant 0 : index
    %181 = vector.load %arg13[%c5_155, %c0_156, %c0_157] : memref<15x128x128xbf16, #tpu.memory_space<vmem>>, vector<1x128x128xbf16>
    %182 = vector.shape_cast %181 : vector<1x128x128xbf16> to vector<128x128xbf16>
    %cst_158 = arith.constant dense<0.000000e+00> : vector<64x128xf32>
    %183 = tpu.matmul %180, %182, %cst_158 {dimension_numbers = #tpu.dot_dimension_numbers<[1], [0], [0], [1], [0, 0, 1, 1], [], []>} : vector<64x128xbf16>, vector<128x128xbf16>, vector<64x128xf32> -> vector<64x128xf32>
    %184 = vector.broadcast %178 : vector<1x128xf32> to vector<64x128xf32>
    %185 = arith.addf %184, %183 : vector<64x128xf32>
    %c6_159 = arith.constant 6 : index
    %c0_160 = arith.constant 0 : index
    %186 = vector.load %arg39[%c6_159, %c0_160] : memref<80x128xf32, #tpu.memory_space<vmem>>, vector<64x128xf32>
    %187 = arith.truncf %186 : vector<64x128xf32> to vector<64x128xbf16>
    %c6_161 = arith.constant 6 : index
    %c0_162 = arith.constant 0 : index
    %c0_163 = arith.constant 0 : index
    %188 = vector.load %arg13[%c6_161, %c0_162, %c0_163] : memref<15x128x128xbf16, #tpu.memory_space<vmem>>, vector<1x128x128xbf16>
    %189 = vector.shape_cast %188 : vector<1x128x128xbf16> to vector<128x128xbf16>
    %cst_164 = arith.constant dense<0.000000e+00> : vector<64x128xf32>
    %190 = tpu.matmul %187, %189, %cst_164 {dimension_numbers = #tpu.dot_dimension_numbers<[1], [0], [0], [1], [0, 0, 1, 1], [], []>} : vector<64x128xbf16>, vector<128x128xbf16>, vector<64x128xf32> -> vector<64x128xf32>
    %191 = arith.addf %185, %190 : vector<64x128xf32>
    %c8_165 = arith.constant 8 : index
    %c0_166 = arith.constant 0 : index
    %192 = vector.load %arg39[%c8_165, %c0_166] : memref<80x128xf32, #tpu.memory_space<vmem>>, vector<64x128xf32>
    %193 = arith.truncf %192 : vector<64x128xf32> to vector<64x128xbf16>
    %c7_167 = arith.constant 7 : index
    %c0_168 = arith.constant 0 : index
    %c0_169 = arith.constant 0 : index
    %194 = vector.load %arg13[%c7_167, %c0_168, %c0_169] : memref<15x128x128xbf16, #tpu.memory_space<vmem>>, vector<1x128x128xbf16>
    %195 = vector.shape_cast %194 : vector<1x128x128xbf16> to vector<128x128xbf16>
    %cst_170 = arith.constant dense<0.000000e+00> : vector<64x128xf32>
    %196 = tpu.matmul %193, %195, %cst_170 {dimension_numbers = #tpu.dot_dimension_numbers<[1], [0], [0], [1], [0, 0, 1, 1], [], []>} : vector<64x128xbf16>, vector<128x128xbf16>, vector<64x128xf32> -> vector<64x128xf32>
    %197 = arith.addf %191, %196 : vector<64x128xf32>
    %c10_171 = arith.constant 10 : index
    %c0_172 = arith.constant 0 : index
    %198 = vector.load %arg39[%c10_171, %c0_172] : memref<80x128xf32, #tpu.memory_space<vmem>>, vector<64x128xf32>
    %199 = arith.truncf %198 : vector<64x128xf32> to vector<64x128xbf16>
    %c8_173 = arith.constant 8 : index
    %c0_174 = arith.constant 0 : index
    %c0_175 = arith.constant 0 : index
    %200 = vector.load %arg13[%c8_173, %c0_174, %c0_175] : memref<15x128x128xbf16, #tpu.memory_space<vmem>>, vector<1x128x128xbf16>
    %201 = vector.shape_cast %200 : vector<1x128x128xbf16> to vector<128x128xbf16>
    %cst_176 = arith.constant dense<0.000000e+00> : vector<64x128xf32>
    %202 = tpu.matmul %199, %201, %cst_176 {dimension_numbers = #tpu.dot_dimension_numbers<[1], [0], [0], [1], [0, 0, 1, 1], [], []>} : vector<64x128xbf16>, vector<128x128xbf16>, vector<64x128xf32> -> vector<64x128xf32>
    %203 = arith.addf %197, %202 : vector<64x128xf32>
    %c12_177 = arith.constant 12 : index
    %c0_178 = arith.constant 0 : index
    %204 = vector.load %arg39[%c12_177, %c0_178] : memref<80x128xf32, #tpu.memory_space<vmem>>, vector<64x128xf32>
    %205 = arith.truncf %204 : vector<64x128xf32> to vector<64x128xbf16>
    %c9_179 = arith.constant 9 : index
    %c0_180 = arith.constant 0 : index
    %c0_181 = arith.constant 0 : index
    %206 = vector.load %arg13[%c9_179, %c0_180, %c0_181] : memref<15x128x128xbf16, #tpu.memory_space<vmem>>, vector<1x128x128xbf16>
    %207 = vector.shape_cast %206 : vector<1x128x128xbf16> to vector<128x128xbf16>
    %cst_182 = arith.constant dense<0.000000e+00> : vector<64x128xf32>
    %208 = tpu.matmul %205, %207, %cst_182 {dimension_numbers = #tpu.dot_dimension_numbers<[1], [0], [0], [1], [0, 0, 1, 1], [], []>} : vector<64x128xbf16>, vector<128x128xbf16>, vector<64x128xf32> -> vector<64x128xf32>
    %209 = arith.addf %203, %208 : vector<64x128xf32>
    %cst_183 = arith.constant 0.000000e+00 : f32
    %210 = vector.broadcast %cst_183 : f32 to vector<64x128xf32>
    %211 = arith.maximumf %209, %210 : vector<64x128xf32>
    %212 = arith.truncf %211 : vector<64x128xf32> to vector<64x128xbf16>
    %c1_184 = arith.constant 1 : index
    %c0_185 = arith.constant 0 : index
    %c0_186 = arith.constant 0 : index
    %213 = vector.load %arg15[%c1_184, %c0_185, %c0_186] : memref<3x128x128xbf16, #tpu.memory_space<vmem>>, vector<1x128x128xbf16>
    %214 = vector.shape_cast %213 : vector<1x128x128xbf16> to vector<128x128xbf16>
    %cst_187 = arith.constant dense<0.000000e+00> : vector<64x128xf32>
    %215 = tpu.matmul %212, %214, %cst_187 {dimension_numbers = #tpu.dot_dimension_numbers<[1], [0], [0], [1], [0, 0, 1, 1], [], []>} : vector<64x128xbf16>, vector<128x128xbf16>, vector<64x128xf32> -> vector<64x128xf32>
    %c1_188 = arith.constant 1 : index
    %c0_189 = arith.constant 0 : index
    %c0_190 = arith.constant 0 : index
    %216 = vector.load %arg16[%c1_188, %c0_189, %c0_190] : memref<3x1x128xf32, #tpu.memory_space<vmem>>, vector<1x1x128xf32>
    %217 = vector.shape_cast %216 : vector<1x1x128xf32> to vector<1x128xf32>
    %218 = vector.broadcast %217 : vector<1x128xf32> to vector<64x128xf32>
    %219 = arith.addf %215, %218 : vector<64x128xf32>
    %220 = arith.addf %175, %219 : vector<64x128xf32>
    %221 = arith.mulf %220, %3 : vector<64x128xf32>
    %c8_191 = arith.constant 8 : index
    %c0_192 = arith.constant 0 : index
    %222 = vector.load %arg39[%c8_191, %c0_192] : memref<80x128xf32, #tpu.memory_space<vmem>>, vector<64x128xf32>
    tpu.vector_store %arg39[%c8_191, %c0_192], %221 {strides = array<i32>} : memref<80x128xf32, #tpu.memory_space<vmem>>, vector<64x128xf32>,
    %c2_193 = arith.constant 2 : index
    %c0_194 = arith.constant 0 : index
    %c0_195 = arith.constant 0 : index
    %223 = vector.load %arg14[%c2_193, %c0_194, %c0_195] : memref<3x1x128xf32, #tpu.memory_space<vmem>>, vector<1x1x128xf32>
    %224 = vector.shape_cast %223 : vector<1x1x128xf32> to vector<1x128xf32>
    %c0_196 = arith.constant 0 : index
    %c0_197 = arith.constant 0 : index
    %225 = vector.load %arg39[%c0_196, %c0_197] : memref<80x128xf32, #tpu.memory_space<vmem>>, vector<64x128xf32>
    %226 = arith.truncf %225 : vector<64x128xf32> to vector<64x128xbf16>
    %c10_198 = arith.constant 10 : index
    %c0_199 = arith.constant 0 : index
    %c0_200 = arith.constant 0 : index
    %227 = vector.load %arg13[%c10_198, %c0_199, %c0_200] : memref<15x128x128xbf16, #tpu.memory_space<vmem>>, vector<1x128x128xbf16>
    %228 = vector.shape_cast %227 : vector<1x128x128xbf16> to vector<128x128xbf16>
    %cst_201 = arith.constant dense<0.000000e+00> : vector<64x128xf32>
    %229 = tpu.matmul %226, %228, %cst_201 {dimension_numbers = #tpu.dot_dimension_numbers<[1], [0], [0], [1], [0, 0, 1, 1], [], []>} : vector<64x128xbf16>, vector<128x128xbf16>, vector<64x128xf32> -> vector<64x128xf32>
    %230 = vector.broadcast %224 : vector<1x128xf32> to vector<64x128xf32>
    %231 = arith.addf %230, %229 : vector<64x128xf32>
    %c4_202 = arith.constant 4 : index
    %c0_203 = arith.constant 0 : index
    %232 = vector.load %arg39[%c4_202, %c0_203] : memref<80x128xf32, #tpu.memory_space<vmem>>, vector<64x128xf32>
    %233 = arith.truncf %232 : vector<64x128xf32> to vector<64x128xbf16>
    %c11 = arith.constant 11 : index
    %c0_204 = arith.constant 0 : index
    %c0_205 = arith.constant 0 : index
    %234 = vector.load %arg13[%c11, %c0_204, %c0_205] : memref<15x128x128xbf16, #tpu.memory_space<vmem>>, vector<1x128x128xbf16>
    %235 = vector.shape_cast %234 : vector<1x128x128xbf16> to vector<128x128xbf16>
    %cst_206 = arith.constant dense<0.000000e+00> : vector<64x128xf32>
    %236 = tpu.matmul %233, %235, %cst_206 {dimension_numbers = #tpu.dot_dimension_numbers<[1], [0], [0], [1], [0, 0, 1, 1], [], []>} : vector<64x128xbf16>, vector<128x128xbf16>, vector<64x128xf32> -> vector<64x128xf32>
    %237 = arith.addf %231, %236 : vector<64x128xf32>
    %c8_207 = arith.constant 8 : index
    %c0_208 = arith.constant 0 : index
    %238 = vector.load %arg39[%c8_207, %c0_208] : memref<80x128xf32, #tpu.memory_space<vmem>>, vector<64x128xf32>
    %239 = arith.truncf %238 : vector<64x128xf32> to vector<64x128xbf16>
    %c12_209 = arith.constant 12 : index
    %c0_210 = arith.constant 0 : index
    %c0_211 = arith.constant 0 : index
    %240 = vector.load %arg13[%c12_209, %c0_210, %c0_211] : memref<15x128x128xbf16, #tpu.memory_space<vmem>>, vector<1x128x128xbf16>
    %241 = vector.shape_cast %240 : vector<1x128x128xbf16> to vector<128x128xbf16>
    %cst_212 = arith.constant dense<0.000000e+00> : vector<64x128xf32>
    %242 = tpu.matmul %239, %241, %cst_212 {dimension_numbers = #tpu.dot_dimension_numbers<[1], [0], [0], [1], [0, 0, 1, 1], [], []>} : vector<64x128xbf16>, vector<128x128xbf16>, vector<64x128xf32> -> vector<64x128xf32>
    %243 = arith.addf %237, %242 : vector<64x128xf32>
    %c12_213 = arith.constant 12 : index
    %c0_214 = arith.constant 0 : index
    %244 = vector.load %arg39[%c12_213, %c0_214] : memref<80x128xf32, #tpu.memory_space<vmem>>, vector<64x128xf32>
    %245 = arith.truncf %244 : vector<64x128xf32> to vector<64x128xbf16>
    %c13 = arith.constant 13 : index
    %c0_215 = arith.constant 0 : index
    %c0_216 = arith.constant 0 : index
    %246 = vector.load %arg13[%c13, %c0_215, %c0_216] : memref<15x128x128xbf16, #tpu.memory_space<vmem>>, vector<1x128x128xbf16>
    %247 = vector.shape_cast %246 : vector<1x128x128xbf16> to vector<128x128xbf16>
    %cst_217 = arith.constant dense<0.000000e+00> : vector<64x128xf32>
    %248 = tpu.matmul %245, %247, %cst_217 {dimension_numbers = #tpu.dot_dimension_numbers<[1], [0], [0], [1], [0, 0, 1, 1], [], []>} : vector<64x128xbf16>, vector<128x128xbf16>, vector<64x128xf32> -> vector<64x128xf32>
    %249 = arith.addf %243, %248 : vector<64x128xf32>
    %c16 = arith.constant 16 : index
    %c0_218 = arith.constant 0 : index
    %250 = vector.load %arg39[%c16, %c0_218] : memref<80x128xf32, #tpu.memory_space<vmem>>, vector<64x128xf32>
    %251 = arith.truncf %250 : vector<64x128xf32> to vector<64x128xbf16>
    %c14 = arith.constant 14 : index
    %c0_219 = arith.constant 0 : index
    %c0_220 = arith.constant 0 : index
    %252 = vector.load %arg13[%c14, %c0_219, %c0_220] : memref<15x128x128xbf16, #tpu.memory_space<vmem>>, vector<1x128x128xbf16>
    %253 = vector.shape_cast %252 : vector<1x128x128xbf16> to vector<128x128xbf16>
    %cst_221 = arith.constant dense<0.000000e+00> : vector<64x128xf32>
    %254 = tpu.matmul %251, %253, %cst_221 {dimension_numbers = #tpu.dot_dimension_numbers<[1], [0], [0], [1], [0, 0, 1, 1], [], []>} : vector<64x128xbf16>, vector<128x128xbf16>, vector<64x128xf32> -> vector<64x128xf32>
    %255 = arith.addf %249, %254 : vector<64x128xf32>
    %cst_222 = arith.constant 0.000000e+00 : f32
    %256 = vector.broadcast %cst_222 : f32 to vector<64x128xf32>
    %257 = arith.maximumf %255, %256 : vector<64x128xf32>
    %258 = arith.truncf %257 : vector<64x128xf32> to vector<64x128xbf16>
    %c2_223 = arith.constant 2 : index
    %c0_224 = arith.constant 0 : index
    %c0_225 = arith.constant 0 : index
    %259 = vector.load %arg15[%c2_223, %c0_224, %c0_225] : memref<3x128x128xbf16, #tpu.memory_space<vmem>>, vector<1x128x128xbf16>
    %260 = vector.shape_cast %259 : vector<1x128x128xbf16> to vector<128x128xbf16>
    %cst_226 = arith.constant dense<0.000000e+00> : vector<64x128xf32>
    %261 = tpu.matmul %258, %260, %cst_226 {dimension_numbers = #tpu.dot_dimension_numbers<[1], [0], [0], [1], [0, 0, 1, 1], [], []>} : vector<64x128xbf16>, vector<128x128xbf16>, vector<64x128xf32> -> vector<64x128xf32>
    %c2_227 = arith.constant 2 : index
    %c0_228 = arith.constant 0 : index
    %c0_229 = arith.constant 0 : index
    %262 = vector.load %arg16[%c2_227, %c0_228, %c0_229] : memref<3x1x128xf32, #tpu.memory_space<vmem>>, vector<1x1x128xf32>
    %263 = vector.shape_cast %262 : vector<1x1x128xf32> to vector<1x128xf32>
    %264 = vector.broadcast %263 : vector<1x128xf32> to vector<64x128xf32>
    %265 = arith.addf %261, %264 : vector<64x128xf32>
    %266 = arith.addf %221, %265 : vector<64x128xf32>
    %267 = arith.mulf %266, %3 : vector<64x128xf32>
    %268 = arith.truncf %267 : vector<64x128xf32> to vector<64x128xbf16>
    %c0_230 = arith.constant 0 : index
    %c0_231 = arith.constant 0 : index
    %269 = vector.load %arg17[%c0_230, %c0_231] : memref<128x128xbf16, #tpu.memory_space<vmem>>, vector<128x128xbf16>
    %cst_232 = arith.constant dense<0.000000e+00> : vector<64x128xf32>
    %270 = tpu.matmul %268, %269, %cst_232 {dimension_numbers = #tpu.dot_dimension_numbers<[1], [0], [0], [1], [0, 0, 1, 1], [], []>} : vector<64x128xbf16>, vector<128x128xbf16>, vector<64x128xf32> -> vector<64x128xf32>
    %c0_233 = arith.constant 0 : index
    %c0_234 = arith.constant 0 : index
    %271 = vector.load %arg18[%c0_233, %c0_234] : memref<1x128xf32, #tpu.memory_space<vmem>>, vector<1x128xf32>
    %272 = vector.broadcast %271 : vector<1x128xf32> to vector<64x128xf32>
    %273 = arith.addf %270, %272 : vector<64x128xf32>
    %274 = arith.mulf %273, %5 : vector<64x128xf32>
    %275 = arith.addf %124, %274 : vector<64x128xf32>
    %c0_235 = arith.constant 0 : index
    %c0_236 = arith.constant 0 : index
    %c0_237 = arith.constant 0 : index
    %276 = vector.load %arg36[%c0_235, %c0_236, %c0_237] : memref<1x64x128xf32, #tpu.memory_space<vmem>>, vector<1x64x128xf32>
    %277 = vector.shape_cast %276 : vector<1x64x128xf32> to vector<64x128xf32>
    %278 = vector.shape_cast %275 : vector<64x128xf32> to vector<1x64x128xf32>
    tpu.vector_store %arg36[%c0_235, %c0_236, %c0_237], %278 {strides = array<i32>} : memref<1x64x128xf32, #tpu.memory_space<vmem>>, vector<1x64x128xf32>,
    %cst_238 = arith.constant dense<0xFF800000> : vector<64xf32>
    %279 = vector.multi_reduction <maximumf>, %275, %cst_238 [1] : vector<64x128xf32> to vector<64xf32>
    %280 = vector.shape_cast %279 : vector<64xf32> to vector<64x1xf32>
    %281 = vector.broadcast %280 : vector<64x1xf32> to vector<64x128xf32>
    %282 = arith.subf %275, %281 : vector<64x128xf32>
    %283 = math.exp %282 : vector<64x128xf32>
    %cst_239 = arith.constant dense<0.000000e+00> : vector<64xf32>
    %284 = vector.multi_reduction <add>, %283, %cst_239 [1] : vector<64x128xf32> to vector<64xf32>
    %285 = vector.shape_cast %284 : vector<64xf32> to vector<64x1xf32>
    %286 = tpu.reciprocal %285 {approx = true} : vector<64x1xf32> -> vector<64x1xf32>
    %287 = vector.broadcast %286 : vector<64x1xf32> to vector<64x128xf32>
    %288 = arith.mulf %283, %287 : vector<64x128xf32>
    %289 = arith.mulf %288, %5 : vector<64x128xf32>
    %290 = arith.truncf %289 : vector<64x128xf32> to vector<64x128xbf16>
    %c0_240 = arith.constant 0 : index
    %c0_241 = arith.constant 0 : index
    %291 = vector.load %arg19[%c0_240, %c0_241] : memref<128x128xbf16, #tpu.memory_space<vmem>>, vector<128x128xbf16>
    %cst_242 = arith.constant dense<0.000000e+00> : vector<64x128xf32>
    %292 = tpu.matmul %290, %291, %cst_242 {dimension_numbers = #tpu.dot_dimension_numbers<[1], [0], [0], [1], [0, 0, 1, 1], [], []>} : vector<64x128xbf16>, vector<128x128xbf16>, vector<64x128xf32> -> vector<64x128xf32>
    %c0_243 = arith.constant 0 : index
    %c0_244 = arith.constant 0 : index
    %293 = vector.load %arg20[%c0_243, %c0_244] : memref<1x128xf32, #tpu.memory_space<vmem>>, vector<1x128xf32>
    %294 = vector.broadcast %293 : vector<1x128xf32> to vector<64x128xf32>
    %295 = arith.addf %292, %294 : vector<64x128xf32>
    %c8_245 = arith.constant 8 : index
    %c0_246 = arith.constant 0 : index
    %296 = vector.load %arg39[%c8_245, %c0_246] : memref<80x128xf32, #tpu.memory_space<vmem>>, vector<64x128xf32>
    tpu.vector_store %arg39[%c8_245, %c0_246], %295 {strides = array<i32>} : memref<80x128xf32, #tpu.memory_space<vmem>>, vector<64x128xf32>,
    %c0_247 = arith.constant 0 : index
    %c0_248 = arith.constant 0 : index
    %c0_249 = arith.constant 0 : index
    %297 = vector.load %arg22[%c0_247, %c0_248, %c0_249] : memref<3x1x128xf32, #tpu.memory_space<vmem>>, vector<1x1x128xf32>
    %298 = vector.shape_cast %297 : vector<1x1x128xf32> to vector<1x128xf32>
    %c7_250 = arith.constant 7 : index
    %c0_251 = arith.constant 0 : index
    %299 = vector.load %arg39[%c7_250, %c0_251] : memref<80x128xf32, #tpu.memory_space<vmem>>, vector<64x128xf32>
    %300 = arith.truncf %299 : vector<64x128xf32> to vector<64x128xbf16>
    %c0_252 = arith.constant 0 : index
    %c0_253 = arith.constant 0 : index
    %c0_254 = arith.constant 0 : index
    %301 = vector.load %arg21[%c0_252, %c0_253, %c0_254] : memref<9x128x128xbf16, #tpu.memory_space<vmem>>, vector<1x128x128xbf16>
    %302 = vector.shape_cast %301 : vector<1x128x128xbf16> to vector<128x128xbf16>
    %cst_255 = arith.constant dense<0.000000e+00> : vector<64x128xf32>
    %303 = tpu.matmul %300, %302, %cst_255 {dimension_numbers = #tpu.dot_dimension_numbers<[1], [0], [0], [1], [0, 0, 1, 1], [], []>} : vector<64x128xbf16>, vector<128x128xbf16>, vector<64x128xf32> -> vector<64x128xf32>
    %304 = vector.broadcast %298 : vector<1x128xf32> to vector<64x128xf32>
    %305 = arith.addf %304, %303 : vector<64x128xf32>
    %c8_256 = arith.constant 8 : index
    %c0_257 = arith.constant 0 : index
    %306 = vector.load %arg39[%c8_256, %c0_257] : memref<80x128xf32, #tpu.memory_space<vmem>>, vector<64x128xf32>
    %307 = arith.truncf %306 : vector<64x128xf32> to vector<64x128xbf16>
    %c1_258 = arith.constant 1 : index
    %c0_259 = arith.constant 0 : index
    %c0_260 = arith.constant 0 : index
    %308 = vector.load %arg21[%c1_258, %c0_259, %c0_260] : memref<9x128x128xbf16, #tpu.memory_space<vmem>>, vector<1x128x128xbf16>
    %309 = vector.shape_cast %308 : vector<1x128x128xbf16> to vector<128x128xbf16>
    %cst_261 = arith.constant dense<0.000000e+00> : vector<64x128xf32>
    %310 = tpu.matmul %307, %309, %cst_261 {dimension_numbers = #tpu.dot_dimension_numbers<[1], [0], [0], [1], [0, 0, 1, 1], [], []>} : vector<64x128xbf16>, vector<128x128xbf16>, vector<64x128xf32> -> vector<64x128xf32>
    %311 = arith.addf %305, %310 : vector<64x128xf32>
    %c9_262 = arith.constant 9 : index
    %c0_263 = arith.constant 0 : index
    %312 = vector.load %arg39[%c9_262, %c0_263] : memref<80x128xf32, #tpu.memory_space<vmem>>, vector<64x128xf32>
    %313 = arith.truncf %312 : vector<64x128xf32> to vector<64x128xbf16>
    %c2_264 = arith.constant 2 : index
    %c0_265 = arith.constant 0 : index
    %c0_266 = arith.constant 0 : index
    %314 = vector.load %arg21[%c2_264, %c0_265, %c0_266] : memref<9x128x128xbf16, #tpu.memory_space<vmem>>, vector<1x128x128xbf16>
    %315 = vector.shape_cast %314 : vector<1x128x128xbf16> to vector<128x128xbf16>
    %cst_267 = arith.constant dense<0.000000e+00> : vector<64x128xf32>
    %316 = tpu.matmul %313, %315, %cst_267 {dimension_numbers = #tpu.dot_dimension_numbers<[1], [0], [0], [1], [0, 0, 1, 1], [], []>} : vector<64x128xbf16>, vector<128x128xbf16>, vector<64x128xf32> -> vector<64x128xf32>
    %317 = arith.addf %311, %316 : vector<64x128xf32>
    %cst_268 = arith.constant 0.000000e+00 : f32
    %318 = vector.broadcast %cst_268 : f32 to vector<64x128xf32>
    %319 = arith.maximumf %317, %318 : vector<64x128xf32>
    %320 = arith.truncf %319 : vector<64x128xf32> to vector<64x128xbf16>
    %c0_269 = arith.constant 0 : index
    %c0_270 = arith.constant 0 : index
    %c0_271 = arith.constant 0 : index
    %321 = vector.load %arg23[%c0_269, %c0_270, %c0_271] : memref<3x128x128xbf16, #tpu.memory_space<vmem>>, vector<1x128x128xbf16>
    %322 = vector.shape_cast %321 : vector<1x128x128xbf16> to vector<128x128xbf16>
    %cst_272 = arith.constant dense<0.000000e+00> : vector<64x128xf32>
    %323 = tpu.matmul %320, %322, %cst_272 {dimension_numbers = #tpu.dot_dimension_numbers<[1], [0], [0], [1], [0, 0, 1, 1], [], []>} : vector<64x128xbf16>, vector<128x128xbf16>, vector<64x128xf32> -> vector<64x128xf32>
    %c0_273 = arith.constant 0 : index
    %c0_274 = arith.constant 0 : index
    %c0_275 = arith.constant 0 : index
    %324 = vector.load %arg24[%c0_273, %c0_274, %c0_275] : memref<3x1x128xf32, #tpu.memory_space<vmem>>, vector<1x1x128xf32>
    %325 = vector.shape_cast %324 : vector<1x1x128xf32> to vector<1x128xf32>
    %326 = vector.broadcast %325 : vector<1x128xf32> to vector<64x128xf32>
    %327 = arith.addf %323, %326 : vector<64x128xf32>
    %328 = arith.addf %295, %327 : vector<64x128xf32>
    %329 = arith.mulf %328, %3 : vector<64x128xf32>
    %c8_276 = arith.constant 8 : index
    %c0_277 = arith.constant 0 : index
    %330 = vector.load %arg39[%c8_276, %c0_277] : memref<80x128xf32, #tpu.memory_space<vmem>>, vector<64x128xf32>
    tpu.vector_store %arg39[%c8_276, %c0_277], %329 {strides = array<i32>} : memref<80x128xf32, #tpu.memory_space<vmem>>, vector<64x128xf32>,
    %c1_278 = arith.constant 1 : index
    %c0_279 = arith.constant 0 : index
    %c0_280 = arith.constant 0 : index
    %331 = vector.load %arg22[%c1_278, %c0_279, %c0_280] : memref<3x1x128xf32, #tpu.memory_space<vmem>>, vector<1x1x128xf32>
    %332 = vector.shape_cast %331 : vector<1x1x128xf32> to vector<1x128xf32>
    %c6_281 = arith.constant 6 : index
    %c0_282 = arith.constant 0 : index
    %333 = vector.load %arg39[%c6_281, %c0_282] : memref<80x128xf32, #tpu.memory_space<vmem>>, vector<64x128xf32>
    %334 = arith.truncf %333 : vector<64x128xf32> to vector<64x128xbf16>
    %c3_283 = arith.constant 3 : index
    %c0_284 = arith.constant 0 : index
    %c0_285 = arith.constant 0 : index
    %335 = vector.load %arg21[%c3_283, %c0_284, %c0_285] : memref<9x128x128xbf16, #tpu.memory_space<vmem>>, vector<1x128x128xbf16>
    %336 = vector.shape_cast %335 : vector<1x128x128xbf16> to vector<128x128xbf16>
    %cst_286 = arith.constant dense<0.000000e+00> : vector<64x128xf32>
    %337 = tpu.matmul %334, %336, %cst_286 {dimension_numbers = #tpu.dot_dimension_numbers<[1], [0], [0], [1], [0, 0, 1, 1], [], []>} : vector<64x128xbf16>, vector<128x128xbf16>, vector<64x128xf32> -> vector<64x128xf32>
    %338 = vector.broadcast %332 : vector<1x128xf32> to vector<64x128xf32>
    %339 = arith.addf %338, %337 : vector<64x128xf32>
    %c8_287 = arith.constant 8 : index
    %c0_288 = arith.constant 0 : index
    %340 = vector.load %arg39[%c8_287, %c0_288] : memref<80x128xf32, #tpu.memory_space<vmem>>, vector<64x128xf32>
    %341 = arith.truncf %340 : vector<64x128xf32> to vector<64x128xbf16>
    %c4_289 = arith.constant 4 : index
    %c0_290 = arith.constant 0 : index
    %c0_291 = arith.constant 0 : index
    %342 = vector.load %arg21[%c4_289, %c0_290, %c0_291] : memref<9x128x128xbf16, #tpu.memory_space<vmem>>, vector<1x128x128xbf16>
    %343 = vector.shape_cast %342 : vector<1x128x128xbf16> to vector<128x128xbf16>
    %cst_292 = arith.constant dense<0.000000e+00> : vector<64x128xf32>
    %344 = tpu.matmul %341, %343, %cst_292 {dimension_numbers = #tpu.dot_dimension_numbers<[1], [0], [0], [1], [0, 0, 1, 1], [], []>} : vector<64x128xbf16>, vector<128x128xbf16>, vector<64x128xf32> -> vector<64x128xf32>
    %345 = arith.addf %339, %344 : vector<64x128xf32>
    %c10_293 = arith.constant 10 : index
    %c0_294 = arith.constant 0 : index
    %346 = vector.load %arg39[%c10_293, %c0_294] : memref<80x128xf32, #tpu.memory_space<vmem>>, vector<64x128xf32>
    %347 = arith.truncf %346 : vector<64x128xf32> to vector<64x128xbf16>
    %c5_295 = arith.constant 5 : index
    %c0_296 = arith.constant 0 : index
    %c0_297 = arith.constant 0 : index
    %348 = vector.load %arg21[%c5_295, %c0_296, %c0_297] : memref<9x128x128xbf16, #tpu.memory_space<vmem>>, vector<1x128x128xbf16>
    %349 = vector.shape_cast %348 : vector<1x128x128xbf16> to vector<128x128xbf16>
    %cst_298 = arith.constant dense<0.000000e+00> : vector<64x128xf32>
    %350 = tpu.matmul %347, %349, %cst_298 {dimension_numbers = #tpu.dot_dimension_numbers<[1], [0], [0], [1], [0, 0, 1, 1], [], []>} : vector<64x128xbf16>, vector<128x128xbf16>, vector<64x128xf32> -> vector<64x128xf32>
    %351 = arith.addf %345, %350 : vector<64x128xf32>
    %cst_299 = arith.constant 0.000000e+00 : f32
    %352 = vector.broadcast %cst_299 : f32 to vector<64x128xf32>
    %353 = arith.maximumf %351, %352 : vector<64x128xf32>
    %354 = arith.truncf %353 : vector<64x128xf32> to vector<64x128xbf16>
    %c1_300 = arith.constant 1 : index
    %c0_301 = arith.constant 0 : index
    %c0_302 = arith.constant 0 : index
    %355 = vector.load %arg23[%c1_300, %c0_301, %c0_302] : memref<3x128x128xbf16, #tpu.memory_space<vmem>>, vector<1x128x128xbf16>
    %356 = vector.shape_cast %355 : vector<1x128x128xbf16> to vector<128x128xbf16>
    %cst_303 = arith.constant dense<0.000000e+00> : vector<64x128xf32>
    %357 = tpu.matmul %354, %356, %cst_303 {dimension_numbers = #tpu.dot_dimension_numbers<[1], [0], [0], [1], [0, 0, 1, 1], [], []>} : vector<64x128xbf16>, vector<128x128xbf16>, vector<64x128xf32> -> vector<64x128xf32>
    %c1_304 = arith.constant 1 : index
    %c0_305 = arith.constant 0 : index
    %c0_306 = arith.constant 0 : index
    %358 = vector.load %arg24[%c1_304, %c0_305, %c0_306] : memref<3x1x128xf32, #tpu.memory_space<vmem>>, vector<1x1x128xf32>
    %359 = vector.shape_cast %358 : vector<1x1x128xf32> to vector<1x128xf32>
    %360 = vector.broadcast %359 : vector<1x128xf32> to vector<64x128xf32>
    %361 = arith.addf %357, %360 : vector<64x128xf32>
    %362 = arith.addf %329, %361 : vector<64x128xf32>
    %363 = arith.mulf %362, %3 : vector<64x128xf32>
    %c8_307 = arith.constant 8 : index
    %c0_308 = arith.constant 0 : index
    %364 = vector.load %arg39[%c8_307, %c0_308] : memref<80x128xf32, #tpu.memory_space<vmem>>, vector<64x128xf32>
    tpu.vector_store %arg39[%c8_307, %c0_308], %363 {strides = array<i32>} : memref<80x128xf32, #tpu.memory_space<vmem>>, vector<64x128xf32>,
    %c2_309 = arith.constant 2 : index
    %c0_310 = arith.constant 0 : index
    %c0_311 = arith.constant 0 : index
    %365 = vector.load %arg22[%c2_309, %c0_310, %c0_311] : memref<3x1x128xf32, #tpu.memory_space<vmem>>, vector<1x1x128xf32>
    %366 = vector.shape_cast %365 : vector<1x1x128xf32> to vector<1x128xf32>
    %c4_312 = arith.constant 4 : index
    %c0_313 = arith.constant 0 : index
    %367 = vector.load %arg39[%c4_312, %c0_313] : memref<80x128xf32, #tpu.memory_space<vmem>>, vector<64x128xf32>
    %368 = arith.truncf %367 : vector<64x128xf32> to vector<64x128xbf16>
    %c6_314 = arith.constant 6 : index
    %c0_315 = arith.constant 0 : index
    %c0_316 = arith.constant 0 : index
    %369 = vector.load %arg21[%c6_314, %c0_315, %c0_316] : memref<9x128x128xbf16, #tpu.memory_space<vmem>>, vector<1x128x128xbf16>
    %370 = vector.shape_cast %369 : vector<1x128x128xbf16> to vector<128x128xbf16>
    %cst_317 = arith.constant dense<0.000000e+00> : vector<64x128xf32>
    %371 = tpu.matmul %368, %370, %cst_317 {dimension_numbers = #tpu.dot_dimension_numbers<[1], [0], [0], [1], [0, 0, 1, 1], [], []>} : vector<64x128xbf16>, vector<128x128xbf16>, vector<64x128xf32> -> vector<64x128xf32>
    %372 = vector.broadcast %366 : vector<1x128xf32> to vector<64x128xf32>
    %373 = arith.addf %372, %371 : vector<64x128xf32>
    %c8_318 = arith.constant 8 : index
    %c0_319 = arith.constant 0 : index
    %374 = vector.load %arg39[%c8_318, %c0_319] : memref<80x128xf32, #tpu.memory_space<vmem>>, vector<64x128xf32>
    %375 = arith.truncf %374 : vector<64x128xf32> to vector<64x128xbf16>
    %c7_320 = arith.constant 7 : index
    %c0_321 = arith.constant 0 : index
    %c0_322 = arith.constant 0 : index
    %376 = vector.load %arg21[%c7_320, %c0_321, %c0_322] : memref<9x128x128xbf16, #tpu.memory_space<vmem>>, vector<1x128x128xbf16>
    %377 = vector.shape_cast %376 : vector<1x128x128xbf16> to vector<128x128xbf16>
    %cst_323 = arith.constant dense<0.000000e+00> : vector<64x128xf32>
    %378 = tpu.matmul %375, %377, %cst_323 {dimension_numbers = #tpu.dot_dimension_numbers<[1], [0], [0], [1], [0, 0, 1, 1], [], []>} : vector<64x128xbf16>, vector<128x128xbf16>, vector<64x128xf32> -> vector<64x128xf32>
    %379 = arith.addf %373, %378 : vector<64x128xf32>
    %c12_324 = arith.constant 12 : index
    %c0_325 = arith.constant 0 : index
    %380 = vector.load %arg39[%c12_324, %c0_325] : memref<80x128xf32, #tpu.memory_space<vmem>>, vector<64x128xf32>
    %381 = arith.truncf %380 : vector<64x128xf32> to vector<64x128xbf16>
    %c8_326 = arith.constant 8 : index
    %c0_327 = arith.constant 0 : index
    %c0_328 = arith.constant 0 : index
    %382 = vector.load %arg21[%c8_326, %c0_327, %c0_328] : memref<9x128x128xbf16, #tpu.memory_space<vmem>>, vector<1x128x128xbf16>
    %383 = vector.shape_cast %382 : vector<1x128x128xbf16> to vector<128x128xbf16>
    %cst_329 = arith.constant dense<0.000000e+00> : vector<64x128xf32>
    %384 = tpu.matmul %381, %383, %cst_329 {dimension_numbers = #tpu.dot_dimension_numbers<[1], [0], [0], [1], [0, 0, 1, 1], [], []>} : vector<64x128xbf16>, vector<128x128xbf16>, vector<64x128xf32> -> vector<64x128xf32>
    %385 = arith.addf %379, %384 : vector<64x128xf32>
    %cst_330 = arith.constant 0.000000e+00 : f32
    %386 = vector.broadcast %cst_330 : f32 to vector<64x128xf32>
    %387 = arith.maximumf %385, %386 : vector<64x128xf32>
    %388 = arith.truncf %387 : vector<64x128xf32> to vector<64x128xbf16>
    %c2_331 = arith.constant 2 : index
    %c0_332 = arith.constant 0 : index
    %c0_333 = arith.constant 0 : index
    %389 = vector.load %arg23[%c2_331, %c0_332, %c0_333] : memref<3x128x128xbf16, #tpu.memory_space<vmem>>, vector<1x128x128xbf16>
    %390 = vector.shape_cast %389 : vector<1x128x128xbf16> to vector<128x128xbf16>
    %cst_334 = arith.constant dense<0.000000e+00> : vector<64x128xf32>
    %391 = tpu.matmul %388, %390, %cst_334 {dimension_numbers = #tpu.dot_dimension_numbers<[1], [0], [0], [1], [0, 0, 1, 1], [], []>} : vector<64x128xbf16>, vector<128x128xbf16>, vector<64x128xf32> -> vector<64x128xf32>
    %c2_335 = arith.constant 2 : index
    %c0_336 = arith.constant 0 : index
    %c0_337 = arith.constant 0 : index
    %392 = vector.load %arg24[%c2_335, %c0_336, %c0_337] : memref<3x1x128xf32, #tpu.memory_space<vmem>>, vector<1x1x128xf32>
    %393 = vector.shape_cast %392 : vector<1x1x128xf32> to vector<1x128xf32>
    %394 = vector.broadcast %393 : vector<1x128xf32> to vector<64x128xf32>
    %395 = arith.addf %391, %394 : vector<64x128xf32>
    %396 = arith.addf %363, %395 : vector<64x128xf32>
    %397 = arith.mulf %396, %3 : vector<64x128xf32>
    %398 = arith.truncf %397 : vector<64x128xf32> to vector<64x128xbf16>
    %c0_338 = arith.constant 0 : index
    %c0_339 = arith.constant 0 : index
    %399 = vector.load %arg25[%c0_338, %c0_339] : memref<128x128xbf16, #tpu.memory_space<vmem>>, vector<128x128xbf16>
    %cst_340 = arith.constant dense<0.000000e+00> : vector<64x128xf32>
    %400 = tpu.matmul %398, %399, %cst_340 {dimension_numbers = #tpu.dot_dimension_numbers<[1], [0], [0], [1], [0, 0, 1, 1], [], []>} : vector<64x128xbf16>, vector<128x128xbf16>, vector<64x128xf32> -> vector<64x128xf32>
    %c0_341 = arith.constant 0 : index
    %c0_342 = arith.constant 0 : index
    %401 = vector.load %arg26[%c0_341, %c0_342] : memref<1x128xf32, #tpu.memory_space<vmem>>, vector<1x128xf32>
    %402 = vector.broadcast %401 : vector<1x128xf32> to vector<64x128xf32>
    %403 = arith.addf %400, %402 : vector<64x128xf32>
    %404 = arith.mulf %403, %5 : vector<64x128xf32>
    %c0_343 = arith.constant 0 : index
    %c0_344 = arith.constant 0 : index
    %c0_345 = arith.constant 0 : index
    %405 = vector.load %arg37[%c0_343, %c0_344, %c0_345] : memref<1x64x128xf32, #tpu.memory_space<vmem>>, vector<1x64x128xf32>
    %406 = vector.shape_cast %405 : vector<1x64x128xf32> to vector<64x128xf32>
    %407 = vector.shape_cast %404 : vector<64x128xf32> to vector<1x64x128xf32>
    tpu.vector_store %arg37[%c0_343, %c0_344, %c0_345], %407 {strides = array<i32>} : memref<1x64x128xf32, #tpu.memory_space<vmem>>, vector<1x64x128xf32>,
    %cst_346 = arith.constant dense<0xFF800000> : vector<64xf32>
    %408 = vector.multi_reduction <maximumf>, %404, %cst_346 [1] : vector<64x128xf32> to vector<64xf32>
    %409 = vector.shape_cast %408 : vector<64xf32> to vector<64x1xf32>
    %410 = vector.broadcast %409 : vector<64x1xf32> to vector<64x128xf32>
    %411 = arith.subf %404, %410 : vector<64x128xf32>
    %412 = math.exp %411 : vector<64x128xf32>
    %cst_347 = arith.constant dense<0.000000e+00> : vector<64xf32>
    %413 = vector.multi_reduction <add>, %412, %cst_347 [1] : vector<64x128xf32> to vector<64xf32>
    %414 = vector.shape_cast %413 : vector<64xf32> to vector<64x1xf32>
    %415 = tpu.reciprocal %414 {approx = true} : vector<64x1xf32> -> vector<64x1xf32>
    %416 = vector.broadcast %415 : vector<64x1xf32> to vector<64x128xf32>
    %417 = arith.mulf %412, %416 : vector<64x128xf32>
    %418 = arith.mulf %417, %5 : vector<64x128xf32>
    %419 = arith.truncf %418 : vector<64x128xf32> to vector<64x128xbf16>
    %c0_348 = arith.constant 0 : index
    %c0_349 = arith.constant 0 : index
    %420 = vector.load %arg27[%c0_348, %c0_349] : memref<128x128xbf16, #tpu.memory_space<vmem>>, vector<128x128xbf16>
    %cst_350 = arith.constant dense<0.000000e+00> : vector<64x128xf32>
    %421 = tpu.matmul %419, %420, %cst_350 {dimension_numbers = #tpu.dot_dimension_numbers<[1], [0], [0], [1], [0, 0, 1, 1], [], []>} : vector<64x128xbf16>, vector<128x128xbf16>, vector<64x128xf32> -> vector<64x128xf32>
    %c0_351 = arith.constant 0 : index
    %c0_352 = arith.constant 0 : index
    %422 = vector.load %arg28[%c0_351, %c0_352] : memref<1x128xf32, #tpu.memory_space<vmem>>, vector<1x128xf32>
    %423 = vector.broadcast %422 : vector<1x128xf32> to vector<64x128xf32>
    %424 = arith.addf %421, %423 : vector<64x128xf32>
    %c8_353 = arith.constant 8 : index
    %c0_354 = arith.constant 0 : index
    %425 = vector.load %arg39[%c8_353, %c0_354] : memref<80x128xf32, #tpu.memory_space<vmem>>, vector<64x128xf32>
    tpu.vector_store %arg39[%c8_353, %c0_354], %424 {strides = array<i32>} : memref<80x128xf32, #tpu.memory_space<vmem>>, vector<64x128xf32>,
    %c0_355 = arith.constant 0 : index
    %c0_356 = arith.constant 0 : index
    %c0_357 = arith.constant 0 : index
    %426 = vector.load %arg30[%c0_355, %c0_356, %c0_357] : memref<3x1x128xf32, #tpu.memory_space<vmem>>, vector<1x1x128xf32>
    %427 = vector.shape_cast %426 : vector<1x1x128xf32> to vector<1x128xf32>
    %c7_358 = arith.constant 7 : index
    %c0_359 = arith.constant 0 : index
    %428 = vector.load %arg39[%c7_358, %c0_359] : memref<80x128xf32, #tpu.memory_space<vmem>>, vector<64x128xf32>
    %429 = arith.truncf %428 : vector<64x128xf32> to vector<64x128xbf16>
    %c0_360 = arith.constant 0 : index
    %c0_361 = arith.constant 0 : index
    %c0_362 = arith.constant 0 : index
    %430 = vector.load %arg29[%c0_360, %c0_361, %c0_362] : memref<9x128x128xbf16, #tpu.memory_space<vmem>>, vector<1x128x128xbf16>
    %431 = vector.shape_cast %430 : vector<1x128x128xbf16> to vector<128x128xbf16>
    %cst_363 = arith.constant dense<0.000000e+00> : vector<64x128xf32>
    %432 = tpu.matmul %429, %431, %cst_363 {dimension_numbers = #tpu.dot_dimension_numbers<[1], [0], [0], [1], [0, 0, 1, 1], [], []>} : vector<64x128xbf16>, vector<128x128xbf16>, vector<64x128xf32> -> vector<64x128xf32>
    %433 = vector.broadcast %427 : vector<1x128xf32> to vector<64x128xf32>
    %434 = arith.addf %433, %432 : vector<64x128xf32>
    %c8_364 = arith.constant 8 : index
    %c0_365 = arith.constant 0 : index
    %435 = vector.load %arg39[%c8_364, %c0_365] : memref<80x128xf32, #tpu.memory_space<vmem>>, vector<64x128xf32>
    %436 = arith.truncf %435 : vector<64x128xf32> to vector<64x128xbf16>
    %c1_366 = arith.constant 1 : index
    %c0_367 = arith.constant 0 : index
    %c0_368 = arith.constant 0 : index
    %437 = vector.load %arg29[%c1_366, %c0_367, %c0_368] : memref<9x128x128xbf16, #tpu.memory_space<vmem>>, vector<1x128x128xbf16>
    %438 = vector.shape_cast %437 : vector<1x128x128xbf16> to vector<128x128xbf16>
    %cst_369 = arith.constant dense<0.000000e+00> : vector<64x128xf32>
    %439 = tpu.matmul %436, %438, %cst_369 {dimension_numbers = #tpu.dot_dimension_numbers<[1], [0], [0], [1], [0, 0, 1, 1], [], []>} : vector<64x128xbf16>, vector<128x128xbf16>, vector<64x128xf32> -> vector<64x128xf32>
    %440 = arith.addf %434, %439 : vector<64x128xf32>
    %c9_370 = arith.constant 9 : index
    %c0_371 = arith.constant 0 : index
    %441 = vector.load %arg39[%c9_370, %c0_371] : memref<80x128xf32, #tpu.memory_space<vmem>>, vector<64x128xf32>
    %442 = arith.truncf %441 : vector<64x128xf32> to vector<64x128xbf16>
    %c2_372 = arith.constant 2 : index
    %c0_373 = arith.constant 0 : index
    %c0_374 = arith.constant 0 : index
    %443 = vector.load %arg29[%c2_372, %c0_373, %c0_374] : memref<9x128x128xbf16, #tpu.memory_space<vmem>>, vector<1x128x128xbf16>
    %444 = vector.shape_cast %443 : vector<1x128x128xbf16> to vector<128x128xbf16>
    %cst_375 = arith.constant dense<0.000000e+00> : vector<64x128xf32>
    %445 = tpu.matmul %442, %444, %cst_375 {dimension_numbers = #tpu.dot_dimension_numbers<[1], [0], [0], [1], [0, 0, 1, 1], [], []>} : vector<64x128xbf16>, vector<128x128xbf16>, vector<64x128xf32> -> vector<64x128xf32>
    %446 = arith.addf %440, %445 : vector<64x128xf32>
    %cst_376 = arith.constant 0.000000e+00 : f32
    %447 = vector.broadcast %cst_376 : f32 to vector<64x128xf32>
    %448 = arith.maximumf %446, %447 : vector<64x128xf32>
    %449 = arith.truncf %448 : vector<64x128xf32> to vector<64x128xbf16>
    %c0_377 = arith.constant 0 : index
    %c0_378 = arith.constant 0 : index
    %c0_379 = arith.constant 0 : index
    %450 = vector.load %arg31[%c0_377, %c0_378, %c0_379] : memref<3x128x128xbf16, #tpu.memory_space<vmem>>, vector<1x128x128xbf16>
    %451 = vector.shape_cast %450 : vector<1x128x128xbf16> to vector<128x128xbf16>
    %cst_380 = arith.constant dense<0.000000e+00> : vector<64x128xf32>
    %452 = tpu.matmul %449, %451, %cst_380 {dimension_numbers = #tpu.dot_dimension_numbers<[1], [0], [0], [1], [0, 0, 1, 1], [], []>} : vector<64x128xbf16>, vector<128x128xbf16>, vector<64x128xf32> -> vector<64x128xf32>
    %c0_381 = arith.constant 0 : index
    %c0_382 = arith.constant 0 : index
    %c0_383 = arith.constant 0 : index
    %453 = vector.load %arg32[%c0_381, %c0_382, %c0_383] : memref<3x1x128xf32, #tpu.memory_space<vmem>>, vector<1x1x128xf32>
    %454 = vector.shape_cast %453 : vector<1x1x128xf32> to vector<1x128xf32>
    %455 = vector.broadcast %454 : vector<1x128xf32> to vector<64x128xf32>
    %456 = arith.addf %452, %455 : vector<64x128xf32>
    %457 = arith.addf %424, %456 : vector<64x128xf32>
    %458 = arith.mulf %457, %3 : vector<64x128xf32>
    %c8_384 = arith.constant 8 : index
    %c0_385 = arith.constant 0 : index
    %459 = vector.load %arg39[%c8_384, %c0_385] : memref<80x128xf32, #tpu.memory_space<vmem>>, vector<64x128xf32>
    tpu.vector_store %arg39[%c8_384, %c0_385], %458 {strides = array<i32>} : memref<80x128xf32, #tpu.memory_space<vmem>>, vector<64x128xf32>,
    %c1_386 = arith.constant 1 : index
    %c0_387 = arith.constant 0 : index
    %c0_388 = arith.constant 0 : index
    %460 = vector.load %arg30[%c1_386, %c0_387, %c0_388] : memref<3x1x128xf32, #tpu.memory_space<vmem>>, vector<1x1x128xf32>
    %461 = vector.shape_cast %460 : vector<1x1x128xf32> to vector<1x128xf32>
    %c6_389 = arith.constant 6 : index
    %c0_390 = arith.constant 0 : index
    %462 = vector.load %arg39[%c6_389, %c0_390] : memref<80x128xf32, #tpu.memory_space<vmem>>, vector<64x128xf32>
    %463 = arith.truncf %462 : vector<64x128xf32> to vector<64x128xbf16>
    %c3_391 = arith.constant 3 : index
    %c0_392 = arith.constant 0 : index
    %c0_393 = arith.constant 0 : index
    %464 = vector.load %arg29[%c3_391, %c0_392, %c0_393] : memref<9x128x128xbf16, #tpu.memory_space<vmem>>, vector<1x128x128xbf16>
    %465 = vector.shape_cast %464 : vector<1x128x128xbf16> to vector<128x128xbf16>
    %cst_394 = arith.constant dense<0.000000e+00> : vector<64x128xf32>
    %466 = tpu.matmul %463, %465, %cst_394 {dimension_numbers = #tpu.dot_dimension_numbers<[1], [0], [0], [1], [0, 0, 1, 1], [], []>} : vector<64x128xbf16>, vector<128x128xbf16>, vector<64x128xf32> -> vector<64x128xf32>
    %467 = vector.broadcast %461 : vector<1x128xf32> to vector<64x128xf32>
    %468 = arith.addf %467, %466 : vector<64x128xf32>
    %c8_395 = arith.constant 8 : index
    %c0_396 = arith.constant 0 : index
    %469 = vector.load %arg39[%c8_395, %c0_396] : memref<80x128xf32, #tpu.memory_space<vmem>>, vector<64x128xf32>
    %470 = arith.truncf %469 : vector<64x128xf32> to vector<64x128xbf16>
    %c4_397 = arith.constant 4 : index
    %c0_398 = arith.constant 0 : index
    %c0_399 = arith.constant 0 : index
    %471 = vector.load %arg29[%c4_397, %c0_398, %c0_399] : memref<9x128x128xbf16, #tpu.memory_space<vmem>>, vector<1x128x128xbf16>
    %472 = vector.shape_cast %471 : vector<1x128x128xbf16> to vector<128x128xbf16>
    %cst_400 = arith.constant dense<0.000000e+00> : vector<64x128xf32>
    %473 = tpu.matmul %470, %472, %cst_400 {dimension_numbers = #tpu.dot_dimension_numbers<[1], [0], [0], [1], [0, 0, 1, 1], [], []>} : vector<64x128xbf16>, vector<128x128xbf16>, vector<64x128xf32> -> vector<64x128xf32>
    %474 = arith.addf %468, %473 : vector<64x128xf32>
    %c10_401 = arith.constant 10 : index
    %c0_402 = arith.constant 0 : index
    %475 = vector.load %arg39[%c10_401, %c0_402] : memref<80x128xf32, #tpu.memory_space<vmem>>, vector<64x128xf32>
    %476 = arith.truncf %475 : vector<64x128xf32> to vector<64x128xbf16>
    %c5_403 = arith.constant 5 : index
    %c0_404 = arith.constant 0 : index
    %c0_405 = arith.constant 0 : index
    %477 = vector.load %arg29[%c5_403, %c0_404, %c0_405] : memref<9x128x128xbf16, #tpu.memory_space<vmem>>, vector<1x128x128xbf16>
    %478 = vector.shape_cast %477 : vector<1x128x128xbf16> to vector<128x128xbf16>
    %cst_406 = arith.constant dense<0.000000e+00> : vector<64x128xf32>
    %479 = tpu.matmul %476, %478, %cst_406 {dimension_numbers = #tpu.dot_dimension_numbers<[1], [0], [0], [1], [0, 0, 1, 1], [], []>} : vector<64x128xbf16>, vector<128x128xbf16>, vector<64x128xf32> -> vector<64x128xf32>
    %480 = arith.addf %474, %479 : vector<64x128xf32>
    %cst_407 = arith.constant 0.000000e+00 : f32
    %481 = vector.broadcast %cst_407 : f32 to vector<64x128xf32>
    %482 = arith.maximumf %480, %481 : vector<64x128xf32>
    %483 = arith.truncf %482 : vector<64x128xf32> to vector<64x128xbf16>
    %c1_408 = arith.constant 1 : index
    %c0_409 = arith.constant 0 : index
    %c0_410 = arith.constant 0 : index
    %484 = vector.load %arg31[%c1_408, %c0_409, %c0_410] : memref<3x128x128xbf16, #tpu.memory_space<vmem>>, vector<1x128x128xbf16>
    %485 = vector.shape_cast %484 : vector<1x128x128xbf16> to vector<128x128xbf16>
    %cst_411 = arith.constant dense<0.000000e+00> : vector<64x128xf32>
    %486 = tpu.matmul %483, %485, %cst_411 {dimension_numbers = #tpu.dot_dimension_numbers<[1], [0], [0], [1], [0, 0, 1, 1], [], []>} : vector<64x128xbf16>, vector<128x128xbf16>, vector<64x128xf32> -> vector<64x128xf32>
    %c1_412 = arith.constant 1 : index
    %c0_413 = arith.constant 0 : index
    %c0_414 = arith.constant 0 : index
    %487 = vector.load %arg32[%c1_412, %c0_413, %c0_414] : memref<3x1x128xf32, #tpu.memory_space<vmem>>, vector<1x1x128xf32>
    %488 = vector.shape_cast %487 : vector<1x1x128xf32> to vector<1x128xf32>
    %489 = vector.broadcast %488 : vector<1x128xf32> to vector<64x128xf32>
    %490 = arith.addf %486, %489 : vector<64x128xf32>
    %491 = arith.addf %458, %490 : vector<64x128xf32>
    %492 = arith.mulf %491, %3 : vector<64x128xf32>
    %c8_415 = arith.constant 8 : index
    %c0_416 = arith.constant 0 : index
    %493 = vector.load %arg39[%c8_415, %c0_416] : memref<80x128xf32, #tpu.memory_space<vmem>>, vector<64x128xf32>
    tpu.vector_store %arg39[%c8_415, %c0_416], %492 {strides = array<i32>} : memref<80x128xf32, #tpu.memory_space<vmem>>, vector<64x128xf32>,
    %c2_417 = arith.constant 2 : index
    %c0_418 = arith.constant 0 : index
    %c0_419 = arith.constant 0 : index
    %494 = vector.load %arg30[%c2_417, %c0_418, %c0_419] : memref<3x1x128xf32, #tpu.memory_space<vmem>>, vector<1x1x128xf32>
    %495 = vector.shape_cast %494 : vector<1x1x128xf32> to vector<1x128xf32>
    %c4_420 = arith.constant 4 : index
    %c0_421 = arith.constant 0 : index
    %496 = vector.load %arg39[%c4_420, %c0_421] : memref<80x128xf32, #tpu.memory_space<vmem>>, vector<64x128xf32>
    %497 = arith.truncf %496 : vector<64x128xf32> to vector<64x128xbf16>
    %c6_422 = arith.constant 6 : index
    %c0_423 = arith.constant 0 : index
    %c0_424 = arith.constant 0 : index
    %498 = vector.load %arg29[%c6_422, %c0_423, %c0_424] : memref<9x128x128xbf16, #tpu.memory_space<vmem>>, vector<1x128x128xbf16>
    %499 = vector.shape_cast %498 : vector<1x128x128xbf16> to vector<128x128xbf16>
    %cst_425 = arith.constant dense<0.000000e+00> : vector<64x128xf32>
    %500 = tpu.matmul %497, %499, %cst_425 {dimension_numbers = #tpu.dot_dimension_numbers<[1], [0], [0], [1], [0, 0, 1, 1], [], []>} : vector<64x128xbf16>, vector<128x128xbf16>, vector<64x128xf32> -> vector<64x128xf32>
    %501 = vector.broadcast %495 : vector<1x128xf32> to vector<64x128xf32>
    %502 = arith.addf %501, %500 : vector<64x128xf32>
    %c8_426 = arith.constant 8 : index
    %c0_427 = arith.constant 0 : index
    %503 = vector.load %arg39[%c8_426, %c0_427] : memref<80x128xf32, #tpu.memory_space<vmem>>, vector<64x128xf32>
    %504 = arith.truncf %503 : vector<64x128xf32> to vector<64x128xbf16>
    %c7_428 = arith.constant 7 : index
    %c0_429 = arith.constant 0 : index
    %c0_430 = arith.constant 0 : index
    %505 = vector.load %arg29[%c7_428, %c0_429, %c0_430] : memref<9x128x128xbf16, #tpu.memory_space<vmem>>, vector<1x128x128xbf16>
    %506 = vector.shape_cast %505 : vector<1x128x128xbf16> to vector<128x128xbf16>
    %cst_431 = arith.constant dense<0.000000e+00> : vector<64x128xf32>
    %507 = tpu.matmul %504, %506, %cst_431 {dimension_numbers = #tpu.dot_dimension_numbers<[1], [0], [0], [1], [0, 0, 1, 1], [], []>} : vector<64x128xbf16>, vector<128x128xbf16>, vector<64x128xf32> -> vector<64x128xf32>
    %508 = arith.addf %502, %507 : vector<64x128xf32>
    %c12_432 = arith.constant 12 : index
    %c0_433 = arith.constant 0 : index
    %509 = vector.load %arg39[%c12_432, %c0_433] : memref<80x128xf32, #tpu.memory_space<vmem>>, vector<64x128xf32>
    %510 = arith.truncf %509 : vector<64x128xf32> to vector<64x128xbf16>
    %c8_434 = arith.constant 8 : index
    %c0_435 = arith.constant 0 : index
    %c0_436 = arith.constant 0 : index
    %511 = vector.load %arg29[%c8_434, %c0_435, %c0_436] : memref<9x128x128xbf16, #tpu.memory_space<vmem>>, vector<1x128x128xbf16>
    %512 = vector.shape_cast %511 : vector<1x128x128xbf16> to vector<128x128xbf16>
    %cst_437 = arith.constant dense<0.000000e+00> : vector<64x128xf32>
    %513 = tpu.matmul %510, %512, %cst_437 {dimension_numbers = #tpu.dot_dimension_numbers<[1], [0], [0], [1], [0, 0, 1, 1], [], []>} : vector<64x128xbf16>, vector<128x128xbf16>, vector<64x128xf32> -> vector<64x128xf32>
    %514 = arith.addf %508, %513 : vector<64x128xf32>
    %cst_438 = arith.constant 0.000000e+00 : f32
    %515 = vector.broadcast %cst_438 : f32 to vector<64x128xf32>
    %516 = arith.maximumf %514, %515 : vector<64x128xf32>
    %517 = arith.truncf %516 : vector<64x128xf32> to vector<64x128xbf16>
    %c2_439 = arith.constant 2 : index
    %c0_440 = arith.constant 0 : index
    %c0_441 = arith.constant 0 : index
    %518 = vector.load %arg31[%c2_439, %c0_440, %c0_441] : memref<3x128x128xbf16, #tpu.memory_space<vmem>>, vector<1x128x128xbf16>
    %519 = vector.shape_cast %518 : vector<1x128x128xbf16> to vector<128x128xbf16>
    %cst_442 = arith.constant dense<0.000000e+00> : vector<64x128xf32>
    %520 = tpu.matmul %517, %519, %cst_442 {dimension_numbers = #tpu.dot_dimension_numbers<[1], [0], [0], [1], [0, 0, 1, 1], [], []>} : vector<64x128xbf16>, vector<128x128xbf16>, vector<64x128xf32> -> vector<64x128xf32>
    %c2_443 = arith.constant 2 : index
    %c0_444 = arith.constant 0 : index
    %c0_445 = arith.constant 0 : index
    %521 = vector.load %arg32[%c2_443, %c0_444, %c0_445] : memref<3x1x128xf32, #tpu.memory_space<vmem>>, vector<1x1x128xf32>
    %522 = vector.shape_cast %521 : vector<1x1x128xf32> to vector<1x128xf32>
    %523 = vector.broadcast %522 : vector<1x128xf32> to vector<64x128xf32>
    %524 = arith.addf %520, %523 : vector<64x128xf32>
    %525 = arith.addf %492, %524 : vector<64x128xf32>
    %526 = arith.mulf %525, %3 : vector<64x128xf32>
    %527 = arith.truncf %526 : vector<64x128xf32> to vector<64x128xbf16>
    %c0_446 = arith.constant 0 : index
    %c0_447 = arith.constant 0 : index
    %528 = vector.load %arg33[%c0_446, %c0_447] : memref<128x128xbf16, #tpu.memory_space<vmem>>, vector<128x128xbf16>
    %cst_448 = arith.constant dense<0.000000e+00> : vector<64x128xf32>
    %529 = tpu.matmul %527, %528, %cst_448 {dimension_numbers = #tpu.dot_dimension_numbers<[1], [0], [0], [1], [0, 0, 1, 1], [], []>} : vector<64x128xbf16>, vector<128x128xbf16>, vector<64x128xf32> -> vector<64x128xf32>
    %c0_449 = arith.constant 0 : index
    %c0_450 = arith.constant 0 : index
    %530 = vector.load %arg34[%c0_449, %c0_450] : memref<1x128xf32, #tpu.memory_space<vmem>>, vector<1x128xf32>
    %531 = vector.broadcast %530 : vector<1x128xf32> to vector<64x128xf32>
    %532 = arith.addf %529, %531 : vector<64x128xf32>
    %533 = arith.mulf %532, %5 : vector<64x128xf32>
    %c0_451 = arith.constant 0 : index
    %c0_452 = arith.constant 0 : index
    %c0_453 = arith.constant 0 : index
    %534 = vector.load %arg38[%c0_451, %c0_452, %c0_453] : memref<1x64x128xf32, #tpu.memory_space<vmem>>, vector<1x64x128xf32>
    %535 = vector.shape_cast %534 : vector<1x64x128xf32> to vector<64x128xf32>
    %536 = vector.shape_cast %533 : vector<64x128xf32> to vector<1x64x128xf32>
    tpu.vector_store %arg38[%c0_451, %c0_452, %c0_453], %536 {strides = array<i32>} : memref<1x64x128xf32, #tpu.memory_space<vmem>>, vector<1x64x128xf32>,
    %c0_454 = arith.constant 0 : index
    %c0_455 = arith.constant 0 : index
    %c0_456 = arith.constant 0 : index
    %537 = vector.load %arg35[%c0_454, %c0_455, %c0_456] : memref<1x64x128xf32, #tpu.memory_space<vmem>>, vector<1x64x128xf32>
    %538 = vector.shape_cast %537 : vector<1x64x128xf32> to vector<64x128xf32>
    %539 = vector.shape_cast %526 : vector<64x128xf32> to vector<1x64x128xf32>
    tpu.vector_store %arg35[%c0_454, %c0_455, %c0_456], %539 {strides = array<i32>} : memref<1x64x128xf32, #tpu.memory_space<vmem>>, vector<1x64x128xf32>,
    return
  }
  func.func @transform_0(%arg0: i32) -> (i32, i32, i32) {
    %c0_i32 = arith.constant 0 : i32
    %c0_i32_0 = arith.constant 0 : i32
    %c0_i32_1 = arith.constant 0 : i32
    return %arg0, %c0_i32, %c0_i32_0 : i32, i32, i32
  }
  func.func @transform_1(%arg0: i32) -> (i32, i32, i32) {
    %c0_i32 = arith.constant 0 : i32
    %c0_i32_0 = arith.constant 0 : i32
    %c0_i32_1 = arith.constant 0 : i32
    return %arg0, %c0_i32, %c0_i32_0 : i32, i32, i32
  }
  func.func @transform_2(%arg0: i32) -> (i32, i32) {
    %c0_i32 = arith.constant 0 : i32
    %c0_i32_0 = arith.constant 0 : i32
    %c0_i32_1 = arith.constant 0 : i32
    return %c0_i32, %c0_i32_0 : i32, i32
  }
  func.func @transform_3(%arg0: i32) -> (i32, i32) {
    %c0_i32 = arith.constant 0 : i32
    %c0_i32_0 = arith.constant 0 : i32
    %c0_i32_1 = arith.constant 0 : i32
    return %c0_i32, %c0_i32_0 : i32, i32
  }
  func.func @transform_4(%arg0: i32) -> (i32, i32, i32) {
    %c0_i32 = arith.constant 0 : i32
    %c0_i32_0 = arith.constant 0 : i32
    %c0_i32_1 = arith.constant 0 : i32
    %c0_i32_2 = arith.constant 0 : i32
    return %c0_i32, %c0_i32_0, %c0_i32_1 : i32, i32, i32
  }
  func.func @transform_5(%arg0: i32) -> (i32, i32, i32) {
    %c0_i32 = arith.constant 0 : i32
    %c0_i32_0 = arith.constant 0 : i32
    %c0_i32_1 = arith.constant 0 : i32
    %c0_i32_2 = arith.constant 0 : i32
    return %c0_i32, %c0_i32_0, %c0_i32_1 : i32, i32, i32
  }
  func.func @transform_6(%arg0: i32) -> (i32, i32, i32) {
    %c0_i32 = arith.constant 0 : i32
    %c0_i32_0 = arith.constant 0 : i32
    %c0_i32_1 = arith.constant 0 : i32
    %c0_i32_2 = arith.constant 0 : i32
    return %c0_i32, %c0_i32_0, %c0_i32_1 : i32, i32, i32
  }
  func.func @transform_7(%arg0: i32) -> (i32, i32, i32) {
    %c0_i32 = arith.constant 0 : i32
    %c0_i32_0 = arith.constant 0 : i32
    %c0_i32_1 = arith.constant 0 : i32
    %c0_i32_2 = arith.constant 0 : i32
    return %c0_i32, %c0_i32_0, %c0_i32_1 : i32, i32, i32
  }
  func.func @transform_8(%arg0: i32) -> (i32, i32) {
    %c0_i32 = arith.constant 0 : i32
    %c0_i32_0 = arith.constant 0 : i32
    %c0_i32_1 = arith.constant 0 : i32
    return %c0_i32, %c0_i32_0 : i32, i32
  }
  func.func @transform_9(%arg0: i32) -> (i32, i32) {
    %c0_i32 = arith.constant 0 : i32
    %c0_i32_0 = arith.constant 0 : i32
    %c0_i32_1 = arith.constant 0 : i32
    return %c0_i32, %c0_i32_0 : i32, i32
  }
  func.func @transform_10(%arg0: i32) -> (i32, i32) {
    %c0_i32 = arith.constant 0 : i32
    %c0_i32_0 = arith.constant 0 : i32
    %c0_i32_1 = arith.constant 0 : i32
    return %c0_i32, %c0_i32_0 : i32, i32
  }
  func.func @transform_11(%arg0: i32) -> (i32, i32) {
    %c0_i32 = arith.constant 0 : i32
    %c0_i32_0 = arith.constant 0 : i32
    %c0_i32_1 = arith.constant 0 : i32
    return %c0_i32, %c0_i32_0 : i32, i32
  }
  func.func @transform_12(%arg0: i32) -> (i32, i32, i32) {
    %c0_i32 = arith.constant 0 : i32
    %c0_i32_0 = arith.constant 0 : i32
    %c0_i32_1 = arith.constant 0 : i32
    %c0_i32_2 = arith.constant 0 : i32
    return %c0_i32, %c0_i32_0, %c0_i32_1 : i32, i32, i32
  }
  func.func @transform_13(%arg0: i32) -> (i32, i32, i32) {
    %c0_i32 = arith.constant 0 : i32
    %c0_i32_0 = arith.constant 0 : i32
    %c0_i32_1 = arith.constant 0 : i32
    %c0_i32_2 = arith.constant 0 : i32
    return %c0_i32, %c0_i32_0, %c0_i32_1 : i32, i32, i32
  }
  func.func @transform_14(%arg0: i32) -> (i32, i32, i32) {
    %c0_i32 = arith.constant 0 : i32
    %c0_i32_0 = arith.constant 0 : i32
    %c0_i32_1 = arith.constant 0 : i32
    %c0_i32_2 = arith.constant 0 : i32
    return %c0_i32, %c0_i32_0, %c0_i32_1 : i32, i32, i32
  }
  func.func @transform_15(%arg0: i32) -> (i32, i32, i32) {
    %c0_i32 = arith.constant 0 : i32
    %c0_i32_0 = arith.constant 0 : i32
    %c0_i32_1 = arith.constant 0 : i32
    %c0_i32_2 = arith.constant 0 : i32
    return %c0_i32, %c0_i32_0, %c0_i32_1 : i32, i32, i32
  }
  func.func @transform_16(%arg0: i32) -> (i32, i32) {
    %c0_i32 = arith.constant 0 : i32
    %c0_i32_0 = arith.constant 0 : i32
    %c0_i32_1 = arith.constant 0 : i32
    return %c0_i32, %c0_i32_0 : i32, i32
  }
  func.func @transform_17(%arg0: i32) -> (i32, i32) {
    %c0_i32 = arith.constant 0 : i32
    %c0_i32_0 = arith.constant 0 : i32
    %c0_i32_1 = arith.constant 0 : i32
    return %c0_i32, %c0_i32_0 : i32, i32
  }
  func.func @transform_18(%arg0: i32) -> (i32, i32) {
    %c0_i32 = arith.constant 0 : i32
    %c0_i32_0 = arith.constant 0 : i32
    %c0_i32_1 = arith.constant 0 : i32
    return %c0_i32, %c0_i32_0 : i32, i32
  }
  func.func @transform_19(%arg0: i32) -> (i32, i32) {
    %c0_i32 = arith.constant 0 : i32
    %c0_i32_0 = arith.constant 0 : i32
    %c0_i32_1 = arith.constant 0 : i32
    return %c0_i32, %c0_i32_0 : i32, i32
  }
  func.func @transform_20(%arg0: i32) -> (i32, i32, i32) {
    %c0_i32 = arith.constant 0 : i32
    %c0_i32_0 = arith.constant 0 : i32
    %c0_i32_1 = arith.constant 0 : i32
    %c0_i32_2 = arith.constant 0 : i32
    return %c0_i32, %c0_i32_0, %c0_i32_1 : i32, i32, i32
  }
  func.func @transform_21(%arg0: i32) -> (i32, i32, i32) {
    %c0_i32 = arith.constant 0 : i32
    %c0_i32_0 = arith.constant 0 : i32
    %c0_i32_1 = arith.constant 0 : i32
    %c0_i32_2 = arith.constant 0 : i32
    return %c0_i32, %c0_i32_0, %c0_i32_1 : i32, i32, i32
  }
  func.func @transform_22(%arg0: i32) -> (i32, i32, i32) {
    %c0_i32 = arith.constant 0 : i32
    %c0_i32_0 = arith.constant 0 : i32
    %c0_i32_1 = arith.constant 0 : i32
    %c0_i32_2 = arith.constant 0 : i32
    return %c0_i32, %c0_i32_0, %c0_i32_1 : i32, i32, i32
  }
  func.func @transform_23(%arg0: i32) -> (i32, i32, i32) {
    %c0_i32 = arith.constant 0 : i32
    %c0_i32_0 = arith.constant 0 : i32
    %c0_i32_1 = arith.constant 0 : i32
    %c0_i32_2 = arith.constant 0 : i32
    return %c0_i32, %c0_i32_0, %c0_i32_1 : i32, i32, i32
  }
  func.func @transform_24(%arg0: i32) -> (i32, i32) {
    %c0_i32 = arith.constant 0 : i32
    %c0_i32_0 = arith.constant 0 : i32
    %c0_i32_1 = arith.constant 0 : i32
    return %c0_i32, %c0_i32_0 : i32, i32
  }
  func.func @transform_25(%arg0: i32) -> (i32, i32) {
    %c0_i32 = arith.constant 0 : i32
    %c0_i32_0 = arith.constant 0 : i32
    %c0_i32_1 = arith.constant 0 : i32
    return %c0_i32, %c0_i32_0 : i32, i32
  }
  func.func @transform_26(%arg0: i32) -> (i32, i32) {
    %c0_i32 = arith.constant 0 : i32
    %c0_i32_0 = arith.constant 0 : i32
    %c0_i32_1 = arith.constant 0 : i32
    return %c0_i32, %c0_i32_0 : i32, i32
  }
  func.func @transform_27(%arg0: i32) -> (i32, i32) {
    %c0_i32 = arith.constant 0 : i32
    %c0_i32_0 = arith.constant 0 : i32
    %c0_i32_1 = arith.constant 0 : i32
    return %c0_i32, %c0_i32_0 : i32, i32
  }
  func.func @transform_28(%arg0: i32) -> (i32, i32, i32) {
    %c0_i32 = arith.constant 0 : i32
    %c0_i32_0 = arith.constant 0 : i32
    %c0_i32_1 = arith.constant 0 : i32
    %c0_i32_2 = arith.constant 0 : i32
    return %c0_i32, %c0_i32_0, %c0_i32_1 : i32, i32, i32
  }
  func.func @transform_29(%arg0: i32) -> (i32, i32, i32) {
    %c0_i32 = arith.constant 0 : i32
    %c0_i32_0 = arith.constant 0 : i32
    %c0_i32_1 = arith.constant 0 : i32
    %c0_i32_2 = arith.constant 0 : i32
    return %c0_i32, %c0_i32_0, %c0_i32_1 : i32, i32, i32
  }
  func.func @transform_30(%arg0: i32) -> (i32, i32, i32) {
    %c0_i32 = arith.constant 0 : i32
    %c0_i32_0 = arith.constant 0 : i32
    %c0_i32_1 = arith.constant 0 : i32
    %c0_i32_2 = arith.constant 0 : i32
    return %c0_i32, %c0_i32_0, %c0_i32_1 : i32, i32, i32
  }
  func.func @transform_31(%arg0: i32) -> (i32, i32, i32) {
    %c0_i32 = arith.constant 0 : i32
    %c0_i32_0 = arith.constant 0 : i32
    %c0_i32_1 = arith.constant 0 : i32
    %c0_i32_2 = arith.constant 0 : i32
    return %c0_i32, %c0_i32_0, %c0_i32_1 : i32, i32, i32
  }
  func.func @transform_32(%arg0: i32) -> (i32, i32) {
    %c0_i32 = arith.constant 0 : i32
    %c0_i32_0 = arith.constant 0 : i32
    %c0_i32_1 = arith.constant 0 : i32
    return %c0_i32, %c0_i32_0 : i32, i32
  }
  func.func @transform_33(%arg0: i32) -> (i32, i32) {
    %c0_i32 = arith.constant 0 : i32
    %c0_i32_0 = arith.constant 0 : i32
    %c0_i32_1 = arith.constant 0 : i32
    return %c0_i32, %c0_i32_0 : i32, i32
  }
  func.func @transform_34(%arg0: i32) -> (i32, i32, i32) {
    %c0_i32 = arith.constant 0 : i32
    %c0_i32_0 = arith.constant 0 : i32
    %c0_i32_1 = arith.constant 0 : i32
    return %arg0, %c0_i32, %c0_i32_0 : i32, i32, i32
  }
  func.func @transform_35(%arg0: i32) -> (i32, i32, i32) {
    %c0_i32 = arith.constant 0 : i32
    %c0_i32_0 = arith.constant 0 : i32
    %c0_i32_1 = arith.constant 0 : i32
    return %arg0, %c0_i32, %c0_i32_0 : i32, i32, i32
  }
  func.func @transform_36(%arg0: i32) -> (i32, i32, i32) {
    %c0_i32 = arith.constant 0 : i32
    %c0_i32_0 = arith.constant 0 : i32
    %c0_i32_1 = arith.constant 0 : i32
    return %arg0, %c0_i32, %c0_i32_0 : i32, i32, i32
  }
  func.func @transform_37(%arg0: i32) -> (i32, i32, i32) {
    %c0_i32 = arith.constant 0 : i32
    %c0_i32_0 = arith.constant 0 : i32
    %c0_i32_1 = arith.constant 0 : i32
    return %arg0, %c0_i32, %c0_i32_0 : i32, i32, i32
  }
}

</mosaic_0001>

<bundles_post_ra>
// kernel: tpu_custom_call.1
= control target key start
LH: loop header
LB: loop body
LE: loop exit
PB: predicated region body
PF: predicated region fallthrough
CT: control target
= control target key end

     0   :  { %s16744_s6 = smov 1   ;;  %s16745_s10 = smov 2   ;;  %s18487_s0 = inlined_call_operand.smem [shape: u32[38], index: -1, kind: input, shape index: {}] }
   0x1   :  { %s16820_s5 = sld [smem:[%s18487_s0]]   ;;  %s16746_s14 = smov 3  }
   0x2   :  { %s16825_s9 = sld [smem:[%s18487_s0 + %s16744_s6]]   ;;  %s16747_s18 = smov 4  }
   0x3   :  { %s16830_s13 = sld [smem:[%s18487_s0 + %s16745_s10]]   ;;  %s16748_s22 = smov 5  }
   0x4   :  { %s16835_s17 = sld [smem:[%s18487_s0 + %s16746_s14]]   ;;  %s16749_s26 = smov 6  }
   0x5   :  { %s16840_s21 = sld [smem:[%s18487_s0 + %s16747_s18]]   ;;  %s16750_s30 = smov 7  }
   0x6   :  { %s16845_s25 = sld [smem:[%s18487_s0 + %s16748_s22]]   ;;  %s16751_s4 = smov 8  }
   0x7   :  { %18543 = sst [smem:[#allocation56_spill]] %s16820_s5  ;;  %s16752_s10 = smov 9  }
   0x8   :  { %18544 = sst [smem:[#allocation57_spill]] %s16825_s9  ;;  %s16753_s15 = smov 10  }
   0x9   :  { %18545 = sst [smem:[#allocation58_spill]] %s16830_s13  ;;  %s16754_s20 = smov 11  }
   0xa   :  { %18546 = sst [smem:[#allocation59_spill]] %s16835_s17  ;;  %s16756_s1 = smov 13  }
   0xb   :  { %18547 = sst [smem:[#allocation60_spill]] %s16840_s21  ;;  %s16757_s7 = smov 14  }
   0xc   :  { %18548 = sst [smem:[#allocation61_spill]] %s16845_s25  ;;  %s16759_s22 = smov 16  }
   0xd   :  { %s16850_s29 = sld [smem:[%s18487_s0 + %s16749_s26]]   ;;  %s16755_s26 = smov 12  }
   0xe   :  { %s16855_s3 = sld [smem:[%s18487_s0 + %s16750_s30]]   ;;  %s16760_s28 = smov 17  }
   0xf   :  { %s16860_s8 = sld [smem:[%s18487_s0 + %s16751_s4]]  }
  0x10   :  { %s16865_s14 = sld [smem:[%s18487_s0 + %s16752_s10]]  }
  0x11   :  { %s16870_s19 = sld [smem:[%s18487_s0 + %s16753_s15]]   ;;  %s16758_s15 = smov 15  }
  0x12   :  { %s16875_s24 = sld [smem:[%s18487_s0 + %s16754_s20]]  }
  0x13   :  { %s16880_s30 = sld [smem:[%s18487_s0 + %s16755_s26]]  }
  0x14   :  { %18549 = sst [smem:[#allocation62_spill]] %s16855_s3 }
  0x15   :  { %18550 = sst [smem:[#allocation63_spill]] %s16860_s8 }
  0x16   :  { %18551 = sst [smem:[#allocation64_spill]] %s16865_s14 }
  0x17   :  { %18552 = sst [smem:[#allocation65_spill]] %s16870_s19 }
  0x18   :  { %18553 = sst [smem:[#allocation66_spill]] %s16875_s24 }
  0x19   :  { %s16885_s6 = sld [smem:[%s18487_s0 + %s16756_s1]]  }
  0x1a   :  { %s16890_s12 = sld [smem:[%s18487_s0 + %s16757_s7]]   ;;  %s16761_s7 = smov 18  }
  0x1b   :  { %s16895_s20 = sld [smem:[%s18487_s0 + %s16758_s15]]   ;;  %s16762_s15 = smov 19  }
  0x1c   :  { %s16900_s27 = sld [smem:[%s18487_s0 + %s16759_s22]]   ;;  %s16763_s22 = smov 20  }
  0x1d   :  { %s16905_s4 = sld [smem:[%s18487_s0 + %s16760_s28]]   ;;  %s16764_s28 = smov 21  }
  0x1e   :  { %s16920_s3 = sld [smem:[%s18487_s0 + %s16763_s22]]   ;;  %s16767_s22 = smov 24  }
  0x1f   :  { %18554 = sst [smem:[#allocation67_spill]] %s16885_s6 }
  0x20   :  { %18555 = sst [smem:[#allocation68_spill]] %s16890_s12 }
  0x21   :  { %18556 = sst [smem:[#allocation69_spill]] %s16895_s20 }
  0x22   :  { %s16910_s6 = sld [smem:[%s18487_s0 + %s16761_s7]]   ;;  %s16765_s7 = smov 22  }
  0x23   :  { %18557 = sst [smem:[#allocation70_spill]] %s16905_s4 }
  0x24   :  { %s16915_s20 = sld [smem:[%s18487_s0 + %s16762_s15]]   ;;  %s16766_s15 = smov 23  }
  0x25   :  { %18560 = sst [smem:[#allocation73_spill]] %s16920_s3 }
  0x26   :  { %s16925_s25 = sld [smem:[%s18487_s0 + %s16764_s28]]   ;;  %s16768_s28 = smov 25  }
  0x27   :  { %s16930_s9 = sld [smem:[%s18487_s0 + %s16765_s7]]   ;;  %s16769_s7 = smov 26  }
  0x28   :  { %18558 = sst [smem:[#allocation71_spill]] %s16910_s6 }
  0x29   :  { %s16935_s5 = sld [smem:[%s18487_s0 + %s16766_s15]]   ;;  %s16770_s15 = smov 27  }
  0x2a   :  { %18559 = sst [smem:[#allocation72_spill]] %s16915_s20 }
  0x2b   :  { %s16940_s20 = sld [smem:[%s18487_s0 + %s16767_s22]]   ;;  %s16771_s22 = smov 28  }
  0x2c   :  { %18561 = sst [smem:[#allocation74_spill]] %s16925_s25 }
  0x2d   :  { %18562 = sst [smem:[#allocation75_spill]] %s16930_s9 }
  0x2e   :  { %s16945_s25 = sld [smem:[%s18487_s0 + %s16768_s28]]   ;;  %s16772_s28 = smov 29  }
  0x2f   :  { %18563 = sst [smem:[#allocation76_spill]] %s16935_s5 }
  0x30   :  { %s16950_s9 = sld [smem:[%s18487_s0 + %s16769_s7]]   ;;  %s16773_s7 = smov 30  }
  0x31   :  { %18564 = sst [smem:[#allocation77_spill]] %s16940_s20 }
  0x32   :  { %s16955_s5 = sld [smem:[%s18487_s0 + %s16770_s15]]   ;;  %s16774_s15 = smov 31  }
  0x33   :  { %s16960_s20 = sld [smem:[%s18487_s0 + %s16771_s22]]   ;;  %s16775_s22 = smov 32  }
  0x34   :  { %18565 = sst [smem:[#allocation78_spill]] %s16945_s25 }
  0x35   :  { %s16965_s25 = sld [smem:[%s18487_s0 + %s16772_s28]]   ;;  %s16776_s28 = smov 33  }
  0x36   :  { %18566 = sst [smem:[#allocation79_spill]] %s16950_s9 }
  0x37   :  { %s16970_s4 = sld [smem:[%s18487_s0 + %s16773_s7]]   ;;  %s16777_s7 = smov 34  }
  0x38   :  { %18567 = sst [smem:[#allocation80_spill]] %s16955_s5 }
  0x39   :  { %18568 = sst [smem:[#allocation81_spill]] %s16960_s20 }
  0x3a   :  { %s16975_s5 = sld [smem:[%s18487_s0 + %s16774_s15]]   ;;  %s16778_s15 = smov 35  }
  0x3b   :  { %18569 = sst [smem:[#allocation82_spill]] %s16965_s25 }
  0x3c   :  { %s16980_s20 = sld [smem:[%s18487_s0 + %s16775_s22]]   ;;  %s16779_s22 = smov 36  }
  0x3d   :  { %18570 = sst [smem:[#allocation83_spill]] %s16970_s4 }
  0x3e   :  { %s16985_s25 = sld [smem:[%s18487_s0 + %s16776_s28]]   ;;  %s16780_s28 = smov 37  }
  0x3f   :  { %s16990_s12 = sld [smem:[%s18487_s0 + %s16777_s7]]  }
  0x40   :  { %18571 = sst [smem:[#allocation84_spill]] %s16975_s5 }
  0x41   :  { %s16995_s5 = sld [smem:[%s18487_s0 + %s16778_s15]]  }
  0x42   :  { %18572 = sst [smem:[#allocation85_spill]] %s16980_s20 }
  0x43   :  { %s17000_s20 = sld [smem:[%s18487_s0 + %s16779_s22]]  }
  0x44   :  { %18573 = sst [smem:[#allocation86_spill]] %s16985_s25 }
  0x45   :  { %s17005_s25 = sld [smem:[%s18487_s0 + %s16780_s28]]  }
  0x47   :  { %18574 = sst [smem:[#allocation87_spill]] %s16995_s5 }
  0x49   :  { %18575 = sst [smem:[#allocation88_spill]] %s17000_s20 }
  0x4b   :  { %18576 = sst [smem:[#allocation89_spill]] %s17005_s25 }
  0x4c   :  { %81 = vsyncpa [#allocation4], 0 }
  0x4d   :  { %83 = vsyncpa [#allocation4 + $0x1], 0 }
  0x4e   :  { %84 = vsyncpa [#allocation7], 0 }
  0x4f   :  { %85 = vsyncpa [#allocation10], 0 }
  0x50   :  { %86 = vsyncpa [#allocation13], 0 }
  0x51   :  { %87 = vsyncpa [#allocation16], 0 }
  0x52   :  { %88 = vsyncpa [#allocation19], 0 }
  0x53   :  { %89 = vsyncpa [#allocation22], 0 }
  0x54   :  { %90 = vsyncpa [#allocation25], 0 }
  0x55   :  { %91 = vsyncpa [#allocation28], 0 }
  0x56   :  { %92 = vsyncpa [#allocation31], 0 }
  0x57   :  { %93 = vsyncpa [#allocation34], 0 }
  0x58   :  { %94 = vsyncpa [#allocation5], 0 }
  0x59   :  { %96 = vsyncpa [#allocation5 + $0x1], 0 }
  0x5a   :  { %97 = vsyncpa [#allocation38], 0 }
  0x5b   :  { %99 = vsyncpa [#allocation38 + $0x1], 0 }
  0x5c   :  { %100 = vsyncpa [#allocation41], 0 }
  0x5d   :  { %102 = vsyncpa [#allocation41 + $0x1], 0  ;;  %s17007_s0 = smov 0   ;;  %s17009_s7 = smov 0  }
  0x5e   :  { %s17011_s10 = smov 0   ;;  %s17013_s11 = smov 0  }
  0x5f LB: > { %s18577_s24 = sld [smem:[#allocation66_spill]]  ;;  %s18578_s5 = sld [smem:[#allocation87_spill]]  ;;  %s16742_s11 = sphi %s17013_s11, %s18650_s11   ;;  %s16738_s10 = sphi %s17011_s10, %s18649_s10   ;;  %s16734_s7 = sphi %s17009_s7, %s18648_s7   ;;  %s16730_s0 = sphi %s17007_s0, %s18647_s0  }
  0x60   : > { %s18579_s19 = sld [smem:[#allocation65_spill]]  ;;  %s18580_s17 = sld [smem:[#allocation59_spill]] }
  0x61   : > { %s18581_s14 = sld [smem:[#allocation64_spill]]  ;;  %s18582_s9 = sld [smem:[#allocation79_spill]] }
  0x62   : > { %s18583_s8 = sld [smem:[#allocation63_spill]]  ;;  %s18585_s4 = sld [smem:[#allocation83_spill]] }
  0x63   : > { %s18584_s6 = sld [smem:[#allocation71_spill]]  ;;  %s18586_s3 = sld [smem:[#allocation73_spill]] }
  0x64   : > { %s18587_s21 = sld [smem:[#allocation60_spill]]  ;;  %s18588_s13 = sld [smem:[#allocation58_spill]] }
  0x65   : > { %s16781_s15 = smov [#allocation6]   ;;  %s17028_s18 = sadd.s32 4294967295, %s16742_s11  }
  0x66   : > { %s953_s16 = sshll.u32 %s16781_s15, 4  ;;  %p11851_p0 = scmp.ge.s32.totalorder %s16742_s11, 1  ;;  %s17033_s16 = int_to_ptr.vmem [resolvable:$true] %s953_s16 }
  0x67   : > { %p18505_p1 = scmp.eq.s32.totalorder %s17028_s18, 0  ;;  %p941_p2 = scmp.lt.s32.totalorder %s16742_s11, 3 }
  0x68   : > { %s16782_s23 = smov [#allocation9]   ;;  %s16783_s1 = smov [#allocation12]  }
  0x69   : > { %p17035_p3 = pnand %p11851_p0, %p941_p2  ;;  %s977_s26 = sshll.u32 %s16782_s23, 4  ;;  %s17048_s26 = int_to_ptr.vmem [resolvable:$true] %s977_s26 }
  0x6a   : > { %s1009_s2 = sshll.u32 %s16783_s1, 4  ;;  %s15954_s15 = scalar_lea.hbm %s18588_s13, 1024  ;;  %s17050_s2 = int_to_ptr.vmem [resolvable:$true] %s1009_s2 }
  0x6b   : > { %s18589_s22 = scalar_select %p17035_p3, 1, 0 }
  0x6c   : > { %p15162_p5 = pneg %p17035_p3  ;;  %p15955_p7 = scmp.ne.s32.totalorder %s18588_s13, %s15954_s15 }
  0x6d   : > { %p15961_p11 = scmp.lt.u32.totalorder %s15954_s15, %s18588_s13 }
  0x6e   : > { %p17044_p6 = pnand %p15162_p5, %p18505_p1 }
  0x70   : > { %p17056_p8 = pneg %p17044_p6 }
  0x72   : > { %p15957_p9 = pnand %p17056_p8, %p15955_p7 }
  0x74   : > { %p15958_p10 = pneg %p15957_p9 }
  0x76   : > { %p15963_p12 = pnand %p15961_p11, %p15958_p10 }
  0x78   : > { %15966 = shalt.err (!%p15963_p12)
}
  0x79   : > { %s15967_s23 = scalar_lea.vmem %s17033_s16, 1024  ;;  %p15975_p5 = scmp.lt.s32.totalorder %s17033_s16, %s17033_s16 }
  0x7a   : > { %p15968_p13 = scmp.ne.s32.totalorder %s17033_s16, %s15967_s23  ;;  %p15976_p4 = scmp.lt.s32.totalorder %s15967_s23, %s15967_s23 }
  0x7c   : > { %p15970_p0 = pnand %p15968_p13, %p17056_p8  ;;  %p15977_p1 = por %p15976_p4, %p15975_p5 }
  0x7e   : > { %p15971_p2 = pneg %p15970_p0 }
  0x80   : > { %p15978_p3 = pnand %p15977_p1, %p15971_p2 }
  0x82   : > { %15981 = shalt.err (!%p15978_p3)
}
  0x83   : > { %s18510_s1 = smov 64   ;;  %s18512_s15 = smov 4  }
  0x84   : > { %15165 = dma.hbm_to_vmem [thread:$0]  (!%p17044_p6), %s18588_s13, 1024, %s17033_s16, [#allocation7], %s18510_s1, %s18510_s1, %s18512_s15  }
  0x85   : > { %s15982_s20 = scalar_lea.hbm %s18587_s21, 9216 }
  0x86   : > { %p15983_p7 = scmp.ne.s32.totalorder %s18587_s21, %s15982_s20  ;;  %p15989_p3 = scmp.lt.u32.totalorder %s15982_s20, %s18587_s21 }
  0x88   : > { %p15985_p4 = pnand %p15983_p7, %p17056_p8 }
  0x8a   : > { %p15986_p1 = pneg %p15985_p4 }
  0x8c   : > { %p15991_p9 = pnand %p15989_p3, %p15986_p1 }
  0x8e   : > { %15994 = shalt.err (!%p15991_p9)
}
  0x8f   : > { %s15995_s23 = scalar_lea.vmem %s17048_s26, 9216  ;;  %p16003_p13 = scmp.lt.s32.totalorder %s17048_s26, %s17048_s26 }
  0x90   : > { %p15996_p10 = scmp.ne.s32.totalorder %s17048_s26, %s15995_s23  ;;  %p16004_p0 = scmp.lt.s32.totalorder %s15995_s23, %s15995_s23 }
  0x92   : > { %p15998_p11 = pnand %p15996_p10, %p17056_p8  ;;  %p16005_p2 = por %p16004_p0, %p16003_p13 }
  0x94   : > { %p15999_p12 = pneg %p15998_p11 }
  0x96   : > { %p16006_p5 = pnand %p16005_p2, %p15999_p12 }
  0x98   : > { %16009 = shalt.err (!%p16006_p5)
}
  0x99   : > { %15171 = dma.hbm_to_vmem [thread:$0]  (!%p17044_p6), %s18587_s21, 9216, %s17048_s26, [#allocation10], %s18510_s1, %s18510_s1, %s18512_s15  }
  0x9a   : > { %s16010_s20 = scalar_lea.hbm %s18583_s8, 1024 }
  0x9b   : > { %p16011_p7 = scmp.ne.s32.totalorder %s18583_s8, %s16010_s20  ;;  %p16017_p3 = scmp.lt.u32.totalorder %s16010_s20, %s18583_s8 }
  0x9d   : > { %p16013_p4 = pnand %p16011_p7, %p17056_p8 }
  0x9f   : > { %p16014_p1 = pneg %p16013_p4 }
  0xa1   : > { %p16019_p9 = pnand %p16017_p3, %p16014_p1 }
  0xa3   : > { %16022 = shalt.err (!%p16019_p9)
}
  0xa4   : > { %s16023_s16 = scalar_lea.vmem %s17050_s2, 1024  ;;  %p16031_p13 = scmp.lt.s32.totalorder %s17050_s2, %s17050_s2 }
  0xa5   : > { %p16024_p10 = scmp.ne.s32.totalorder %s17050_s2, %s16023_s16  ;;  %p16032_p0 = scmp.lt.s32.totalorder %s16023_s16, %s16023_s16 }
  0xa7   : > { %p16026_p11 = pnand %p16024_p10, %p17056_p8  ;;  %p16033_p2 = por %p16032_p0, %p16031_p13 }
  0xa9   : > { %p16027_p12 = pneg %p16026_p11 }
  0xab   : > { %p16034_p5 = pnand %p16033_p2, %p16027_p12 }
  0xad   : > { %16037 = shalt.err (!%p16034_p5)
}
  0xae   : > { %15177 = dma.hbm_to_vmem [thread:$0]  (!%p17044_p6), %s18583_s8, 1024, %s17050_s2, [#allocation13], %s18510_s1, %s18510_s1, %s18512_s15  }
  0xaf   : > { %s16786_s26 = smov [#allocation15]   ;;  %s16787_s20 = smov [#allocation18]  }
  0xb0   : > { %s1033_s23 = sshll.u32 %s16786_s26, 4  ;;  %s1057_s16 = sshll.u32 %s16787_s20, 4  ;;  %s1034_s23 = int_to_ptr.vmem [resolvable:$true] %s1033_s23  ;;  %s1058_s16 = int_to_ptr.vmem [resolvable:$true] %s1057_s16 }
  0xb1   : > { %s16038_s13 = scalar_lea.hbm %s18579_s19, 1024 }
  0xb2   : > { %p16039_p7 = scmp.ne.s32.totalorder %s18579_s19, %s16038_s13  ;;  %p16045_p3 = scmp.lt.u32.totalorder %s16038_s13, %s18579_s19 }
  0xb4   : > { %p16041_p4 = pnand %p16039_p7, %p17056_p8 }
  0xb6   : > { %p16042_p1 = pneg %p16041_p4 }
  0xb8   : > { %p16047_p9 = pnand %p16045_p3, %p16042_p1 }
  0xba   : > { %16050 = shalt.err (!%p16047_p9)
}
  0xbb   : > { %s16051_s21 = scalar_lea.vmem %s1034_s23, 1024  ;;  %p16059_p13 = scmp.lt.s32.totalorder %s1034_s23, %s1034_s23 }
  0xbc   : > { %p16052_p10 = scmp.ne.s32.totalorder %s1034_s23, %s16051_s21  ;;  %p16060_p0 = scmp.lt.s32.totalorder %s16051_s21, %s16051_s21 }
  0xbe   : > { %p16054_p11 = pnand %p16052_p10, %p17056_p8  ;;  %p16061_p2 = por %p16060_p0, %p16059_p13 }
  0xc0   : > { %p16055_p12 = pneg %p16054_p11 }
  0xc2   : > { %p16062_p5 = pnand %p16061_p2, %p16055_p12 }
  0xc4   : > { %16065 = shalt.err (!%p16062_p5)
}
  0xc5   : > { %15183 = dma.hbm_to_vmem [thread:$0]  (!%p17044_p6), %s18579_s19, 1024, %s1034_s23, [#allocation16], %s18510_s1, %s18510_s1, %s18512_s15  }
  0xc6   : > { %s16066_s13 = scalar_lea.hbm %s16880_s30, 15360 }
  0xc7   : > { %p16067_p7 = scmp.ne.s32.totalorder %s16880_s30, %s16066_s13  ;;  %p16073_p3 = scmp.lt.u32.totalorder %s16066_s13, %s16880_s30 }
  0xc9   : > { %p16069_p4 = pnand %p16067_p7, %p17056_p8 }
  0xcb   : > { %p16070_p1 = pneg %p16069_p4 }
  0xcd   : > { %p16075_p9 = pnand %p16073_p3, %p16070_p1 }
  0xcf   : > { %16078 = shalt.err (!%p16075_p9)
}
  0xd0   : > { %s16079_s21 = scalar_lea.vmem %s1058_s16, 15360  ;;  %p16087_p13 = scmp.lt.s32.totalorder %s1058_s16, %s1058_s16 }
  0xd1   : > { %p16080_p10 = scmp.ne.s32.totalorder %s1058_s16, %s16079_s21  ;;  %p16088_p0 = scmp.lt.s32.totalorder %s16079_s21, %s16079_s21 }
  0xd3   : > { %p16082_p11 = pnand %p16080_p10, %p17056_p8  ;;  %p16089_p2 = por %p16088_p0, %p16087_p13 }
  0xd5   : > { %p16083_p12 = pneg %p16082_p11 }
  0xd7   : > { %p16090_p5 = pnand %p16089_p2, %p16083_p12 }
  0xd9   : > { %16093 = shalt.err (!%p16090_p5)
}
  0xda   : > { %15189 = dma.hbm_to_vmem [thread:$0]  (!%p17044_p6), %s16880_s30, 15360, %s1058_s16, [#allocation19], %s18510_s1, %s18510_s1, %s18512_s15  }
  0xdb   : > { %s16788_s2 = smov [#allocation21]   ;;  %s16789_s23 = smov [#allocation24]  }
  0xdc   : > { %s1089_s26 = sshll.u32 %s16788_s2, 4  ;;  %s1113_s20 = sshll.u32 %s16789_s23, 4  ;;  %s1090_s26 = int_to_ptr.vmem [resolvable:$true] %s1089_s26  ;;  %s1114_s20 = int_to_ptr.vmem [resolvable:$true] %s1113_s20 }
  0xdd   : > { %s16094_s13 = scalar_lea.hbm %s16900_s27, 1024 }
  0xde   : > { %p16095_p7 = scmp.ne.s32.totalorder %s16900_s27, %s16094_s13  ;;  %p16101_p3 = scmp.lt.u32.totalorder %s16094_s13, %s16900_s27 }
  0xe0   : > { %p16097_p4 = pnand %p16095_p7, %p17056_p8 }
  0xe2   : > { %p16098_p1 = pneg %p16097_p4 }
  0xe4   : > { %p16103_p9 = pnand %p16101_p3, %p16098_p1 }
  0xe6   : > { %16106 = shalt.err (!%p16103_p9)
}
  0xe7   : > { %s16107_s21 = scalar_lea.vmem %s1090_s26, 1024  ;;  %p16115_p13 = scmp.lt.s32.totalorder %s1090_s26, %s1090_s26 }
  0xe8   : > { %p16108_p10 = scmp.ne.s32.totalorder %s1090_s26, %s16107_s21  ;;  %p16116_p0 = scmp.lt.s32.totalorder %s16107_s21, %s16107_s21 }
  0xea   : > { %p16110_p11 = pnand %p16108_p10, %p17056_p8  ;;  %p16117_p2 = por %p16116_p0, %p16115_p13 }
  0xec   : > { %p16111_p12 = pneg %p16110_p11 }
  0xee   : > { %p16118_p5 = pnand %p16117_p2, %p16111_p12 }
  0xf0   : > { %16121 = shalt.err (!%p16118_p5)
}
  0xf1   : > { %15195 = dma.hbm_to_vmem [thread:$0]  (!%p17044_p6), %s16900_s27, 1024, %s1090_s26, [#allocation22], %s18510_s1, %s18510_s1, %s18512_s15  }
  0xf2   : > { %s16122_s16 = scalar_lea.hbm %s18584_s6, 1024 }
  0xf3   : > { %p16123_p7 = scmp.ne.s32.totalorder %s18584_s6, %s16122_s16  ;;  %p16129_p3 = scmp.lt.u32.totalorder %s16122_s16, %s18584_s6 }
  0xf5   : > { %p16125_p4 = pnand %p16123_p7, %p17056_p8 }
  0xf7   : > { %p16126_p1 = pneg %p16125_p4 }
  0xf9   : > { %p16131_p9 = pnand %p16129_p3, %p16126_p1 }
  0xfb   : > { %16134 = shalt.err (!%p16131_p9)
}
  0xfc   : > { %s16135_s2 = scalar_lea.vmem %s1114_s20, 1024  ;;  %p16143_p13 = scmp.lt.s32.totalorder %s1114_s20, %s1114_s20 }
  0xfd   : > { %p16136_p10 = scmp.ne.s32.totalorder %s1114_s20, %s16135_s2  ;;  %p16144_p0 = scmp.lt.s32.totalorder %s16135_s2, %s16135_s2 }
  0xff   : > { %p16138_p11 = pnand %p16136_p10, %p17056_p8  ;;  %p16145_p2 = por %p16144_p0, %p16143_p13 }
 0x101   : > { %p16139_p12 = pneg %p16138_p11 }
 0x103   : > { %p16146_p5 = pnand %p16145_p2, %p16139_p12 }
 0x105   : > { %16149 = shalt.err (!%p16146_p5)
}
 0x106   : > { %15201 = dma.hbm_to_vmem [thread:$0]  (!%p17044_p6), %s18584_s6, 1024, %s1114_s20, [#allocation25], %s18510_s1, %s18510_s1, %s18512_s15  }
 0x107   : > { %s16790_s26 = smov [#allocation27]   ;;  %s16791_s13 = smov [#allocation30]  }
 0x108   : > { %s1137_s23 = sshll.u32 %s16790_s26, 4  ;;  %s1175_s21 = sshll.u32 %s16791_s13, 4  ;;  %s1138_s23 = int_to_ptr.vmem [resolvable:$true] %s1137_s23  ;;  %s1176_s21 = int_to_ptr.vmem [resolvable:$true] %s1175_s21 }
 0x109   : > { %s16150_s16 = scalar_lea.hbm %s18586_s3, 9216 }
 0x10a   : > { %p16151_p7 = scmp.ne.s32.totalorder %s18586_s3, %s16150_s16  ;;  %p16157_p3 = scmp.lt.u32.totalorder %s16150_s16, %s18586_s3 }
 0x10c   : > { %p16153_p4 = pnand %p16151_p7, %p17056_p8 }
 0x10e   : > { %p16154_p1 = pneg %p16153_p4 }
 0x110   : > { %p16159_p9 = pnand %p16157_p3, %p16154_p1 }
 0x112   : > { %16162 = shalt.err (!%p16159_p9)
}
 0x113   : > { %s16163_s2 = scalar_lea.vmem %s1138_s23, 9216  ;;  %p16171_p13 = scmp.lt.s32.totalorder %s1138_s23, %s1138_s23 }
 0x114   : > { %p16164_p10 = scmp.ne.s32.totalorder %s1138_s23, %s16163_s2  ;;  %p16172_p0 = scmp.lt.s32.totalorder %s16163_s2, %s16163_s2 }
 0x116   : > { %p16166_p11 = pnand %p16164_p10, %p17056_p8  ;;  %p16173_p2 = por %p16172_p0, %p16171_p13 }
 0x118   : > { %p16167_p12 = pneg %p16166_p11 }
 0x11a   : > { %p16174_p5 = pnand %p16173_p2, %p16167_p12 }
 0x11c   : > { %16177 = shalt.err (!%p16174_p5)
}
 0x11d   : > { %15207 = dma.hbm_to_vmem [thread:$0]  (!%p17044_p6), %s18586_s3, 9216, %s1138_s23, [#allocation28], %s18510_s1, %s18510_s1, %s18512_s15  }
 0x11e   : > { %s16178_s20 = scalar_lea.hbm %s18582_s9, 1024 }
 0x11f   : > { %p16179_p7 = scmp.ne.s32.totalorder %s18582_s9, %s16178_s20  ;;  %p16185_p3 = scmp.lt.u32.totalorder %s16178_s20, %s18582_s9 }
 0x121   : > { %p16181_p4 = pnand %p16179_p7, %p17056_p8 }
 0x123   : > { %p16182_p1 = pneg %p16181_p4 }
 0x125   : > { %p16187_p9 = pnand %p16185_p3, %p16182_p1 }
 0x127   : > { %16190 = shalt.err (!%p16187_p9)
}
 0x128   : > { %s16191_s26 = scalar_lea.vmem %s1176_s21, 1024  ;;  %p16199_p13 = scmp.lt.s32.totalorder %s1176_s21, %s1176_s21 }
 0x129   : > { %p16192_p10 = scmp.ne.s32.totalorder %s1176_s21, %s16191_s26  ;;  %p16200_p0 = scmp.lt.s32.totalorder %s16191_s26, %s16191_s26 }
 0x12b   : > { %p16194_p11 = pnand %p16192_p10, %p17056_p8  ;;  %p16201_p2 = por %p16200_p0, %p16199_p13 }
 0x12d   : > { %p16195_p12 = pneg %p16194_p11 }
 0x12f   : > { %p16202_p5 = pnand %p16201_p2, %p16195_p12 }
 0x131   : > { %16205 = shalt.err (!%p16202_p5)
}
 0x132   : > { %15213 = dma.hbm_to_vmem [thread:$0]  (!%p17044_p6), %s18582_s9, 1024, %s1176_s21, [#allocation31], %s18510_s1, %s18510_s1, %s18512_s15  }
 0x133   : > { %s16792_s23 = smov [#allocation33]   ;;  %s16793_s16 = smov [#allocation8]  }
 0x134   : > { %s1207_s13 = sshll.u32 %s16792_s23, 4  ;;  %s967_s2 = sshll.u32 %s16793_s16, 4  ;;  %s1208_s13 = int_to_ptr.vmem [resolvable:$true] %s1207_s13  ;;  %s968_s2 = int_to_ptr.vmem [resolvable:$true] %s967_s2 }
 0x135   : > { %s16206_s20 = scalar_lea.hbm %s18585_s4, 3072 }
 0x136   : > { %p16207_p7 = scmp.ne.s32.totalorder %s18585_s4, %s16206_s20  ;;  %p16213_p3 = scmp.lt.u32.totalorder %s16206_s20, %s18585_s4 }
 0x138   : > { %p16209_p4 = pnand %p16207_p7, %p17056_p8 }
 0x13a   : > { %p16210_p1 = pneg %p16209_p4 }
 0x13c   : > { %p16215_p9 = pnand %p16213_p3, %p16210_p1 }
 0x13e   : > { %16218 = shalt.err (!%p16215_p9)
}
 0x13f   : > { %s16219_s26 = scalar_lea.vmem %s1208_s13, 3072  ;;  %p16227_p13 = scmp.lt.s32.totalorder %s1208_s13, %s1208_s13 }
 0x140   : > { %p16220_p10 = scmp.ne.s32.totalorder %s1208_s13, %s16219_s26  ;;  %p16228_p0 = scmp.lt.s32.totalorder %s16219_s26, %s16219_s26 }
 0x142   : > { %p16222_p11 = pnand %p16220_p10, %p17056_p8  ;;  %p16229_p2 = por %p16228_p0, %p16227_p13 }
 0x144   : > { %p16223_p12 = pneg %p16222_p11 }
 0x146   : > { %p16230_p5 = pnand %p16229_p2, %p16223_p12 }
 0x148   : > { %16233 = shalt.err (!%p16230_p5)
}
 0x149   : > { %15219 = dma.hbm_to_vmem [thread:$0]  (!%p17044_p6), %s18585_s4, 3072, %s1208_s13, [#allocation34], %s18510_s1, %s18510_s1, %s18512_s15  }
 0x14a   : > { %s16234_s21 = scalar_lea.hbm %s18580_s17, 16 }
 0x14b   : > { %p16235_p7 = scmp.ne.s32.totalorder %s18580_s17, %s16234_s21  ;;  %p16241_p3 = scmp.lt.u32.totalorder %s16234_s21, %s18580_s17 }
 0x14d   : > { %p16237_p4 = pnand %p16235_p7, %p17056_p8 }
 0x14f   : > { %p16238_p1 = pneg %p16237_p4 }
 0x151   : > { %p16243_p9 = pnand %p16241_p3, %p16238_p1 }
 0x153   : > { %16246 = shalt.err (!%p16243_p9)
}
 0x154   : > { %s16247_s23 = scalar_lea.vmem %s968_s2, 16  ;;  %s16254_s16 = scalar_lea.vmem %s968_s2, 32 }
 0x155   : > { %p16248_p10 = scmp.ne.s32.totalorder %s968_s2, %s16247_s23  ;;  %p16255_p13 = scmp.lt.s32.totalorder %s968_s2, %s968_s2 }
 0x156   : > { %p16256_p0 = scmp.lt.s32.totalorder %s16254_s16, %s16247_s23 }
 0x157   : > { %p16250_p11 = pnand %p16248_p10, %p17056_p8 }
 0x158   : > { %p16257_p2 = por %p16256_p0, %p16255_p13 }
 0x159   : > { %p16251_p12 = pneg %p16250_p11 }
 0x15b   : > { %p16258_p5 = pnand %p16257_p2, %p16251_p12 }
 0x15d   : > { %16261 = shalt.err (!%p16258_p5)
}
 0x15e   : > { %15168 = dma.hbm_to_vmem [thread:$0]  (!%p17044_p6), %s18580_s17, 16, %s968_s2, [#allocation7]  }
 0x15f   : > { %s16794_s13 = smov [#allocation11]   ;;  %s16795_s26 = smov [#allocation14]  }
 0x160   : > { %s993_s20 = sshll.u32 %s16794_s13, 4  ;;  %s1023_s21 = sshll.u32 %s16795_s26, 4  ;;  %s994_s20 = int_to_ptr.vmem [resolvable:$true] %s993_s20  ;;  %s1024_s21 = int_to_ptr.vmem [resolvable:$true] %s1023_s21 }
 0x161   : > { %s16262_s1 = scalar_lea.hbm %s16850_s29, 3072 }
 0x162   : > { %p16263_p7 = scmp.ne.s32.totalorder %s16850_s29, %s16262_s1  ;;  %p16269_p3 = scmp.lt.u32.totalorder %s16262_s1, %s16850_s29 }
 0x164   : > { %p16265_p4 = pnand %p16263_p7, %p17056_p8 }
 0x166   : > { %p16266_p1 = pneg %p16265_p4 }
 0x168   : > { %p16271_p9 = pnand %p16269_p3, %p16266_p1 }
 0x16a   : > { %16274 = shalt.err (!%p16271_p9)
}
 0x16b   : > { %s16275_s23 = scalar_lea.vmem %s994_s20, 3072  ;;  %p16283_p13 = scmp.lt.s32.totalorder %s994_s20, %s994_s20 }
 0x16c   : > { %p16276_p10 = scmp.ne.s32.totalorder %s994_s20, %s16275_s23  ;;  %p16284_p0 = scmp.lt.s32.totalorder %s16275_s23, %s16275_s23 }
 0x16e   : > { %p16278_p11 = pnand %p16276_p10, %p17056_p8  ;;  %p16285_p2 = por %p16284_p0, %p16283_p13 }
 0x170   : > { %p16279_p12 = pneg %p16278_p11 }
 0x172   : > { %p16286_p5 = pnand %p16285_p2, %p16279_p12 }
 0x174   : > { %16289 = shalt.err (!%p16286_p5)
}
 0x175   : > { %s18592_s2 = smov 64   ;;  %s16290_s1 = scalar_lea.hbm %s18581_s14, 16 }
 0x176   : > { %15174 = dma.hbm_to_vmem [thread:$0]  (!%p17044_p6), %s16850_s29, 3072, %s994_s20, [#allocation10], %s18592_s2, %s18592_s2, %s18512_s15  }
 0x177   : > { %p16291_p7 = scmp.ne.s32.totalorder %s18581_s14, %s16290_s1  ;;  %p16297_p3 = scmp.lt.u32.totalorder %s16290_s1, %s18581_s14 }
 0x179   : > { %p16293_p4 = pnand %p16291_p7, %p17056_p8 }
 0x17b   : > { %p16294_p1 = pneg %p16293_p4 }
 0x17d   : > { %p16299_p9 = pnand %p16297_p3, %p16294_p1 }
 0x17f   : > { %16302 = shalt.err (!%p16299_p9)
}
 0x180   : > { %s16303_s16 = scalar_lea.vmem %s1024_s21, 16  ;;  %s16310_s13 = scalar_lea.vmem %s1024_s21, 32 }
 0x181   : > { %p16304_p10 = scmp.ne.s32.totalorder %s1024_s21, %s16303_s16  ;;  %p16311_p13 = scmp.lt.s32.totalorder %s1024_s21, %s1024_s21 }
 0x182   : > { %p16312_p0 = scmp.lt.s32.totalorder %s16310_s13, %s16303_s16 }
 0x183   : > { %p16306_p11 = pnand %p16304_p10, %p17056_p8 }
 0x184   : > { %p16313_p2 = por %p16312_p0, %p16311_p13 }
 0x185   : > { %p16307_p12 = pneg %p16306_p11 }
 0x187   : > { %p16314_p5 = pnand %p16313_p2, %p16307_p12 }
 0x189   : > { %16317 = shalt.err (!%p16314_p5)
}
 0x18a   : > { %15180 = dma.hbm_to_vmem [thread:$0]  (!%p17044_p6), %s18581_s14, 16, %s1024_s21, [#allocation13]  }
 0x18b   : > { %s16796_s20 = smov [#allocation17]   ;;  %s16797_s23 = smov [#allocation20]  }
 0x18c   : > { %s1047_s26 = sshll.u32 %s16796_s20, 4  ;;  %s1073_s1 = sshll.u32 %s16797_s23, 4  ;;  %s1048_s26 = int_to_ptr.vmem [resolvable:$true] %s1047_s26  ;;  %s1074_s1 = int_to_ptr.vmem [resolvable:$true] %s1073_s1 }
 0x18d   : > { %s16318_s15 = scalar_lea.hbm %s18577_s24, 16 }
 0x18e   : > { %p16319_p7 = scmp.ne.s32.totalorder %s18577_s24, %s16318_s15  ;;  %p16325_p3 = scmp.lt.u32.totalorder %s16318_s15, %s18577_s24 }
 0x190   : > { %p16321_p4 = pnand %p16319_p7, %p17056_p8 }
 0x192   : > { %p16322_p1 = pneg %p16321_p4 }
 0x194   : > { %p16327_p9 = pnand %p16325_p3, %p16322_p1 }
 0x196   : > { %16330 = shalt.err (!%p16327_p9)
}
 0x197   : > { %s16331_s16 = scalar_lea.vmem %s1048_s26, 16  ;;  %s16338_s21 = scalar_lea.vmem %s1048_s26, 32 }
 0x198   : > { %p16332_p10 = scmp.ne.s32.totalorder %s1048_s26, %s16331_s16  ;;  %p16339_p13 = scmp.lt.s32.totalorder %s1048_s26, %s1048_s26 }
 0x199   : > { %p16340_p0 = scmp.lt.s32.totalorder %s16338_s21, %s16331_s16 }
 0x19a   : > { %p16334_p11 = pnand %p16332_p10, %p17056_p8 }
 0x19b   : > { %p16341_p2 = por %p16340_p0, %p16339_p13 }
 0x19c   : > { %p16335_p12 = pneg %p16334_p11 }
 0x19e   : > { %p16342_p5 = pnand %p16341_p2, %p16335_p12 }
 0x1a0   : > { %16345 = shalt.err (!%p16342_p5)
}
 0x1a1   : > { %s18593_s13 = sld [smem:[#allocation68_spill]] }
 0x1a2   : > { %15186 = dma.hbm_to_vmem [thread:$0]  (!%p17044_p6), %s18577_s24, 16, %s1048_s26, [#allocation16]  }
 0x1a7   : > { %s16346_s15 = scalar_lea.hbm %s18593_s13, 3072 }
 0x1a8   : > { %p16347_p7 = scmp.ne.s32.totalorder %s18593_s13, %s16346_s15  ;;  %p16353_p3 = scmp.lt.u32.totalorder %s16346_s15, %s18593_s13 }
 0x1aa   : > { %p16349_p4 = pnand %p16347_p7, %p17056_p8 }
 0x1ac   : > { %p16350_p1 = pneg %p16349_p4 }
 0x1ae   : > { %p16355_p9 = pnand %p16353_p3, %p16350_p1 }
 0x1b0   : > { %16358 = shalt.err (!%p16355_p9)
}
 0x1b1   : > { %s16359_s20 = scalar_lea.vmem %s1074_s1, 3072  ;;  %p16367_p13 = scmp.lt.s32.totalorder %s1074_s1, %s1074_s1 }
 0x1b2   : > { %p16360_p10 = scmp.ne.s32.totalorder %s1074_s1, %s16359_s20  ;;  %p16368_p0 = scmp.lt.s32.totalorder %s16359_s20, %s16359_s20 }
 0x1b4   : > { %p16362_p11 = pnand %p16360_p10, %p17056_p8  ;;  %p16369_p2 = por %p16368_p0, %p16367_p13 }
 0x1b6   : > { %p16363_p12 = pneg %p16362_p11 }
 0x1b8   : > { %p16370_p5 = pnand %p16369_p2, %p16363_p12 }
 0x1ba   : > { %16373 = shalt.err (!%p16370_p5)
}
 0x1bb   : > { %s18594_s26 = smov 4   ;;  %s18595_s23 = sld [smem:[#allocation70_spill]] }
 0x1bc   : > { %15192 = dma.hbm_to_vmem [thread:$0]  (!%p17044_p6), %s18593_s13, 3072, %s1074_s1, [#allocation19], %s18592_s2, %s18592_s2, %s18594_s26  }
 0x1bd   : > { %s16798_s16 = smov [#allocation23]   ;;  %s16799_s15 = smov [#allocation26]  }
 0x1be   : > { %s1103_s21 = sshll.u32 %s16798_s16, 4  ;;  %s1127_s3 = sshll.u32 %s16799_s15, 4  ;;  %s1104_s21 = int_to_ptr.vmem [resolvable:$true] %s1103_s21  ;;  %s1128_s3 = int_to_ptr.vmem [resolvable:$true] %s1127_s3 }
 0x1c1   : > { %s16374_s20 = scalar_lea.hbm %s18595_s23, 16 }
 0x1c2   : > { %p16375_p7 = scmp.ne.s32.totalorder %s18595_s23, %s16374_s20  ;;  %p16381_p3 = scmp.lt.u32.totalorder %s16374_s20, %s18595_s23 }
 0x1c4   : > { %p16377_p4 = pnand %p16375_p7, %p17056_p8 }
 0x1c6   : > { %p16378_p1 = pneg %p16377_p4 }
 0x1c8   : > { %p16383_p9 = pnand %p16381_p3, %p16378_p1 }
 0x1ca   : > { %16386 = shalt.err (!%p16383_p9)
}
 0x1cb   : > { %s16387_s4 = scalar_lea.vmem %s1104_s21, 16  ;;  %s16394_s1 = scalar_lea.vmem %s1104_s21, 32 }
 0x1cc   : > { %p16388_p10 = scmp.ne.s32.totalorder %s1104_s21, %s16387_s4  ;;  %p16395_p13 = scmp.lt.s32.totalorder %s1104_s21, %s1104_s21 }
 0x1cd   : > { %p16396_p0 = scmp.lt.s32.totalorder %s16394_s1, %s16387_s4 }
 0x1ce   : > { %p16390_p11 = pnand %p16388_p10, %p17056_p8 }
 0x1cf   : > { %p16397_p2 = por %p16396_p0, %p16395_p13 }
 0x1d0   : > { %p16391_p12 = pneg %p16390_p11 }
 0x1d2   : > { %p16398_p5 = pnand %p16397_p2, %p16391_p12 }
 0x1d4   : > { %16401 = shalt.err (!%p16398_p5)
}
 0x1d5   : > { %s18596_s16 = sld [smem:[#allocation72_spill]] }
 0x1d6   : > { %15198 = dma.hbm_to_vmem [thread:$0]  (!%p17044_p6), %s18595_s23, 16, %s1104_s21, [#allocation22]  }
 0x1db   : > { %s16402_s15 = scalar_lea.hbm %s18596_s16, 16 }
 0x1dc   : > { %p16403_p7 = scmp.ne.s32.totalorder %s18596_s16, %s16402_s15  ;;  %p16409_p3 = scmp.lt.u32.totalorder %s16402_s15, %s18596_s16 }
 0x1de   : > { %p16405_p4 = pnand %p16403_p7, %p17056_p8 }
 0x1e0   : > { %p16406_p1 = pneg %p16405_p4 }
 0x1e2   : > { %p16411_p9 = pnand %p16409_p3, %p16406_p1 }
 0x1e4   : > { %16414 = shalt.err (!%p16411_p9)
}
 0x1e5   : > { %s16415_s4 = scalar_lea.vmem %s1128_s3, 16  ;;  %s16422_s20 = scalar_lea.vmem %s1128_s3, 32 }
 0x1e6   : > { %p16416_p10 = scmp.ne.s32.totalorder %s1128_s3, %s16415_s4  ;;  %p16423_p13 = scmp.lt.s32.totalorder %s1128_s3, %s1128_s3 }
 0x1e7   : > { %p16424_p0 = scmp.lt.s32.totalorder %s16422_s20, %s16415_s4 }
 0x1e8   : > { %p16418_p11 = pnand %p16416_p10, %p17056_p8 }
 0x1e9   : > { %p16425_p2 = por %p16424_p0, %p16423_p13 }
 0x1ea   : > { %p16419_p12 = pneg %p16418_p11 }
 0x1ec   : > { %p16426_p5 = pnand %p16425_p2, %p16419_p12 }
 0x1ee   : > { %16429 = shalt.err (!%p16426_p5)
}
 0x1ef   : > { %s18597_s21 = sld [smem:[#allocation77_spill]]  ;;  %s16800_s1 = smov [#allocation29]  }
 0x1f0   : > { %15204 = dma.hbm_to_vmem [thread:$0]  (!%p17044_p6), %s18596_s16, 16, %s1128_s3, [#allocation25]  }
 0x1f1   : > { %s1159_s15 = sshll.u32 %s16800_s1, 4  ;;  %s16801_s6 = smov [#allocation32]   ;;  %s1160_s15 = int_to_ptr.vmem [resolvable:$true] %s1159_s15 }
 0x1f2   : > { %s1191_s8 = sshll.u32 %s16801_s6, 4  ;;  %s1192_s8 = int_to_ptr.vmem [resolvable:$true] %s1191_s8 }
 0x1f5   : > { %s16430_s9 = scalar_lea.hbm %s18597_s21, 1024 }
 0x1f6   : > { %p16431_p7 = scmp.ne.s32.totalorder %s18597_s21, %s16430_s9  ;;  %p16437_p3 = scmp.lt.u32.totalorder %s16430_s9, %s18597_s21 }
 0x1f8   : > { %p16433_p4 = pnand %p16431_p7, %p17056_p8 }
 0x1fa   : > { %p16434_p1 = pneg %p16433_p4 }
 0x1fc   : > { %p16439_p9 = pnand %p16437_p3, %p16434_p1 }
 0x1fe   : > { %16442 = shalt.err (!%p16439_p9)
}
 0x1ff   : > { %s16443_s4 = scalar_lea.vmem %s1160_s15, 1024  ;;  %p16451_p13 = scmp.lt.s32.totalorder %s1160_s15, %s1160_s15 }
 0x200   : > { %p16444_p10 = scmp.ne.s32.totalorder %s1160_s15, %s16443_s4  ;;  %p16452_p0 = scmp.lt.s32.totalorder %s16443_s4, %s16443_s4 }
 0x202   : > { %p16446_p11 = pnand %p16444_p10, %p17056_p8  ;;  %p16453_p2 = por %p16452_p0, %p16451_p13 }
 0x204   : > { %p16447_p12 = pneg %p16446_p11 }
 0x206   : > { %p16454_p5 = pnand %p16453_p2, %p16447_p12 }
 0x208   : > { %16457 = shalt.err (!%p16454_p5)
}
 0x209   : > { %s18598_s9 = sld [smem:[#allocation81_spill]] }
 0x20a   : > { %15210 = dma.hbm_to_vmem [thread:$0]  (!%p17044_p6), %s18597_s21, 1024, %s1160_s15, [#allocation28], %s18592_s2, %s18592_s2, %s18594_s26  }
 0x20f   : > { %s16458_s3 = scalar_lea.hbm %s18598_s9, 9216 }
 0x210   : > { %p16459_p7 = scmp.ne.s32.totalorder %s18598_s9, %s16458_s3  ;;  %p16465_p3 = scmp.lt.u32.totalorder %s16458_s3, %s18598_s9 }
 0x212   : > { %p16461_p4 = pnand %p16459_p7, %p17056_p8 }
 0x214   : > { %p16462_p1 = pneg %p16461_p4 }
 0x216   : > { %p16467_p9 = pnand %p16465_p3, %p16462_p1 }
 0x218   : > { %16470 = shalt.err (!%p16467_p9)
}
 0x219   : > { %s16471_s6 = scalar_lea.vmem %s1192_s8, 9216  ;;  %p16479_p13 = scmp.lt.s32.totalorder %s1192_s8, %s1192_s8 }
 0x21a   : > { %p16472_p10 = scmp.ne.s32.totalorder %s1192_s8, %s16471_s6  ;;  %p16480_p0 = scmp.lt.s32.totalorder %s16471_s6, %s16471_s6 }
 0x21c   : > { %p16474_p11 = pnand %p16472_p10, %p17056_p8  ;;  %p16481_p2 = por %p16480_p0, %p16479_p13 }
 0x21e   : > { %p16475_p12 = pneg %p16474_p11 }
 0x220   : > { %p16482_p5 = pnand %p16481_p2, %p16475_p12 }
 0x222   : > { %16485 = shalt.err (!%p16482_p5)
}
 0x223   : > { %s18599_s20 = sld [smem:[#allocation85_spill]]  ;;  %s16802_s1 = smov [#allocation35]  }
 0x224   : > { %15216 = dma.hbm_to_vmem [thread:$0]  (!%p17044_p6), %s18598_s9, 9216, %s1192_s8, [#allocation31], %s18592_s2, %s18592_s2, %s18594_s26  }
 0x225   : > { %s1223_s15 = sshll.u32 %s16802_s1, 4  ;;  %s1224_s15 = int_to_ptr.vmem [resolvable:$true] %s1223_s15 }
 0x229   : > { %s16486_s4 = scalar_lea.hbm %s18599_s20, 1024 }
 0x22a   : > { %p16487_p7 = scmp.ne.s32.totalorder %s18599_s20, %s16486_s4  ;;  %p16493_p3 = scmp.lt.u32.totalorder %s16486_s4, %s18599_s20 }
 0x22c   : > { %p16489_p4 = pnand %p16487_p7, %p17056_p8 }
 0x22e   : > { %p16490_p1 = pneg %p16489_p4 }
 0x230   : > { %p16495_p9 = pnand %p16493_p3, %p16490_p1 }
 0x232   : > { %16498 = shalt.err (!%p16495_p9)
}
 0x233   : > { %s16499_s3 = scalar_lea.vmem %s1224_s15, 1024  ;;  %p16507_p13 = scmp.lt.s32.totalorder %s1224_s15, %s1224_s15 }
 0x234   : > { %p16500_p10 = scmp.ne.s32.totalorder %s1224_s15, %s16499_s3  ;;  %p16508_p0 = scmp.lt.s32.totalorder %s16499_s3, %s16499_s3 }
 0x236   : > { %p16502_p11 = pnand %p16500_p10, %p17056_p8  ;;  %p16509_p2 = por %p16508_p0, %p16507_p13 }
 0x238   : > { %p16503_p12 = pneg %p16502_p11 }
 0x23a   : > { %p16510_p5 = pnand %p16509_p2, %p16503_p12 }
 0x23c   : > { %16513 = shalt.err (!%p16510_p5)
}
 0x23d   : > { %15222 = dma.hbm_to_vmem [thread:$0]  (!%p17044_p6), %s18599_s20, 1024, %s1224_s15, [#allocation34], %s18592_s2, %s18592_s2, %s18594_s26  }
 0x23e   : > { %s18523_s25 = sadd.s32 4294967294, %s16742_s11   ;;  %s17320_s8 = sadd.s32 1, %s16742_s11  }
 0x23f   : > { %s112_s28 = ssub.s32 %s16742_s11, %s17320_s8  ;;  %s115_s6 = sadd.s32 1, %s16738_s10 }
 0x240   : > { %s18600_s1 = sld [smem:[#allocation56_spill]]  ;;  %p113_p8 = scmp.eq.s32.totalorder %s112_s28, 0 }
 0x241   : > { %p122_p7 = scmp.ne.s32.totalorder %s16738_s10, %s16734_s7  ;;  %p123_p4 = scmp.eq.s32.totalorder %s16742_s11, 0 }
 0x242   : > { %p128_p1 = scmp.ne.s32.totalorder %s16734_s7, %s16730_s0  ;;  %p18602_p9 = scmp.eq.s32.totalorder %s17028_s18, 0 }
 0x243   : > { %s17331_s4 = scalar_select %p113_p8, %s16738_s10, %s115_s6  }
 0x244   : > { %p17333_p3 = por %p123_p4, %p122_p7  ;;  %p17339_p6 = por %p18602_p9, %p128_p1 }
 0x245   : > { %p850_p10 = scmp.eq.s32.totalorder %s17028_s18, 1  ;;  %p856_p11 = scmp.eq.s32.totalorder %s18523_s25, 1 }
 0x246   : > { %s18603_s15 = scalar_select %p17339_p6, 1, 0 }
 0x247   : > { %p15260_p12 = scmp.lt.s32.totalorder %s16742_s11, 2  ;;  %s1240_s28 = sand.u32 1, %s16738_s10  }
 0x248   : > { %p17348_p13 = por %p850_p10, %p122_p7  ;;  %p17352_p0 = por %p856_p11, %p128_p1 }
 0x249   : > { %s11873_s13 = sshll.u32 %s1240_s28, 5  ;;  %s12498_s14 = sshll.u32 %s16742_s11, 9 }
 0x24a   : > { %s18604_s9 = scalar_select %p17348_p13, 1, 0 }
 0x24b   : > { %s18605_s6 = scalar_select %p17352_p0, 1, 0 }
 0x24c   : > { %s17358_s16 = scalar_lea.hbm %s18600_s1, %s12498_s14  ;;  %s1244_s25 = scalar_lea.vmem [#allocation3], %s11873_s13 }
 0x24d   : > { %s1251_s17 = sshll.u32 %s1244_s25, 4  ;;  %p17364_p2 = pnand %p15260_p12, %p17333_p3  ;;  %s17360_s17 = int_to_ptr.vmem [resolvable:$true] %s1251_s17 }
 0x24e   : > { %s17368_s20 = scalar_lea.sflag [#allocation4], %s1240_s28  ;;  %s16514_s21 = scalar_lea.hbm %s17358_s16, 512 }
 0x24f   : > { %p16515_p5 = scmp.ne.s32.totalorder %s17358_s16, %s16514_s21  ;;  %p16516_p8 = pneg %p17364_p2 }
 0x250   : > { %s16519_s14 = scalar_lea.hbm %s18600_s1, 1024  ;;  %p16520_p1 = scmp.lt.u32.totalorder %s17358_s16, %s18600_s1 }
 0x251   : > { %p16517_p7 = pnand %p16516_p8, %p16515_p5  ;;  %p16521_p9 = scmp.lt.u32.totalorder %s16519_s14, %s16514_s21 }
 0x252   : > { %p16523_p3 = scmp.lt.u32.totalorder %s16514_s21, %s17358_s16 }
 0x253   : > { %p16518_p4 = pneg %p16517_p7  ;;  %p16522_p10 = por %p16521_p9, %p16520_p1 }
 0x255   : > { %p16524_p11 = por %p16523_p3, %p16522_p10 }
 0x257   : > { %p16525_p12 = pnand %p16524_p11, %p16518_p4 }
 0x259   : > { %16528 = shalt.err (!%p16525_p12)
}
 0x25a   : > { %s16529_s13 = scalar_lea.vmem %s17360_s17, 512  ;;  %s16803_s25 = smov [#allocation3]  }
 0x25b   : > { %p16530_p0 = scmp.ne.s32.totalorder %s17360_s17, %s16529_s13  ;;  %s16534_s3 = sshll.u32 %s16803_s25, 4  ;;  %s16535_s3 = int_to_ptr.vmem [resolvable:$false] %s16534_s3 }
 0x25c   : > { %s16536_s28 = scalar_lea.vmem %s16535_s3, 1024  ;;  %p16537_p5 = scmp.lt.s32.totalorder %s17360_s17, %s16535_s3 }
 0x25d   : > { %p16532_p13 = pnand %p16530_p0, %p16516_p8  ;;  %p16538_p7 = scmp.lt.s32.totalorder %s16536_s28, %s16529_s13 }
 0x25f   : > { %p16533_p6 = pneg %p16532_p13  ;;  %p16539_p1 = por %p16538_p7, %p16537_p5 }
 0x261   : > { %p16540_p9 = pnand %p16539_p1, %p16533_p6 }
 0x263   : > { %16543 = shalt.err (!%p16540_p9)
}
 0x264   : > { %15226 = dma.hbm_to_vmem [thread:$0]  (!%p17364_p2), %s17358_s16, 512, %s17360_s17, %s17368_s20, %s18592_s2, %s18592_s2, %s18594_s26  }
 0x265   : > { %p18607_p13 = scmp.ne.s32.totalorder %s18589_s22, 0 }
 0x266   : > { %s17398_s21 = sand.u32 (!%p18607_p13), 1, %s16734_s7   ;;  %p18608_p6 = scmp.ne.s32.totalorder (!%p18607_p13), %s18603_s15, 0 }
 0x267   : > { %1271 = sbr.rel (%p18607_p13) target bundleno = 9320 (0x2468), region = 156  ;;  %s11877_s14 = sshll.u32 (!%p18607_p13), %s17398_s21, 5 }
 0x268   : > { %s1274_s13 = scalar_lea.sflag (!%p18607_p13), [#allocation4], %s17398_s21  ;;  %s17402_s25 = scalar_lea.vmem (!%p18607_p13), [#allocation3], %s11877_s14 }
 0x26e   : > { %16673 = dma.done.wait (%p18608_p6), %s1274_s13, 512  }
 0x26f   : > { %16675 = vsyncadd (%p18608_p6), %s1274_s13, 4294966784  ;;  %p18609_p0 = scmp.eq.s32.totalorder %s17028_s18, 0 }
 0x271   : > { %16677 = dma.done.wait (%p18609_p0), [#allocation7], 1040   ;;  %p18610_p2 = pmov %p18609_p0 }
 0x272   : > { %p18611_p8 = pmov %p18609_p0 }
 0x273   : > { %16679 = vsyncadd (%p18610_p2), [#allocation7], 4294966256 }
 0x274   : > { %16681 = dma.done.wait (%p18611_p8), [#allocation10], 12288   ;;  %p18612_p4 = pmov %p18609_p0 }
 0x275   : > { %p18613_p10 = pmov %p18609_p0 }
 0x276   : > { %16683 = vsyncadd (%p18612_p4), [#allocation10], 4294955008 }
 0x277   : > { %16685 = dma.done.wait (%p18613_p10), [#allocation13], 1040   ;;  %p18614_p3 = pmov %p18609_p0 }
 0x278   : > { %p18615_p11 = pmov %p18609_p0 }
 0x279   : > { %16687 = vsyncadd (%p18614_p3), [#allocation13], 4294966256 }
 0x27a   : > { %16689 = dma.done.wait (%p18615_p11), [#allocation16], 1040   ;;  %p18616_p12 = pmov %p18609_p0 }
 0x27b   : > { %p18617_p5 = pmov %p18609_p0 }
 0x27c   : > { %16691 = vsyncadd (%p18616_p12), [#allocation16], 4294966256 }
 0x27d   : > { %16693 = dma.done.wait (%p18617_p5), [#allocation19], 18432   ;;  %p18618_p7 = pmov %p18609_p0 }
 0x27e   : > { %p18619_p1 = pmov %p18609_p0 }
 0x27f   : > { %16695 = vsyncadd (%p18618_p7), [#allocation19], 4294948864 }
 0x280   : > { %16697 = dma.done.wait (%p18619_p1), [#allocation22], 1040   ;;  %p18620_p9 = pmov %p18609_p0 }
 0x281   : > { %p18621_p13 = pmov %p18609_p0 }
 0x282   : > { %16699 = vsyncadd (%p18620_p9), [#allocation22], 4294966256 }
 0x283   : > { %16701 = dma.done.wait (%p18621_p13), [#allocation25], 1040   ;;  %p18622_p6 = pmov %p18609_p0 }
 0x285   : > { %16703 = vsyncadd (%p18622_p6), [#allocation25], 4294966256 }
 0x286   : > { %16705 = dma.done.wait (%p18609_p0), [#allocation28], 10240   ;;  %p18623_p2 = pmov %p18609_p0 }
 0x287   : > { %p18624_p8 = pmov %p18609_p0 }
 0x288   : > { %16707 = vsyncadd (%p18623_p2), [#allocation28], 4294957056 }
 0x289   : > { %16709 = dma.done.wait (%p18624_p8), [#allocation31], 10240   ;;  %p18625_p4 = pmov %p18609_p0 }
 0x28a   : > { %p18626_p10 = pmov %p18609_p0 }
 0x28b   : > { %16711 = vsyncadd (%p18625_p4), [#allocation31], 4294957056 }
 0x28c   : > { %16713 = dma.done.wait (%p18626_p10), [#allocation34], 4096   ;;  %p18627_p3 = pmov %p18609_p0 }
 0x28d   : > { %v15379_v0 = vld [vmem:[#allocation6] sm:$0xff]   ;;  %v15380_v1 = vld [vmem:[#allocation6 + $0x8] sm:$0xff]   ;;  %v15381_v2 = vld [vmem:[#allocation6 + $0x10] sm:$0xff]   ;;  %v16804_v18 = vmov 0.0   ;;  %s18628_s17 = sld [smem:[#allocation57_spill]]  ;;  %p1468_p11 = scmp.lt.s32.totalorder %s17028_s18, 1 }
 0x28e   : > { %16715 = vsyncadd (%p18627_p3), [#allocation34], 4294963200  ;;  %13248 = vmatprep.subr.bf16.mxu0 %v15379_v0  ;;  %v15382_v3 = vld [vmem:[#allocation6 + $0x18] sm:$0xff]   ;;  %v15387_v4 = vld [vmem:[%s17402_s25] sm:$0xff]   ;;  %1522 = vst [vmem:[#allocation2] sm:$0xff] %v16804_v18  ;;  %s18629_s26 = sld [smem:[#allocation61_spill]] }
 0x28f   : > { %13249 = vmatpush3.bf16.msra.mxu0 %v15379_v0  ;;  %13264 = vmatprep.mubr.bf16.mxu0 %v15387_v4  ;;  %v15383_v5 = vld [vmem:[#allocation6 + $0x20] sm:$0xff]   ;;  %v15392_v7 = vld [vmem:[#allocation9 + $0x8] sm:$0xff]   ;;  %v15393_v9 = vld [vmem:[#allocation9 + $0x10] sm:$0xff]   ;;  %1523 = vst [vmem:[#allocation2 + $0x48] sm:$0xff] %v16804_v18  ;;  %s1469_s19 = scalar_select %p1468_p11, %s17028_s18, 1 }
 0x290   : > { %13250 = vmatprep.subr.bf16.mxu0 %v15380_v1  ;;  %v15391_v6 = vld [vmem:[#allocation9] sm:$0xff]   ;;  %v15385_v10 = vld [vmem:[#allocation6 + $0x30] sm:$0xff]   ;;  %v15394_v11 = vld [vmem:[#allocation9 + $0x18] sm:$0xff]   ;;  %s18630_s16 = sld [smem:[#allocation62_spill]]  ;;  %s18631_s20 = sld [smem:[#allocation67_spill]] }
 0x291   : > { %v15384_v8 = vld [vmem:[#allocation6 + $0x28] sm:$0xff]   ;;  %13272 = vmatprep.subr.bf16.mxu1 %v15391_v6  ;;  %v15386_v12 = vld [vmem:[#allocation6 + $0x38] sm:$0xff]   ;;  %v15389_v14 = vld [vmem:[%s17402_s25 + $0x10] sm:$0xff]   ;;  %s12499_s22 = sshll.u32 %s1469_s19, 6  ;;  %s18632_s15 = sld [smem:[#allocation69_spill]] }
 0x292   : > { %13273 = vmatpush3.bf16.msra.mxu1 %v15391_v6  ;;  %v15388_v13 = vld [vmem:[%s17402_s25 + $0x8] sm:$0xff]   ;;  %v15390_v15 = vld [vmem:[%s17402_s25 + $0x18] sm:$0xff]   ;;  %v11904_v28 = vld [vmem:[#allocation8] ss:$0 sm:$0xff]  ;;  %s17865_s3 = sshll.u32 %s17398_s21, 6  ;;  %s18633_s14 = sld [smem:[#allocation75_spill]] }
 0x293   : > { %13251 = vmatpush3.bf16.msra.mxu0 %v15380_v1  ;;  %13274 = vmatprep.subr.bf16.mxu1 %v15392_v7  ;;  %v15395_v16 = vld [vmem:[#allocation9 + $0x20] sm:$0xff]   ;;  %v15396_v17 = vld [vmem:[#allocation9 + $0x28] sm:$0xff]   ;;  %v15397_v19 = vld [vmem:[#allocation9 + $0x30] sm:$0xff]   ;;  %s1472_s2 = scalar_lea.vmem %s18628_s17, %s12499_s22  ;;  %s17880_s28 = scalar_lea.vmem [#allocation37], %s17865_s3 }
 0x294   : > { %13252 = vmatprep.subr.bf16.mxu0 %v15381_v2  ;;  %v15398_v20 = vld [vmem:[#allocation9 + $0x38] sm:$0xff]   ;;  %v15399_v21 = vld [vmem:[#allocation9 + $0x40] sm:$0xff]   ;;  %v15416_v23 = vld [vmem:[#allocation11 + $0x8] sm:$0xff]   ;;  %s18634_s13 = sld [smem:[#allocation74_spill]]  ;;  %s18636_s17 = sld [smem:[#allocation78_spill]] }
 0x295   : > { %v15415_v22 = vld [vmem:[#allocation11] sm:$0xff]   ;;  %v15417_v24 = vld [vmem:[#allocation11 + $0x10] sm:$0xff]   ;;  %v15418_v25 = vld [vmem:[#allocation11 + $0x18] sm:$0xff]   ;;  %s18114_s19 = scalar_lea.vmem [#allocation39], %s17865_s3  ;;  %s18637_s22 = sld [smem:[#allocation80_spill]] }
 0x296   : > { %13275 = vmatpush3.bf16.msra.mxu1 %v15392_v7  ;;  %v15419_v26 = vld [vmem:[#allocation11 + $0x20] sm:$0xff]   ;;  %v15420_v27 = vld [vmem:[#allocation11 + $0x28] sm:$0xff]   ;;  %v15401_v52 = vld [vmem:[#allocation9 + $0x50] sm:$0xff]   ;;  %s11429_s1 = sshll.u32 %s18114_s19, 4  ;;  %p18640_p5 = scmp.ne.s32.totalorder %s18604_s9, 0  ;;  %s18337_s1 = int_to_ptr.vmem [resolvable:$true] %s11429_s1 }
 0x297   : > { %13253 = vmatpush3.bf16.msra.mxu0 %v15381_v2  ;;  %13276 = vmatprep.subr.bf16.mxu1 %v15393_v9  ;;  %v15400_v51 = vld [vmem:[#allocation9 + $0x48] sm:$0xff]   ;;  %v15402_v59 = vld [vmem:[#allocation9 + $0x58] sm:$0xff]   ;;  %v15403_v61 = vld [vmem:[#allocation9 + $0x60] sm:$0xff]  }
 0x298   : > { %13254 = vmatprep.subr.bf16.mxu0 %v15382_v3  ;;  %v15404_v62 = vld [vmem:[#allocation9 + $0x68] sm:$0xff]   ;;  %v15405_v63 = vld [vmem:[#allocation9 + $0x70] sm:$0xff]   ;;  %v15406_v0 = vld [vmem:[#allocation9 + $0x78] sm:$0xff]  }
 0x299   : > { %v15407_v1 = vld [vmem:[#allocation9 + $0x80] sm:$0xff]   ;;  %v15408_v2 = vld [vmem:[#allocation9 + $0x88] sm:$0xff]  }
 0x29a   : > { %13277 = vmatpush3.bf16.msra.mxu1 %v15393_v9 }
 0x29b   : > { %13255 = vmatpush3.bf16.msra.mxu0 %v15382_v3  ;;  %13278 = vmatprep.subr.bf16.mxu1 %v15394_v11 }
 0x29c   : > { %13256 = vmatprep.subr.bf16.mxu0 %v15383_v5 }
 0x29e   : > { %13279 = vmatpush3.bf16.msra.mxu1 %v15394_v11  ;;  %v15411_v11 = vld [vmem:[#allocation9 + $0xa0] sm:$0xff]  }
 0x29f   : > { %13257 = vmatpush3.bf16.msra.mxu0 %v15383_v5  ;;  %13280 = vmatprep.subr.bf16.mxu1 %v15395_v16  ;;  %v15409_v5 = vld [vmem:[#allocation9 + $0x90] sm:$0xff]  }
 0x2a0   : > { %13258 = vmatprep.subr.bf16.mxu0 %v15384_v8 }
 0x2a2   : > { %13281 = vmatpush3.bf16.msra.mxu1 %v15395_v16 }
 0x2a3   : > { %13259 = vmatpush3.bf16.msra.mxu0 %v15384_v8  ;;  %13282 = vmatprep.subr.bf16.mxu1 %v15396_v17  ;;  %v15410_v8 = vld [vmem:[#allocation9 + $0x98] sm:$0xff]  }
 0x2a4   : > { %13260 = vmatprep.subr.bf16.mxu0 %v15385_v10 }
 0x2a6   : > { %13283 = vmatpush3.bf16.msra.mxu1 %v15396_v17 }
 0x2a7   : > { %13261 = vmatpush3.bf16.msra.mxu0 %v15385_v10  ;;  %13284 = vmatprep.subr.bf16.mxu1 %v15397_v19 }
 0x2a8   : > { %13262 = vmatprep.subr.bf16.mxu0 %v15386_v12 }
 0x2aa   : > { %13285 = vmatpush3.bf16.msra.mxu1 %v15397_v19 }
 0x2ab   : > { %13263 = vmatpush3.bf16.msra.mxu0 %v15386_v12  ;;  %13286 = vmatprep.subr.bf16.mxu1 %v15398_v20  ;;  %v15412_v12 = vld [vmem:[#allocation9 + $0xa8] sm:$0xff]  }
 0x2ac   : > { %13344 = vmatprep.subr.bf16.mxu0 %v15415_v22 }
 0x2ae   : > { %13265 = vmatmul.mubr.bf16.vlgmr.msra.gmra.mrb[0].mxu0 %v15388_v13  ;;  %13287 = vmatpush3.bf16.msra.mxu1 %v15398_v20  ;;  %v15413_v13 = vld [vmem:[#allocation9 + $0xb0] sm:$0xff]  }
 0x2af   : > { %13268 = vmatprep.mubr.bf16.mxu0 %v15389_v14  ;;  %13296 = vmatprep.subr.bf16.mxu1 %v15399_v21  ;;  %v15414_v14 = vld [vmem:[#allocation9 + $0xb8] sm:$0xff]  }
 0x2b0   : > { %13345 = vmatpush3.bf16.msra.mxu0 %v15415_v22 }
 0x2b1   : > { %13346 = vmatprep.subr.bf16.mxu0 %v15416_v23 }
 0x2b4   : > { %13347 = vmatpush3.bf16.msra.mxu0 %v15416_v23 }
 0x2b5   : > { %13348 = vmatprep.subr.bf16.mxu0 %v15417_v24 }
 0x2b6   : > { %13269 = vmatmul.mubr.bf16.gmra.mrb[4].mxu0 %v15390_v15 }
 0x2b8   : > { %13349 = vmatpush3.bf16.msra.mxu0 %v15417_v24  ;;  %v15421_v24 = vld [vmem:[#allocation11 + $0x30] sm:$0xff]  }
 0x2b9   : > { %13350 = vmatprep.subr.bf16.mxu0 %v15418_v25 }
 0x2bc   : > { %13351 = vmatpush3.bf16.msra.mxu0 %v15418_v25  ;;  %v15422_v25 = vld [vmem:[#allocation11 + $0x38] sm:$0xff]  }
 0x2bd   : > { %13352 = vmatprep.subr.bf16.mxu0 %v15419_v26 }
 0x2c0   : > { %13353 = vmatpush3.bf16.msra.mxu0 %v15419_v26  ;;  %v15423_v26 = vld [vmem:[#allocation9 + $0xc0] sm:$0xff]  }
 0x2c1   : > { %13354 = vmatprep.subr.bf16.mxu0 %v15420_v27 }
 0x2c4   : > { %13355 = vmatpush3.bf16.msra.mxu0 %v15420_v27  ;;  %v16805_v27 = vmov 0  }
 0x2c5   : > { %13356 = vmatprep.subr.bf16.mxu0 %v15421_v24  ;;  %15377 = vset.pattern.permute.xlu0 %v16805_v27 }
 0x2c6   : > { %15378 = vset.pattern.permute.xlu1 %v16805_v27 }
 0x2c8   : > { %13357 = vmatpush3.bf16.msra.mxu0 %v15421_v24 }
 0x2c9   : > { %13358 = vmatprep.subr.bf16.mxu0 %v15422_v25 }
 0x2cc   : > { %13359 = vmatpush3.bf16.msra.mxu0 %v15422_v25 }
 0x2cd   : > { %13368 = vmatprep.subr.bf16.mxu0 %v15423_v26 }
 0x381   : > { %v13266_v29 = vpop.f32.mrb[0].mxu0 }
 0x382   : > { %v17452_v30 = vadd.f32 %v13266_v29, %v11904_v28  ;;  %v1661_v31 = vpop.f32.mrb[1].mxu0  ;;  %v1476_v29 = vld [vmem:[%s1472_s2 + $0x10] sm:$0xff] }
 0x383   : > { %v1662_v32 = vadd.f32 %v11904_v28, %v1661_v31  ;;  %v13267_v33 = vpop.f32.mrb[2].mxu0  ;;  %1494 = vperm.xlu1 %15378, %v1476_v29   ;;  %v1477_v31 = vld [vmem:[%s1472_s2 + $0x18] sm:$0xff] }
 0x384   : > { %1694 = vst [vmem:[#allocation2 + $0x18] sm:$0xff] %v17452_v30  ;;  %v17455_v34 = vadd.f32 %v13267_v33, %v11904_v28  ;;  %v1664_v35 = vpop.f32.mrb[3].mxu0  ;;  %v1479_v33 = vld [vmem:[%s1472_s2 + $0x28] sm:$0xff] }
 0x385   : > { %1692 = vst [vmem:[#allocation2 + $0x8] sm:$0xff] %v1662_v32  ;;  %v1665_v36 = vadd.f32 %v11904_v28, %v1664_v35  ;;  %v1481_v35 = vld [vmem:[%s1472_s2 + $0x38] sm:$0xff] }
 0x386   : > { %1695 = vst [vmem:[#allocation2 + $0x20] sm:$0xff] %v17455_v34  ;;  %v1865_v3 = vpack.c.bf16 %v17455_v34, %v17452_v30  ;;  %v1475_v30 = vld [vmem:[%s1472_s2 + $0x8] sm:$0xff]  ;;  %v1480_v34 = vld [vmem:[%s1472_s2 + $0x30] sm:$0xff] }
 0x387   : > { %1693 = vst [vmem:[#allocation2 + $0x10] sm:$0xff] %v1665_v36  ;;  %v1864_v60 = vpack.c.bf16 %v1665_v36, %v1662_v32  ;;  %1499 = vperm.xlu1 %15378, %v1477_v31   ;;  %v1478_v32 = vld [vmem:[%s1472_s2 + $0x20] sm:$0xff] }
 0x388   : > { %v11925_v36 = vld [vmem:[%s18629_s26] ss:$0 sm:$0xff] }
 0x389   : > { %v13270_v37 = vpop.f32.mrb[4].mxu0 }
 0x38a   : > { %v17458_v38 = vadd.f32 %v13270_v37, %v11904_v28  ;;  %v1677_v39 = vpop.f32.mrb[5].mxu0 }
 0x38b   : > { %v1678_v40 = vadd.f32 %v11904_v28, %v1677_v39  ;;  %v13271_v41 = vpop.f32.mrb[6].mxu0  ;;  %1509 = vperm.xlu1 %15378, %v1479_v33   ;;  %v15943_v27 = vld [vmem:[#allocation2 + $0x18] sm:$0xff] }
 0x38c   : > { %1698 = vst [vmem:[#allocation2 + $0x38] sm:$0xff] %v17458_v38  ;;  %v17461_v42 = vadd.f32 %v13271_v41, %v11904_v28  ;;  %v1680_v43 = vpop.f32.mrb[7].mxu0  ;;  %v1701_v46 = vld [vmem:[#allocation2 + $0x7] sm:$0xff] }
 0x38d   : > { %v1704_v44 = vld [vmem:[#allocation2 + $0x1f] sm:$0xff]  ;;  %1696 = vst [vmem:[#allocation2 + $0x28] sm:$0xff] %v1678_v40  ;;  %v17463_v45 = vadd.f32 %v11904_v28, %v1680_v43  ;;  %v15944_v31 = vld [vmem:[#allocation2 + $0x8] sm:$0xff] }
 0x38e   : > { %v1702_v47 = vld [vmem:[#allocation2 + $0xf] sm:$0xff]  ;;  %v1703_v48 = vld [vmem:[#allocation2 + $0x17] sm:$0xff]  ;;  %1699 = vst [vmem:[#allocation2 + $0x40] sm:$0xff] %v17461_v42  ;;  %v1867_v9 = vpack.c.bf16 %v17461_v42, %v17458_v38  ;;  %v1474_v28 = vld [vmem:[%s1472_s2] sm:$0xff]  ;;  %s18638_s2 = sld [smem:[#allocation82_spill]] }
 0x38f   : > { %1697 = vst [vmem:[#allocation2 + $0x30] sm:$0xff] %v17463_v45  ;;  %v1709_v49 = vpack.c.bf16 %v1702_v47, %v1701_v46  ;;  %v1710_v50 = vpack.c.bf16 %v1704_v44, %v1703_v48  ;;  %v1866_v4 = vpack.c.bf16 %v17463_v45, %v1678_v40  ;;  %v2006_v6 = vld [vmem:[#allocation2 + $0x9] sm:$0xff]  ;;  %v2007_v7 = vld [vmem:[#allocation2 + $0x11] sm:$0xff]  ;;  %v2008_v18 = vld [vmem:[#allocation2 + $0x19] sm:$0xff]  ;;  %1484 = vperm.xlu0 %15377, %v1474_v28  }
 0x390   : > { %v2014_v10 = vpack.c.bf16 %v2007_v7, %v2006_v6  ;;  %1519 = vperm.xlu1 %15378, %v1481_v35   ;;  %v15427_v6 = vld [vmem:[#allocation9 + $0xe0] sm:$0xff]   ;;  %v15428_v7 = vld [vmem:[#allocation9 + $0xe8] sm:$0xff]  }
 0x391   : > { %13288 = vmatprep.mubr.bf16.mxu1 %v1709_v49  ;;  %v15945_v35 = vld [vmem:[#allocation2 + $0x20] sm:$0xff] }
 0x392   : > { %13289 = vmatmul.mubr.bf16.vlgmr.msra.gmra.mrb[0].mxu1 %v1710_v50 }
 0x393   : > { %13297 = vmatpush3.bf16.msra.mxu1 %v15399_v21  ;;  %1489 = vperm.xlu0 %15377, %v1475_v30  }
 0x394   : > { %13298 = vmatprep.subr.bf16.mxu1 %v15400_v51  ;;  %v1705_v54 = vld [vmem:[#allocation2 + $0x27] sm:$0xff] }
 0x395   : > { %v1708_v53 = vld [vmem:[#allocation2 + $0x3f] sm:$0xff] }
 0x396   : > { %v1706_v55 = vld [vmem:[#allocation2 + $0x2f] sm:$0xff]  ;;  %v1707_v56 = vld [vmem:[#allocation2 + $0x37] sm:$0xff]  ;;  %v2009_v15 = vld [vmem:[#allocation2 + $0x21] sm:$0xff] }
 0x397   : > { %13299 = vmatpush3.bf16.msra.mxu1 %v15400_v51  ;;  %v1711_v57 = vpack.c.bf16 %v1706_v55, %v1705_v54  ;;  %v1712_v58 = vpack.c.bf16 %v1708_v53, %v1707_v56  ;;  %v2010_v16 = vld [vmem:[#allocation2 + $0x29] sm:$0xff]  ;;  %v2011_v17 = vld [vmem:[#allocation2 + $0x31] sm:$0xff]  ;;  %v2015_v19 = vpack.c.bf16 %v2009_v15, %v2008_v18  ;;  %v2012_v21 = vld [vmem:[#allocation2 + $0x39] sm:$0xff]  ;;  %1504 = vperm.xlu0 %15377, %v1478_v32  }
 0x398   : > { %13300 = vmatprep.subr.bf16.mxu1 %v15401_v52  ;;  %v2016_v20 = vpack.c.bf16 %v2011_v17, %v2010_v16  ;;  %v2013_v22 = vld [vmem:[#allocation2 + $0x41] sm:$0xff]  ;;  %v15451_v15 = vld [vmem:[#allocation11 + $0x60] sm:$0xff]  }
 0x399   : > { %13292 = vmatprep.mubr.bf16.mxu1 %v1711_v57  ;;  %v2017_v23 = vpack.c.bf16 %v2013_v22, %v2012_v21  ;;  %v15424_v56 = vld [vmem:[#allocation9 + $0xc8] sm:$0xff]  }
 0x39a   : > { %13293 = vmatmul.mubr.bf16.gmra.mrb[4].mxu1 %v1712_v58  ;;  %v15452_v16 = vld [vmem:[#allocation11 + $0x68] sm:$0xff]  }
 0x39b   : > { %13301 = vmatpush3.bf16.msra.mxu1 %v15401_v52  ;;  %13312 = vmatprep.mubr.bf16.mxu1 %v1864_v60 }
 0x39c   : > { %13302 = vmatprep.subr.bf16.mxu1 %v15402_v59  ;;  %1514 = vperm.xlu0 %15377, %v1480_v34  }
 0x39f   : > { %13303 = vmatpush3.bf16.msra.mxu1 %v15402_v59 }
 0x3a0   : > { %13304 = vmatprep.subr.bf16.mxu1 %v15403_v61 }
 0x3a3   : > { %13305 = vmatpush3.bf16.msra.mxu1 %v15403_v61 }
 0x3a4   : > { %13306 = vmatprep.subr.bf16.mxu1 %v15404_v62 }
 0x3a7   : > { %13307 = vmatpush3.bf16.msra.mxu1 %v15404_v62 }
 0x3a8   : > { %13308 = vmatprep.subr.bf16.mxu1 %v15405_v63 }
 0x3ab   : > { %13309 = vmatpush3.bf16.msra.mxu1 %v15405_v63 }
 0x3ac   : > { %13310 = vmatprep.subr.bf16.mxu1 %v15406_v0 }
 0x3af   : > { %13311 = vmatpush3.bf16.msra.mxu1 %v15406_v0  ;;  %v15425_v0 = vld [vmem:[#allocation9 + $0xd0] sm:$0xff]  }
 0x3b0   : > { %13320 = vmatprep.subr.bf16.mxu1 %v15407_v1 }
 0x3b2   : > { %13313 = vmatmul.mubr.bf16.vlgmr.msra.gmra.mrb[0].mxu1 %v1865_v3 }
 0x3b3   : > { %13316 = vmatprep.mubr.bf16.mxu1 %v1866_v4  ;;  %13321 = vmatpush3.bf16.msra.mxu1 %v15407_v1 }
 0x3b4   : > { %13322 = vmatprep.subr.bf16.mxu1 %v15408_v2 }
 0x3b7   : > { %13323 = vmatpush3.bf16.msra.mxu1 %v15408_v2 }
 0x3b8   : > { %13324 = vmatprep.subr.bf16.mxu1 %v15409_v5 }
 0x3ba   : > { %13317 = vmatmul.mubr.bf16.gmra.mrb[4].mxu1 %v1867_v9  ;;  %v15430_v9 = vld [vmem:[#allocation9 + $0xf8] sm:$0xff]  }
 0x3bb   : > { %13325 = vmatpush3.bf16.msra.mxu1 %v15409_v5  ;;  %13336 = vmatprep.mubr.bf16.mxu1 %v2014_v10  ;;  %v15426_v5 = vld [vmem:[#allocation9 + $0xd8] sm:$0xff]   ;;  %v17476_v10 = vld [vmem:[#allocation9 + $0x100] sm:$0xff]  }
 0x3bc   : > { %13326 = vmatprep.subr.bf16.mxu1 %v15410_v8 }
 0x3bf   : > { %13327 = vmatpush3.bf16.msra.mxu1 %v15410_v8  ;;  %v15429_v8 = vld [vmem:[#allocation9 + $0xf0] sm:$0xff]  }
 0x3c0   : > { %13328 = vmatprep.subr.bf16.mxu1 %v15411_v11 }
 0x3c3   : > { %13329 = vmatpush3.bf16.msra.mxu1 %v15411_v11  ;;  %v15447_v11 = vld [vmem:[#allocation11 + $0x40] sm:$0xff]  }
 0x3c4   : > { %13330 = vmatprep.subr.bf16.mxu1 %v15412_v12 }
 0x3c7   : > { %13331 = vmatpush3.bf16.msra.mxu1 %v15412_v12  ;;  %v15448_v12 = vld [vmem:[#allocation11 + $0x48] sm:$0xff]  }
 0x3c8   : > { %13332 = vmatprep.subr.bf16.mxu1 %v15413_v13 }
 0x3cb   : > { %13333 = vmatpush3.bf16.msra.mxu1 %v15413_v13  ;;  %v15449_v13 = vld [vmem:[#allocation11 + $0x50] sm:$0xff]  }
 0x3cc   : > { %13334 = vmatprep.subr.bf16.mxu1 %v15414_v14 }
 0x3cf   : > { %13335 = vmatpush3.bf16.msra.mxu1 %v15414_v14  ;;  %v15450_v14 = vld [vmem:[#allocation11 + $0x58] sm:$0xff]  }
 0x3d0   : > { %13440 = vmatprep.subr.bf16.mxu1 %v15447_v11 }
 0x3d2   : > { %13337 = vmatmul.mubr.bf16.vlgmr.msra.gmra.mrb[0].mxu1 %v2015_v19  ;;  %v11942_v19 = vld [vmem:[%s18630_s16] ss:$0 sm:$0xff] }
 0x3d3   : > { %13340 = vmatprep.mubr.bf16.mxu1 %v2016_v20  ;;  %13441 = vmatpush3.bf16.msra.mxu1 %v15447_v11 }
 0x3d4   : > { %13442 = vmatprep.subr.bf16.mxu1 %v15448_v12 }
 0x3d7   : > { %13443 = vmatpush3.bf16.msra.mxu1 %v15448_v12 }
 0x3d8   : > { %13444 = vmatprep.subr.bf16.mxu1 %v15449_v13 }
 0x3da   : > { %13341 = vmatmul.mubr.bf16.gmra.mrb[4].mxu1 %v2017_v23 }
 0x3db   : > { %13445 = vmatpush3.bf16.msra.mxu1 %v15449_v13 }
 0x3dc   : > { %13446 = vmatprep.subr.bf16.mxu1 %v15450_v14 }
 0x3df   : > { %13447 = vmatpush3.bf16.msra.mxu1 %v15450_v14 }
 0x3e0   : > { %13448 = vmatprep.subr.bf16.mxu1 %v15451_v15 }
 0x3e3   : > { %13449 = vmatpush3.bf16.msra.mxu1 %v15451_v15  ;;  %v15434_v15 = vld [vmem:[#allocation9 + $0x118] sm:$0xff]  }
 0x3e4   : > { %13450 = vmatprep.subr.bf16.mxu1 %v15452_v16 }
 0x3e7   : > { %13451 = vmatpush3.bf16.msra.mxu1 %v15452_v16 }
 0x402   : > { %v17481_v18 = vpop.permute.xlu1 %1494 }
 0x406   : > { %v17486_v24 = vpop.permute.xlu1 %1499 }
 0x40e   : > { %v17479_v17 = vpop.permute.xlu0 %1484 }
 0x412   : > { %v17484_v20 = vpop.permute.xlu0 %1489 }
 0x4a5   : > { %v13338_v37 = vpop.f32.mrb[0].mxu1 }
 0x4a6   : > { %v14736_v38 = vadd.f32 %v13338_v37, %v11925_v36  ;;  %v2117_v39 = vpop.f32.mrb[1].mxu1  ;;  %v17491_v37 = vpop.permute.xlu0 %1504 }
 0x4a7   : > { %v14737_v40 = vadd.f32 %v11925_v36, %v2117_v39  ;;  %v13339_v41 = vpop.f32.mrb[2].mxu1  ;;  %v15946_v39 = vld [vmem:[#allocation2 + $0x10] sm:$0xff] }
 0x4a8   : > { %v14738_v43 = vadd.f32 %v13339_v41, %v11925_v36  ;;  %v2120_v44 = vpop.f32.mrb[3].mxu1  ;;  %v2158_v47 = vmax.f32 %v14736_v38, 0.0 }
 0x4a9   : > { %v14739_v46 = vadd.f32 %v11925_v36, %v2120_v44  ;;  %v2156_v49 = vmax.f32 %v14737_v40, 0.0 }
 0x4aa   : > { %v2159_v48 = vmax.f32 %v14738_v43, 0.0  ;;  %v17500_v43 = vpop.permute.xlu1 %1509 }
 0x4ab   : > { %v2157_v50 = vmax.f32 %v14739_v46, 0.0 }
 0x4ac   : > { %v2165_v51 = vpack.c.bf16 %v2159_v48, %v2158_v47 }
 0x4ad   : > { %v2164_v52 = vpack.c.bf16 %v2157_v50, %v2156_v49  ;;  %v13342_v53 = vpop.f32.mrb[4].mxu1 }
 0x4ae   : > { %v14740_v54 = vadd.f32 %v13342_v53, %v11925_v36  ;;  %v2133_v55 = vpop.f32.mrb[5].mxu1 }
 0x4af   : > { %v14741_v57 = vadd.f32 %v11925_v36, %v2133_v55  ;;  %v13343_v58 = vpop.f32.mrb[6].mxu1  ;;  %13360 = vmatprep.mubr.bf16.mxu0 %v2164_v52  ;;  %v17508_v55 = vpop.permute.xlu0 %1514 }
 0x4b0   : > { %v14742_v59 = vadd.f32 %v13343_v58, %v11925_v36  ;;  %v2136_v60 = vpop.f32.mrb[7].mxu1  ;;  %13361 = vmatmul.mubr.bf16.vlgmr.msra.gmra.mrb[8].mxu0 %v2165_v51  ;;  %v2162_v62 = vmax.f32 %v14740_v54, 0.0  ;;  %v15947_v51 = vld [vmem:[#allocation2 + $0x38] sm:$0xff] }
 0x4b1   : > { %v14743_v61 = vadd.f32 %v11925_v36, %v2136_v60  ;;  %13369 = vmatpush3.bf16.msra.mxu0 %v15423_v26  ;;  %v2160_v1 = vmax.f32 %v14741_v57, 0.0 }
 0x4b2   : > { %v2163_v63 = vmax.f32 %v14742_v59, 0.0  ;;  %13370 = vmatprep.subr.bf16.mxu0 %v15424_v56 }
 0x4b3   : > { %v2161_v2 = vmax.f32 %v14743_v61, 0.0  ;;  %v17514_v61 = vpop.permute.xlu1 %1519 }
 0x4b4   : > { %v2167_v3 = vpack.c.bf16 %v2163_v63, %v2162_v62 }
 0x4b5   : > { %v2166_v4 = vpack.c.bf16 %v2161_v2, %v2160_v1  ;;  %13371 = vmatpush3.bf16.msra.mxu0 %v15424_v56  ;;  %v15948_v56 = vld [vmem:[#allocation2 + $0x28] sm:$0xff] }
 0x4b6   : > { %13372 = vmatprep.subr.bf16.mxu0 %v15425_v0 }
 0x4b7   : > { %13364 = vmatprep.mubr.bf16.mxu0 %v2166_v4 }
 0x4b8   : > { %13365 = vmatmul.mubr.bf16.gmra.mrb[12].mxu0 %v2167_v3 }
 0x4b9   : > { %13373 = vmatpush3.bf16.msra.mxu0 %v15425_v0 }
 0x4ba   : > { %13374 = vmatprep.subr.bf16.mxu0 %v15426_v5 }
 0x4bd   : > { %13375 = vmatpush3.bf16.msra.mxu0 %v15426_v5 }
 0x4be   : > { %13376 = vmatprep.subr.bf16.mxu0 %v15427_v6 }
 0x4c1   : > { %13377 = vmatpush3.bf16.msra.mxu0 %v15427_v6  ;;  %v15432_v6 = vld [vmem:[#allocation9 + $0x108] sm:$0xff]  }
 0x4c2   : > { %13378 = vmatprep.subr.bf16.mxu0 %v15428_v7 }
 0x4c5   : > { %13379 = vmatpush3.bf16.msra.mxu0 %v15428_v7  ;;  %v15433_v7 = vld [vmem:[#allocation9 + $0x110] sm:$0xff]  }
 0x4c6   : > { %13380 = vmatprep.subr.bf16.mxu0 %v15429_v8 }
 0x4c9   : > { %13381 = vmatpush3.bf16.msra.mxu0 %v15429_v8 }
 0x4ca   : > { %13382 = vmatprep.subr.bf16.mxu0 %v15430_v9 }
 0x4cd   : > { %13383 = vmatpush3.bf16.msra.mxu0 %v15430_v9 }
 0x4ce   : > { %13392 = vmatprep.subr.bf16.mxu0 %v17476_v10 }
 0x583   : > { %v13362_v21 = vpop.f32.mrb[8].mxu0 }
 0x584   : > { %v2282_v22 = vadd.f32 %v13362_v21, %v11942_v19  ;;  %v2273_v23 = vpop.f32.mrb[9].mxu0  ;;  %v15437_v21 = vld [vmem:[#allocation9 + $0x130] sm:$0xff]  }
 0x585   : > { %v2274_v25 = vadd.f32 %v11942_v19, %v2273_v23  ;;  %v13363_v26 = vpop.f32.mrb[10].mxu0  ;;  %v15439_v23 = vld [vmem:[#allocation9 + $0x140] sm:$0xff]  }
 0x586   : > { %v2306_v28 = vadd.f32 %v15943_v27, %v2282_v22  ;;  %v2285_v29 = vadd.f32 %v13363_v26, %v11942_v19  ;;  %v2276_v30 = vpop.f32.mrb[11].mxu0  ;;  %v15438_v22 = vld [vmem:[#allocation9 + $0x138] sm:$0xff]   ;;  %v15440_v26 = vld [vmem:[#allocation9 + $0x148] sm:$0xff]  }
 0x587   : > { %v2304_v32 = vadd.f32 %v15944_v31, %v2274_v25  ;;  %v2277_v33 = vadd.f32 %v11942_v19, %v2276_v30 }
 0x588   : > { %v17489_v34 = vmul.f32 %v2306_v28, %v17481_v18  ;;  %v2307_v36 = vadd.f32 %v15945_v35, %v2285_v29  ;;  %v15441_v28 = vld [vmem:[#allocation9 + $0x150] sm:$0xff]   ;;  %v15443_v35 = vld [vmem:[#allocation9 + $0x160] sm:$0xff]  }
 0x589   : > { %v17494_v38 = vmul.f32 %v2304_v32, %v17479_v17  ;;  %v2305_v40 = vadd.f32 %v15946_v39, %v2277_v33  ;;  %v15442_v32 = vld [vmem:[#allocation9 + $0x158] sm:$0xff]   ;;  %v15445_v39 = vld [vmem:[#allocation9 + $0x170] sm:$0xff]  }
 0x58a   : > { %2322 = vst [vmem:[#allocation2 + $0x18] sm:$0xff] %v17489_v34  ;;  %v17498_v41 = vmul.f32 %v2307_v36, %v17486_v24  ;;  %v15444_v36 = vld [vmem:[#allocation9 + $0x168] sm:$0xff]  }
 0x58b   : > { %2320 = vst [vmem:[#allocation2 + $0x8] sm:$0xff] %v17494_v38  ;;  %v17504_v44 = vmul.f32 %v2305_v40, %v17484_v20  ;;  %v13366_v46 = vpop.f32.mrb[12].mxu0  ;;  %v15446_v40 = vld [vmem:[#allocation9 + $0x178] sm:$0xff]  }
 0x58c   : > { %2323 = vst [vmem:[#allocation2 + $0x20] sm:$0xff] %v17498_v41  ;;  %v2298_v47 = vadd.f32 %v13366_v46, %v11942_v19  ;;  %v2289_v48 = vpop.f32.mrb[13].mxu0  ;;  %v2495_v25 = vpack.c.bf16 %v17498_v41, %v17489_v34 }
 0x58d   : > { %2321 = vst [vmem:[#allocation2 + $0x10] sm:$0xff] %v17504_v44  ;;  %v2290_v49 = vadd.f32 %v11942_v19, %v2289_v48  ;;  %v13367_v50 = vpop.f32.mrb[14].mxu0  ;;  %v2494_v16 = vpack.c.bf16 %v17504_v44, %v17494_v38 }
 0x58e   : > { %v2310_v52 = vadd.f32 %v15947_v51, %v2298_v47  ;;  %v2301_v53 = vadd.f32 %v13367_v50, %v11942_v19  ;;  %v2292_v54 = vpop.f32.mrb[15].mxu0 }
 0x58f   : > { %v2308_v57 = vadd.f32 %v15948_v56, %v2290_v49  ;;  %v2293_v58 = vadd.f32 %v11942_v19, %v2292_v54  ;;  %v15436_v19 = vld [vmem:[#allocation9 + $0x128] sm:$0xff]   ;;  %v15453_v56 = vld [vmem:[#allocation11 + $0x70] sm:$0xff]  }
 0x590   : > { %v17511_v59 = vmul.f32 %v2310_v52, %v17508_v55  ;;  %v2311_v60 = vadd.f32 %v2301_v53, %v17461_v42  ;;  %13452 = vmatprep.subr.bf16.mxu1 %v15453_v56 }
 0x591   : > { %v17517_v62 = vmul.f32 %v2308_v57, %v17491_v37  ;;  %v2309_v63 = vadd.f32 %v2293_v58, %v17463_v45  ;;  %13453 = vmatpush3.bf16.msra.mxu1 %v15453_v56  ;;  %v15454_v57 = vld [vmem:[#allocation11 + $0x78] sm:$0xff]   ;;  %v15455_v58 = vld [vmem:[#allocation9 + $0x180] sm:$0xff]  }
 0x592   : > { %2326 = vst [vmem:[#allocation2 + $0x38] sm:$0xff] %v17511_v59  ;;  %v17522_v0 = vmul.f32 %v2311_v60, %v17514_v61  ;;  %v2330_v4 = vld [vmem:[#allocation2 + $0x6] sm:$0xff]  ;;  %13454 = vmatprep.subr.bf16.mxu1 %v15454_v57  ;;  %v11960_v60 = vld [vmem:[%s18629_s26 + $0x1] ss:$0 sm:$0xff] }
 0x593   : > { %v2333_v1 = vld [vmem:[#allocation2 + $0x1e] sm:$0xff]  ;;  %2324 = vst [vmem:[#allocation2 + $0x28] sm:$0xff] %v17517_v62  ;;  %v17526_v2 = vmul.f32 %v2309_v63, %v17500_v43 }
 0x594   : > { %v2331_v3 = vld [vmem:[#allocation2 + $0xe] sm:$0xff]  ;;  %v2332_v42 = vld [vmem:[#allocation2 + $0x16] sm:$0xff]  ;;  %2327 = vst [vmem:[#allocation2 + $0x40] sm:$0xff] %v17522_v0  ;;  %v2497_v31 = vpack.c.bf16 %v17522_v0, %v17511_v59 }
 0x595   : > { %2325 = vst [vmem:[#allocation2 + $0x30] sm:$0xff] %v17526_v2  ;;  %v2338_v5 = vpack.c.bf16 %v2331_v3, %v2330_v4  ;;  %v2339_v45 = vpack.c.bf16 %v2333_v1, %v2332_v42  ;;  %v2496_v27 = vpack.c.bf16 %v17526_v2, %v17517_v62  ;;  %v2636_v29 = vld [vmem:[#allocation2 + $0xa] sm:$0xff]  ;;  %v2637_v30 = vld [vmem:[#allocation2 + $0x12] sm:$0xff]  ;;  %v2638_v49 = vld [vmem:[#allocation2 + $0x1a] sm:$0xff]  ;;  %13455 = vmatpush3.bf16.msra.mxu1 %v15454_v57 }
 0x596   : > { %v2644_v33 = vpack.c.bf16 %v2637_v30, %v2636_v29  ;;  %13464 = vmatprep.subr.bf16.mxu1 %v15455_v58 }
 0x597   : > { %13384 = vmatprep.mubr.bf16.mxu0 %v2338_v5 }
 0x598   : > { %13385 = vmatmul.mubr.bf16.vlgmr.msra.gmra.mrb[16].mxu0 %v2339_v45 }
 0x599   : > { %13393 = vmatpush3.bf16.msra.mxu0 %v17476_v10  ;;  %v15435_v10 = vld [vmem:[#allocation9 + $0x120] sm:$0xff]  }
 0x59a   : > { %13394 = vmatprep.subr.bf16.mxu0 %v15432_v6  ;;  %v2334_v9 = vld [vmem:[#allocation2 + $0x26] sm:$0xff] }
 0x59b   : > { %v2337_v8 = vld [vmem:[#allocation2 + $0x3e] sm:$0xff] }
 0x59c   : > { %v2335_v11 = vld [vmem:[#allocation2 + $0x2e] sm:$0xff]  ;;  %v2336_v12 = vld [vmem:[#allocation2 + $0x36] sm:$0xff]  ;;  %v2639_v46 = vld [vmem:[#allocation2 + $0x22] sm:$0xff] }
 0x59d   : > { %13395 = vmatpush3.bf16.msra.mxu0 %v15432_v6  ;;  %v2340_v13 = vpack.c.bf16 %v2335_v11, %v2334_v9  ;;  %v2341_v14 = vpack.c.bf16 %v2337_v8, %v2336_v12  ;;  %v2640_v47 = vld [vmem:[#allocation2 + $0x2a] sm:$0xff]  ;;  %v2641_v48 = vld [vmem:[#allocation2 + $0x32] sm:$0xff]  ;;  %v2645_v50 = vpack.c.bf16 %v2639_v46, %v2638_v49  ;;  %v2642_v52 = vld [vmem:[#allocation2 + $0x3a] sm:$0xff] }
 0x59e   : > { %13396 = vmatprep.subr.bf16.mxu0 %v15433_v7  ;;  %v2646_v51 = vpack.c.bf16 %v2641_v48, %v2640_v47  ;;  %v2643_v53 = vld [vmem:[#allocation2 + $0x42] sm:$0xff]  ;;  %v17540_v46 = vld [vmem:[#allocation9 + $0x1c0] sm:$0xff]   ;;  %v15480_v48 = vld [vmem:[#allocation11 + $0x88] sm:$0xff]  }
 0x59f   : > { %13388 = vmatprep.mubr.bf16.mxu0 %v2340_v13  ;;  %v2647_v54 = vpack.c.bf16 %v2643_v53, %v2642_v52  ;;  %v15479_v47 = vld [vmem:[#allocation11 + $0x80] sm:$0xff]   ;;  %v15481_v49 = vld [vmem:[#allocation11 + $0x90] sm:$0xff]   ;;  %v15484_v52 = vld [vmem:[#allocation11 + $0xa8] sm:$0xff]  }
 0x5a0   : > { %13389 = vmatmul.mubr.bf16.gmra.mrb[20].mxu0 %v2341_v14  ;;  %v11978_v53 = vld [vmem:[%s18630_s16 + $0x1] ss:$0 sm:$0xff] }
 0x5a1   : > { %13397 = vmatpush3.bf16.msra.mxu0 %v15433_v7  ;;  %13408 = vmatprep.mubr.bf16.mxu0 %v2494_v16 }
 0x5a2   : > { %13398 = vmatprep.subr.bf16.mxu0 %v15434_v15 }
 0x5a5   : > { %13399 = vmatpush3.bf16.msra.mxu0 %v15434_v15 }
 0x5a6   : > { %13400 = vmatprep.subr.bf16.mxu0 %v15435_v10 }
 0x5a9   : > { %13401 = vmatpush3.bf16.msra.mxu0 %v15435_v10  ;;  %v15456_v10 = vld [vmem:[#allocation9 + $0x188] sm:$0xff]  }
 0x5aa   : > { %13402 = vmatprep.subr.bf16.mxu0 %v15436_v19 }
 0x5ad   : > { %13403 = vmatpush3.bf16.msra.mxu0 %v15436_v19 }
 0x5ae   : > { %13404 = vmatprep.subr.bf16.mxu0 %v15437_v21 }
 0x5b1   : > { %13405 = vmatpush3.bf16.msra.mxu0 %v15437_v21 }
 0x5b2   : > { %13406 = vmatprep.subr.bf16.mxu0 %v15438_v22 }
 0x5b5   : > { %13407 = vmatpush3.bf16.msra.mxu0 %v15438_v22 }
 0x5b6   : > { %13416 = vmatprep.subr.bf16.mxu0 %v15439_v23 }
 0x5b8   : > { %13409 = vmatmul.mubr.bf16.vlgmr.msra.gmra.mrb[16].mxu0 %v2495_v25 }
 0x5b9   : > { %13412 = vmatprep.mubr.bf16.mxu0 %v2496_v27  ;;  %13417 = vmatpush3.bf16.msra.mxu0 %v15439_v23 }
 0x5ba   : > { %13418 = vmatprep.subr.bf16.mxu0 %v15440_v26 }
 0x5bd   : > { %13419 = vmatpush3.bf16.msra.mxu0 %v15440_v26 }
 0x5be   : > { %13420 = vmatprep.subr.bf16.mxu0 %v15441_v28 }
 0x5c0   : > { %13413 = vmatmul.mubr.bf16.gmra.mrb[20].mxu0 %v2497_v31 }
 0x5c1   : > { %13421 = vmatpush3.bf16.msra.mxu0 %v15441_v28  ;;  %13432 = vmatprep.mubr.bf16.mxu0 %v2644_v33  ;;  %v15457_v28 = vld [vmem:[#allocation9 + $0x190] sm:$0xff]   ;;  %v15458_v33 = vld [vmem:[#allocation9 + $0x198] sm:$0xff]  }
 0x5c2   : > { %13422 = vmatprep.subr.bf16.mxu0 %v15442_v32 }
 0x5c5   : > { %13423 = vmatpush3.bf16.msra.mxu0 %v15442_v32 }
 0x5c6   : > { %13424 = vmatprep.subr.bf16.mxu0 %v15443_v35 }
 0x5c9   : > { %13425 = vmatpush3.bf16.msra.mxu0 %v15443_v35  ;;  %v15459_v35 = vld [vmem:[#allocation9 + $0x1a0] sm:$0xff]  }
 0x5ca   : > { %13426 = vmatprep.subr.bf16.mxu0 %v15444_v36 }
 0x5cd   : > { %13427 = vmatpush3.bf16.msra.mxu0 %v15444_v36  ;;  %v15460_v36 = vld [vmem:[#allocation9 + $0x1a8] sm:$0xff]  }
 0x5ce   : > { %13428 = vmatprep.subr.bf16.mxu0 %v15445_v39 }
 0x5d1   : > { %13429 = vmatpush3.bf16.msra.mxu0 %v15445_v39  ;;  %v15461_v39 = vld [vmem:[#allocation9 + $0x1b0] sm:$0xff]  }
 0x5d2   : > { %13430 = vmatprep.subr.bf16.mxu0 %v15446_v40 }
 0x5d5   : > { %13431 = vmatpush3.bf16.msra.mxu0 %v15446_v40  ;;  %v15462_v40 = vld [vmem:[#allocation9 + $0x1b8] sm:$0xff]  }
 0x5d6   : > { %13536 = vmatprep.subr.bf16.mxu0 %v15479_v47 }
 0x5d8   : > { %13433 = vmatmul.mubr.bf16.vlgmr.msra.gmra.mrb[16].mxu0 %v2645_v50  ;;  %v15482_v50 = vld [vmem:[#allocation11 + $0x98] sm:$0xff]  }
 0x5d9   : > { %13436 = vmatprep.mubr.bf16.mxu0 %v2646_v51  ;;  %13537 = vmatpush3.bf16.msra.mxu0 %v15479_v47  ;;  %v15483_v51 = vld [vmem:[#allocation11 + $0xa0] sm:$0xff]   ;;  %v15468_v47 = vld [vmem:[#allocation9 + $0x1e8] sm:$0xff]  }
 0x5da   : > { %13538 = vmatprep.subr.bf16.mxu0 %v15480_v48 }
 0x5dd   : > { %13539 = vmatpush3.bf16.msra.mxu0 %v15480_v48  ;;  %v15469_v48 = vld [vmem:[#allocation9 + $0x1f0] sm:$0xff]  }
 0x5de   : > { %13540 = vmatprep.subr.bf16.mxu0 %v15481_v49 }
 0x5e0   : > { %13437 = vmatmul.mubr.bf16.gmra.mrb[20].mxu0 %v2647_v54 }
 0x5e1   : > { %13541 = vmatpush3.bf16.msra.mxu0 %v15481_v49  ;;  %v15470_v49 = vld [vmem:[#allocation9 + $0x1f8] sm:$0xff]  }
 0x5e2   : > { %13542 = vmatprep.subr.bf16.mxu0 %v15482_v50 }
 0x5e5   : > { %13543 = vmatpush3.bf16.msra.mxu0 %v15482_v50  ;;  %v15471_v50 = vld [vmem:[#allocation9 + $0x200] sm:$0xff]  }
 0x5e6   : > { %13544 = vmatprep.subr.bf16.mxu0 %v15483_v51 }
 0x5e9   : > { %13545 = vmatpush3.bf16.msra.mxu0 %v15483_v51 }
 0x5ea   : > { %13546 = vmatprep.subr.bf16.mxu0 %v15484_v52 }
 0x5ed   : > { %13547 = vmatpush3.bf16.msra.mxu0 %v15484_v52  ;;  %v15472_v52 = vld [vmem:[#allocation9 + $0x208] sm:$0xff]  }
 0x6ab   : > { %v13434_v63 = vpop.f32.mrb[16].mxu0 }
 0x6ac   : > { %v14744_v1 = vadd.f32 %v13434_v63, %v11960_v60  ;;  %v2747_v3 = vpop.f32.mrb[17].mxu0 }
 0x6ad   : > { %v14745_v42 = vadd.f32 %v11960_v60, %v2747_v3  ;;  %v13435_v4 = vpop.f32.mrb[18].mxu0 }
 0x6ae   : > { %v14746_v5 = vadd.f32 %v13435_v4, %v11960_v60  ;;  %v2750_v45 = vpop.f32.mrb[19].mxu0  ;;  %v2788_v7 = vmax.f32 %v14744_v1, 0.0 }
 0x6af   : > { %v14747_v6 = vadd.f32 %v11960_v60, %v2750_v45  ;;  %v2786_v9 = vmax.f32 %v14745_v42, 0.0 }
 0x6b0   : > { %v2789_v8 = vmax.f32 %v14746_v5, 0.0 }
 0x6b1   : > { %v2787_v11 = vmax.f32 %v14747_v6, 0.0 }
 0x6b2   : > { %v2795_v12 = vpack.c.bf16 %v2789_v8, %v2788_v7 }
 0x6b3   : > { %v2794_v13 = vpack.c.bf16 %v2787_v11, %v2786_v9  ;;  %v13438_v14 = vpop.f32.mrb[20].mxu0 }
 0x6b4   : > { %v14748_v15 = vadd.f32 %v13438_v14, %v11960_v60  ;;  %v2763_v16 = vpop.f32.mrb[21].mxu0 }
 0x6b5   : > { %v14749_v19 = vadd.f32 %v11960_v60, %v2763_v16  ;;  %v13439_v21 = vpop.f32.mrb[22].mxu0  ;;  %13456 = vmatprep.mubr.bf16.mxu1 %v2794_v13 }
 0x6b6   : > { %v14750_v22 = vadd.f32 %v13439_v21, %v11960_v60  ;;  %v2766_v23 = vpop.f32.mrb[23].mxu0  ;;  %13457 = vmatmul.mubr.bf16.vlgmr.msra.gmra.mrb[8].mxu1 %v2795_v12  ;;  %v2792_v26 = vmax.f32 %v14748_v15, 0.0 }
 0x6b7   : > { %v14751_v25 = vadd.f32 %v11960_v60, %v2766_v23  ;;  %13465 = vmatpush3.bf16.msra.mxu1 %v15455_v58  ;;  %v2790_v29 = vmax.f32 %v14749_v19, 0.0 }
 0x6b8   : > { %v2793_v27 = vmax.f32 %v14750_v22, 0.0  ;;  %13466 = vmatprep.subr.bf16.mxu1 %v15456_v10 }
 0x6b9   : > { %v2791_v30 = vmax.f32 %v14751_v25, 0.0 }
 0x6ba   : > { %v2797_v31 = vpack.c.bf16 %v2793_v27, %v2792_v26 }
 0x6bb   : > { %v2796_v32 = vpack.c.bf16 %v2791_v30, %v2790_v29  ;;  %13467 = vmatpush3.bf16.msra.mxu1 %v15456_v10  ;;  %v15465_v29 = vld [vmem:[#allocation9 + $0x1d0] sm:$0xff]  }
 0x6bc   : > { %13468 = vmatprep.subr.bf16.mxu1 %v15457_v28 }
 0x6bd   : > { %13460 = vmatprep.mubr.bf16.mxu1 %v2796_v32 }
 0x6be   : > { %13461 = vmatmul.mubr.bf16.gmra.mrb[12].mxu1 %v2797_v31 }
 0x6bf   : > { %13469 = vmatpush3.bf16.msra.mxu1 %v15457_v28  ;;  %v15464_v28 = vld [vmem:[#allocation9 + $0x1c8] sm:$0xff]  }
 0x6c0   : > { %13470 = vmatprep.subr.bf16.mxu1 %v15458_v33 }
 0x6c3   : > { %13471 = vmatpush3.bf16.msra.mxu1 %v15458_v33 }
 0x6c4   : > { %13472 = vmatprep.subr.bf16.mxu1 %v15459_v35 }
 0x6c7   : > { %13473 = vmatpush3.bf16.msra.mxu1 %v15459_v35 }
 0x6c8   : > { %13474 = vmatprep.subr.bf16.mxu1 %v15460_v36 }
 0x6cb   : > { %13475 = vmatpush3.bf16.msra.mxu1 %v15460_v36 }
 0x6cc   : > { %13476 = vmatprep.subr.bf16.mxu1 %v15461_v39 }
 0x6cf   : > { %13477 = vmatpush3.bf16.msra.mxu1 %v15461_v39  ;;  %v15466_v39 = vld [vmem:[#allocation9 + $0x1d8] sm:$0xff]  }
 0x6d0   : > { %13478 = vmatprep.subr.bf16.mxu1 %v15462_v40 }
 0x6d3   : > { %13479 = vmatpush3.bf16.msra.mxu1 %v15462_v40 }
 0x6d4   : > { %13488 = vmatprep.subr.bf16.mxu1 %v17540_v46 }
 0x789   : > { %v13458_v54 = vpop.f32.mrb[8].mxu1 }
 0x78a   : > { %v2914_v56 = vadd.f32 %v13458_v54, %v11978_v53  ;;  %v2905_v57 = vpop.f32.mrb[9].mxu1  ;;  %v15473_v54 = vld [vmem:[#allocation9 + $0x210] sm:$0xff]  }
 0x78b   : > { %v2906_v58 = vadd.f32 %v11978_v53, %v2905_v57  ;;  %v13459_v60 = vpop.f32.mrb[10].mxu1  ;;  %v15474_v57 = vld [vmem:[#allocation9 + $0x218] sm:$0xff]  }
 0x78c   : > { %v2938_v63 = vadd.f32 %v2914_v56, %v17489_v34  ;;  %v2917_v1 = vadd.f32 %v13459_v60, %v11978_v53  ;;  %v2908_v3 = vpop.f32.mrb[11].mxu1  ;;  %v15475_v60 = vld [vmem:[#allocation9 + $0x220] sm:$0xff]  }
 0x78d   : > { %v2936_v42 = vadd.f32 %v2906_v58, %v17494_v38  ;;  %v2909_v4 = vadd.f32 %v11978_v53, %v2908_v3  ;;  %v15478_v3 = vld [vmem:[#allocation9 + $0x238] sm:$0xff]  }
 0x78e   : > { %v17547_v5 = vmul.f32 %v2938_v63, %v17481_v18  ;;  %v2939_v45 = vadd.f32 %v2917_v1, %v17498_v41  ;;  %v15476_v63 = vld [vmem:[#allocation9 + $0x228] sm:$0xff]   ;;  %v15477_v1 = vld [vmem:[#allocation9 + $0x230] sm:$0xff]  }
 0x78f   : > { %v17551_v6 = vmul.f32 %v2936_v42, %v17479_v17  ;;  %v2937_v7 = vadd.f32 %v2909_v4, %v17504_v44 }
 0x790   : > { %2954 = vst [vmem:[#allocation2 + $0x18] sm:$0xff] %v17547_v5  ;;  %v17556_v8 = vmul.f32 %v2939_v45, %v17486_v24 }
 0x791   : > { %2952 = vst [vmem:[#allocation2 + $0x8] sm:$0xff] %v17551_v6  ;;  %v17560_v34 = vmul.f32 %v2937_v7, %v17484_v20  ;;  %v13462_v38 = vpop.f32.mrb[12].mxu1 }
 0x792   : > { %2955 = vst [vmem:[#allocation2 + $0x20] sm:$0xff] %v17556_v8  ;;  %v2930_v9 = vadd.f32 %v13462_v38, %v11978_v53  ;;  %v2921_v41 = vpop.f32.mrb[13].mxu1  ;;  %v3127_v51 = vpack.c.bf16 %v17556_v8, %v17547_v5  ;;  %v15485_v38 = vld [vmem:[#allocation11 + $0xb0] sm:$0xff]  }
 0x793   : > { %2953 = vst [vmem:[#allocation2 + $0x10] sm:$0xff] %v17560_v34  ;;  %v2922_v11 = vadd.f32 %v11978_v53, %v2921_v41  ;;  %v13463_v12 = vpop.f32.mrb[14].mxu1  ;;  %v3126_v40 = vpack.c.bf16 %v17560_v34, %v17551_v6  ;;  %13548 = vmatprep.subr.bf16.mxu0 %v15485_v38  ;;  %v15487_v41 = vld [vmem:[#allocation12] sm:$0xff]  }
 0x794   : > { %v2942_v44 = vadd.f32 %v2930_v9, %v17511_v59  ;;  %v2933_v13 = vadd.f32 %v13463_v12, %v11978_v53  ;;  %v2924_v14 = vpop.f32.mrb[15].mxu1  ;;  %13549 = vmatpush3.bf16.msra.mxu0 %v15485_v38  ;;  %v15486_v9 = vld [vmem:[#allocation11 + $0xb8] sm:$0xff]  }
 0x795   : > { %v2940_v15 = vadd.f32 %v2922_v11, %v17517_v62  ;;  %v2925_v16 = vadd.f32 %v11978_v53, %v2924_v14  ;;  %13550 = vmatprep.subr.bf16.mxu0 %v15486_v9  ;;  %v11996_v11 = vld [vmem:[%s18629_s26 + $0x2] ss:$0 sm:$0xff] }
 0x796   : > { %v17567_v10 = vmul.f32 %v2942_v44, %v17508_v55  ;;  %v2943_v19 = vadd.f32 %v2933_v13, %v17522_v0 }
 0x797   : > { %v17571_v21 = vmul.f32 %v2940_v15, %v17491_v37  ;;  %v2941_v22 = vadd.f32 %v2925_v16, %v17526_v2 }
 0x798   : > { %2958 = vst [vmem:[#allocation2 + $0x38] sm:$0xff] %v17567_v10  ;;  %v17576_v23 = vmul.f32 %v2943_v19, %v17514_v61  ;;  %v2962_v0 = vld [vmem:[#allocation2 + $0x4] sm:$0xff]  ;;  %13551 = vmatpush3.bf16.msra.mxu0 %v15486_v9 }
 0x799   : > { %2956 = vst [vmem:[#allocation2 + $0x28] sm:$0xff] %v17571_v21  ;;  %v17580_v59 = vmul.f32 %v2941_v22, %v17500_v43  ;;  %v17582_v62 = vld [vmem:[#allocation2 + $0x1c] sm:$0xff]  ;;  %13560 = vmatprep.subr.bf16.mxu0 %v15487_v41 }
 0x79a   : > { %2959 = vst [vmem:[#allocation2 + $0x40] sm:$0xff] %v17576_v23  ;;  %v2963_v25 = vld [vmem:[#allocation2 + $0xc] sm:$0xff]  ;;  %v2964_v26 = vld [vmem:[#allocation2 + $0x14] sm:$0xff]  ;;  %v3129_v56 = vpack.c.bf16 %v17576_v23, %v17567_v10 }
 0x79b   : > { %2957 = vst [vmem:[#allocation2 + $0x30] sm:$0xff] %v17580_v59  ;;  %v2970_v2 = vpack.c.bf16 %v2963_v25, %v2962_v0  ;;  %v2971_v27 = vpack.c.bf16 %v17582_v62, %v2964_v26  ;;  %v3128_v53 = vpack.c.bf16 %v17580_v59, %v17571_v21  ;;  %v3276_v58 = vpack.c.bf16 %v2964_v26, %v2963_v25 }
 0x79d   : > { %13480 = vmatprep.mubr.bf16.mxu1 %v2970_v2 }
 0x79e   : > { %13481 = vmatmul.mubr.bf16.vlgmr.msra.gmra.mrb[16].mxu1 %v2971_v27 }
 0x79f   : > { %13489 = vmatpush3.bf16.msra.mxu1 %v17540_v46  ;;  %v15467_v46 = vld [vmem:[#allocation9 + $0x1e0] sm:$0xff]  }
 0x7a0   : > { %13490 = vmatprep.subr.bf16.mxu1 %v15464_v28  ;;  %v2966_v31 = vld [vmem:[#allocation2 + $0x24] sm:$0xff] }
 0x7a1   : > { %v17588_v30 = vld [vmem:[#allocation2 + $0x3c] sm:$0xff]  ;;  %v3277_v42 = vpack.c.bf16 %v2966_v31, %v17582_v62  ;;  %v3275_v45 = vld [vmem:[#allocation2 + $0x44] sm:$0xff] }
 0x7a2   : > { %v2967_v32 = vld [vmem:[#allocation2 + $0x2c] sm:$0xff]  ;;  %v2968_v33 = vld [vmem:[#allocation2 + $0x34] sm:$0xff]  ;;  %v3279_v7 = vpack.c.bf16 %v3275_v45, %v17588_v30 }
 0x7a3   : > { %13491 = vmatpush3.bf16.msra.mxu1 %v15464_v28  ;;  %v2972_v35 = vpack.c.bf16 %v2967_v32, %v2966_v31  ;;  %v2973_v36 = vpack.c.bf16 %v17588_v30, %v2968_v33  ;;  %v3278_v4 = vpack.c.bf16 %v2968_v33, %v2967_v32  ;;  %v15488_v31 = vld [vmem:[#allocation12 + $0x8] sm:$0xff]  }
 0x7a4   : > { %13492 = vmatprep.subr.bf16.mxu1 %v15465_v29 }
 0x7a5   : > { %13484 = vmatprep.mubr.bf16.mxu1 %v2972_v35 }
 0x7a6   : > { %13485 = vmatmul.mubr.bf16.gmra.mrb[20].mxu1 %v2973_v36 }
 0x7a7   : > { %13493 = vmatpush3.bf16.msra.mxu1 %v15465_v29  ;;  %13504 = vmatprep.mubr.bf16.mxu1 %v3126_v40 }
 0x7a8   : > { %13494 = vmatprep.subr.bf16.mxu1 %v15466_v39 }
 0x7ab   : > { %13495 = vmatpush3.bf16.msra.mxu1 %v15466_v39 }
 0x7ac   : > { %13496 = vmatprep.subr.bf16.mxu1 %v15467_v46 }
 0x7af   : > { %13497 = vmatpush3.bf16.msra.mxu1 %v15467_v46 }
 0x7b0   : > { %13498 = vmatprep.subr.bf16.mxu1 %v15468_v47 }
 0x7b3   : > { %13499 = vmatpush3.bf16.msra.mxu1 %v15468_v47  ;;  %v15489_v47 = vld [vmem:[#allocation12 + $0x10] sm:$0xff]  }
 0x7b4   : > { %13500 = vmatprep.subr.bf16.mxu1 %v15469_v48 }
 0x7b7   : > { %13501 = vmatpush3.bf16.msra.mxu1 %v15469_v48 }
 0x7b8   : > { %13502 = vmatprep.subr.bf16.mxu1 %v15470_v49 }
 0x7bb   : > { %13503 = vmatpush3.bf16.msra.mxu1 %v15470_v49 }
 0x7bc   : > { %13512 = vmatprep.subr.bf16.mxu1 %v15471_v50 }
 0x7be   : > { %13505 = vmatmul.mubr.bf16.vlgmr.msra.gmra.mrb[16].mxu1 %v3127_v51 }
 0x7bf   : > { %13508 = vmatprep.mubr.bf16.mxu1 %v3128_v53  ;;  %13513 = vmatpush3.bf16.msra.mxu1 %v15471_v50  ;;  %v15491_v53 = vld [vmem:[#allocation12 + $0x20] sm:$0xff]  }
 0x7c0   : > { %13514 = vmatprep.subr.bf16.mxu1 %v15472_v52 }
 0x7c3   : > { %13515 = vmatpush3.bf16.msra.mxu1 %v15472_v52  ;;  %v15490_v52 = vld [vmem:[#allocation12 + $0x18] sm:$0xff]  }
 0x7c4   : > { %13516 = vmatprep.subr.bf16.mxu1 %v15473_v54 }
 0x7c6   : > { %13509 = vmatmul.mubr.bf16.gmra.mrb[20].mxu1 %v3129_v56  ;;  %v15493_v56 = vld [vmem:[#allocation12 + $0x30] sm:$0xff]  }
 0x7c7   : > { %13517 = vmatpush3.bf16.msra.mxu1 %v15473_v54  ;;  %13528 = vmatprep.mubr.bf16.mxu1 %v3276_v58  ;;  %v15492_v54 = vld [vmem:[#allocation12 + $0x28] sm:$0xff]  }
 0x7c8   : > { %13518 = vmatprep.subr.bf16.mxu1 %v15474_v57  ;;  %v15495_v58 = vld [vmem:[#allocation15] sm:$0xff]  }
 0x7cb   : > { %13519 = vmatpush3.bf16.msra.mxu1 %v15474_v57  ;;  %v15494_v57 = vld [vmem:[#allocation12 + $0x38] sm:$0xff]  }
 0x7cc   : > { %13520 = vmatprep.subr.bf16.mxu1 %v15475_v60 }
 0x7cf   : > { %13521 = vmatpush3.bf16.msra.mxu1 %v15475_v60  ;;  %v12014_v60 = vld [vmem:[%s18630_s16 + $0x2] ss:$0 sm:$0xff] }
 0x7d0   : > { %13522 = vmatprep.subr.bf16.mxu1 %v15476_v63 }
 0x7d3   : > { %13523 = vmatpush3.bf16.msra.mxu1 %v15476_v63 }
 0x7d4   : > { %13524 = vmatprep.subr.bf16.mxu1 %v15477_v1 }
 0x7d7   : > { %13525 = vmatpush3.bf16.msra.mxu1 %v15477_v1 }
 0x7d8   : > { %13526 = vmatprep.subr.bf16.mxu1 %v15478_v3 }
 0x7db   : > { %13527 = vmatpush3.bf16.msra.mxu1 %v15478_v3 }
 0x7de   : > { %13529 = vmatmul.mubr.bf16.vlgmr.msra.gmra.mrb[16].mxu1 %v3277_v42 }
 0x7df   : > { %13532 = vmatprep.mubr.bf16.mxu1 %v3278_v4 }
 0x7e6   : > { %13533 = vmatmul.mubr.bf16.gmra.mrb[20].mxu1 %v3279_v7 }
 0x8b1   : > { %v13530_v12 = vpop.f32.mrb[16].mxu1 }
 0x8b2   : > { %v14752_v44 = vadd.f32 %v13530_v12, %v11996_v11  ;;  %v3379_v13 = vpop.f32.mrb[17].mxu1 }
 0x8b3   : > { %v14753_v14 = vadd.f32 %v11996_v11, %v3379_v13  ;;  %v13531_v15 = vpop.f32.mrb[18].mxu1 }
 0x8b4   : > { %v14754_v16 = vadd.f32 %v13531_v15, %v11996_v11  ;;  %v3382_v19 = vpop.f32.mrb[19].mxu1  ;;  %v3420_v62 = vmax.f32 %v14752_v44, 0.0 }
 0x8b5   : > { %v14755_v22 = vadd.f32 %v11996_v11, %v3382_v19  ;;  %v3418_v25 = vmax.f32 %v14753_v14, 0.0 }
 0x8b6   : > { %v3421_v0 = vmax.f32 %v14754_v16, 0.0 }
 0x8b7   : > { %v3419_v26 = vmax.f32 %v14755_v22, 0.0 }
 0x8b8   : > { %v3427_v2 = vpack.c.bf16 %v3421_v0, %v3420_v62 }
 0x8b9   : > { %v3426_v27 = vpack.c.bf16 %v3419_v26, %v3418_v25  ;;  %v13534_v28 = vpop.f32.mrb[20].mxu1 }
 0x8ba   : > { %v14756_v29 = vadd.f32 %v13534_v28, %v11996_v11  ;;  %v3395_v30 = vpop.f32.mrb[21].mxu1 }
 0x8bb   : > { %v14757_v32 = vadd.f32 %v11996_v11, %v3395_v30  ;;  %v13535_v33 = vpop.f32.mrb[22].mxu1  ;;  %13552 = vmatprep.mubr.bf16.mxu0 %v3426_v27 }
 0x8bc   : > { %v14758_v35 = vadd.f32 %v13535_v33, %v11996_v11  ;;  %v3398_v36 = vpop.f32.mrb[23].mxu1  ;;  %13553 = vmatmul.mubr.bf16.vlgmr.msra.gmra.mrb[24].mxu0 %v3427_v2  ;;  %v3424_v40 = vmax.f32 %v14756_v29, 0.0 }
 0x8bd   : > { %v14759_v39 = vadd.f32 %v11996_v11, %v3398_v36  ;;  %13561 = vmatpush3.bf16.msra.mxu0 %v15487_v41  ;;  %v3422_v48 = vmax.f32 %v14757_v32, 0.0  ;;  %v15499_v36 = vld [vmem:[#allocation15 + $0x20] sm:$0xff]  }
 0x8be   : > { %v3425_v46 = vmax.f32 %v14758_v35, 0.0  ;;  %13562 = vmatprep.subr.bf16.mxu0 %v15488_v31 }
 0x8bf   : > { %v3423_v49 = vmax.f32 %v14759_v39, 0.0  ;;  %v15500_v39 = vld [vmem:[#allocation15 + $0x28] sm:$0xff]  }
 0x8c0   : > { %v3429_v50 = vpack.c.bf16 %v3425_v46, %v3424_v40  ;;  %v15501_v40 = vld [vmem:[#allocation15 + $0x30] sm:$0xff]   ;;  %v15502_v46 = vld [vmem:[#allocation15 + $0x38] sm:$0xff]  }
 0x8c1   : > { %v3428_v51 = vpack.c.bf16 %v3423_v49, %v3422_v48  ;;  %13563 = vmatpush3.bf16.msra.mxu0 %v15488_v31  ;;  %v15951_v48 = vld [vmem:[%s17402_s25 + $0x10] sm:$0xff]   ;;  %v15952_v49 = vld [vmem:[%s17402_s25 + $0x18] sm:$0xff]  }
 0x8c2   : > { %13564 = vmatprep.subr.bf16.mxu0 %v15489_v47 }
 0x8c3   : > { %13556 = vmatprep.mubr.bf16.mxu0 %v3428_v51  ;;  %v15504_v51 = vld [vmem:[#allocation18 + $0x8] sm:$0xff]  }
 0x8c4   : > { %13557 = vmatmul.mubr.bf16.gmra.mrb[28].mxu0 %v3429_v50  ;;  %v15503_v50 = vld [vmem:[#allocation18] sm:$0xff]  }
 0x8c5   : > { %13565 = vmatpush3.bf16.msra.mxu0 %v15489_v47  ;;  %v15950_v47 = vld [vmem:[%s17402_s25 + $0x8] sm:$0xff]   ;;  %13608 = vmatprep.subr.bf16.mxu1 %v15503_v50 }
 0x8c6   : > { %13566 = vmatprep.subr.bf16.mxu0 %v15490_v52  ;;  %13609 = vmatpush3.bf16.msra.mxu1 %v15503_v50  ;;  %v15516_v50 = vld [vmem:[#allocation18 + $0x68] sm:$0xff]  }
 0x8c7   : > { %13610 = vmatprep.subr.bf16.mxu1 %v15504_v51 }
 0x8c9   : > { %13567 = vmatpush3.bf16.msra.mxu0 %v15490_v52  ;;  %v15505_v52 = vld [vmem:[#allocation18 + $0x10] sm:$0xff]  }
 0x8ca   : > { %13568 = vmatprep.subr.bf16.mxu0 %v15491_v53  ;;  %13611 = vmatpush3.bf16.msra.mxu1 %v15504_v51  ;;  %v15546_v51 = vld [vmem:[#allocation20 + $0x18] sm:$0xff]  }
 0x8cb   : > { %13612 = vmatprep.subr.bf16.mxu1 %v15505_v52 }
 0x8cd   : > { %13569 = vmatpush3.bf16.msra.mxu0 %v15491_v53  ;;  %v15506_v53 = vld [vmem:[#allocation18 + $0x18] sm:$0xff]  }
 0x8ce   : > { %13570 = vmatprep.subr.bf16.mxu0 %v15492_v54  ;;  %13613 = vmatpush3.bf16.msra.mxu1 %v15505_v52  ;;  %v15517_v52 = vld [vmem:[#allocation18 + $0x70] sm:$0xff]  }
 0x8cf   : > { %13614 = vmatprep.subr.bf16.mxu1 %v15506_v53 }
 0x8d1   : > { %13571 = vmatpush3.bf16.msra.mxu0 %v15492_v54  ;;  %v15507_v54 = vld [vmem:[#allocation18 + $0x20] sm:$0xff]  }
 0x8d2   : > { %13572 = vmatprep.subr.bf16.mxu0 %v15493_v56  ;;  %13615 = vmatpush3.bf16.msra.mxu1 %v15506_v53  ;;  %v15547_v53 = vld [vmem:[#allocation20 + $0x20] sm:$0xff]  }
 0x8d3   : > { %13616 = vmatprep.subr.bf16.mxu1 %v15507_v54 }
 0x8d5   : > { %13573 = vmatpush3.bf16.msra.mxu0 %v15493_v56  ;;  %v15508_v56 = vld [vmem:[#allocation18 + $0x28] sm:$0xff]  }
 0x8d6   : > { %13574 = vmatprep.subr.bf16.mxu0 %v15494_v57  ;;  %13617 = vmatpush3.bf16.msra.mxu1 %v15507_v54  ;;  %v15518_v54 = vld [vmem:[#allocation18 + $0x78] sm:$0xff]  }
 0x8d7   : > { %13618 = vmatprep.subr.bf16.mxu1 %v15508_v56 }
 0x8d9   : > { %13575 = vmatpush3.bf16.msra.mxu0 %v15494_v57  ;;  %v15509_v57 = vld [vmem:[#allocation18 + $0x30] sm:$0xff]  }
 0x8da   : > { %13584 = vmatprep.subr.bf16.mxu0 %v15495_v58  ;;  %13619 = vmatpush3.bf16.msra.mxu1 %v15508_v56  ;;  %v15548_v56 = vld [vmem:[#allocation20 + $0x28] sm:$0xff]  }
 0x8db   : > { %13620 = vmatprep.subr.bf16.mxu1 %v15509_v57 }
 0x8de   : > { %13621 = vmatpush3.bf16.msra.mxu1 %v15509_v57  ;;  %v15519_v57 = vld [vmem:[#allocation18 + $0x80] sm:$0xff]  }
 0x98f   : > { %v13554_v63 = vpop.f32.mrb[24].mxu0 }
 0x990   : > { %v3546_v1 = vadd.f32 %v13554_v63, %v12014_v60  ;;  %v3537_v3 = vpop.f32.mrb[25].mxu0 }
 0x991   : > { %v3538_v42 = vadd.f32 %v12014_v60, %v3537_v3  ;;  %v13555_v4 = vpop.f32.mrb[26].mxu0 }
 0x992   : > { %v3570_v45 = vadd.f32 %v3546_v1, %v17547_v5  ;;  %v3549_v7 = vadd.f32 %v13555_v4, %v12014_v60  ;;  %v3540_v38 = vpop.f32.mrb[27].mxu0 }
 0x993   : > { %v3568_v9 = vadd.f32 %v3538_v42, %v17551_v6  ;;  %v3541_v41 = vadd.f32 %v12014_v60, %v3540_v38 }
 0x994   : > { %v3571_v11 = vadd.f32 %v3549_v7, %v17556_v8  ;;  %v3578_v44 = vmul.f32 %v3570_v45, %v17481_v18 }
 0x995   : > { %v3569_v12 = vadd.f32 %v3541_v41, %v17560_v34  ;;  %v3576_v14 = vmul.f32 %v3568_v9, %v17479_v17  ;;  %v15496_v34 = vld [vmem:[#allocation15 + $0x8] sm:$0xff]   ;;  %v12032_v9 = vld [vmem:[#allocation17] ss:$0 sm:$0xff] }
 0x996   : > { %v3579_v13 = vmul.f32 %v3571_v11, %v17486_v24 }
 0x997   : > { %v3577_v15 = vmul.f32 %v3569_v12, %v17484_v20  ;;  %v13558_v16 = vpop.f32.mrb[28].mxu0 }
 0x998   : > { %v3585_v19 = vpack.c.bf16 %v3579_v13, %v3578_v44  ;;  %v3562_v5 = vadd.f32 %v13558_v16, %v12014_v60  ;;  %v3553_v22 = vpop.f32.mrb[29].mxu0 }
 0x999   : > { %v3554_v62 = vadd.f32 %v12014_v60, %v3553_v22  ;;  %v13559_v0 = vpop.f32.mrb[30].mxu0  ;;  %v3584_v6 = vpack.c.bf16 %v3577_v15, %v3576_v14 }
 0x99a   : > { %v3574_v25 = vadd.f32 %v3562_v5, %v17567_v10  ;;  %v3565_v8 = vadd.f32 %v13559_v0, %v12014_v60  ;;  %v3556_v26 = vpop.f32.mrb[31].mxu0  ;;  %v15497_v10 = vld [vmem:[#allocation15 + $0x10] sm:$0xff]  }
 0x99b   : > { %v3572_v2 = vadd.f32 %v3554_v62, %v17571_v21  ;;  %v3557_v27 = vadd.f32 %v12014_v60, %v3556_v26  ;;  %13576 = vmatprep.mubr.bf16.mxu0 %v3584_v6  ;;  %v15511_v60 = vld [vmem:[#allocation18 + $0x40] sm:$0xff]  }
 0x99c   : > { %v3575_v28 = vadd.f32 %v3565_v8, %v17576_v23  ;;  %13577 = vmatmul.mubr.bf16.vlgmr.msra.gmra.mrb[32].mxu0 %v3585_v19  ;;  %v3582_v30 = vmul.f32 %v3574_v25, %v17508_v55  ;;  %v15498_v23 = vld [vmem:[#allocation15 + $0x18] sm:$0xff]  }
 0x99d   : > { %v3573_v29 = vadd.f32 %v3557_v27, %v17580_v59  ;;  %13585 = vmatpush3.bf16.msra.mxu0 %v15495_v58  ;;  %v3580_v32 = vmul.f32 %v3572_v2, %v17491_v37  ;;  %v15949_v59 = vld [vmem:[%s17402_s25] sm:$0xff]   ;;  %s18635_s25 = sld [smem:[#allocation76_spill]] }
 0x99e   : > { %v3583_v31 = vmul.f32 %v3575_v28, %v17514_v61  ;;  %13586 = vmatprep.subr.bf16.mxu0 %v15496_v34  ;;  %v15510_v58 = vld [vmem:[#allocation18 + $0x38] sm:$0xff]  }
 0x99f   : > { %v3581_v33 = vmul.f32 %v3573_v29, %v17500_v43  ;;  %13622 = vmatprep.subr.bf16.mxu1 %v15510_v58 }
 0x9a0   : > { %v3587_v21 = vpack.c.bf16 %v3583_v31, %v3582_v30  ;;  %13623 = vmatpush3.bf16.msra.mxu1 %v15510_v58  ;;  %v15512_v30 = vld [vmem:[#allocation18 + $0x48] sm:$0xff]   ;;  %v15513_v31 = vld [vmem:[#allocation18 + $0x50] sm:$0xff]  }
 0x9a1   : > { %13587 = vmatpush3.bf16.msra.mxu0 %v15496_v34  ;;  %v3586_v35 = vpack.c.bf16 %v3581_v33, %v3580_v32  ;;  %13632 = vmatprep.subr.bf16.mxu1 %v15511_v60 }
 0x9a2   : > { %13588 = vmatprep.subr.bf16.mxu0 %v15497_v10 }
 0x9a3   : > { %13580 = vmatprep.mubr.bf16.mxu0 %v3586_v35 }
 0x9a4   : > { %13581 = vmatmul.mubr.bf16.gmra.mrb[36].mxu0 %v3587_v21 }
 0x9a5   : > { %13589 = vmatpush3.bf16.msra.mxu0 %v15497_v10  ;;  %13600 = vmatprep.mubr.bf16.mxu0 %v15949_v59 }
 0x9a6   : > { %13590 = vmatprep.subr.bf16.mxu0 %v15498_v23 }
 0x9a9   : > { %13591 = vmatpush3.bf16.msra.mxu0 %v15498_v23 }
 0x9aa   : > { %13592 = vmatprep.subr.bf16.mxu0 %v15499_v36 }
 0x9ad   : > { %13593 = vmatpush3.bf16.msra.mxu0 %v15499_v36 }
 0x9ae   : > { %13594 = vmatprep.subr.bf16.mxu0 %v15500_v39 }
 0x9b1   : > { %13595 = vmatpush3.bf16.msra.mxu0 %v15500_v39  ;;  %v15514_v39 = vld [vmem:[#allocation18 + $0x58] sm:$0xff]  }
 0x9b2   : > { %13596 = vmatprep.subr.bf16.mxu0 %v15501_v40 }
 0x9b5   : > { %13597 = vmatpush3.bf16.msra.mxu0 %v15501_v40 }
 0x9b6   : > { %13598 = vmatprep.subr.bf16.mxu0 %v15502_v46 }
 0x9b9   : > { %13599 = vmatpush3.bf16.msra.mxu0 %v15502_v46  ;;  %v15543_v46 = vld [vmem:[#allocation20] sm:$0xff]  }
 0x9ba   : > { %13728 = vmatprep.subr.bf16.mxu0 %v15543_v46 }
 0x9bc   : > { %13601 = vmatmul.mubr.bf16.vlgmr.msra.gmra.mrb[40].mxu0 %v15950_v47  ;;  %v15544_v47 = vld [vmem:[#allocation20 + $0x8] sm:$0xff]  }
 0x9bd   : > { %13604 = vmatprep.mubr.bf16.mxu0 %v15951_v48  ;;  %v15515_v48 = vld [vmem:[#allocation18 + $0x60] sm:$0xff]   ;;  %13729 = vmatpush3.bf16.msra.mxu0 %v15543_v46  ;;  %v15533_v46 = vld [vmem:[#allocation18 + $0xf0] sm:$0xff]  }
 0x9be   : > { %13730 = vmatprep.subr.bf16.mxu0 %v15544_v47 }
 0x9c1   : > { %13731 = vmatpush3.bf16.msra.mxu0 %v15544_v47  ;;  %v15534_v47 = vld [vmem:[#allocation18 + $0xf8] sm:$0xff]  }
 0x9c4   : > { %13605 = vmatmul.mubr.bf16.gmra.mrb[44].mxu0 %v15952_v49  ;;  %v15545_v49 = vld [vmem:[#allocation20 + $0x10] sm:$0xff]  }
 0x9c5   : > { %13732 = vmatprep.subr.bf16.mxu0 %v15545_v49 }
 0x9c6   : > { %13733 = vmatpush3.bf16.msra.mxu0 %v15545_v49 }
 0x9c7   : > { %13734 = vmatprep.subr.bf16.mxu0 %v15546_v51 }
 0x9ca   : > { %13735 = vmatpush3.bf16.msra.mxu0 %v15546_v51 }
 0x9cb   : > { %13736 = vmatprep.subr.bf16.mxu0 %v15547_v53 }
 0x9ce   : > { %13737 = vmatpush3.bf16.msra.mxu0 %v15547_v53 }
 0x9cf   : > { %13738 = vmatprep.subr.bf16.mxu0 %v15548_v56 }
 0x9d2   : > { %13739 = vmatpush3.bf16.msra.mxu0 %v15548_v56 }
 0xa6f   : > { %v17623_v63 = vpop.f32.mrb[32].mxu0 }
 0xa70   : > { %v17625_v1 = vpop.f32.mrb[33].mxu0 }
 0xa71   : > { %v17627_v3 = vpop.f32.mrb[34].mxu0 }
 0xa72   : > { %v17629_v42 = vpop.f32.mrb[35].mxu0 }
 0xa77   : > { %v17631_v4 = vpop.f32.mrb[36].mxu0 }
 0xa78   : > { %v17633_v45 = vpop.f32.mrb[37].mxu0 }
 0xa79   : > { %v17635_v7 = vpop.f32.mrb[38].mxu0 }
 0xa7a   : > { %v17637_v38 = vpop.f32.mrb[39].mxu0 }
 0xa8f   : > { %v13602_v41 = vpop.f32.mrb[40].mxu0 }
 0xa90   : > { %v17639_v11 = vadd.f32 %v13602_v41, %v12032_v9  ;;  %v3837_v12 = vpop.f32.mrb[41].mxu0 }
 0xa91   : > { %v17641_v44 = vadd.f32 %v12032_v9, %v3837_v12  ;;  %v13603_v13 = vpop.f32.mrb[42].mxu0 }
 0xa92   : > { %3870 = vst [vmem:[#allocation2 + $0x18] sm:$0xff] %v17639_v11  ;;  %v17644_v14 = vadd.f32 %v13603_v13, %v12032_v9  ;;  %v3840_v15 = vpop.f32.mrb[43].mxu0  ;;  %v15520_v13 = vld [vmem:[#allocation18 + $0x88] sm:$0xff]  }
 0xa93   : > { %3868 = vst [vmem:[#allocation2 + $0x8] sm:$0xff] %v17641_v44  ;;  %v17647_v16 = vadd.f32 %v12032_v9, %v3840_v15 }
 0xa94   : > { %3871 = vst [vmem:[#allocation2 + $0x20] sm:$0xff] %v17644_v14 }
 0xa95   : > { %3869 = vst [vmem:[#allocation2 + $0x10] sm:$0xff] %v17647_v16 }
 0xa97   : > { %v13606_v19 = vpop.f32.mrb[44].mxu0 }
 0xa98   : > { %v17651_v5 = vadd.f32 %v13606_v19, %v12032_v9  ;;  %v3853_v22 = vpop.f32.mrb[45].mxu0  ;;  %v15521_v19 = vld [vmem:[#allocation18 + $0x90] sm:$0xff]  }
 0xa99   : > { %v17653_v62 = vadd.f32 %v12032_v9, %v3853_v22  ;;  %v13607_v0 = vpop.f32.mrb[46].mxu0 }
 0xa9a   : > { %3874 = vst [vmem:[#allocation2 + $0x38] sm:$0xff] %v17651_v5  ;;  %v17656_v6 = vadd.f32 %v13607_v0, %v12032_v9  ;;  %v3856_v25 = vpop.f32.mrb[47].mxu0  ;;  %v3877_v34 = vld [vmem:[#allocation2 + $0x6] sm:$0xff] }
 0xa9b   : > { %3872 = vst [vmem:[#allocation2 + $0x28] sm:$0xff] %v17653_v62  ;;  %v17659_v8 = vadd.f32 %v12032_v9, %v3856_v25  ;;  %v3880_v26 = vld [vmem:[#allocation2 + $0x1e] sm:$0xff]  ;;  %v4032_v36 = vld [vmem:[#allocation2 + $0x7] sm:$0xff] }
 0xa9c   : > { %3875 = vst [vmem:[#allocation2 + $0x40] sm:$0xff] %v17656_v6  ;;  %v3878_v2 = vld [vmem:[#allocation2 + $0xe] sm:$0xff]  ;;  %v3879_v27 = vld [vmem:[#allocation2 + $0x16] sm:$0xff] }
 0xa9d   : > { %3873 = vst [vmem:[#allocation2 + $0x30] sm:$0xff] %v17659_v8  ;;  %v3885_v28 = vpack.c.bf16 %v3878_v2, %v3877_v34  ;;  %v3886_v29 = vpack.c.bf16 %v3880_v26, %v3879_v27  ;;  %v4033_v32 = vld [vmem:[#allocation2 + $0xf] sm:$0xff]  ;;  %v4034_v58 = vld [vmem:[#allocation2 + $0x17] sm:$0xff]  ;;  %v4190_v34 = vpack.c.bf16 %v17647_v16, %v17641_v44 }
 0xa9e   : > { %v4040_v40 = vpack.c.bf16 %v4033_v32, %v4032_v36  ;;  %v15522_v26 = vld [vmem:[#allocation18 + $0x98] sm:$0xff]   ;;  %v15523_v2 = vld [vmem:[#allocation18 + $0xa0] sm:$0xff]   ;;  %v15524_v27 = vld [vmem:[#allocation18 + $0xa8] sm:$0xff]   ;;  %v4192_v32 = vpack.c.bf16 %v17659_v8, %v17653_v62 }
 0xa9f   : > { %13624 = vmatprep.mubr.bf16.mxu1 %v3885_v28  ;;  %v15525_v28 = vld [vmem:[#allocation18 + $0xb0] sm:$0xff]  }
 0xaa0   : > { %13625 = vmatmul.mubr.bf16.vlgmr.msra.gmra.mrb[24].mxu1 %v3886_v29  ;;  %v15526_v29 = vld [vmem:[#allocation18 + $0xb8] sm:$0xff]  }
 0xaa1   : > { %13633 = vmatpush3.bf16.msra.mxu1 %v15511_v60  ;;  %v4035_v60 = vld [vmem:[#allocation2 + $0x1f] sm:$0xff] }
 0xaa2   : > { %13634 = vmatprep.subr.bf16.mxu1 %v15512_v30  ;;  %v3881_v33 = vld [vmem:[#allocation2 + $0x26] sm:$0xff]  ;;  %v4041_v41 = vpack.c.bf16 %v4035_v60, %v4034_v58 }
 0xaa3   : > { %v3884_v10 = vld [vmem:[#allocation2 + $0x3e] sm:$0xff]  ;;  %v4036_v12 = vld [vmem:[#allocation2 + $0x27] sm:$0xff] }
 0xaa4   : > { %v3882_v21 = vld [vmem:[#allocation2 + $0x2e] sm:$0xff]  ;;  %v3883_v35 = vld [vmem:[#allocation2 + $0x36] sm:$0xff]  ;;  %v4039_v0 = vld [vmem:[#allocation2 + $0x3f] sm:$0xff] }
 0xaa5   : > { %13635 = vmatpush3.bf16.msra.mxu1 %v15512_v30  ;;  %v3887_v23 = vpack.c.bf16 %v3882_v21, %v3881_v33  ;;  %v3888_v59 = vpack.c.bf16 %v3884_v10, %v3883_v35  ;;  %v4037_v9 = vld [vmem:[#allocation2 + $0x2f] sm:$0xff]  ;;  %v4038_v22 = vld [vmem:[#allocation2 + $0x37] sm:$0xff]  ;;  %v15529_v33 = vld [vmem:[#allocation18 + $0xd0] sm:$0xff]  }
 0xaa6   : > { %13636 = vmatprep.subr.bf16.mxu1 %v15513_v31  ;;  %v4042_v15 = vpack.c.bf16 %v4037_v9, %v4036_v12  ;;  %v4043_v25 = vpack.c.bf16 %v4039_v0, %v4038_v22  ;;  %v15527_v30 = vld [vmem:[#allocation18 + $0xc0] sm:$0xff]   ;;  %v15528_v10 = vld [vmem:[#allocation18 + $0xc8] sm:$0xff]   ;;  %v4332_v21 = vld [vmem:[#allocation2 + $0x9] sm:$0xff] }
 0xaa7   : > { %13628 = vmatprep.mubr.bf16.mxu1 %v3887_v23  ;;  %v4333_v35 = vld [vmem:[#allocation2 + $0x11] sm:$0xff]  ;;  %v4193_v23 = vpack.c.bf16 %v17656_v6, %v17651_v5  ;;  %v4335_v49 = vld [vmem:[#allocation2 + $0x21] sm:$0xff]  ;;  %v4338_v58 = vld [vmem:[#allocation2 + $0x39] sm:$0xff] }
 0xaa8   : > { %13629 = vmatmul.mubr.bf16.gmra.mrb[28].mxu1 %v3888_v59  ;;  %v15530_v59 = vld [vmem:[#allocation18 + $0xd8] sm:$0xff]   ;;  %v4340_v36 = vpack.c.bf16 %v4333_v35, %v4332_v21  ;;  %v4339_v60 = vld [vmem:[#allocation2 + $0x41] sm:$0xff]  ;;  %v15551_v21 = vld [vmem:[#allocation18 + $0x140] sm:$0xff]  }
 0xaa9   : > { %13637 = vmatpush3.bf16.msra.mxu1 %v15513_v31  ;;  %13648 = vmatprep.mubr.bf16.mxu1 %v4040_v40  ;;  %v4191_v31 = vpack.c.bf16 %v17644_v14, %v17639_v11  ;;  %v15532_v40 = vld [vmem:[#allocation18 + $0xe8] sm:$0xff]   ;;  %v4337_v51 = vld [vmem:[#allocation2 + $0x31] sm:$0xff]  ;;  %v4343_v12 = vpack.c.bf16 %v4339_v60, %v4338_v58  ;;  %v15541_v0 = vld [vmem:[#allocation18 + $0x130] sm:$0xff]  }
 0xaaa   : > { %13638 = vmatprep.subr.bf16.mxu1 %v15514_v39  ;;  %v4482_v9 = vld [vmem:[#allocation2 + $0xa] sm:$0xff]  ;;  %v15540_v22 = vld [vmem:[#allocation18 + $0x128] sm:$0xff]  }
 0xaab   : > { %v12049_v35 = vld [vmem:[%s18631_s20] ss:$0 sm:$0xff] }
 0xaac   : > { %v15552_v60 = vld [vmem:[#allocation18 + $0x148] sm:$0xff]  }
 0xaad   : > { %13639 = vmatpush3.bf16.msra.mxu1 %v15514_v39  ;;  %v15531_v39 = vld [vmem:[#allocation18 + $0xe0] sm:$0xff]  }
 0xaae   : > { %13640 = vmatprep.subr.bf16.mxu1 %v15515_v48 }
 0xab1   : > { %13641 = vmatpush3.bf16.msra.mxu1 %v15515_v48  ;;  %v15535_v48 = vld [vmem:[#allocation18 + $0x100] sm:$0xff]  }
 0xab2   : > { %13642 = vmatprep.subr.bf16.mxu1 %v15516_v50 }
 0xab5   : > { %13643 = vmatpush3.bf16.msra.mxu1 %v15516_v50  ;;  %v4336_v50 = vld [vmem:[#allocation2 + $0x29] sm:$0xff] }
 0xab6   : > { %13644 = vmatprep.subr.bf16.mxu1 %v15517_v52  ;;  %v4342_v56 = vpack.c.bf16 %v4337_v51, %v4336_v50 }
 0xab9   : > { %13645 = vmatpush3.bf16.msra.mxu1 %v15517_v52  ;;  %v4334_v52 = vld [vmem:[#allocation2 + $0x19] sm:$0xff] }
 0xaba   : > { %13646 = vmatprep.subr.bf16.mxu1 %v15518_v54  ;;  %v4341_v53 = vpack.c.bf16 %v4335_v49, %v4334_v52 }
 0xabd   : > { %13647 = vmatpush3.bf16.msra.mxu1 %v15518_v54  ;;  %v15536_v54 = vld [vmem:[#allocation18 + $0x108] sm:$0xff]  }
 0xabe   : > { %13656 = vmatprep.subr.bf16.mxu1 %v15519_v57 }
 0xac0   : > { %13649 = vmatmul.mubr.bf16.vlgmr.msra.gmra.mrb[24].mxu1 %v4041_v41  ;;  %v4483_v41 = vld [vmem:[#allocation2 + $0x12] sm:$0xff] }
 0xac1   : > { %13652 = vmatprep.mubr.bf16.mxu1 %v4042_v15  ;;  %13657 = vmatpush3.bf16.msra.mxu1 %v15519_v57  ;;  %v15537_v57 = vld [vmem:[#allocation18 + $0x110] sm:$0xff]   ;;  %v4490_v15 = vpack.c.bf16 %v4483_v41, %v4482_v9 }
 0xac2   : > { %13658 = vmatprep.subr.bf16.mxu1 %v15520_v13 }
 0xac5   : > { %13659 = vmatpush3.bf16.msra.mxu1 %v15520_v13  ;;  %v15538_v13 = vld [vmem:[#allocation18 + $0x118] sm:$0xff]  }
 0xac6   : > { %13660 = vmatprep.subr.bf16.mxu1 %v15521_v19 }
 0xac8   : > { %13653 = vmatmul.mubr.bf16.gmra.mrb[28].mxu1 %v4043_v25  ;;  %v15542_v25 = vld [vmem:[#allocation18 + $0x138] sm:$0xff]  }
 0xac9   : > { %13661 = vmatpush3.bf16.msra.mxu1 %v15521_v19  ;;  %13672 = vmatprep.mubr.bf16.mxu1 %v4190_v34  ;;  %v15539_v19 = vld [vmem:[#allocation18 + $0x120] sm:$0xff]   ;;  %v4486_v34 = vld [vmem:[#allocation2 + $0x2a] sm:$0xff] }
 0xaca   : > { %13662 = vmatprep.subr.bf16.mxu1 %v15522_v26 }
 0xacd   : > { %13663 = vmatpush3.bf16.msra.mxu1 %v15522_v26  ;;  %v4485_v26 = vld [vmem:[#allocation2 + $0x22] sm:$0xff] }
 0xace   : > { %13664 = vmatprep.subr.bf16.mxu1 %v15523_v2 }
 0xad1   : > { %13665 = vmatpush3.bf16.msra.mxu1 %v15523_v2  ;;  %v4487_v2 = vld [vmem:[#allocation2 + $0x32] sm:$0xff] }
 0xad2   : > { %13666 = vmatprep.subr.bf16.mxu1 %v15524_v27 }
 0xad5   : > { %13667 = vmatpush3.bf16.msra.mxu1 %v15524_v27  ;;  %v4484_v27 = vld [vmem:[#allocation2 + $0x1a] sm:$0xff] }
 0xad6   : > { %13668 = vmatprep.subr.bf16.mxu1 %v15525_v28 }
 0xad9   : > { %13669 = vmatpush3.bf16.msra.mxu1 %v15525_v28  ;;  %v4491_v28 = vpack.c.bf16 %v4485_v26, %v4484_v27  ;;  %v15554_v27 = vld [vmem:[#allocation18 + $0x158] sm:$0xff]  }
 0xada   : > { %13670 = vmatprep.subr.bf16.mxu1 %v15526_v29 }
 0xadd   : > { %13671 = vmatpush3.bf16.msra.mxu1 %v15526_v29  ;;  %v4492_v29 = vpack.c.bf16 %v4487_v2, %v4486_v34 }
 0xade   : > { %13680 = vmatprep.subr.bf16.mxu1 %v15527_v30 }
 0xae0   : > { %13673 = vmatmul.mubr.bf16.vlgmr.msra.gmra.mrb[24].mxu1 %v4191_v31  ;;  %v4489_v31 = vld [vmem:[#allocation2 + $0x42] sm:$0xff] }
 0xae1   : > { %13676 = vmatprep.mubr.bf16.mxu1 %v4192_v32  ;;  %13681 = vmatpush3.bf16.msra.mxu1 %v15527_v30  ;;  %v4488_v30 = vld [vmem:[#allocation2 + $0x3a] sm:$0xff]  ;;  %v15549_v32 = vld [vmem:[#allocation20 + $0x30] sm:$0xff]  }
 0xae2   : > { %13682 = vmatprep.subr.bf16.mxu1 %v15528_v10  ;;  %13740 = vmatprep.subr.bf16.mxu0 %v15549_v32 }
 0xae3   : > { %13741 = vmatpush3.bf16.msra.mxu0 %v15549_v32  ;;  %v12082_v32 = vld [vmem:[%s18632_s15] ss:$0 sm:$0xff] }
 0xae5   : > { %13683 = vmatpush3.bf16.msra.mxu1 %v15528_v10  ;;  %v4493_v10 = vpack.c.bf16 %v4489_v31, %v4488_v30  ;;  %v15557_v30 = vld [vmem:[#allocation18 + $0x170] sm:$0xff]   ;;  %v15558_v31 = vld [vmem:[#allocation18 + $0x178] sm:$0xff]  }
 0xae6   : > { %13684 = vmatprep.subr.bf16.mxu1 %v15529_v33 }
 0xae8   : > { %13677 = vmatmul.mubr.bf16.gmra.mrb[28].mxu1 %v4193_v23 }
 0xae9   : > { %13685 = vmatpush3.bf16.msra.mxu1 %v15529_v33  ;;  %13696 = vmatprep.mubr.bf16.mxu1 %v4340_v36  ;;  %v15550_v33 = vld [vmem:[#allocation20 + $0x38] sm:$0xff]  }
 0xaea   : > { %13686 = vmatprep.subr.bf16.mxu1 %v15530_v59  ;;  %13742 = vmatprep.subr.bf16.mxu0 %v15550_v33 }
 0xaeb   : > { %13743 = vmatpush3.bf16.msra.mxu0 %v15550_v33 }
 0xaec   : > { %13752 = vmatprep.subr.bf16.mxu0 %v15551_v21 }
 0xaed   : > { %13687 = vmatpush3.bf16.msra.mxu1 %v15530_v59 }
 0xaee   : > { %13688 = vmatprep.subr.bf16.mxu1 %v15531_v39 }
 0xaf1   : > { %13689 = vmatpush3.bf16.msra.mxu1 %v15531_v39 }
 0xaf2   : > { %13690 = vmatprep.subr.bf16.mxu1 %v15532_v40 }
 0xaf5   : > { %13691 = vmatpush3.bf16.msra.mxu1 %v15532_v40 }
 0xaf6   : > { %13692 = vmatprep.subr.bf16.mxu1 %v15533_v46 }
 0xaf9   : > { %13693 = vmatpush3.bf16.msra.mxu1 %v15533_v46 }
 0xafa   : > { %13694 = vmatprep.subr.bf16.mxu1 %v15534_v47 }
 0xafd   : > { %13695 = vmatpush3.bf16.msra.mxu1 %v15534_v47 }
 0xafe   : > { %13704 = vmatprep.subr.bf16.mxu1 %v15535_v48 }
 0xb00   : > { %13697 = vmatmul.mubr.bf16.vlgmr.msra.gmra.mrb[24].mxu1 %v4341_v53 }
 0xb01   : > { %13700 = vmatprep.mubr.bf16.mxu1 %v4342_v56  ;;  %13705 = vmatpush3.bf16.msra.mxu1 %v15535_v48 }
 0xb02   : > { %13706 = vmatprep.subr.bf16.mxu1 %v15536_v54 }
 0xb05   : > { %13707 = vmatpush3.bf16.msra.mxu1 %v15536_v54 }
 0xb06   : > { %13708 = vmatprep.subr.bf16.mxu1 %v15537_v57 }
 0xb08   : > { %13701 = vmatmul.mubr.bf16.gmra.mrb[28].mxu1 %v4343_v12 }
 0xb09   : > { %13709 = vmatpush3.bf16.msra.mxu1 %v15537_v57  ;;  %13720 = vmatprep.mubr.bf16.mxu1 %v4490_v15 }
 0xb0a   : > { %13710 = vmatprep.subr.bf16.mxu1 %v15538_v13 }
 0xb0d   : > { %13711 = vmatpush3.bf16.msra.mxu1 %v15538_v13 }
 0xb0e   : > { %13712 = vmatprep.subr.bf16.mxu1 %v15539_v19 }
 0xb11   : > { %13713 = vmatpush3.bf16.msra.mxu1 %v15539_v19 }
 0xb12   : > { %13714 = vmatprep.subr.bf16.mxu1 %v15540_v22 }
 0xb15   : > { %13715 = vmatpush3.bf16.msra.mxu1 %v15540_v22 }
 0xb16   : > { %13716 = vmatprep.subr.bf16.mxu1 %v15541_v0 }
 0xb19   : > { %13717 = vmatpush3.bf16.msra.mxu1 %v15541_v0  ;;  %v15553_v0 = vld [vmem:[#allocation18 + $0x150] sm:$0xff]  }
 0xb1a   : > { %13718 = vmatprep.subr.bf16.mxu1 %v15542_v25 }
 0xb1d   : > { %13719 = vmatpush3.bf16.msra.mxu1 %v15542_v25 }
 0xb20   : > { %13721 = vmatmul.mubr.bf16.vlgmr.msra.gmra.mrb[24].mxu1 %v4491_v28  ;;  %v15555_v28 = vld [vmem:[#allocation18 + $0x160] sm:$0xff]  }
 0xb21   : > { %13724 = vmatprep.mubr.bf16.mxu1 %v4492_v29  ;;  %v15556_v29 = vld [vmem:[#allocation18 + $0x168] sm:$0xff]  }
 0xb28   : > { %13725 = vmatmul.mubr.bf16.gmra.mrb[28].mxu1 %v4493_v10  ;;  %v15559_v10 = vld [vmem:[#allocation18 + $0x180] sm:$0xff]  }
 0xbf3   : > { %v13722_v23 = vpop.f32.mrb[24].mxu1 }
 0xbf4   : > { %v14760_v59 = vadd.f32 %v13722_v23, %v12049_v35  ;;  %v4593_v36 = vpop.f32.mrb[25].mxu1 }
 0xbf5   : > { %v14761_v39 = vadd.f32 %v12049_v35, %v4593_v36  ;;  %v13723_v40 = vpop.f32.mrb[26].mxu1 }
 0xbf6   : > { %v14762_v46 = vadd.f32 %v13723_v40, %v12049_v35  ;;  %v4596_v47 = vpop.f32.mrb[27].mxu1  ;;  %v4634_v49 = vmax.f32 %v14760_v59, 0.0 }
 0xbf7   : > { %v14763_v48 = vadd.f32 %v12049_v35, %v4596_v47  ;;  %v4632_v51 = vmax.f32 %v14761_v39, 0.0 }
 0xbf8   : > { %v4635_v50 = vmax.f32 %v14762_v46, 0.0 }
 0xbf9   : > { %v4633_v52 = vmax.f32 %v14763_v48, 0.0 }
 0xbfa   : > { %v4641_v53 = vpack.c.bf16 %v4635_v50, %v4634_v49 }
 0xbfb   : > { %v4640_v54 = vpack.c.bf16 %v4633_v52, %v4632_v51  ;;  %v13726_v56 = vpop.f32.mrb[28].mxu1 }
 0xbfc   : > { %v14764_v57 = vadd.f32 %v13726_v56, %v12049_v35  ;;  %v4609_v58 = vpop.f32.mrb[29].mxu1 }
 0xbfd   : > { %v14765_v9 = vadd.f32 %v12049_v35, %v4609_v58  ;;  %v13727_v41 = vpop.f32.mrb[30].mxu1  ;;  %13744 = vmatprep.mubr.bf16.mxu0 %v4640_v54 }
 0xbfe   : > { %v14766_v12 = vadd.f32 %v13727_v41, %v12049_v35  ;;  %v4612_v13 = vpop.f32.mrb[31].mxu1  ;;  %13745 = vmatmul.mubr.bf16.vlgmr.msra.gmra.mrb[48].mxu0 %v4641_v53  ;;  %v4638_v19 = vmax.f32 %v14764_v57, 0.0 }
 0xbff   : > { %v14767_v15 = vadd.f32 %v12049_v35, %v4612_v13  ;;  %13753 = vmatpush3.bf16.msra.mxu0 %v15551_v21  ;;  %v4636_v25 = vmax.f32 %v14765_v9, 0.0 }
 0xc00   : > { %v4639_v22 = vmax.f32 %v14766_v12, 0.0  ;;  %13754 = vmatprep.subr.bf16.mxu0 %v15552_v60 }
 0xc01   : > { %v4637_v26 = vmax.f32 %v14767_v15, 0.0 }
 0xc02   : > { %v4643_v34 = vpack.c.bf16 %v4639_v22, %v4638_v19 }
 0xc03   : > { %v4642_v2 = vpack.c.bf16 %v4637_v26, %v4636_v25  ;;  %13755 = vmatpush3.bf16.msra.mxu0 %v15552_v60  ;;  %v15560_v26 = vld [vmem:[#allocation18 + $0x188] sm:$0xff]  }
 0xc04   : > { %13756 = vmatprep.subr.bf16.mxu0 %v15553_v0 }
 0xc05   : > { %13748 = vmatprep.mubr.bf16.mxu0 %v4642_v2 }
 0xc06   : > { %13749 = vmatmul.mubr.bf16.gmra.mrb[52].mxu0 %v4643_v34  ;;  %v15561_v34 = vld [vmem:[#allocation18 + $0x190] sm:$0xff]  }
 0xc07   : > { %13757 = vmatpush3.bf16.msra.mxu0 %v15553_v0 }
 0xc08   : > { %13758 = vmatprep.subr.bf16.mxu0 %v15554_v27 }
 0xc0b   : > { %13759 = vmatpush3.bf16.msra.mxu0 %v15554_v27 }
 0xc0c   : > { %13760 = vmatprep.subr.bf16.mxu0 %v15555_v28 }
 0xc0f   : > { %13761 = vmatpush3.bf16.msra.mxu0 %v15555_v28 }
 0xc10   : > { %13762 = vmatprep.subr.bf16.mxu0 %v15556_v29 }
 0xc13   : > { %13763 = vmatpush3.bf16.msra.mxu0 %v15556_v29 }
 0xc14   : > { %13764 = vmatprep.subr.bf16.mxu0 %v15557_v30 }
 0xc17   : > { %13765 = vmatpush3.bf16.msra.mxu0 %v15557_v30 }
 0xc18   : > { %13766 = vmatprep.subr.bf16.mxu0 %v15558_v31 }
 0xc1b   : > { %13767 = vmatpush3.bf16.msra.mxu0 %v15558_v31 }
 0xc1c   : > { %13776 = vmatprep.subr.bf16.mxu0 %v15559_v10 }
 0xcd1   : > { %v13746_v33 = vpop.f32.mrb[48].mxu0 }
 0xcd2   : > { %v4758_v21 = vadd.f32 %v13746_v33, %v12082_v32  ;;  %v4749_v35 = vpop.f32.mrb[49].mxu0  ;;  %v15562_v33 = vld [vmem:[#allocation18 + $0x198] sm:$0xff]  }
 0xcd3   : > { %v4750_v23 = vadd.f32 %v12082_v32, %v4749_v35  ;;  %v13747_v59 = vpop.f32.mrb[50].mxu0  ;;  %v15591_v35 = vld [vmem:[#allocation20 + $0x40] sm:$0xff]  }
 0xcd4   : > { %v4782_v36 = vadd.f32 %v4758_v21, %v17639_v11  ;;  %v4761_v39 = vadd.f32 %v13747_v59, %v12082_v32  ;;  %v4752_v40 = vpop.f32.mrb[51].mxu0  ;;  %v15563_v59 = vld [vmem:[#allocation18 + $0x1a0] sm:$0xff]   ;;  %13872 = vmatprep.subr.bf16.mxu1 %v15591_v35 }
 0xcd5   : > { %v4780_v46 = vadd.f32 %v4750_v23, %v17641_v44  ;;  %v4753_v47 = vadd.f32 %v12082_v32, %v4752_v40  ;;  %v15592_v23 = vld [vmem:[#allocation20 + $0x48] sm:$0xff]   ;;  %13873 = vmatpush3.bf16.msra.mxu1 %v15591_v35  ;;  %v15594_v40 = vld [vmem:[#allocation20 + $0x58] sm:$0xff]  }
 0xcd6   : > { %v17676_v48 = vmul.f32 %v4782_v36, %v17481_v18  ;;  %v4783_v49 = vadd.f32 %v4761_v39, %v17644_v14  ;;  %13874 = vmatprep.subr.bf16.mxu1 %v15592_v23  ;;  %v15593_v36 = vld [vmem:[#allocation20 + $0x50] sm:$0xff]   ;;  %v15564_v39 = vld [vmem:[#allocation18 + $0x1a8] sm:$0xff]  }
 0xcd7   : > { %v17680_v50 = vmul.f32 %v4780_v46, %v17479_v17  ;;  %v4781_v51 = vadd.f32 %v4753_v47, %v17647_v16  ;;  %v15565_v46 = vld [vmem:[#allocation18 + $0x1b0] sm:$0xff]   ;;  %v15595_v47 = vld [vmem:[#allocation20 + $0x60] sm:$0xff]  }
 0xcd8   : > { %4798 = vst [vmem:[#allocation2 + $0x18] sm:$0xff] %v17676_v48  ;;  %v17685_v52 = vmul.f32 %v4783_v49, %v17486_v24  ;;  %v15566_v49 = vld [vmem:[#allocation18 + $0x1b8] sm:$0xff]  }
 0xcd9   : > { %4796 = vst [vmem:[#allocation2 + $0x8] sm:$0xff] %v17680_v50  ;;  %v17689_v11 = vmul.f32 %v4781_v51, %v17484_v20  ;;  %v13750_v44 = vpop.f32.mrb[52].mxu0  ;;  %13875 = vmatpush3.bf16.msra.mxu1 %v15592_v23  ;;  %v15596_v51 = vld [vmem:[#allocation20 + $0x68] sm:$0xff]  }
 0xcda   : > { %4799 = vst [vmem:[#allocation2 + $0x20] sm:$0xff] %v17685_v52  ;;  %v4774_v53 = vadd.f32 %v13750_v44, %v12082_v32  ;;  %v4765_v14 = vpop.f32.mrb[53].mxu0  ;;  %13876 = vmatprep.subr.bf16.mxu1 %v15593_v36  ;;  %v15567_v44 = vld [vmem:[#allocation18 + $0x1c0] sm:$0xff]  }
 0xcdb   : > { %4797 = vst [vmem:[#allocation2 + $0x10] sm:$0xff] %v17689_v11  ;;  %v4766_v54 = vadd.f32 %v12082_v32, %v4765_v14  ;;  %v13751_v56 = vpop.f32.mrb[54].mxu0 }
 0xcdc   : > { %v4786_v16 = vadd.f32 %v4774_v53, %v17651_v5  ;;  %v4777_v57 = vadd.f32 %v13751_v56, %v12082_v32  ;;  %v4768_v58 = vpop.f32.mrb[55].mxu0 }
 0xcdd   : > { %v4784_v60 = vadd.f32 %v4766_v54, %v17653_v62  ;;  %v4769_v9 = vadd.f32 %v12082_v32, %v4768_v58  ;;  %13877 = vmatpush3.bf16.msra.mxu1 %v15593_v36  ;;  %v15578_v36 = vld [vmem:[#allocation18 + $0x218] sm:$0xff]  }
 0xcde   : > { %v17696_v41 = vmul.f32 %v4786_v16, %v17508_v55  ;;  %v4787_v12 = vadd.f32 %v4777_v57, %v17656_v6  ;;  %13878 = vmatprep.subr.bf16.mxu1 %v15594_v40  ;;  %v15568_v57 = vld [vmem:[#allocation18 + $0x1c8] sm:$0xff]  }
 0xcdf   : > { %v17700_v13 = vmul.f32 %v4784_v60, %v17491_v37  ;;  %v4785_v15 = vadd.f32 %v4769_v9, %v17659_v8  ;;  %v15569_v60 = vld [vmem:[#allocation18 + $0x1d0] sm:$0xff]  }
 0xce0   : > { %4802 = vst [vmem:[#allocation2 + $0x38] sm:$0xff] %v17696_v41  ;;  %v17705_v19 = vmul.f32 %v4787_v12, %v17514_v61  ;;  %v4806_v6 = vld [vmem:[#allocation2 + $0x4] sm:$0xff] }
 0xce1   : > { %4800 = vst [vmem:[#allocation2 + $0x28] sm:$0xff] %v17700_v13  ;;  %v17709_v5 = vmul.f32 %v4785_v15, %v17500_v43  ;;  %v17711_v62 = vld [vmem:[#allocation2 + $0x1c] sm:$0xff]  ;;  %13879 = vmatpush3.bf16.msra.mxu1 %v15594_v40 }
 0xce2   : > { %4803 = vst [vmem:[#allocation2 + $0x40] sm:$0xff] %v17705_v19  ;;  %v17714_v22 = vld [vmem:[#allocation2 + $0xc] sm:$0xff]  ;;  %v17716_v0 = vld [vmem:[#allocation2 + $0x14] sm:$0xff]  ;;  %13880 = vmatprep.subr.bf16.mxu1 %v15595_v47  ;;  %v4965_v14 = vld [vmem:[#allocation2 + $0x1e] sm:$0xff] }
 0xce3   : > { %4801 = vst [vmem:[#allocation2 + $0x30] sm:$0xff] %v17709_v5  ;;  %v4814_v8 = vpack.c.bf16 %v17714_v22, %v4806_v6  ;;  %v4815_v25 = vpack.c.bf16 %v17711_v62, %v17716_v0  ;;  %v4963_v27 = vld [vmem:[#allocation2 + $0xe] sm:$0xff]  ;;  %v4964_v53 = vld [vmem:[#allocation2 + $0x16] sm:$0xff] }
 0xce4   : > { %v4971_v56 = vpack.c.bf16 %v4965_v14, %v4964_v53  ;;  %v15570_v6 = vld [vmem:[#allocation18 + $0x1d8] sm:$0xff]   ;;  %v15579_v40 = vld [vmem:[#allocation18 + $0x220] sm:$0xff]  }
 0xce5   : > { %13768 = vmatprep.mubr.bf16.mxu0 %v4814_v8  ;;  %13881 = vmatpush3.bf16.msra.mxu1 %v15595_v47  ;;  %v5120_v8 = vpack.c.bf16 %v17689_v11, %v17680_v50  ;;  %v5262_v35 = vld [vmem:[#allocation2 + $0xa] sm:$0xff]  ;;  %v5263_v23 = vld [vmem:[#allocation2 + $0x12] sm:$0xff] }
 0xce6   : > { %13769 = vmatmul.mubr.bf16.vlgmr.msra.gmra.mrb[56].mxu0 %v4815_v25  ;;  %13882 = vmatprep.subr.bf16.mxu1 %v15596_v51  ;;  %v15571_v25 = vld [vmem:[#allocation18 + $0x1e0] sm:$0xff]   ;;  %v15581_v47 = vld [vmem:[#allocation18 + $0x230] sm:$0xff]  }
 0xce7   : > { %13777 = vmatpush3.bf16.msra.mxu0 %v15559_v10  ;;  %v4962_v10 = vld [vmem:[#allocation2 + $0x6] sm:$0xff] }
 0xce8   : > { %13778 = vmatprep.subr.bf16.mxu0 %v15560_v26  ;;  %v17724_v28 = vld [vmem:[#allocation2 + $0x24] sm:$0xff]  ;;  %v4970_v21 = vpack.c.bf16 %v4963_v27, %v4962_v10  ;;  %v15574_v27 = vld [vmem:[#allocation18 + $0x1f8] sm:$0xff]  }
 0xce9   : > { %v17722_v2 = vld [vmem:[#allocation2 + $0x3c] sm:$0xff]  ;;  %v4966_v16 = vld [vmem:[#allocation2 + $0x26] sm:$0xff]  ;;  %13883 = vmatpush3.bf16.msra.mxu1 %v15596_v51 }
 0xcea   : > { %v17726_v29 = vld [vmem:[#allocation2 + $0x2c] sm:$0xff]  ;;  %v17728_v30 = vld [vmem:[#allocation2 + $0x34] sm:$0xff]  ;;  %v4969_v12 = vld [vmem:[#allocation2 + $0x3e] sm:$0xff] }
 0xceb   : > { %13779 = vmatpush3.bf16.msra.mxu0 %v15560_v26  ;;  %v4816_v31 = vpack.c.bf16 %v17726_v29, %v17724_v28  ;;  %v4817_v32 = vpack.c.bf16 %v17722_v2, %v17728_v30  ;;  %v4967_v54 = vld [vmem:[#allocation2 + $0x2e] sm:$0xff]  ;;  %v4968_v9 = vld [vmem:[#allocation2 + $0x36] sm:$0xff]  ;;  %v15572_v26 = vld [vmem:[#allocation18 + $0x1e8] sm:$0xff]  }
 0xcec   : > { %13780 = vmatprep.subr.bf16.mxu0 %v15561_v34  ;;  %v4972_v58 = vpack.c.bf16 %v4967_v54, %v4966_v16  ;;  %v4973_v15 = vpack.c.bf16 %v4969_v12, %v4968_v9  ;;  %v15576_v10 = vld [vmem:[#allocation18 + $0x208] sm:$0xff]   ;;  %v15583_v51 = vld [vmem:[#allocation18 + $0x240] sm:$0xff]   ;;  %v5266_v53 = vld [vmem:[#allocation2 + $0x2a] sm:$0xff] }
 0xced   : > { %13772 = vmatprep.mubr.bf16.mxu0 %v4816_v31  ;;  %v15575_v31 = vld [vmem:[#allocation18 + $0x200] sm:$0xff]   ;;  %v15584_v16 = vld [vmem:[#allocation18 + $0x248] sm:$0xff]  }
 0xcee   : > { %13773 = vmatmul.mubr.bf16.gmra.mrb[60].mxu0 %v4817_v32  ;;  %v5121_v32 = vpack.c.bf16 %v17685_v52, %v17676_v48  ;;  %v5267_v14 = vld [vmem:[#allocation2 + $0x32] sm:$0xff]  ;;  %v5264_v54 = vld [vmem:[#allocation2 + $0x1a] sm:$0xff]  ;;  %v5269_v9 = vld [vmem:[#allocation2 + $0x42] sm:$0xff] }
 0xcef   : > { %13781 = vmatpush3.bf16.msra.mxu0 %v15561_v34  ;;  %13792 = vmatprep.mubr.bf16.mxu0 %v4970_v21  ;;  %v15573_v34 = vld [vmem:[#allocation18 + $0x1f0] sm:$0xff]  }
 0xcf0   : > { %13782 = vmatprep.subr.bf16.mxu0 %v15562_v33  ;;  %v15577_v21 = vld [vmem:[#allocation18 + $0x210] sm:$0xff]  }
 0xcf3   : > { %13783 = vmatpush3.bf16.msra.mxu0 %v15562_v33  ;;  %v5122_v33 = vpack.c.bf16 %v17709_v5, %v17700_v13 }
 0xcf4   : > { %13784 = vmatprep.subr.bf16.mxu0 %v15563_v59 }
 0xcf7   : > { %13785 = vmatpush3.bf16.msra.mxu0 %v15563_v59  ;;  %v5123_v59 = vpack.c.bf16 %v17705_v19, %v17696_v41 }
 0xcf8   : > { %13786 = vmatprep.subr.bf16.mxu0 %v15564_v39 }
 0xcfb   : > { %13787 = vmatpush3.bf16.msra.mxu0 %v15564_v39  ;;  %v5270_v39 = vpack.c.bf16 %v5263_v23, %v5262_v35 }
 0xcfc   : > { %13788 = vmatprep.subr.bf16.mxu0 %v15565_v46 }
 0xcff   : > { %13789 = vmatpush3.bf16.msra.mxu0 %v15565_v46  ;;  %v15580_v46 = vld [vmem:[#allocation18 + $0x228] sm:$0xff]  }
 0xd00   : > { %13790 = vmatprep.subr.bf16.mxu0 %v15566_v49 }
 0xd03   : > { %13791 = vmatpush3.bf16.msra.mxu0 %v15566_v49  ;;  %v15582_v49 = vld [vmem:[#allocation18 + $0x238] sm:$0xff]  }
 0xd04   : > { %13800 = vmatprep.subr.bf16.mxu0 %v15567_v44 }
 0xd06   : > { %13793 = vmatmul.mubr.bf16.vlgmr.msra.gmra.mrb[56].mxu0 %v4971_v56 }
 0xd07   : > { %13796 = vmatprep.mubr.bf16.mxu0 %v4972_v58  ;;  %13801 = vmatpush3.bf16.msra.mxu0 %v15567_v44  ;;  %v5265_v44 = vld [vmem:[#allocation2 + $0x22] sm:$0xff] }
 0xd08   : > { %13802 = vmatprep.subr.bf16.mxu0 %v15568_v57  ;;  %v5271_v56 = vpack.c.bf16 %v5265_v44, %v5264_v54  ;;  %v15585_v58 = vld [vmem:[#allocation18 + $0x250] sm:$0xff]  }
 0xd0b   : > { %13803 = vmatpush3.bf16.msra.mxu0 %v15568_v57  ;;  %v5272_v57 = vpack.c.bf16 %v5267_v14, %v5266_v53  ;;  %v15600_v14 = vld [vmem:[#allocation18 + $0x288] sm:$0xff]  }
 0xd0c   : > { %13804 = vmatprep.subr.bf16.mxu0 %v15569_v60 }
 0xd0e   : > { %13797 = vmatmul.mubr.bf16.gmra.mrb[60].mxu0 %v4973_v15  ;;  %v15586_v15 = vld [vmem:[#allocation18 + $0x258] sm:$0xff]  }
 0xd0f   : > { %13805 = vmatpush3.bf16.msra.mxu0 %v15569_v60  ;;  %13816 = vmatprep.mubr.bf16.mxu0 %v5120_v8  ;;  %v5268_v60 = vld [vmem:[#allocation2 + $0x3a] sm:$0xff] }
 0xd10   : > { %13806 = vmatprep.subr.bf16.mxu0 %v15570_v6  ;;  %v5273_v12 = vpack.c.bf16 %v5269_v9, %v5268_v60  ;;  %v15587_v8 = vld [vmem:[#allocation18 + $0x260] sm:$0xff]  }
 0xd13   : > { %13807 = vmatpush3.bf16.msra.mxu0 %v15570_v6  ;;  %v5420_v6 = vpack.c.bf16 %v17716_v0, %v17714_v22  ;;  %v5421_v22 = vpack.c.bf16 %v17724_v28, %v17711_v62  ;;  %v5422_v0 = vpack.c.bf16 %v17728_v30, %v17726_v29 }
 0xd14   : > { %13808 = vmatprep.subr.bf16.mxu0 %v15571_v25 }
 0xd17   : > { %13809 = vmatpush3.bf16.msra.mxu0 %v15571_v25  ;;  %v15588_v25 = vld [vmem:[#allocation18 + $0x268] sm:$0xff]  }
 0xd18   : > { %13810 = vmatprep.subr.bf16.mxu0 %v15572_v26 }
 0xd1b   : > { %13811 = vmatpush3.bf16.msra.mxu0 %v15572_v26  ;;  %v15589_v26 = vld [vmem:[#allocation18 + $0x270] sm:$0xff]  }
 0xd1c   : > { %13812 = vmatprep.subr.bf16.mxu0 %v15573_v34 }
 0xd1f   : > { %13813 = vmatpush3.bf16.msra.mxu0 %v15573_v34  ;;  %v15590_v34 = vld [vmem:[#allocation18 + $0x278] sm:$0xff]  }
 0xd20   : > { %13814 = vmatprep.subr.bf16.mxu0 %v15574_v27 }
 0xd23   : > { %13815 = vmatpush3.bf16.msra.mxu0 %v15574_v27  ;;  %v5419_v27 = vld [vmem:[#allocation2 + $0x44] sm:$0xff] }
 0xd24   : > { %13824 = vmatprep.subr.bf16.mxu0 %v15575_v31 }
 0xd26   : > { %13817 = vmatmul.mubr.bf16.vlgmr.msra.gmra.mrb[56].mxu0 %v5121_v32  ;;  %v15597_v32 = vld [vmem:[#allocation20 + $0x70] sm:$0xff]  }
 0xd27   : > { %13820 = vmatprep.mubr.bf16.mxu0 %v5122_v33  ;;  %13825 = vmatpush3.bf16.msra.mxu0 %v15575_v31  ;;  %v5423_v31 = vpack.c.bf16 %v5419_v27, %v17722_v2  ;;  %v15599_v33 = vld [vmem:[#allocation18 + $0x280] sm:$0xff]   ;;  %v15606_v27 = vld [vmem:[#allocation18 + $0x2b8] sm:$0xff]  }
 0xd28   : > { %13826 = vmatprep.subr.bf16.mxu0 %v15576_v10  ;;  %13884 = vmatprep.subr.bf16.mxu1 %v15597_v32 }
 0xd29   : > { %13885 = vmatpush3.bf16.msra.mxu1 %v15597_v32  ;;  %v12134_v32 = vld [vmem:[%s18632_s15 + $0x1] ss:$0 sm:$0xff] }
 0xd2b   : > { %13827 = vmatpush3.bf16.msra.mxu0 %v15576_v10  ;;  %v15598_v10 = vld [vmem:[#allocation20 + $0x78] sm:$0xff]  }
 0xd2c   : > { %13828 = vmatprep.subr.bf16.mxu0 %v15577_v21  ;;  %13886 = vmatprep.subr.bf16.mxu1 %v15598_v10 }
 0xd2d   : > { %13887 = vmatpush3.bf16.msra.mxu1 %v15598_v10 }
 0xd2e   : > { %13821 = vmatmul.mubr.bf16.gmra.mrb[60].mxu0 %v5123_v59  ;;  %13896 = vmatprep.subr.bf16.mxu1 %v15599_v33 }
 0xd2f   : > { %13829 = vmatpush3.bf16.msra.mxu0 %v15577_v21  ;;  %13840 = vmatprep.mubr.bf16.mxu0 %v5270_v39  ;;  %v12100_v21 = vld [vmem:[%s18631_s20 + $0x1] ss:$0 sm:$0xff] }
 0xd30   : > { %13830 = vmatprep.subr.bf16.mxu0 %v15578_v36 }
 0xd33   : > { %13831 = vmatpush3.bf16.msra.mxu0 %v15578_v36 }
 0xd34   : > { %13832 = vmatprep.subr.bf16.mxu0 %v15579_v40 }
 0xd37   : > { %13833 = vmatpush3.bf16.msra.mxu0 %v15579_v40 }
 0xd38   : > { %13834 = vmatprep.subr.bf16.mxu0 %v15580_v46 }
 0xd3b   : > { %13835 = vmatpush3.bf16.msra.mxu0 %v15580_v46 }
 0xd3c   : > { %13836 = vmatprep.subr.bf16.mxu0 %v15581_v47 }
 0xd3f   : > { %13837 = vmatpush3.bf16.msra.mxu0 %v15581_v47 }
 0xd40   : > { %13838 = vmatprep.subr.bf16.mxu0 %v15582_v49 }
 0xd43   : > { %13839 = vmatpush3.bf16.msra.mxu0 %v15582_v49 }
 0xd44   : > { %13848 = vmatprep.subr.bf16.mxu0 %v15583_v51 }
 0xd46   : > { %13841 = vmatmul.mubr.bf16.vlgmr.msra.gmra.mrb[56].mxu0 %v5271_v56 }
 0xd47   : > { %13844 = vmatprep.mubr.bf16.mxu0 %v5272_v57  ;;  %13849 = vmatpush3.bf16.msra.mxu0 %v15583_v51 }
 0xd48   : > { %13850 = vmatprep.subr.bf16.mxu0 %v15584_v16 }
 0xd4b   : > { %13851 = vmatpush3.bf16.msra.mxu0 %v15584_v16 }
 0xd4c   : > { %13852 = vmatprep.subr.bf16.mxu0 %v15585_v58 }
 0xd4e   : > { %13845 = vmatmul.mubr.bf16.gmra.mrb[60].mxu0 %v5273_v12  ;;  %v15601_v12 = vld [vmem:[#allocation18 + $0x290] sm:$0xff]  }
 0xd4f   : > { %13853 = vmatpush3.bf16.msra.mxu0 %v15585_v58  ;;  %13864 = vmatprep.mubr.bf16.mxu0 %v5420_v6 }
 0xd50   : > { %13854 = vmatprep.subr.bf16.mxu0 %v15586_v15 }
 0xd53   : > { %13855 = vmatpush3.bf16.msra.mxu0 %v15586_v15 }
 0xd54   : > { %13856 = vmatprep.subr.bf16.mxu0 %v15587_v8 }
 0xd57   : > { %13857 = vmatpush3.bf16.msra.mxu0 %v15587_v8 }
 0xd58   : > { %13858 = vmatprep.subr.bf16.mxu0 %v15588_v25 }
 0xd5b   : > { %13859 = vmatpush3.bf16.msra.mxu0 %v15588_v25 }
 0xd5c   : > { %13860 = vmatprep.subr.bf16.mxu0 %v15589_v26 }
 0xd5f   : > { %13861 = vmatpush3.bf16.msra.mxu0 %v15589_v26  ;;  %v15602_v26 = vld [vmem:[#allocation18 + $0x298] sm:$0xff]  }
 0xd60   : > { %13862 = vmatprep.subr.bf16.mxu0 %v15590_v34 }
 0xd63   : > { %13863 = vmatpush3.bf16.msra.mxu0 %v15590_v34  ;;  %v15603_v34 = vld [vmem:[#allocation18 + $0x2a0] sm:$0xff]  }
 0xd66   : > { %13865 = vmatmul.mubr.bf16.vlgmr.msra.gmra.mrb[56].mxu0 %v5421_v22  ;;  %v15604_v22 = vld [vmem:[#allocation18 + $0x2a8] sm:$0xff]  }
 0xd67   : > { %13868 = vmatprep.mubr.bf16.mxu0 %v5422_v0  ;;  %v15605_v0 = vld [vmem:[#allocation18 + $0x2b0] sm:$0xff]  }
 0xd6e   : > { %13869 = vmatmul.mubr.bf16.gmra.mrb[60].mxu0 %v5423_v31  ;;  %v15607_v31 = vld [vmem:[#allocation18 + $0x2c0] sm:$0xff]  }
 0xe39   : > { %v13866_v35 = vpop.f32.mrb[56].mxu0 }
 0xe3a   : > { %v14768_v62 = vadd.f32 %v13866_v35, %v12100_v21  ;;  %v5523_v28 = vpop.f32.mrb[57].mxu0 }
 0xe3b   : > { %v14769_v23 = vadd.f32 %v12100_v21, %v5523_v28  ;;  %v13867_v29 = vpop.f32.mrb[58].mxu0 }
 0xe3c   : > { %v14770_v30 = vadd.f32 %v13867_v29, %v12100_v21  ;;  %v5526_v59 = vpop.f32.mrb[59].mxu0  ;;  %v5564_v39 = vmax.f32 %v14768_v62, 0.0 }
 0xe3d   : > { %v14771_v36 = vadd.f32 %v12100_v21, %v5526_v59  ;;  %v5562_v40 = vmax.f32 %v14769_v23, 0.0 }
 0xe3e   : > { %v5565_v2 = vmax.f32 %v14770_v30, 0.0 }
 0xe3f   : > { %v5563_v46 = vmax.f32 %v14771_v36, 0.0 }
 0xe40   : > { %v5571_v47 = vpack.c.bf16 %v5565_v2, %v5564_v39 }
 0xe41   : > { %v5570_v49 = vpack.c.bf16 %v5563_v46, %v5562_v40  ;;  %v13870_v51 = vpop.f32.mrb[60].mxu0 }
 0xe42   : > { %v14772_v44 = vadd.f32 %v13870_v51, %v12100_v21  ;;  %v5539_v53 = vpop.f32.mrb[61].mxu0 }
 0xe43   : > { %v14773_v54 = vadd.f32 %v12100_v21, %v5539_v53  ;;  %v13871_v56 = vpop.f32.mrb[62].mxu0  ;;  %13888 = vmatprep.mubr.bf16.mxu1 %v5570_v49 }
 0xe44   : > { %v14774_v16 = vadd.f32 %v13871_v56, %v12100_v21  ;;  %v5542_v57 = vpop.f32.mrb[63].mxu0  ;;  %13889 = vmatmul.mubr.bf16.vlgmr.msra.gmra.mrb[32].mxu1 %v5571_v47  ;;  %v5568_v60 = vmax.f32 %v14772_v44, 0.0  ;;  %v17769_v47 = vld [vmem:[#allocation2] sm:$0xff] }
 0xe45   : > { %v14775_v58 = vadd.f32 %v12100_v21, %v5542_v57  ;;  %13897 = vmatpush3.bf16.msra.mxu1 %v15599_v33  ;;  %v5566_v15 = vmax.f32 %v14773_v54, 0.0 }
 0xe46   : > { %v5569_v9 = vmax.f32 %v14774_v16, 0.0  ;;  %13898 = vmatprep.subr.bf16.mxu1 %v15600_v14 }
 0xe47   : > { %v5567_v6 = vmax.f32 %v14775_v58, 0.0 }
 0xe48   : > { %v5573_v8 = vpack.c.bf16 %v5569_v9, %v5568_v60 }
 0xe49   : > { %v5572_v25 = vpack.c.bf16 %v5567_v6, %v5566_v15  ;;  %13899 = vmatpush3.bf16.msra.mxu1 %v15600_v14  ;;  %v15608_v14 = vld [vmem:[#allocation18 + $0x2c8] sm:$0xff]  }
 0xe4a   : > { %13900 = vmatprep.subr.bf16.mxu1 %v15601_v12 }
 0xe4b   : > { %13892 = vmatprep.mubr.bf16.mxu1 %v5572_v25 }
 0xe4c   : > { %13893 = vmatmul.mubr.bf16.gmra.mrb[36].mxu1 %v5573_v8 }
 0xe4d   : > { %13901 = vmatpush3.bf16.msra.mxu1 %v15601_v12 }
 0xe4e   : > { %13902 = vmatprep.subr.bf16.mxu1 %v15602_v26 }
 0xe51   : > { %13903 = vmatpush3.bf16.msra.mxu1 %v15602_v26 }
 0xe52   : > { %13904 = vmatprep.subr.bf16.mxu1 %v15603_v34 }
 0xe55   : > { %13905 = vmatpush3.bf16.msra.mxu1 %v15603_v34  ;;  %v15610_v34 = vld [vmem:[#allocation18 + $0x2d8] sm:$0xff]  }
 0xe56   : > { %13906 = vmatprep.subr.bf16.mxu1 %v15604_v22 }
 0xe59   : > { %13907 = vmatpush3.bf16.msra.mxu1 %v15604_v22  ;;  %v15639_v22 = vld [vmem:[#allocation20 + $0x80] sm:$0xff]  }
 0xe5a   : > { %13908 = vmatprep.subr.bf16.mxu1 %v15605_v0  ;;  %14016 = vmatprep.subr.bf16.mxu0 %v15639_v22 }
 0xe5b   : > { %14017 = vmatpush3.bf16.msra.mxu0 %v15639_v22 }
 0xe5d   : > { %13909 = vmatpush3.bf16.msra.mxu1 %v15605_v0  ;;  %v15640_v0 = vld [vmem:[#allocation20 + $0x88] sm:$0xff]  }
 0xe5e   : > { %13910 = vmatprep.subr.bf16.mxu1 %v15606_v27  ;;  %14018 = vmatprep.subr.bf16.mxu0 %v15640_v0 }
 0xe5f   : > { %14019 = vmatpush3.bf16.msra.mxu0 %v15640_v0  ;;  %v15627_v0 = vld [vmem:[#allocation18 + $0x360] sm:$0xff]  }
 0xe61   : > { %13911 = vmatpush3.bf16.msra.mxu1 %v15606_v27  ;;  %v15611_v27 = vld [vmem:[#allocation18 + $0x2e0] sm:$0xff]  }
 0xe62   : > { %13920 = vmatprep.subr.bf16.mxu1 %v15607_v31 }
 0xf17   : > { %v13890_v10 = vpop.f32.mrb[32].mxu1 }
 0xf18   : > { %v5690_v33 = vadd.f32 %v13890_v10, %v12134_v32  ;;  %v5681_v21 = vpop.f32.mrb[33].mxu1  ;;  %v15642_v10 = vld [vmem:[#allocation20 + $0x98] sm:$0xff]  }
 0xf19   : > { %v5682_v35 = vadd.f32 %v12134_v32, %v5681_v21  ;;  %v13891_v62 = vpop.f32.mrb[34].mxu1  ;;  %v15643_v21 = vld [vmem:[#allocation20 + $0xa0] sm:$0xff]  }
 0xf1a   : > { %v5714_v28 = vadd.f32 %v5690_v33, %v17676_v48  ;;  %v5693_v23 = vadd.f32 %v13891_v62, %v12134_v32  ;;  %v5684_v29 = vpop.f32.mrb[35].mxu1  ;;  %v15613_v33 = vld [vmem:[#allocation18 + $0x2f0] sm:$0xff]   ;;  %v15644_v62 = vld [vmem:[#allocation20 + $0xa8] sm:$0xff]  }
 0xf1b   : > { %v5712_v30 = vadd.f32 %v5682_v35, %v17680_v50  ;;  %v5685_v59 = vadd.f32 %v12134_v32, %v5684_v29  ;;  %v15614_v35 = vld [vmem:[#allocation18 + $0x2f8] sm:$0xff]  }
 0xf1c   : > { %v17754_v36 = vmul.f32 %v5714_v28, %v17481_v18  ;;  %v5715_v39 = vadd.f32 %v5693_v23, %v17685_v52  ;;  %v15615_v28 = vld [vmem:[#allocation18 + $0x300] sm:$0xff]  }
 0xf1d   : > { %v17758_v2 = vmul.f32 %v5712_v30, %v17479_v17  ;;  %v5713_v40 = vadd.f32 %v5685_v59, %v17689_v11 }
 0xf1e   : > { %5730 = vst [vmem:[#allocation2 + $0x18] sm:$0xff] %v17754_v36  ;;  %v17763_v46 = vmul.f32 %v5715_v39, %v17486_v24 }
 0xf1f   : > { %5728 = vst [vmem:[#allocation2 + $0x8] sm:$0xff] %v17758_v2  ;;  %v17767_v48 = vmul.f32 %v5713_v40, %v17484_v20  ;;  %v13894_v50 = vpop.f32.mrb[36].mxu1  ;;  %v5746_v52 = vpack.c.bf16 %v17758_v2, %v17769_v47  ;;  %v15616_v40 = vld [vmem:[#allocation18 + $0x308] sm:$0xff]  }
 0xf20   : > { %5731 = vst [vmem:[#allocation2 + $0x20] sm:$0xff] %v17763_v46  ;;  %v5706_v49 = vadd.f32 %v13894_v50, %v12134_v32  ;;  %v5697_v11 = vpop.f32.mrb[37].mxu1 }
 0xf21   : > { %5729 = vst [vmem:[#allocation2 + $0x10] sm:$0xff] %v17767_v48  ;;  %v5698_v51 = vadd.f32 %v12134_v32, %v5697_v11  ;;  %v13895_v44 = vpop.f32.mrb[38].mxu1  ;;  %13912 = vmatprep.mubr.bf16.mxu1 %v5746_v52  ;;  %v17777_v53 = vpack.c.bf16 %v17754_v36, %v17767_v48  ;;  %v15617_v52 = vld [vmem:[#allocation18 + $0x310] sm:$0xff]  }
 0xf22   : > { %v5718_v54 = vadd.f32 %v5706_v49, %v17696_v41  ;;  %v5709_v56 = vadd.f32 %v13895_v44, %v12134_v32  ;;  %v5700_v16 = vpop.f32.mrb[39].mxu1  ;;  %v15609_v41 = vld [vmem:[#allocation18 + $0x2d0] sm:$0xff]   ;;  %v15618_v44 = vld [vmem:[#allocation18 + $0x318] sm:$0xff]  }
 0xf23   : > { %v5716_v57 = vadd.f32 %v5698_v51, %v17700_v13  ;;  %v5701_v58 = vadd.f32 %v12134_v32, %v5700_v16  ;;  %13913 = vmatmul.mubr.bf16.vlgmr.msra.gmra.mrb[40].mxu1 %v17777_v53  ;;  %v15612_v32 = vld [vmem:[#allocation18 + $0x2e8] sm:$0xff]   ;;  %v15621_v16 = vld [vmem:[#allocation18 + $0x330] sm:$0xff]  }
 0xf24   : > { %v17783_v60 = vmul.f32 %v5718_v54, %v17508_v55  ;;  %v5719_v9 = vadd.f32 %v5709_v56, %v17705_v19  ;;  %13921 = vmatpush3.bf16.msra.mxu1 %v15607_v31  ;;  %v15641_v31 = vld [vmem:[#allocation20 + $0x90] sm:$0xff]   ;;  %v15619_v54 = vld [vmem:[#allocation18 + $0x320] sm:$0xff]   ;;  %v15620_v56 = vld [vmem:[#allocation18 + $0x328] sm:$0xff]  }
 0xf25   : > { %v17787_v12 = vmul.f32 %v5716_v57, %v17491_v37  ;;  %v5717_v15 = vadd.f32 %v5701_v58, %v17709_v5  ;;  %13922 = vmatprep.subr.bf16.mxu1 %v15608_v14  ;;  %14020 = vmatprep.subr.bf16.mxu0 %v15641_v31  ;;  %v15622_v57 = vld [vmem:[#allocation18 + $0x338] sm:$0xff]   ;;  %v15623_v58 = vld [vmem:[#allocation18 + $0x340] sm:$0xff]  }
 0xf26   : > { %5734 = vst [vmem:[#allocation2 + $0x38] sm:$0xff] %v17783_v60  ;;  %v17792_v13 = vmul.f32 %v5719_v9, %v17514_v61  ;;  %v5894_v5 = vld [vmem:[#allocation2 + $0x4] sm:$0xff]  ;;  %14021 = vmatpush3.bf16.msra.mxu0 %v15641_v31  ;;  %v6053_v9 = vpack.c.bf16 %v17763_v46, %v17754_v36 }
 0xf27   : > { %5732 = vst [vmem:[#allocation2 + $0x28] sm:$0xff] %v17787_v12  ;;  %v17796_v6 = vmul.f32 %v5717_v15, %v17500_v43  ;;  %v17800_v19 = vpack.c.bf16 %v17787_v12, %v17763_v46  ;;  %14022 = vmatprep.subr.bf16.mxu0 %v15642_v10  ;;  %v17813_v29 = vld [vmem:[#allocation2 + $0x1c] sm:$0xff]  ;;  %v15629_v31 = vld [vmem:[#allocation18 + $0x370] sm:$0xff]  }
 0xf28   : > { %5735 = vst [vmem:[#allocation2 + $0x40] sm:$0xff] %v17792_v13  ;;  %13923 = vmatpush3.bf16.msra.mxu1 %v15608_v14  ;;  %v17803_v8 = vld [vmem:[#allocation2 + $0xc] sm:$0xff]  ;;  %v5896_v23 = vld [vmem:[#allocation2 + $0x14] sm:$0xff]  ;;  %v6052_v14 = vpack.c.bf16 %v17767_v48, %v17758_v2  ;;  %v15624_v15 = vld [vmem:[#allocation18 + $0x348] sm:$0xff]  }
 0xf29   : > { %5733 = vst [vmem:[#allocation2 + $0x30] sm:$0xff] %v17796_v6  ;;  %13916 = vmatprep.mubr.bf16.mxu1 %v17800_v19  ;;  %13924 = vmatprep.subr.bf16.mxu1 %v15609_v41  ;;  %v17809_v25 = vpack.c.bf16 %v17783_v60, %v17796_v6  ;;  %v5902_v26 = vpack.c.bf16 %v17803_v8, %v5894_v5  ;;  %v15625_v5 = vld [vmem:[#allocation18 + $0x350] sm:$0xff]  }
 0xf2a   : > { %14023 = vmatpush3.bf16.msra.mxu0 %v15642_v10  ;;  %v5903_v59 = vpack.c.bf16 %v17813_v29, %v5896_v23  ;;  %v6202_v22 = vpack.c.bf16 %v5896_v23, %v17803_v8  ;;  %v15631_v10 = vld [vmem:[#allocation18 + $0x380] sm:$0xff]   ;;  %v15634_v23 = vld [vmem:[#allocation18 + $0x398] sm:$0xff]  }
 0xf2b   : > { %13917 = vmatmul.mubr.bf16.gmra.mrb[44].mxu1 %v17809_v25  ;;  %14024 = vmatprep.subr.bf16.mxu0 %v15643_v21 }
 0xf2c   : > { %13925 = vmatpush3.bf16.msra.mxu1 %v15609_v41  ;;  %13936 = vmatprep.mubr.bf16.mxu1 %v5902_v26  ;;  %v6054_v41 = vpack.c.bf16 %v17796_v6, %v17787_v12  ;;  %v6055_v26 = vpack.c.bf16 %v17792_v13, %v17783_v60 }
 0xf2d   : > { %13926 = vmatprep.subr.bf16.mxu1 %v15610_v34 }
 0xf2e   : > { %14025 = vmatpush3.bf16.msra.mxu0 %v15643_v21  ;;  %v17818_v39 = vld [vmem:[#allocation2 + $0x24] sm:$0xff] }
 0xf2f   : > { %14026 = vmatprep.subr.bf16.mxu0 %v15644_v62  ;;  %v17822_v11 = vld [vmem:[#allocation2 + $0x3c] sm:$0xff]  ;;  %v6203_v8 = vpack.c.bf16 %v17818_v39, %v17813_v29 }
 0xf30   : > { %13927 = vmatpush3.bf16.msra.mxu1 %v15610_v34  ;;  %v17815_v30 = vld [vmem:[#allocation2 + $0x2c] sm:$0xff]  ;;  %v5900_v49 = vld [vmem:[#allocation2 + $0x34] sm:$0xff] }
 0xf31   : > { %13928 = vmatprep.subr.bf16.mxu1 %v15611_v27  ;;  %v5904_v50 = vpack.c.bf16 %v17815_v30, %v17818_v39  ;;  %v5905_v51 = vpack.c.bf16 %v17822_v11, %v5900_v49  ;;  %v15626_v34 = vld [vmem:[#allocation18 + $0x358] sm:$0xff]   ;;  %v6204_v21 = vpack.c.bf16 %v5900_v49, %v17815_v30  ;;  %v15635_v29 = vld [vmem:[#allocation18 + $0x3a0] sm:$0xff]   ;;  %v15636_v30 = vld [vmem:[#allocation18 + $0x3a8] sm:$0xff]  }
 0xf32   : > { %14027 = vmatpush3.bf16.msra.mxu0 %v15644_v62  ;;  %v6201_v62 = vld [vmem:[#allocation2 + $0x44] sm:$0xff]  ;;  %v15638_v39 = vld [vmem:[#allocation18 + $0x3b8] sm:$0xff]   ;;  %v12152_v49 = vld [vmem:[%s18631_s20 + $0x2] ss:$0 sm:$0xff] }
 0xf34   : > { %13929 = vmatpush3.bf16.msra.mxu1 %v15611_v27  ;;  %v15628_v27 = vld [vmem:[#allocation18 + $0x368] sm:$0xff]  }
 0xf35   : > { %13930 = vmatprep.subr.bf16.mxu1 %v15612_v32 }
 0xf38   : > { %13931 = vmatpush3.bf16.msra.mxu1 %v15612_v32  ;;  %v15630_v32 = vld [vmem:[#allocation18 + $0x378] sm:$0xff]  }
 0xf39   : > { %13932 = vmatprep.subr.bf16.mxu1 %v15613_v33 }
 0xf3c   : > { %13933 = vmatpush3.bf16.msra.mxu1 %v15613_v33  ;;  %v15632_v33 = vld [vmem:[#allocation18 + $0x388] sm:$0xff]  }
 0xf3d   : > { %13934 = vmatprep.subr.bf16.mxu1 %v15614_v35 }
 0xf40   : > { %13935 = vmatpush3.bf16.msra.mxu1 %v15614_v35  ;;  %v15633_v35 = vld [vmem:[#allocation18 + $0x390] sm:$0xff]  }
 0xf41   : > { %13944 = vmatprep.subr.bf16.mxu1 %v15615_v28 }
 0xf43   : > { %13937 = vmatmul.mubr.bf16.vlgmr.msra.gmra.mrb[40].mxu1 %v5903_v59  ;;  %v15637_v59 = vld [vmem:[#allocation18 + $0x3b0] sm:$0xff]  }
 0xf44   : > { %13940 = vmatprep.mubr.bf16.mxu1 %v5904_v50  ;;  %13945 = vmatpush3.bf16.msra.mxu1 %v15615_v28  ;;  %v6205_v28 = vpack.c.bf16 %v6201_v62, %v17822_v11  ;;  %v15646_v50 = vld [vmem:[#allocation20 + $0xb8] sm:$0xff]  }
 0xf45   : > { %13946 = vmatprep.subr.bf16.mxu1 %v15616_v40 }
 0xf48   : > { %13947 = vmatpush3.bf16.msra.mxu1 %v15616_v40  ;;  %v15645_v40 = vld [vmem:[#allocation20 + $0xb0] sm:$0xff]  }
 0xf49   : > { %13948 = vmatprep.subr.bf16.mxu1 %v15617_v52  ;;  %14028 = vmatprep.subr.bf16.mxu0 %v15645_v40 }
 0xf4a   : > { %14029 = vmatpush3.bf16.msra.mxu0 %v15645_v40 }
 0xf4b   : > { %13941 = vmatmul.mubr.bf16.gmra.mrb[44].mxu1 %v5905_v51  ;;  %14030 = vmatprep.subr.bf16.mxu0 %v15646_v50 }
 0xf4c   : > { %13949 = vmatpush3.bf16.msra.mxu1 %v15617_v52  ;;  %13960 = vmatprep.mubr.bf16.mxu1 %v6052_v14  ;;  %v15647_v52 = vld [vmem:[#allocation21] sm:$0xff]  }
 0xf4d   : > { %13950 = vmatprep.subr.bf16.mxu1 %v15618_v44 }
 0xf4e   : > { %14031 = vmatpush3.bf16.msra.mxu0 %v15646_v50 }
 0xf4f   : > { %14040 = vmatprep.subr.bf16.mxu0 %v15647_v52 }
 0xf50   : > { %13951 = vmatpush3.bf16.msra.mxu1 %v15618_v44 }
 0xf51   : > { %13952 = vmatprep.subr.bf16.mxu1 %v15619_v54 }
 0xf54   : > { %13953 = vmatpush3.bf16.msra.mxu1 %v15619_v54 }
 0xf55   : > { %13954 = vmatprep.subr.bf16.mxu1 %v15620_v56 }
 0xf58   : > { %13955 = vmatpush3.bf16.msra.mxu1 %v15620_v56 }
 0xf59   : > { %13956 = vmatprep.subr.bf16.mxu1 %v15621_v16 }
 0xf5c   : > { %13957 = vmatpush3.bf16.msra.mxu1 %v15621_v16 }
 0xf5d   : > { %13958 = vmatprep.subr.bf16.mxu1 %v15622_v57 }
 0xf60   : > { %13959 = vmatpush3.bf16.msra.mxu1 %v15622_v57 }
 0xf61   : > { %13968 = vmatprep.subr.bf16.mxu1 %v15623_v58 }
 0xf63   : > { %13961 = vmatmul.mubr.bf16.vlgmr.msra.gmra.mrb[40].mxu1 %v6053_v9 }
 0xf64   : > { %13964 = vmatprep.mubr.bf16.mxu1 %v6054_v41  ;;  %13969 = vmatpush3.bf16.msra.mxu1 %v15623_v58 }
 0xf65   : > { %13970 = vmatprep.subr.bf16.mxu1 %v15624_v15 }
 0xf68   : > { %13971 = vmatpush3.bf16.msra.mxu1 %v15624_v15 }
 0xf69   : > { %13972 = vmatprep.subr.bf16.mxu1 %v15625_v5 }
 0xf6b   : > { %13965 = vmatmul.mubr.bf16.gmra.mrb[44].mxu1 %v6055_v26 }
 0xf6c   : > { %13973 = vmatpush3.bf16.msra.mxu1 %v15625_v5  ;;  %13984 = vmatprep.mubr.bf16.mxu1 %v6202_v22 }
 0xf6d   : > { %13974 = vmatprep.subr.bf16.mxu1 %v15626_v34 }
 0xf70   : > { %13975 = vmatpush3.bf16.msra.mxu1 %v15626_v34  ;;  %v15648_v34 = vld [vmem:[#allocation21 + $0x8] sm:$0xff]  }
 0xf71   : > { %13976 = vmatprep.subr.bf16.mxu1 %v15627_v0 }
 0xf74   : > { %13977 = vmatpush3.bf16.msra.mxu1 %v15627_v0 }
 0xf75   : > { %13978 = vmatprep.subr.bf16.mxu1 %v15628_v27 }
 0xf78   : > { %13979 = vmatpush3.bf16.msra.mxu1 %v15628_v27 }
 0xf79   : > { %13980 = vmatprep.subr.bf16.mxu1 %v15629_v31 }
 0xf7c   : > { %13981 = vmatpush3.bf16.msra.mxu1 %v15629_v31 }
 0xf7d   : > { %13982 = vmatprep.subr.bf16.mxu1 %v15630_v32 }
 0xf80   : > { %13983 = vmatpush3.bf16.msra.mxu1 %v15630_v32 }
 0xf81   : > { %13992 = vmatprep.subr.bf16.mxu1 %v15631_v10 }
 0xf83   : > { %13985 = vmatmul.mubr.bf16.vlgmr.msra.gmra.mrb[40].mxu1 %v6203_v8 }
 0xf84   : > { %13988 = vmatprep.mubr.bf16.mxu1 %v6204_v21  ;;  %13993 = vmatpush3.bf16.msra.mxu1 %v15631_v10 }
 0xf85   : > { %13994 = vmatprep.subr.bf16.mxu1 %v15632_v33 }
 0xf88   : > { %13995 = vmatpush3.bf16.msra.mxu1 %v15632_v33  ;;  %v15649_v33 = vld [vmem:[#allocation21 + $0x10] sm:$0xff]  }
 0xf89   : > { %13996 = vmatprep.subr.bf16.mxu1 %v15633_v35 }
 0xf8b   : > { %13989 = vmatmul.mubr.bf16.gmra.mrb[44].mxu1 %v6205_v28 }
 0xf8c   : > { %13997 = vmatpush3.bf16.msra.mxu1 %v15633_v35  ;;  %14008 = vmatprep.mubr.bf16.mxu1 %v17777_v53  ;;  %v6355_v53 = vpack.c.bf16 %v17769_v47, %v17792_v13 }
 0xf8d   : > { %13998 = vmatprep.subr.bf16.mxu1 %v15634_v23 }
 0xf90   : > { %13999 = vmatpush3.bf16.msra.mxu1 %v15634_v23  ;;  %v15650_v23 = vld [vmem:[#allocation21 + $0x18] sm:$0xff]  }
 0xf91   : > { %14000 = vmatprep.subr.bf16.mxu1 %v15635_v29 }
 0xf94   : > { %14001 = vmatpush3.bf16.msra.mxu1 %v15635_v29  ;;  %v15651_v29 = vld [vmem:[#allocation21 + $0x20] sm:$0xff]  }
 0xf95   : > { %14002 = vmatprep.subr.bf16.mxu1 %v15636_v30 }
 0xf98   : > { %14003 = vmatpush3.bf16.msra.mxu1 %v15636_v30  ;;  %v15652_v30 = vld [vmem:[#allocation21 + $0x28] sm:$0xff]  }
 0xf99   : > { %14004 = vmatprep.subr.bf16.mxu1 %v15637_v59 }
 0xf9c   : > { %14005 = vmatpush3.bf16.msra.mxu1 %v15637_v59  ;;  %v15653_v59 = vld [vmem:[#allocation21 + $0x30] sm:$0xff]  }
 0xf9d   : > { %14006 = vmatprep.subr.bf16.mxu1 %v15638_v39 }
 0xfa0   : > { %14007 = vmatpush3.bf16.msra.mxu1 %v15638_v39  ;;  %v15654_v39 = vld [vmem:[#allocation21 + $0x38] sm:$0xff]  }
 0xfa3   : > { %14009 = vmatmul.mubr.bf16.vlgmr.msra.gmra.mrb[40].mxu1 %v17800_v19 }
 0xfa4   : > { %14012 = vmatprep.mubr.bf16.mxu1 %v17809_v25 }
 0xfab   : > { %14013 = vmatmul.mubr.bf16.gmra.mrb[44].mxu1 %v6355_v53  ;;  %v12186_v53 = vld [vmem:[%s18632_s15 + $0x2] ss:$0 sm:$0xff]  ;;  %s11413_s15 = sshll.u32 %s17880_s28, 4  ;;  %s18348_s15 = int_to_ptr.vmem [resolvable:$true] %s11413_s15 }
0x1076   : > { %v14010_v11 = vpop.f32.mrb[40].mxu1 }
0x1077   : > { %v14776_v51 = vadd.f32 %v14010_v11, %v12152_v49  ;;  %v6455_v44 = vpop.f32.mrb[41].mxu1 }
0x1078   : > { %v14777_v14 = vadd.f32 %v12152_v49, %v6455_v44  ;;  %v14011_v19 = vpop.f32.mrb[42].mxu1 }
0x1079   : > { %v14778_v54 = vadd.f32 %v14011_v19, %v12152_v49  ;;  %v6458_v25 = vpop.f32.mrb[43].mxu1  ;;  %v6496_v16 = vmax.f32 %v14776_v51, 0.0 }
0x107a   : > { %v14779_v56 = vadd.f32 %v12152_v49, %v6458_v25  ;;  %v6494_v57 = vmax.f32 %v14777_v14, 0.0 }
0x107b   : > { %v6497_v47 = vmax.f32 %v14778_v54, 0.0 }
0x107c   : > { %v6495_v58 = vmax.f32 %v14779_v56, 0.0 }
0x107d   : > { %v6503_v9 = vpack.c.bf16 %v6497_v47, %v6496_v16 }
0x107e   : > { %v6502_v15 = vpack.c.bf16 %v6495_v58, %v6494_v57  ;;  %v14014_v41 = vpop.f32.mrb[44].mxu1 }
0x107f   : > { %v14780_v5 = vadd.f32 %v14014_v41, %v12152_v49  ;;  %v6471_v26 = vpop.f32.mrb[45].mxu1 }
0x1080   : > { %v14781_v22 = vadd.f32 %v12152_v49, %v6471_v26  ;;  %v14015_v0 = vpop.f32.mrb[46].mxu1  ;;  %14032 = vmatprep.mubr.bf16.mxu0 %v6502_v15 }
0x1081   : > { %v14782_v27 = vadd.f32 %v14015_v0, %v12152_v49  ;;  %v6474_v31 = vpop.f32.mrb[47].mxu1  ;;  %14033 = vmatmul.mubr.bf16.vlgmr.msra.gmra.mrb[64].mxu0 %v6503_v9  ;;  %v6500_v10 = vmax.f32 %v14780_v5, 0.0 }
0x1082   : > { %v14783_v32 = vadd.f32 %v12152_v49, %v6474_v31  ;;  %14041 = vmatpush3.bf16.msra.mxu0 %v15647_v52  ;;  %v6498_v21 = vmax.f32 %v14781_v22, 0.0 }
0x1083   : > { %v6501_v8 = vmax.f32 %v14782_v27, 0.0  ;;  %14042 = vmatprep.subr.bf16.mxu0 %v15648_v34 }
0x1084   : > { %v6499_v35 = vmax.f32 %v14783_v32, 0.0 }
0x1085   : > { %v6505_v62 = vpack.c.bf16 %v6501_v8, %v6500_v10 }
0x1086   : > { %v6504_v28 = vpack.c.bf16 %v6499_v35, %v6498_v21  ;;  %14043 = vmatpush3.bf16.msra.mxu0 %v15648_v34  ;;  %v12195_v35 = vld [vmem:[#allocation23] ss:$0 sm:$0xff] }
0x1087   : > { %14044 = vmatprep.subr.bf16.mxu0 %v15649_v33 }
0x1088   : > { %14036 = vmatprep.mubr.bf16.mxu0 %v6504_v28 }
0x1089   : > { %14037 = vmatmul.mubr.bf16.gmra.mrb[68].mxu0 %v6505_v62 }
0x108a   : > { %14045 = vmatpush3.bf16.msra.mxu0 %v15649_v33 }
0x108b   : > { %14046 = vmatprep.subr.bf16.mxu0 %v15650_v23 }
0x108e   : > { %14047 = vmatpush3.bf16.msra.mxu0 %v15650_v23 }
0x108f   : > { %14048 = vmatprep.subr.bf16.mxu0 %v15651_v29 }
0x1092   : > { %14049 = vmatpush3.bf16.msra.mxu0 %v15651_v29 }
0x1093   : > { %14050 = vmatprep.subr.bf16.mxu0 %v15652_v30 }
0x1096   : > { %14051 = vmatpush3.bf16.msra.mxu0 %v15652_v30 }
0x1097   : > { %14052 = vmatprep.subr.bf16.mxu0 %v15653_v59 }
0x109a   : > { %14053 = vmatpush3.bf16.msra.mxu0 %v15653_v59 }
0x109b   : > { %14054 = vmatprep.subr.bf16.mxu0 %v15654_v39 }
0x109e   : > { %14055 = vmatpush3.bf16.msra.mxu0 %v15654_v39 }
0x1154   : > { %v14034_v40 = vpop.f32.mrb[64].mxu0 }
0x1155   : > { %v6622_v50 = vadd.f32 %v14034_v40, %v12186_v53  ;;  %v6613_v52 = vpop.f32.mrb[65].mxu0 }
0x1156   : > { %v6614_v49 = vadd.f32 %v12186_v53, %v6613_v52  ;;  %v14035_v11 = vpop.f32.mrb[66].mxu0 }
0x1157   : > { %v6646_v51 = vadd.f32 %v6622_v50, %v17754_v36  ;;  %v6625_v44 = vadd.f32 %v14035_v11, %v12186_v53  ;;  %v6616_v14 = vpop.f32.mrb[67].mxu0 }
0x1158   : > { %v6644_v19 = vadd.f32 %v6614_v49, %v17758_v2  ;;  %v6617_v54 = vadd.f32 %v12186_v53, %v6616_v14 }
0x1159   : > { %v6647_v25 = vadd.f32 %v6625_v44, %v17763_v46  ;;  %v6654_v16 = vmul.f32 %v6646_v51, %v17481_v18 }
0x115a   : > { %v6645_v56 = vadd.f32 %v6617_v54, %v17767_v48  ;;  %v6652_v57 = vmul.f32 %v6644_v19, %v17479_v17 }
0x115b   : > { %v6655_v47 = vmul.f32 %v6647_v25, %v17486_v24 }
0x115c   : > { %v6653_v58 = vmul.f32 %v6645_v56, %v17484_v20  ;;  %v14038_v9 = vpop.f32.mrb[68].mxu0 }
0x115d   : > { %v6661_v15 = vpack.c.bf16 %v6655_v47, %v6654_v16  ;;  %v6638_v36 = vadd.f32 %v14038_v9, %v12186_v53  ;;  %v6629_v41 = vpop.f32.mrb[69].mxu0 }
0x115e   : > { %v6630_v5 = vadd.f32 %v12186_v53, %v6629_v41  ;;  %v14039_v26 = vpop.f32.mrb[70].mxu0  ;;  %v6660_v2 = vpack.c.bf16 %v6653_v58, %v6652_v57 }
0x115f   : > { %v6650_v34 = vadd.f32 %v6638_v36, %v17783_v60  ;;  %v6641_v46 = vadd.f32 %v14039_v26, %v12186_v53  ;;  %v6632_v22 = vpop.f32.mrb[71].mxu0 }
0x1160   : > { %v6648_v48 = vadd.f32 %v6630_v5, %v17787_v12  ;;  %v6633_v0 = vadd.f32 %v12186_v53, %v6632_v22  ;;  %14056 = vmatprep.mubr.bf16.mxu0 %v6660_v2  ;;  %v12023_v12 = vld [vmem:[#allocation14] ss:$0 sm:$0xff] }
0x1161   : > { %v6651_v27 = vadd.f32 %v6641_v46, %v17792_v13  ;;  %14057 = vmatmul.mubr.bf16.vlgmr.msra.gmra.mrb[72].mxu0 %v6661_v15  ;;  %v6658_v32 = vmul.f32 %v6650_v34, %v17508_v55  ;;  %v3702_v13 = vadd.f32 %v17623_v63, %v12023_v12  ;;  %v3694_v62 = vadd.f32 %v12023_v12, %v17625_v1 }
0x1162   : > { %v6649_v31 = vadd.f32 %v6633_v0, %v17796_v6  ;;  %v6656_v8 = vmul.f32 %v6648_v48, %v17491_v37  ;;  %v3705_v28 = vadd.f32 %v17627_v3, %v12023_v12  ;;  %v3697_v30 = vadd.f32 %v12023_v12, %v17629_v42 }
0x1163   : > { %v6659_v10 = vmul.f32 %v6651_v27, %v17514_v61  ;;  %v3726_v53 = vmul.f32 %v3702_v13, %v17481_v18  ;;  %v3724_v1 = vmul.f32 %v3694_v62, %v17479_v17  ;;  %v3718_v19 = vadd.f32 %v17631_v4, %v12023_v12 }
0x1164   : > { %v6657_v60 = vmul.f32 %v6649_v31, %v17500_v43  ;;  %v3727_v49 = vmul.f32 %v3705_v28, %v17486_v24  ;;  %v3725_v42 = vmul.f32 %v3697_v30, %v17484_v20  ;;  %v3710_v25 = vadd.f32 %v12023_v12, %v17633_v45 }
0x1165   : > { %v6663_v33 = vpack.c.bf16 %v6659_v10, %v6658_v32  ;;  %v3721_v47 = vadd.f32 %v17635_v7, %v12023_v12  ;;  %v3713_v4 = vadd.f32 %v12023_v12, %v17637_v38  ;;  %v3730_v36 = vmul.f32 %v3718_v19, %v17508_v55  ;;  %v15655_v32 = vld [vmem:[#allocation24] sm:$0xff]   ;;  %v15656_v10 = vld [vmem:[#allocation24 + $0x8] sm:$0xff]  }
0x1166   : > { %v6662_v21 = vpack.c.bf16 %v6657_v60, %v6656_v8  ;;  %v3728_v26 = vmul.f32 %v3710_v25, %v17491_v37  ;;  %14064 = vmatprep.subr.bf16.mxu0 %v15655_v32 }
0x1167   : > { %v3731_v38 = vmul.f32 %v3721_v47, %v17514_v61  ;;  %v3729_v22 = vmul.f32 %v3713_v4, %v17500_v43  ;;  %14065 = vmatpush3.bf16.msra.mxu0 %v15655_v32  ;;  %v15658_v47 = vld [vmem:[#allocation24 + $0x18] sm:$0xff]   ;;  %v15661_v4 = vld [vmem:[#allocation24 + $0x30] sm:$0xff]  }
0x1168   : > { %14060 = vmatprep.mubr.bf16.mxu0 %v6662_v21  ;;  %14066 = vmatprep.subr.bf16.mxu0 %v15656_v10 }
0x1169   : > { %14061 = vmatmul.mubr.bf16.gmra.mrb[76].mxu0 %v6663_v33 }
0x116b   : > { %14067 = vmatpush3.bf16.msra.mxu0 %v15656_v10 }
0x1234   : > { %v14058_v6 = vpop.f32.mrb[72].mxu0 }
0x1235   : > { %v6778_v23 = vadd.f32 %v14058_v6, %v12195_v35  ;;  %v6769_v29 = vpop.f32.mrb[73].mxu0 }
0x1236   : > { %v6770_v59 = vadd.f32 %v12195_v35, %v6769_v29  ;;  %v14059_v39 = vpop.f32.mrb[74].mxu0 }
0x1237   : > { %v6802_v40 = vmul.f32 %v6778_v23, %v17481_v18  ;;  %v6781_v50 = vadd.f32 %v14059_v39, %v12195_v35  ;;  %v6772_v63 = vpop.f32.mrb[75].mxu0 }
0x1238   : > { %v6800_v52 = vmul.f32 %v6770_v59, %v17479_v17  ;;  %v6773_v3 = vadd.f32 %v12195_v35, %v6772_v63 }
0x1239   : > { %v6803_v11 = vmul.f32 %v6781_v50, %v17486_v24  ;;  %v17874_v51 = vadd.f32 %v6802_v40, %v3726_v53 }
0x123a   : > { %v6801_v44 = vmul.f32 %v6773_v3, %v17484_v20  ;;  %v6808_v14 = vadd.f32 %v6800_v52, %v3724_v1 }
0x123b   : > { %6818 = vst [vmem:[%s17880_s28 + $0x10] sm:$0xff] %v17874_v51  ;;  %v6811_v54 = vadd.f32 %v6803_v11, %v3727_v49 }
0x123c   : > { %6824 = vmax.xlane.f32.xlu0 %v6808_v14  ;;  %6816 = vst [vmem:[%s17880_s28] sm:$0xff] %v6808_v14  ;;  %v14062_v56 = vpop.f32.mrb[76].mxu0  ;;  %v6809_v16 = vadd.f32 %v6801_v44, %v3725_v42 }
0x123d   : > { %v6794_v57 = vadd.f32 %v14062_v56, %v12195_v35  ;;  %v6785_v58 = vpop.f32.mrb[77].mxu0  ;;  %6819 = vst [vmem:[%s17880_s28 + $0x18] sm:$0xff] %v6811_v54  ;;  %v15657_v56 = vld [vmem:[#allocation24 + $0x10] sm:$0xff]  }
0x123e   : > { %v6786_v9 = vadd.f32 %v12195_v35, %v6785_v58  ;;  %6826 = vmax.xlane.f32.xlu1 %v6809_v16  ;;  %6817 = vst [vmem:[%s17880_s28 + $0x8] sm:$0xff] %v6809_v16  ;;  %v14063_v15 = vpop.f32.mrb[78].mxu0  ;;  %14068 = vmatprep.subr.bf16.mxu0 %v15657_v56  ;;  %v15660_v58 = vld [vmem:[#allocation24 + $0x28] sm:$0xff]  }
0x123f   : > { %v6806_v45 = vmul.f32 %v6794_v57, %v17508_v55  ;;  %v6797_v41 = vadd.f32 %v14063_v15, %v12195_v35  ;;  %v6788_v5 = vpop.f32.mrb[79].mxu0  ;;  %14069 = vmatpush3.bf16.msra.mxu0 %v15657_v56  ;;  %v15659_v57 = vld [vmem:[#allocation24 + $0x20] sm:$0xff]   ;;  %v15691_v56 = vld [vmem:[%s18633_s14 + $0x20] sm:$0xff]  }
0x1240   : > { %v6804_v7 = vmul.f32 %v6786_v9, %v17491_v37  ;;  %v6789_v2 = vadd.f32 %v12195_v35, %v6788_v5  ;;  %6828 = vmax.xlane.f32.xlu0 %v17874_v51  ;;  %14070 = vmatprep.subr.bf16.mxu0 %v15658_v47  ;;  %v15662_v9 = vld [vmem:[#allocation24 + $0x38] sm:$0xff]   ;;  %v15663_v15 = vld [vmem:[#allocation27] sm:$0xff]  }
0x1241   : > { %v6807_v34 = vmul.f32 %v6797_v41, %v17514_v61  ;;  %v6814_v46 = vadd.f32 %v6806_v45, %v3730_v36 }
0x1242   : > { %v6805_v48 = vmul.f32 %v6789_v2, %v17500_v43  ;;  %v6812_v0 = vadd.f32 %v6804_v7, %v3728_v26 }
0x1243   : > { %6822 = vst [vmem:[%s17880_s28 + $0x30] sm:$0xff] %v6814_v46  ;;  %v6815_v27 = vadd.f32 %v6807_v34, %v3731_v38  ;;  %14071 = vmatpush3.bf16.msra.mxu0 %v15658_v47  ;;  %v12204_v47 = vld [vmem:[#allocation26] ss:$0 sm:$0xff] }
0x1244   : > { %6830 = vmax.xlane.f32.xlu0 %v6811_v54  ;;  %6832 = vmax.xlane.f32.xlu1 %v6812_v0  ;;  %6820 = vst [vmem:[%s17880_s28 + $0x20] sm:$0xff] %v6812_v0  ;;  %v6813_v31 = vadd.f32 %v6805_v48, %v3729_v22 }
0x1245   : > { %6823 = vst [vmem:[%s17880_s28 + $0x38] sm:$0xff] %v6815_v27  ;;  %14072 = vmatprep.subr.bf16.mxu0 %v15659_v57 }
0x1246   : > { %6821 = vst [vmem:[%s17880_s28 + $0x28] sm:$0xff] %v6813_v31 }
0x1247   : > { %14073 = vmatpush3.bf16.msra.mxu0 %v15659_v57 }
0x1248   : > { %6834 = vmax.xlane.f32.xlu0 %v6813_v31  ;;  %6836 = vmax.xlane.f32.xlu1 %v6814_v46 }
0x1249   : > { %14074 = vmatprep.subr.bf16.mxu0 %v15660_v58 }
0x124b   : > { %14075 = vmatpush3.bf16.msra.mxu0 %v15660_v58 }
0x124c   : > { %6838 = vmax.xlane.f32.xlu0 %v6815_v27  ;;  %14076 = vmatprep.subr.bf16.mxu0 %v15661_v4 }
0x124f   : > { %14077 = vmatpush3.bf16.msra.mxu0 %v15661_v4 }
0x1250   : > { %14078 = vmatprep.subr.bf16.mxu0 %v15662_v9 }
0x1253   : > { %14079 = vmatpush3.bf16.msra.mxu0 %v15662_v9 }
0x1254   : > { %14088 = vmatprep.subr.bf16.mxu0 %v15663_v15 }
0x12c9   : > { %v6825_v8 = vpop.xlane.xlu0 %6824 }
0x12ca   : > { %v6840_v60 = vsub.f32 %v6808_v14, %v6825_v8 }
0x12cb   : > { %v6827_v33 = vpop.xlane.xlu1 %6826 }
0x12cc   : > { %v6848_v21 = vmul.f32 1.442695, %v6840_v60  ;;  %v6841_v12 = vsub.f32 %v6809_v16, %v6827_v33 }
0x12cd   : > { %v6829_v35 = vpop.xlane.xlu0 %6828 }
0x12ce   : > { %15879 = vpow2.f32 %v6848_v21  ;;  %v6850_v13 = vmul.f32 1.442695, %v6841_v12  ;;  %v6842_v62 = vsub.f32 %v17874_v51, %v6829_v35 }
0x12d0   : > { %15881 = vpow2.f32 %v6850_v13  ;;  %v6852_v6 = vmul.f32 1.442695, %v6842_v62 }
0x12d1   : > { %v6831_v28 = vpop.xlane.xlu0 %6830  ;;  %v6833_v23 = vpop.xlane.xlu1 %6832 }
0x12d2   : > { %15883 = vpow2.f32 %v6852_v6  ;;  %v6843_v29 = vsub.f32 %v6811_v54, %v6831_v28  ;;  %v6844_v30 = vsub.f32 %v6812_v0, %v6833_v23  ;;  %v15664_v23 = vld [vmem:[#allocation27 + $0x8] sm:$0xff]  }
0x12d4   : > { %v6854_v59 = vmul.f32 1.442695, %v6843_v29  ;;  %v6856_v39 = vmul.f32 1.442695, %v6844_v30 }
0x12d5   : > { %v6835_v53 = vpop.xlane.xlu0 %6834  ;;  %v6837_v40 = vpop.xlane.xlu1 %6836 }
0x12d6   : > { %15885 = vpow2.f32 %v6854_v59  ;;  %v6845_v50 = vsub.f32 %v6813_v31, %v6835_v53  ;;  %v6846_v63 = vsub.f32 %v6814_v46, %v6837_v40 }
0x12d7   : > { %15887 = vpow2.f32 %v6856_v39 }
0x12d8   : > { %v15880_v1 = vpop.eup %15879  ;;  %v6858_v52 = vmul.f32 1.442695, %v6845_v50  ;;  %v6860_v3 = vmul.f32 1.442695, %v6846_v63  ;;  %v15665_v50 = vld [vmem:[#allocation27 + $0x10] sm:$0xff]  }
0x12d9   : > { %v6839_v49 = vpop.xlane.xlu0 %6838  ;;  %6864 = vadd.xlane.f32.xlu1 %v15880_v1 }
0x12da   : > { %v15882_v11 = vpop.eup %15881  ;;  %15889 = vpow2.f32 %v6858_v52  ;;  %v6847_v51 = vsub.f32 %v6815_v27, %v6839_v49  ;;  %v15667_v49 = vld [vmem:[#allocation27 + $0x20] sm:$0xff]  }
0x12db   : > { %15891 = vpow2.f32 %v6860_v3  ;;  %6866 = vadd.xlane.f32.xlu0 %v15882_v11  ;;  %v15666_v3 = vld [vmem:[#allocation27 + $0x18] sm:$0xff]  }
0x12dc   : > { %v15884_v42 = vpop.eup %15883  ;;  %v6862_v44 = vmul.f32 1.442695, %v6847_v51  ;;  %v15669_v51 = vld [vmem:[#allocation27 + $0x30] sm:$0xff]  }
0x12dd   : > { %6868 = vadd.xlane.f32.xlu1 %v15884_v42 }
0x12de   : > { %15893 = vpow2.f32 %v6862_v44  ;;  %v15671_v44 = vld [vmem:[#allocation27 + $0x40] sm:$0xff]  }
0x12e0   : > { %v15886_v14 = vpop.eup %15885 }
0x12e1   : > { %v15888_v19 = vpop.eup %15887  ;;  %6870 = vadd.xlane.f32.xlu0 %v15886_v14 }
0x12e2   : > { %6872 = vadd.xlane.f32.xlu1 %v15888_v19 }
0x12e4   : > { %v15890_v54 = vpop.eup %15889 }
0x12e5   : > { %v17904_v25 = vpop.eup %15891  ;;  %6874 = vadd.xlane.f32.xlu0 %v15890_v54 }
0x12e6   : > { %6876 = vadd.xlane.f32.xlu1 %v17904_v25 }
0x12e8   : > { %v17907_v16 = vpop.eup %15893 }
0x12e9   : > { %6878 = vadd.xlane.f32.xlu0 %v17907_v16 }
0x1366   : > { %v6865_v36 = vpop.xlane.xlu1 %6864 }
0x1367   : > { %15895 = vrcp.f32 %v6865_v36 }
0x1368   : > { %v6867_v45 = vpop.xlane.xlu0 %6866 }
0x1369   : > { %15897 = vrcp.f32 %v6867_v45 }
0x136a   : > { %v6869_v41 = vpop.xlane.xlu1 %6868 }
0x136b   : > { %15899 = vrcp.f32 %v6869_v41 }
0x136e   : > { %v6871_v5 = vpop.xlane.xlu0 %6870 }
0x136f   : > { %15901 = vrcp.f32 %v6871_v5  ;;  %v6873_v26 = vpop.xlane.xlu1 %6872 }
0x1370   : > { %15903 = vrcp.f32 %v6873_v26 }
0x1371   : > { %v15896_v7 = vpop.eup %15895 }
0x1372   : > { %v6875_v2 = vpop.xlane.xlu0 %6874  ;;  %v6888_v38 = vmul.f32 %v15896_v7, %v15880_v1 }
0x1373   : > { %v15898_v34 = vpop.eup %15897  ;;  %15905 = vrcp.f32 %v6875_v2  ;;  %v6877_v46 = vpop.xlane.xlu1 %6876 }
0x1374   : > { %15907 = vrcp.f32 %v6877_v46  ;;  %v6889_v22 = vmul.f32 %v15898_v34, %v15882_v11  ;;  %v6896_v27 = vmul.f32 %v6888_v38, %v17479_v17  ;;  %v15668_v11 = vld [vmem:[#allocation27 + $0x28] sm:$0xff]  }
0x1375   : > { %v15900_v48 = vpop.eup %15899 }
0x1376   : > { %v6879_v0 = vpop.xlane.xlu0 %6878  ;;  %v6897_v31 = vmul.f32 %v6889_v22, %v17484_v20  ;;  %v6890_v32 = vmul.f32 %v15900_v48, %v15884_v42  ;;  %v15670_v42 = vld [vmem:[#allocation27 + $0x38] sm:$0xff]  }
0x1377   : > { %15909 = vrcp.f32 %v6879_v0 }
0x1378   : > { %v6904_v10 = vpack.c.bf16 %v6897_v31, %v6896_v27  ;;  %v6898_v21 = vmul.f32 %v6890_v32, %v17481_v18 }
0x1379   : > { %v15902_v8 = vpop.eup %15901 }
0x137a   : > { %v15904_v60 = vpop.eup %15903  ;;  %v6891_v33 = vmul.f32 %v15902_v8, %v15886_v14  ;;  %14080 = vmatprep.mubr.bf16.mxu0 %v6904_v10  ;;  %v15687_v14 = vld [vmem:[%s18633_s14] sm:$0xff]  }
0x137b   : > { %v6892_v35 = vmul.f32 %v15904_v60, %v15888_v19  ;;  %v15688_v19 = vld [vmem:[%s18633_s14 + $0x8] sm:$0xff]   ;;  %14160 = vmatprep.subr.bf16.mxu1 %v15687_v14 }
0x137c   : > { %v6899_v12 = vmul.f32 %v6891_v33, %v17486_v24  ;;  %14161 = vmatpush3.bf16.msra.mxu1 %v15687_v14  ;;  %v15672_v8 = vld [vmem:[#allocation27 + $0x48] sm:$0xff]   ;;  %v15673_v60 = vld [vmem:[#allocation27 + $0x50] sm:$0xff]   ;;  %v15686_v14 = vld [vmem:[#allocation27 + $0xb8] sm:$0xff]  }
0x137d   : > { %v15906_v13 = vpop.eup %15905  ;;  %v6900_v29 = vmul.f32 %v6892_v35, %v17491_v37  ;;  %14162 = vmatprep.subr.bf16.mxu1 %v15688_v19 }
0x137e   : > { %v15908_v62 = vpop.eup %15907  ;;  %v6905_v6 = vpack.c.bf16 %v6899_v12, %v6898_v21  ;;  %v6893_v28 = vmul.f32 %v15906_v13, %v15890_v54  ;;  %v15689_v54 = vld [vmem:[%s18633_s14 + $0x10] sm:$0xff]  }
0x137f   : > { %v6894_v59 = vmul.f32 %v15908_v62, %v17904_v25  ;;  %v15690_v25 = vld [vmem:[%s18633_s14 + $0x18] sm:$0xff]  }
0x1380   : > { %14081 = vmatmul.mubr.bf16.vlgmr.msra.gmra.mrb[80].mxu0 %v6905_v6  ;;  %v6901_v30 = vmul.f32 %v6893_v28, %v17500_v43  ;;  %14163 = vmatpush3.bf16.msra.mxu1 %v15688_v19  ;;  %v15674_v6 = vld [vmem:[#allocation27 + $0x58] sm:$0xff]  }
0x1381   : > { %v15910_v39 = vpop.eup %15909  ;;  %14089 = vmatpush3.bf16.msra.mxu0 %v15663_v15  ;;  %v6902_v63 = vmul.f32 %v6894_v59, %v17508_v55  ;;  %14164 = vmatprep.subr.bf16.mxu1 %v15689_v54  ;;  %v15678_v59 = vld [vmem:[#allocation27 + $0x78] sm:$0xff]  }
0x1382   : > { %v6906_v53 = vpack.c.bf16 %v6901_v30, %v6900_v29  ;;  %v6895_v40 = vmul.f32 %v15910_v39, %v17907_v16  ;;  %14090 = vmatprep.subr.bf16.mxu0 %v15664_v23  ;;  %v15692_v16 = vld [vmem:[%s18633_s14 + $0x28] sm:$0xff]   ;;  %v15679_v39 = vld [vmem:[#allocation27 + $0x80] sm:$0xff]  }
0x1383   : > { %v15676_v29 = vld [vmem:[#allocation27 + $0x68] sm:$0xff]   ;;  %v15677_v30 = vld [vmem:[#allocation27 + $0x70] sm:$0xff]  }
0x1384   : > { %14084 = vmatprep.mubr.bf16.mxu0 %v6906_v53  ;;  %v6903_v1 = vmul.f32 %v6895_v40, %v17514_v61  ;;  %14165 = vmatpush3.bf16.msra.mxu1 %v15689_v54  ;;  %v15680_v40 = vld [vmem:[#allocation27 + $0x88] sm:$0xff]  }
0x1385   : > { %14091 = vmatpush3.bf16.msra.mxu0 %v15664_v23  ;;  %14166 = vmatprep.subr.bf16.mxu1 %v15690_v25  ;;  %v15675_v23 = vld [vmem:[#allocation27 + $0x60] sm:$0xff]  }
0x1386   : > { %v6907_v52 = vpack.c.bf16 %v6903_v1, %v6902_v63  ;;  %14092 = vmatprep.subr.bf16.mxu0 %v15665_v50  ;;  %v15681_v63 = vld [vmem:[#allocation27 + $0x90] sm:$0xff]  }
0x1388   : > { %14085 = vmatmul.mubr.bf16.gmra.mrb[84].mxu0 %v6907_v52  ;;  %14167 = vmatpush3.bf16.msra.mxu1 %v15690_v25 }
0x1389   : > { %14093 = vmatpush3.bf16.msra.mxu0 %v15665_v50  ;;  %14168 = vmatprep.subr.bf16.mxu1 %v15691_v56 }
0x138a   : > { %14094 = vmatprep.subr.bf16.mxu0 %v15666_v3 }
0x138c   : > { %14169 = vmatpush3.bf16.msra.mxu1 %v15691_v56 }
0x138d   : > { %14095 = vmatpush3.bf16.msra.mxu0 %v15666_v3  ;;  %14170 = vmatprep.subr.bf16.mxu1 %v15692_v16 }
0x138e   : > { %14096 = vmatprep.subr.bf16.mxu0 %v15667_v49 }
0x1390   : > { %14171 = vmatpush3.bf16.msra.mxu1 %v15692_v16 }
0x1391   : > { %14097 = vmatpush3.bf16.msra.mxu0 %v15667_v49  ;;  %v15682_v49 = vld [vmem:[#allocation27 + $0x98] sm:$0xff]  }
0x1392   : > { %14098 = vmatprep.subr.bf16.mxu0 %v15668_v11 }
0x1395   : > { %14099 = vmatpush3.bf16.msra.mxu0 %v15668_v11 }
0x1396   : > { %14100 = vmatprep.subr.bf16.mxu0 %v15669_v51 }
0x1399   : > { %14101 = vmatpush3.bf16.msra.mxu0 %v15669_v51  ;;  %v15683_v51 = vld [vmem:[#allocation27 + $0xa0] sm:$0xff]  }
0x139a   : > { %14102 = vmatprep.subr.bf16.mxu0 %v15670_v42 }
0x139d   : > { %14103 = vmatpush3.bf16.msra.mxu0 %v15670_v42  ;;  %v15684_v42 = vld [vmem:[#allocation27 + $0xa8] sm:$0xff]  }
0x139e   : > { %14112 = vmatprep.subr.bf16.mxu0 %v15671_v44 }
0x1453   : > { %v14082_v57 = vpop.f32.mrb[80].mxu0 }
0x1454   : > { %v17926_v58 = vadd.f32 %v14082_v57, %v12204_v47  ;;  %v7013_v4 = vpop.f32.mrb[81].mxu0 }
0x1455   : > { %v17928_v9 = vadd.f32 %v12204_v47, %v7013_v4  ;;  %v14083_v15 = vpop.f32.mrb[82].mxu0 }
0x1456   : > { %7046 = vst [vmem:[#allocation2 + $0x18] sm:$0xff] %v17926_v58  ;;  %v17931_v36 = vadd.f32 %v14083_v15, %v12204_v47  ;;  %v7016_v45 = vpop.f32.mrb[83].mxu0 }
0x1457   : > { %7044 = vst [vmem:[#allocation2 + $0x8] sm:$0xff] %v17928_v9  ;;  %v17934_v41 = vadd.f32 %v12204_v47, %v7016_v45  ;;  %v15693_v45 = vld [vmem:[%s18633_s14 + $0x30] sm:$0xff]  }
0x1458   : > { %7047 = vst [vmem:[#allocation2 + $0x20] sm:$0xff] %v17931_v36  ;;  %v7217_v53 = vpack.c.bf16 %v17931_v36, %v17926_v58  ;;  %14172 = vmatprep.subr.bf16.mxu1 %v15693_v45 }
0x1459   : > { %7045 = vst [vmem:[#allocation2 + $0x10] sm:$0xff] %v17934_v41  ;;  %v7216_v28 = vpack.c.bf16 %v17934_v41, %v17928_v9  ;;  %14173 = vmatpush3.bf16.msra.mxu1 %v15693_v45 }
0x145b   : > { %v14086_v5 = vpop.f32.mrb[84].mxu0 }
0x145c   : > { %v17938_v26 = vadd.f32 %v14086_v5, %v12204_v47  ;;  %v7029_v7 = vpop.f32.mrb[85].mxu0  ;;  %v15694_v5 = vld [vmem:[%s18633_s14 + $0x38] sm:$0xff]  }
0x145d   : > { %v17940_v2 = vadd.f32 %v12204_v47, %v7029_v7  ;;  %v14087_v38 = vpop.f32.mrb[86].mxu0  ;;  %14174 = vmatprep.subr.bf16.mxu1 %v15694_v5  ;;  %v15695_v7 = vld [vmem:[#allocation27 + $0xc0] sm:$0xff]  }
0x145e   : > { %7050 = vst [vmem:[#allocation2 + $0x38] sm:$0xff] %v17938_v26  ;;  %v17943_v34 = vadd.f32 %v14087_v38, %v12204_v47  ;;  %v7032_v46 = vpop.f32.mrb[87].mxu0  ;;  %v7053_v0 = vld [vmem:[#allocation2 + $0x7] sm:$0xff]  ;;  %14175 = vmatpush3.bf16.msra.mxu1 %v15694_v5  ;;  %v12221_v38 = vld [vmem:[%s18634_s13] ss:$0 sm:$0xff] }
0x145f   : > { %7048 = vst [vmem:[#allocation2 + $0x28] sm:$0xff] %v17940_v2  ;;  %v17946_v22 = vadd.f32 %v12204_v47, %v7032_v46  ;;  %v7056_v48 = vld [vmem:[#allocation2 + $0x1f] sm:$0xff]  ;;  %14184 = vmatprep.subr.bf16.mxu1 %v15695_v7 }
0x1460   : > { %7051 = vst [vmem:[#allocation2 + $0x40] sm:$0xff] %v17943_v34  ;;  %v7054_v27 = vld [vmem:[#allocation2 + $0xf] sm:$0xff]  ;;  %v7055_v31 = vld [vmem:[#allocation2 + $0x17] sm:$0xff]  ;;  %v7219_v3 = vpack.c.bf16 %v17943_v34, %v17938_v26 }
0x1461   : > { %7049 = vst [vmem:[#allocation2 + $0x30] sm:$0xff] %v17946_v22  ;;  %v7061_v32 = vpack.c.bf16 %v7054_v27, %v7053_v0  ;;  %v7062_v10 = vpack.c.bf16 %v7056_v48, %v7055_v31  ;;  %v7218_v50 = vpack.c.bf16 %v17946_v22, %v17940_v2  ;;  %v7358_v1 = vld [vmem:[#allocation2 + $0x9] sm:$0xff]  ;;  %v7359_v52 = vld [vmem:[#allocation2 + $0x11] sm:$0xff]  ;;  %v7360_v56 = vld [vmem:[#allocation2 + $0x19] sm:$0xff] }
0x1462   : > { %v7366_v11 = vpack.c.bf16 %v7359_v52, %v7358_v1 }
0x1463   : > { %14104 = vmatprep.mubr.bf16.mxu0 %v7061_v32 }
0x1464   : > { %14105 = vmatmul.mubr.bf16.vlgmr.msra.gmra.mrb[88].mxu0 %v7062_v10 }
0x1465   : > { %14113 = vmatpush3.bf16.msra.mxu0 %v15671_v44  ;;  %v15685_v44 = vld [vmem:[#allocation27 + $0xb0] sm:$0xff]  }
0x1466   : > { %14114 = vmatprep.subr.bf16.mxu0 %v15672_v8  ;;  %v7057_v21 = vld [vmem:[#allocation2 + $0x27] sm:$0xff] }
0x1467   : > { %v7060_v33 = vld [vmem:[#allocation2 + $0x3f] sm:$0xff] }
0x1468   : > { %v7058_v12 = vld [vmem:[#allocation2 + $0x2f] sm:$0xff]  ;;  %v7059_v35 = vld [vmem:[#allocation2 + $0x37] sm:$0xff]  ;;  %v7361_v19 = vld [vmem:[#allocation2 + $0x21] sm:$0xff] }
0x1469   : > { %14115 = vmatpush3.bf16.msra.mxu0 %v15672_v8  ;;  %v7063_v13 = vpack.c.bf16 %v7058_v12, %v7057_v21  ;;  %v7064_v62 = vpack.c.bf16 %v7060_v33, %v7059_v35  ;;  %v7362_v54 = vld [vmem:[#allocation2 + $0x29] sm:$0xff]  ;;  %v7363_v25 = vld [vmem:[#allocation2 + $0x31] sm:$0xff]  ;;  %v7367_v16 = vpack.c.bf16 %v7361_v19, %v7360_v56  ;;  %v7364_v57 = vld [vmem:[#allocation2 + $0x39] sm:$0xff] }
0x146a   : > { %14116 = vmatprep.subr.bf16.mxu0 %v15673_v60  ;;  %v7368_v47 = vpack.c.bf16 %v7363_v25, %v7362_v54  ;;  %v7365_v4 = vld [vmem:[#allocation2 + $0x41] sm:$0xff]  ;;  %v15721_v56 = vld [vmem:[%s18633_s14 + $0x50] sm:$0xff]  }
0x146b   : > { %14108 = vmatprep.mubr.bf16.mxu0 %v7063_v13  ;;  %v7369_v15 = vpack.c.bf16 %v7365_v4, %v7364_v57  ;;  %v17961_v19 = vld [vmem:[#allocation27 + $0x100] sm:$0xff]   ;;  %v15720_v25 = vld [vmem:[%s18633_s14 + $0x48] sm:$0xff]  }
0x146c   : > { %14109 = vmatmul.mubr.bf16.gmra.mrb[92].mxu0 %v7064_v62  ;;  %v15719_v54 = vld [vmem:[%s18633_s14 + $0x40] sm:$0xff]   ;;  %v15724_v57 = vld [vmem:[%s18633_s14 + $0x68] sm:$0xff]  }
0x146d   : > { %14117 = vmatpush3.bf16.msra.mxu0 %v15673_v60  ;;  %14128 = vmatprep.mubr.bf16.mxu0 %v7216_v28  ;;  %v12238_v4 = vld [vmem:[%s18635_s25] ss:$0 sm:$0xff] }
0x146e   : > { %14118 = vmatprep.subr.bf16.mxu0 %v15674_v6 }
0x1471   : > { %14119 = vmatpush3.bf16.msra.mxu0 %v15674_v6 }
0x1472   : > { %14120 = vmatprep.subr.bf16.mxu0 %v15675_v23 }
0x1475   : > { %14121 = vmatpush3.bf16.msra.mxu0 %v15675_v23  ;;  %v15696_v23 = vld [vmem:[#allocation27 + $0xc8] sm:$0xff]  }
0x1476   : > { %14122 = vmatprep.subr.bf16.mxu0 %v15676_v29 }
0x1479   : > { %14123 = vmatpush3.bf16.msra.mxu0 %v15676_v29 }
0x147a   : > { %14124 = vmatprep.subr.bf16.mxu0 %v15677_v30 }
0x147d   : > { %14125 = vmatpush3.bf16.msra.mxu0 %v15677_v30 }
0x147e   : > { %14126 = vmatprep.subr.bf16.mxu0 %v15678_v59 }
0x1481   : > { %14127 = vmatpush3.bf16.msra.mxu0 %v15678_v59 }
0x1482   : > { %14136 = vmatprep.subr.bf16.mxu0 %v15679_v39 }
0x1484   : > { %14129 = vmatmul.mubr.bf16.vlgmr.msra.gmra.mrb[88].mxu0 %v7217_v53 }
0x1485   : > { %14132 = vmatprep.mubr.bf16.mxu0 %v7218_v50  ;;  %14137 = vmatpush3.bf16.msra.mxu0 %v15679_v39 }
0x1486   : > { %14138 = vmatprep.subr.bf16.mxu0 %v15680_v40 }
0x1489   : > { %14139 = vmatpush3.bf16.msra.mxu0 %v15680_v40 }
0x148a   : > { %14140 = vmatprep.subr.bf16.mxu0 %v15681_v63 }
0x148c   : > { %14133 = vmatmul.mubr.bf16.gmra.mrb[92].mxu0 %v7219_v3 }
0x148d   : > { %14141 = vmatpush3.bf16.msra.mxu0 %v15681_v63  ;;  %14152 = vmatprep.mubr.bf16.mxu0 %v7366_v11  ;;  %v15697_v63 = vld [vmem:[#allocation27 + $0xd0] sm:$0xff]   ;;  %v15698_v11 = vld [vmem:[#allocation27 + $0xd8] sm:$0xff]  }
0x148e   : > { %14142 = vmatprep.subr.bf16.mxu0 %v15682_v49 }
0x1491   : > { %14143 = vmatpush3.bf16.msra.mxu0 %v15682_v49 }
0x1492   : > { %14144 = vmatprep.subr.bf16.mxu0 %v15683_v51 }
0x1495   : > { %14145 = vmatpush3.bf16.msra.mxu0 %v15683_v51  ;;  %v15699_v51 = vld [vmem:[#allocation27 + $0xe0] sm:$0xff]  }
0x1496   : > { %14146 = vmatprep.subr.bf16.mxu0 %v15684_v42 }
0x1499   : > { %14147 = vmatpush3.bf16.msra.mxu0 %v15684_v42  ;;  %v15700_v42 = vld [vmem:[#allocation27 + $0xe8] sm:$0xff]  }
0x149a   : > { %14148 = vmatprep.subr.bf16.mxu0 %v15685_v44 }
0x149d   : > { %14149 = vmatpush3.bf16.msra.mxu0 %v15685_v44  ;;  %v15701_v44 = vld [vmem:[#allocation27 + $0xf0] sm:$0xff]  }
0x149e   : > { %14150 = vmatprep.subr.bf16.mxu0 %v15686_v14 }
0x14a1   : > { %14151 = vmatpush3.bf16.msra.mxu0 %v15686_v14  ;;  %v15702_v14 = vld [vmem:[#allocation27 + $0xf8] sm:$0xff]  }
0x14a2   : > { %14256 = vmatprep.subr.bf16.mxu0 %v15719_v54 }
0x14a4   : > { %14153 = vmatmul.mubr.bf16.vlgmr.msra.gmra.mrb[88].mxu0 %v7367_v16  ;;  %v15722_v16 = vld [vmem:[%s18633_s14 + $0x58] sm:$0xff]  }
0x14a5   : > { %14156 = vmatprep.mubr.bf16.mxu0 %v7368_v47  ;;  %14257 = vmatpush3.bf16.msra.mxu0 %v15719_v54  ;;  %v15723_v47 = vld [vmem:[%s18633_s14 + $0x60] sm:$0xff]  }
0x14a6   : > { %14258 = vmatprep.subr.bf16.mxu0 %v15720_v25  ;;  %v15708_v54 = vld [vmem:[#allocation27 + $0x128] sm:$0xff]  }
0x14a9   : > { %14259 = vmatpush3.bf16.msra.mxu0 %v15720_v25  ;;  %v15709_v25 = vld [vmem:[#allocation27 + $0x130] sm:$0xff]  }
0x14aa   : > { %14260 = vmatprep.subr.bf16.mxu0 %v15721_v56 }
0x14ac   : > { %14157 = vmatmul.mubr.bf16.gmra.mrb[92].mxu0 %v7369_v15 }
0x14ad   : > { %14261 = vmatpush3.bf16.msra.mxu0 %v15721_v56  ;;  %v15710_v56 = vld [vmem:[#allocation27 + $0x138] sm:$0xff]  }
0x14ae   : > { %14262 = vmatprep.subr.bf16.mxu0 %v15722_v16 }
0x14b1   : > { %14263 = vmatpush3.bf16.msra.mxu0 %v15722_v16  ;;  %v15711_v16 = vld [vmem:[#allocation27 + $0x140] sm:$0xff]  }
0x14b2   : > { %14264 = vmatprep.subr.bf16.mxu0 %v15723_v47 }
0x14b5   : > { %14265 = vmatpush3.bf16.msra.mxu0 %v15723_v47 }
0x14b6   : > { %14266 = vmatprep.subr.bf16.mxu0 %v15724_v57 }
0x14b9   : > { %14267 = vmatpush3.bf16.msra.mxu0 %v15724_v57  ;;  %v15712_v57 = vld [vmem:[#allocation27 + $0x148] sm:$0xff]  }
0x1577   : > { %v14154_v46 = vpop.f32.mrb[88].mxu0 }
0x1578   : > { %v14784_v48 = vadd.f32 %v14154_v46, %v12221_v38  ;;  %v7469_v0 = vpop.f32.mrb[89].mxu0 }
0x1579   : > { %v14785_v27 = vadd.f32 %v12221_v38, %v7469_v0  ;;  %v14155_v31 = vpop.f32.mrb[90].mxu0 }
0x157a   : > { %v14786_v32 = vadd.f32 %v14155_v31, %v12221_v38  ;;  %v7472_v10 = vpop.f32.mrb[91].mxu0  ;;  %v7510_v60 = vmax.f32 %v14784_v48, 0.0 }
0x157b   : > { %v14787_v8 = vadd.f32 %v12221_v38, %v7472_v10  ;;  %v7508_v21 = vmax.f32 %v14785_v27, 0.0 }
0x157c   : > { %v7511_v33 = vmax.f32 %v14786_v32, 0.0 }
0x157d   : > { %v7509_v12 = vmax.f32 %v14787_v8, 0.0 }
0x157e   : > { %v7517_v35 = vpack.c.bf16 %v7511_v33, %v7510_v60 }
0x157f   : > { %v7516_v13 = vpack.c.bf16 %v7509_v12, %v7508_v21  ;;  %v14158_v62 = vpop.f32.mrb[92].mxu0 }
0x1580   : > { %v14788_v6 = vadd.f32 %v14158_v62, %v12221_v38  ;;  %v7485_v28 = vpop.f32.mrb[93].mxu0 }
0x1581   : > { %v14789_v29 = vadd.f32 %v12221_v38, %v7485_v28  ;;  %v14159_v30 = vpop.f32.mrb[94].mxu0  ;;  %14176 = vmatprep.mubr.bf16.mxu1 %v7516_v13 }
0x1582   : > { %v14790_v59 = vadd.f32 %v14159_v30, %v12221_v38  ;;  %v7488_v39 = vpop.f32.mrb[95].mxu0  ;;  %14177 = vmatmul.mubr.bf16.vlgmr.msra.gmra.mrb[48].mxu1 %v7517_v35  ;;  %v7514_v40 = vmax.f32 %v14788_v6, 0.0 }
0x1583   : > { %v14791_v53 = vadd.f32 %v12221_v38, %v7488_v39  ;;  %14185 = vmatpush3.bf16.msra.mxu1 %v15695_v7  ;;  %v7512_v1 = vmax.f32 %v14789_v29, 0.0 }
0x1584   : > { %v7515_v50 = vmax.f32 %v14790_v59, 0.0  ;;  %14186 = vmatprep.subr.bf16.mxu1 %v15696_v23 }
0x1585   : > { %v7513_v52 = vmax.f32 %v14791_v53, 0.0 }
0x1586   : > { %v7519_v3 = vpack.c.bf16 %v7515_v50, %v7514_v40 }
0x1587   : > { %v7518_v49 = vpack.c.bf16 %v7513_v52, %v7512_v1  ;;  %14187 = vmatpush3.bf16.msra.mxu1 %v15696_v23  ;;  %v15705_v1 = vld [vmem:[#allocation27 + $0x110] sm:$0xff]  }
0x1588   : > { %14188 = vmatprep.subr.bf16.mxu1 %v15697_v63 }
0x1589   : > { %14180 = vmatprep.mubr.bf16.mxu1 %v7518_v49 }
0x158a   : > { %14181 = vmatmul.mubr.bf16.gmra.mrb[52].mxu1 %v7519_v3 }
0x158b   : > { %14189 = vmatpush3.bf16.msra.mxu1 %v15697_v63  ;;  %v15704_v63 = vld [vmem:[#allocation27 + $0x108] sm:$0xff]  }
0x158c   : > { %14190 = vmatprep.subr.bf16.mxu1 %v15698_v11 }
0x158f   : > { %14191 = vmatpush3.bf16.msra.mxu1 %v15698_v11 }
0x1590   : > { %14192 = vmatprep.subr.bf16.mxu1 %v15699_v51 }
0x1593   : > { %14193 = vmatpush3.bf16.msra.mxu1 %v15699_v51 }
0x1594   : > { %14194 = vmatprep.subr.bf16.mxu1 %v15700_v42 }
0x1597   : > { %14195 = vmatpush3.bf16.msra.mxu1 %v15700_v42 }
0x1598   : > { %14196 = vmatprep.subr.bf16.mxu1 %v15701_v44 }
0x159b   : > { %14197 = vmatpush3.bf16.msra.mxu1 %v15701_v44  ;;  %v15706_v44 = vld [vmem:[#allocation27 + $0x118] sm:$0xff]  }
0x159c   : > { %14198 = vmatprep.subr.bf16.mxu1 %v15702_v14 }
0x159f   : > { %14199 = vmatpush3.bf16.msra.mxu1 %v15702_v14 }
0x15a0   : > { %14208 = vmatprep.subr.bf16.mxu1 %v17961_v19 }
0x1655   : > { %v14178_v15 = vpop.f32.mrb[48].mxu1 }
0x1656   : > { %v7634_v45 = vadd.f32 %v14178_v15, %v12238_v4  ;;  %v7625_v5 = vpop.f32.mrb[49].mxu1  ;;  %v15713_v15 = vld [vmem:[#allocation27 + $0x150] sm:$0xff]  }
0x1657   : > { %v7626_v7 = vadd.f32 %v12238_v4, %v7625_v5  ;;  %v14179_v38 = vpop.f32.mrb[50].mxu1 }
0x1658   : > { %v7658_v46 = vadd.f32 %v7634_v45, %v17926_v58  ;;  %v7637_v48 = vadd.f32 %v14179_v38, %v12238_v4  ;;  %v7628_v0 = vpop.f32.mrb[51].mxu1  ;;  %v15714_v38 = vld [vmem:[#allocation27 + $0x158] sm:$0xff]  }
0x1659   : > { %v7656_v27 = vadd.f32 %v7626_v7, %v17928_v9  ;;  %v7629_v31 = vadd.f32 %v12238_v4, %v7628_v0  ;;  %v15716_v0 = vld [vmem:[#allocation27 + $0x168] sm:$0xff]  }
0x165a   : > { %v17974_v32 = vmul.f32 %v7658_v46, %v17481_v18  ;;  %v7659_v10 = vadd.f32 %v7637_v48, %v17931_v36  ;;  %v15715_v48 = vld [vmem:[#allocation27 + $0x160] sm:$0xff]  }
0x165b   : > { %v17978_v8 = vmul.f32 %v7656_v27, %v17479_v17  ;;  %v7657_v60 = vadd.f32 %v7629_v31, %v17934_v41  ;;  %v15717_v27 = vld [vmem:[#allocation27 + $0x170] sm:$0xff]   ;;  %v15718_v31 = vld [vmem:[#allocation27 + $0x178] sm:$0xff]  }
0x165c   : > { %7674 = vst [vmem:[#allocation2 + $0x18] sm:$0xff] %v17974_v32  ;;  %v17983_v33 = vmul.f32 %v7659_v10, %v17486_v24 }
0x165d   : > { %7672 = vst [vmem:[#allocation2 + $0x8] sm:$0xff] %v17978_v8  ;;  %v17987_v58 = vmul.f32 %v7657_v60, %v17484_v20  ;;  %v14182_v9 = vpop.f32.mrb[52].mxu1 }
0x165e   : > { %7675 = vst [vmem:[#allocation2 + $0x20] sm:$0xff] %v17983_v33  ;;  %v7650_v21 = vadd.f32 %v14182_v9, %v12238_v4  ;;  %v7641_v36 = vpop.f32.mrb[53].mxu1  ;;  %v7847_v47 = vpack.c.bf16 %v17983_v33, %v17974_v32 }
0x165f   : > { %7673 = vst [vmem:[#allocation2 + $0x10] sm:$0xff] %v17987_v58  ;;  %v7642_v12 = vadd.f32 %v12238_v4, %v7641_v36  ;;  %v14183_v35 = vpop.f32.mrb[54].mxu1  ;;  %v7846_v14 = vpack.c.bf16 %v17987_v58, %v17978_v8 }
0x1660   : > { %v7662_v41 = vadd.f32 %v7650_v21, %v17938_v26  ;;  %v7653_v13 = vadd.f32 %v14183_v35, %v12238_v4  ;;  %v7644_v62 = vpop.f32.mrb[55].mxu1 }
0x1661   : > { %v7660_v6 = vadd.f32 %v7642_v12, %v17940_v2  ;;  %v7645_v28 = vadd.f32 %v12238_v4, %v7644_v62  ;;  %v15725_v62 = vld [vmem:[%s18633_s14 + $0x70] sm:$0xff]  }
0x1662   : > { %v17994_v23 = vmul.f32 %v7662_v41, %v17508_v55  ;;  %v7663_v29 = vadd.f32 %v7653_v13, %v17943_v34  ;;  %14268 = vmatprep.subr.bf16.mxu0 %v15725_v62 }
0x1663   : > { %v17998_v30 = vmul.f32 %v7660_v6, %v17491_v37  ;;  %v7661_v59 = vadd.f32 %v7645_v28, %v17946_v22  ;;  %14269 = vmatpush3.bf16.msra.mxu0 %v15725_v62  ;;  %v15726_v6 = vld [vmem:[%s18633_s14 + $0x78] sm:$0xff]  }
0x1664   : > { %7678 = vst [vmem:[#allocation2 + $0x38] sm:$0xff] %v17994_v23  ;;  %v18003_v39 = vmul.f32 %v7663_v29, %v17514_v61  ;;  %v7682_v53 = vld [vmem:[#allocation2 + $0x6] sm:$0xff]  ;;  %14270 = vmatprep.subr.bf16.mxu0 %v15726_v6  ;;  %v15727_v28 = vld [vmem:[#allocation27 + $0x180] sm:$0xff]  }
0x1665   : > { %7676 = vst [vmem:[#allocation2 + $0x28] sm:$0xff] %v17998_v30  ;;  %v18007_v26 = vmul.f32 %v7661_v59, %v17500_v43  ;;  %v7685_v2 = vld [vmem:[#allocation2 + $0x1e] sm:$0xff] }
0x1666   : > { %7679 = vst [vmem:[#allocation2 + $0x40] sm:$0xff] %v18003_v39  ;;  %v7683_v34 = vld [vmem:[#allocation2 + $0xe] sm:$0xff]  ;;  %v7684_v40 = vld [vmem:[#allocation2 + $0x16] sm:$0xff]  ;;  %v7849_v7 = vpack.c.bf16 %v18003_v39, %v17994_v23  ;;  %v12256_v29 = vld [vmem:[%s18634_s13 + $0x1] ss:$0 sm:$0xff] }
0x1667   : > { %7677 = vst [vmem:[#allocation2 + $0x30] sm:$0xff] %v18007_v26  ;;  %v7690_v50 = vpack.c.bf16 %v7683_v34, %v7682_v53  ;;  %v7691_v22 = vpack.c.bf16 %v7685_v2, %v7684_v40  ;;  %v7848_v4 = vpack.c.bf16 %v18007_v26, %v17998_v30  ;;  %v7988_v45 = vld [vmem:[#allocation2 + $0xa] sm:$0xff]  ;;  %v7989_v5 = vld [vmem:[#allocation2 + $0x12] sm:$0xff]  ;;  %v7990_v21 = vld [vmem:[#allocation2 + $0x1a] sm:$0xff]  ;;  %14271 = vmatpush3.bf16.msra.mxu0 %v15726_v6 }
0x1668   : > { %v7996_v46 = vpack.c.bf16 %v7989_v5, %v7988_v45  ;;  %14280 = vmatprep.subr.bf16.mxu0 %v15727_v28 }
0x1669   : > { %14200 = vmatprep.mubr.bf16.mxu1 %v7690_v50 }
0x166a   : > { %14201 = vmatmul.mubr.bf16.vlgmr.msra.gmra.mrb[56].mxu1 %v7691_v22 }
0x166b   : > { %14209 = vmatpush3.bf16.msra.mxu1 %v17961_v19  ;;  %v15707_v19 = vld [vmem:[#allocation27 + $0x120] sm:$0xff]  }
0x166c   : > { %14210 = vmatprep.subr.bf16.mxu1 %v15704_v63  ;;  %v7686_v3 = vld [vmem:[#allocation2 + $0x26] sm:$0xff] }
0x166d   : > { %v7689_v52 = vld [vmem:[#allocation2 + $0x3e] sm:$0xff] }
0x166e   : > { %v7687_v49 = vld [vmem:[#allocation2 + $0x2e] sm:$0xff]  ;;  %v7688_v11 = vld [vmem:[#allocation2 + $0x36] sm:$0xff]  ;;  %v7991_v10 = vld [vmem:[#allocation2 + $0x22] sm:$0xff] }
0x166f   : > { %14211 = vmatpush3.bf16.msra.mxu1 %v15704_v63  ;;  %v7692_v51 = vpack.c.bf16 %v7687_v49, %v7686_v3  ;;  %v7693_v42 = vpack.c.bf16 %v7689_v52, %v7688_v11  ;;  %v7992_v60 = vld [vmem:[#allocation2 + $0x2a] sm:$0xff]  ;;  %v7993_v9 = vld [vmem:[#allocation2 + $0x32] sm:$0xff]  ;;  %v7997_v36 = vpack.c.bf16 %v7991_v10, %v7990_v21  ;;  %v7994_v35 = vld [vmem:[#allocation2 + $0x3a] sm:$0xff] }
0x1670   : > { %14212 = vmatprep.subr.bf16.mxu1 %v15705_v1  ;;  %v7998_v12 = vpack.c.bf16 %v7993_v9, %v7992_v60  ;;  %v7995_v41 = vld [vmem:[#allocation2 + $0x42] sm:$0xff]  ;;  %v18023_v10 = vld [vmem:[#allocation27 + $0x1c0] sm:$0xff]   ;;  %v15753_v21 = vld [vmem:[%s18633_s14 + $0x90] sm:$0xff]  }
0x1671   : > { %14204 = vmatprep.mubr.bf16.mxu1 %v7692_v51  ;;  %v7999_v13 = vpack.c.bf16 %v7995_v41, %v7994_v35  ;;  %v15751_v60 = vld [vmem:[%s18633_s14 + $0x80] sm:$0xff]   ;;  %v15752_v9 = vld [vmem:[%s18633_s14 + $0x88] sm:$0xff]  }
0x1672   : > { %14205 = vmatmul.mubr.bf16.gmra.mrb[60].mxu1 %v7693_v42  ;;  %v15756_v35 = vld [vmem:[%s18633_s14 + $0xa8] sm:$0xff]   ;;  %v12290_v41 = vld [vmem:[%s18635_s25 + $0x1] ss:$0 sm:$0xff] }
0x1673   : > { %14213 = vmatpush3.bf16.msra.mxu1 %v15705_v1  ;;  %14224 = vmatprep.mubr.bf16.mxu1 %v7846_v14 }
0x1674   : > { %14214 = vmatprep.subr.bf16.mxu1 %v15706_v44 }
0x1677   : > { %14215 = vmatpush3.bf16.msra.mxu1 %v15706_v44 }
0x1678   : > { %14216 = vmatprep.subr.bf16.mxu1 %v15707_v19 }
0x167b   : > { %14217 = vmatpush3.bf16.msra.mxu1 %v15707_v19  ;;  %v15728_v19 = vld [vmem:[#allocation27 + $0x188] sm:$0xff]  }
0x167c   : > { %14218 = vmatprep.subr.bf16.mxu1 %v15708_v54 }
0x167f   : > { %14219 = vmatpush3.bf16.msra.mxu1 %v15708_v54 }
0x1680   : > { %14220 = vmatprep.subr.bf16.mxu1 %v15709_v25 }
0x1683   : > { %14221 = vmatpush3.bf16.msra.mxu1 %v15709_v25 }
0x1684   : > { %14222 = vmatprep.subr.bf16.mxu1 %v15710_v56 }
0x1687   : > { %14223 = vmatpush3.bf16.msra.mxu1 %v15710_v56 }
0x1688   : > { %14232 = vmatprep.subr.bf16.mxu1 %v15711_v16 }
0x168a   : > { %14225 = vmatmul.mubr.bf16.vlgmr.msra.gmra.mrb[56].mxu1 %v7847_v47 }
0x168b   : > { %14228 = vmatprep.mubr.bf16.mxu1 %v7848_v4  ;;  %14233 = vmatpush3.bf16.msra.mxu1 %v15711_v16 }
0x168c   : > { %14234 = vmatprep.subr.bf16.mxu1 %v15712_v57 }
0x168f   : > { %14235 = vmatpush3.bf16.msra.mxu1 %v15712_v57 }
0x1690   : > { %14236 = vmatprep.subr.bf16.mxu1 %v15713_v15 }
0x1692   : > { %14229 = vmatmul.mubr.bf16.gmra.mrb[60].mxu1 %v7849_v7 }
0x1693   : > { %14237 = vmatpush3.bf16.msra.mxu1 %v15713_v15  ;;  %14248 = vmatprep.mubr.bf16.mxu1 %v7996_v46  ;;  %v15729_v15 = vld [vmem:[#allocation27 + $0x190] sm:$0xff]   ;;  %v15730_v46 = vld [vmem:[#allocation27 + $0x198] sm:$0xff]  }
0x1694   : > { %14238 = vmatprep.subr.bf16.mxu1 %v15714_v38 }
0x1697   : > { %14239 = vmatpush3.bf16.msra.mxu1 %v15714_v38 }
0x1698   : > { %14240 = vmatprep.subr.bf16.mxu1 %v15715_v48 }
0x169b   : > { %14241 = vmatpush3.bf16.msra.mxu1 %v15715_v48  ;;  %v15731_v48 = vld [vmem:[#allocation27 + $0x1a0] sm:$0xff]  }
0x169c   : > { %14242 = vmatprep.subr.bf16.mxu1 %v15716_v0 }
0x169f   : > { %14243 = vmatpush3.bf16.msra.mxu1 %v15716_v0  ;;  %v15732_v0 = vld [vmem:[#allocation27 + $0x1a8] sm:$0xff]  }
0x16a0   : > { %14244 = vmatprep.subr.bf16.mxu1 %v15717_v27 }
0x16a3   : > { %14245 = vmatpush3.bf16.msra.mxu1 %v15717_v27  ;;  %v15733_v27 = vld [vmem:[#allocation27 + $0x1b0] sm:$0xff]  }
0x16a4   : > { %14246 = vmatprep.subr.bf16.mxu1 %v15718_v31 }
0x16a7   : > { %14247 = vmatpush3.bf16.msra.mxu1 %v15718_v31  ;;  %v15734_v31 = vld [vmem:[#allocation27 + $0x1b8] sm:$0xff]  }
0x16a8   : > { %14352 = vmatprep.subr.bf16.mxu1 %v15751_v60 }
0x16aa   : > { %14249 = vmatmul.mubr.bf16.vlgmr.msra.gmra.mrb[56].mxu1 %v7997_v36  ;;  %v15754_v36 = vld [vmem:[%s18633_s14 + $0x98] sm:$0xff]  }
0x16ab   : > { %14252 = vmatprep.mubr.bf16.mxu1 %v7998_v12  ;;  %14353 = vmatpush3.bf16.msra.mxu1 %v15751_v60  ;;  %v15755_v12 = vld [vmem:[%s18633_s14 + $0xa0] sm:$0xff]  }
0x16ac   : > { %14354 = vmatprep.subr.bf16.mxu1 %v15752_v9  ;;  %v15740_v60 = vld [vmem:[#allocation27 + $0x1e8] sm:$0xff]  }
0x16af   : > { %14355 = vmatpush3.bf16.msra.mxu1 %v15752_v9  ;;  %v15741_v9 = vld [vmem:[#allocation27 + $0x1f0] sm:$0xff]  }
0x16b0   : > { %14356 = vmatprep.subr.bf16.mxu1 %v15753_v21 }
0x16b2   : > { %14253 = vmatmul.mubr.bf16.gmra.mrb[60].mxu1 %v7999_v13 }
0x16b3   : > { %14357 = vmatpush3.bf16.msra.mxu1 %v15753_v21  ;;  %v15742_v21 = vld [vmem:[#allocation27 + $0x1f8] sm:$0xff]  }
0x16b4   : > { %14358 = vmatprep.subr.bf16.mxu1 %v15754_v36 }
0x16b7   : > { %14359 = vmatpush3.bf16.msra.mxu1 %v15754_v36  ;;  %v15743_v36 = vld [vmem:[#allocation27 + $0x200] sm:$0xff]  }
0x16b8   : > { %14360 = vmatprep.subr.bf16.mxu1 %v15755_v12 }
0x16bb   : > { %14361 = vmatpush3.bf16.msra.mxu1 %v15755_v12 }
0x16bc   : > { %14362 = vmatprep.subr.bf16.mxu1 %v15756_v35 }
0x16bf   : > { %14363 = vmatpush3.bf16.msra.mxu1 %v15756_v35  ;;  %v15744_v35 = vld [vmem:[#allocation27 + $0x208] sm:$0xff]  }
0x177d   : > { %v14250_v59 = vpop.f32.mrb[56].mxu1 }
0x177e   : > { %v14792_v2 = vadd.f32 %v14250_v59, %v12256_v29  ;;  %v8099_v53 = vpop.f32.mrb[57].mxu1 }
0x177f   : > { %v14793_v34 = vadd.f32 %v12256_v29, %v8099_v53  ;;  %v14251_v40 = vpop.f32.mrb[58].mxu1 }
0x1780   : > { %v14794_v50 = vadd.f32 %v14251_v40, %v12256_v29  ;;  %v8102_v22 = vpop.f32.mrb[59].mxu1  ;;  %v8140_v1 = vmax.f32 %v14792_v2, 0.0 }
0x1781   : > { %v14795_v63 = vadd.f32 %v12256_v29, %v8102_v22  ;;  %v8138_v3 = vmax.f32 %v14793_v34, 0.0 }
0x1782   : > { %v8141_v52 = vmax.f32 %v14794_v50, 0.0 }
0x1783   : > { %v8139_v49 = vmax.f32 %v14795_v63, 0.0 }
0x1784   : > { %v8147_v11 = vpack.c.bf16 %v8141_v52, %v8140_v1 }
0x1785   : > { %v8146_v51 = vpack.c.bf16 %v8139_v49, %v8138_v3  ;;  %v14254_v42 = vpop.f32.mrb[60].mxu1 }
0x1786   : > { %v14796_v44 = vadd.f32 %v14254_v42, %v12256_v29  ;;  %v8115_v14 = vpop.f32.mrb[61].mxu1 }
0x1787   : > { %v14797_v54 = vadd.f32 %v12256_v29, %v8115_v14  ;;  %v14255_v25 = vpop.f32.mrb[62].mxu1  ;;  %14272 = vmatprep.mubr.bf16.mxu0 %v8146_v51 }
0x1788   : > { %v14798_v56 = vadd.f32 %v14255_v25, %v12256_v29  ;;  %v8118_v16 = vpop.f32.mrb[63].mxu1  ;;  %14273 = vmatmul.mubr.bf16.vlgmr.msra.gmra.mrb[96].mxu0 %v8147_v11  ;;  %v8144_v57 = vmax.f32 %v14796_v44, 0.0 }
0x1789   : > { %v14799_v47 = vadd.f32 %v12256_v29, %v8118_v16  ;;  %14281 = vmatpush3.bf16.msra.mxu0 %v15727_v28  ;;  %v8142_v45 = vmax.f32 %v14797_v54, 0.0 }
0x178a   : > { %v8145_v4 = vmax.f32 %v14798_v56, 0.0  ;;  %14282 = vmatprep.subr.bf16.mxu0 %v15728_v19 }
0x178b   : > { %v8143_v5 = vmax.f32 %v14799_v47, 0.0 }
0x178c   : > { %v8149_v7 = vpack.c.bf16 %v8145_v4, %v8144_v57 }
0x178d   : > { %v8148_v38 = vpack.c.bf16 %v8143_v5, %v8142_v45  ;;  %14283 = vmatpush3.bf16.msra.mxu0 %v15728_v19  ;;  %v15737_v45 = vld [vmem:[#allocation27 + $0x1d0] sm:$0xff]  }
0x178e   : > { %14284 = vmatprep.subr.bf16.mxu0 %v15729_v15 }
0x178f   : > { %14276 = vmatprep.mubr.bf16.mxu0 %v8148_v38 }
0x1790   : > { %14277 = vmatmul.mubr.bf16.gmra.mrb[100].mxu0 %v8149_v7 }
0x1791   : > { %14285 = vmatpush3.bf16.msra.mxu0 %v15729_v15  ;;  %v15736_v15 = vld [vmem:[#allocation27 + $0x1c8] sm:$0xff]  }
0x1792   : > { %14286 = vmatprep.subr.bf16.mxu0 %v15730_v46 }
0x1795   : > { %14287 = vmatpush3.bf16.msra.mxu0 %v15730_v46 }
0x1796   : > { %14288 = vmatprep.subr.bf16.mxu0 %v15731_v48 }
0x1799   : > { %14289 = vmatpush3.bf16.msra.mxu0 %v15731_v48 }
0x179a   : > { %14290 = vmatprep.subr.bf16.mxu0 %v15732_v0 }
0x179d   : > { %14291 = vmatpush3.bf16.msra.mxu0 %v15732_v0 }
0x179e   : > { %14292 = vmatprep.subr.bf16.mxu0 %v15733_v27 }
0x17a1   : > { %14293 = vmatpush3.bf16.msra.mxu0 %v15733_v27  ;;  %v15738_v27 = vld [vmem:[#allocation27 + $0x1d8] sm:$0xff]  }
0x17a2   : > { %14294 = vmatprep.subr.bf16.mxu0 %v15734_v31 }
0x17a5   : > { %14295 = vmatpush3.bf16.msra.mxu0 %v15734_v31 }
0x17a6   : > { %14304 = vmatprep.subr.bf16.mxu0 %v18023_v10 }
0x185b   : > { %v14274_v13 = vpop.f32.mrb[96].mxu0 }
0x185c   : > { %v8266_v62 = vadd.f32 %v14274_v13, %v12290_v41  ;;  %v8257_v6 = vpop.f32.mrb[97].mxu0  ;;  %v15745_v13 = vld [vmem:[#allocation27 + $0x210] sm:$0xff]  }
0x185d   : > { %v8258_v28 = vadd.f32 %v12290_v41, %v8257_v6  ;;  %v14275_v29 = vpop.f32.mrb[98].mxu0  ;;  %v15746_v6 = vld [vmem:[#allocation27 + $0x218] sm:$0xff]  }
0x185e   : > { %v8290_v59 = vadd.f32 %v8266_v62, %v17974_v32  ;;  %v8269_v2 = vadd.f32 %v14275_v29, %v12290_v41  ;;  %v8260_v53 = vpop.f32.mrb[99].mxu0  ;;  %v15747_v29 = vld [vmem:[#allocation27 + $0x220] sm:$0xff]  }
0x185f   : > { %v8288_v34 = vadd.f32 %v8258_v28, %v17978_v8  ;;  %v8261_v40 = vadd.f32 %v12290_v41, %v8260_v53  ;;  %v15750_v53 = vld [vmem:[#allocation27 + $0x238] sm:$0xff]  }
0x1860   : > { %v18036_v50 = vmul.f32 %v8290_v59, %v17481_v18  ;;  %v8291_v22 = vadd.f32 %v8269_v2, %v17983_v33  ;;  %v15748_v59 = vld [vmem:[#allocation27 + $0x228] sm:$0xff]   ;;  %v15749_v2 = vld [vmem:[#allocation27 + $0x230] sm:$0xff]  }
0x1861   : > { %v18040_v63 = vmul.f32 %v8288_v34, %v17479_v17  ;;  %v8289_v1 = vadd.f32 %v8261_v40, %v17987_v58 }
0x1862   : > { %8306 = vst [vmem:[#allocation2 + $0x18] sm:$0xff] %v18036_v50  ;;  %v18045_v52 = vmul.f32 %v8291_v22, %v17486_v24 }
0x1863   : > { %8304 = vst [vmem:[#allocation2 + $0x8] sm:$0xff] %v18040_v63  ;;  %v18049_v32 = vmul.f32 %v8289_v1, %v17484_v20  ;;  %v14278_v8 = vpop.f32.mrb[100].mxu0 }
0x1864   : > { %8307 = vst [vmem:[#allocation2 + $0x20] sm:$0xff] %v18045_v52  ;;  %v8282_v3 = vadd.f32 %v14278_v8, %v12290_v41  ;;  %v8273_v33 = vpop.f32.mrb[101].mxu0  ;;  %v8479_v12 = vpack.c.bf16 %v18045_v52, %v18036_v50  ;;  %v15757_v8 = vld [vmem:[%s18633_s14 + $0xb0] sm:$0xff]  }
0x1865   : > { %8305 = vst [vmem:[#allocation2 + $0x10] sm:$0xff] %v18049_v32  ;;  %v8274_v49 = vadd.f32 %v12290_v41, %v8273_v33  ;;  %v14279_v11 = vpop.f32.mrb[102].mxu0  ;;  %v8478_v31 = vpack.c.bf16 %v18049_v32, %v18040_v63  ;;  %14364 = vmatprep.subr.bf16.mxu1 %v15757_v8  ;;  %v15759_v33 = vld [vmem:[#allocation29] sm:$0xff]  }
0x1866   : > { %v8294_v58 = vadd.f32 %v8282_v3, %v17994_v23  ;;  %v8285_v51 = vadd.f32 %v14279_v11, %v12290_v41  ;;  %v8276_v42 = vpop.f32.mrb[103].mxu0  ;;  %14365 = vmatpush3.bf16.msra.mxu1 %v15757_v8  ;;  %v15758_v3 = vld [vmem:[%s18633_s14 + $0xb8] sm:$0xff]  }
0x1867   : > { %v8292_v44 = vadd.f32 %v8274_v49, %v17998_v30  ;;  %v8277_v14 = vadd.f32 %v12290_v41, %v8276_v42  ;;  %14366 = vmatprep.subr.bf16.mxu1 %v15758_v3  ;;  %v12308_v49 = vld [vmem:[%s18634_s13 + $0x2] ss:$0 sm:$0xff]  ;;  %s18341_s13 = sshll.u32 %s17028_s18, 10 }
0x1868   : > { %v18056_v19 = vmul.f32 %v8294_v58, %v17508_v55  ;;  %v8295_v54 = vadd.f32 %v8285_v51, %v18003_v39  ;;  %s18345_s14 = scalar_lea.hbm %s18578_s5, %s18341_s13  ;;  %s18352_s16 = scalar_lea.hbm %s16990_s12, %s18341_s13 }
0x1869   : > { %v18060_v25 = vmul.f32 %v8292_v44, %v17491_v37  ;;  %v8293_v56 = vadd.f32 %v8277_v14, %v18007_v26 }
0x186a   : > { %8310 = vst [vmem:[#allocation2 + $0x38] sm:$0xff] %v18056_v19  ;;  %v18065_v16 = vmul.f32 %v8295_v54, %v17514_v61  ;;  %v8314_v39 = vld [vmem:[#allocation2 + $0x4] sm:$0xff]  ;;  %14367 = vmatpush3.bf16.msra.mxu1 %v15758_v3 }
0x186b   : > { %8308 = vst [vmem:[#allocation2 + $0x28] sm:$0xff] %v18060_v25  ;;  %v18069_v23 = vmul.f32 %v8293_v56, %v17500_v43  ;;  %v18071_v30 = vld [vmem:[#allocation2 + $0x1c] sm:$0xff]  ;;  %14376 = vmatprep.subr.bf16.mxu1 %v15759_v33 }
0x186c   : > { %8311 = vst [vmem:[#allocation2 + $0x40] sm:$0xff] %v18065_v16  ;;  %v8315_v47 = vld [vmem:[#allocation2 + $0xc] sm:$0xff]  ;;  %v8316_v57 = vld [vmem:[#allocation2 + $0x14] sm:$0xff]  ;;  %v8481_v62 = vpack.c.bf16 %v18065_v16, %v18056_v19 }
0x186d   : > { %8309 = vst [vmem:[#allocation2 + $0x30] sm:$0xff] %v18069_v23  ;;  %v8322_v26 = vpack.c.bf16 %v8315_v47, %v8314_v39  ;;  %v8323_v4 = vpack.c.bf16 %v18071_v30, %v8316_v57  ;;  %v8480_v41 = vpack.c.bf16 %v18069_v23, %v18060_v25  ;;  %v8628_v28 = vpack.c.bf16 %v8316_v57, %v8315_v47 }
0x186f   : > { %14296 = vmatprep.mubr.bf16.mxu0 %v8322_v26 }
0x1870   : > { %14297 = vmatmul.mubr.bf16.vlgmr.msra.gmra.mrb[104].mxu0 %v8323_v4 }
0x1871   : > { %14305 = vmatpush3.bf16.msra.mxu0 %v18023_v10  ;;  %v15739_v10 = vld [vmem:[#allocation27 + $0x1e0] sm:$0xff]  }
0x1872   : > { %14306 = vmatprep.subr.bf16.mxu0 %v15736_v15  ;;  %v8318_v7 = vld [vmem:[#allocation2 + $0x24] sm:$0xff] }
0x1873   : > { %v18077_v5 = vld [vmem:[#allocation2 + $0x3c] sm:$0xff]  ;;  %v8629_v34 = vpack.c.bf16 %v8318_v7, %v18071_v30  ;;  %v8627_v22 = vld [vmem:[#allocation2 + $0x44] sm:$0xff] }
0x1874   : > { %v8319_v38 = vld [vmem:[#allocation2 + $0x2c] sm:$0xff]  ;;  %v8320_v46 = vld [vmem:[#allocation2 + $0x34] sm:$0xff]  ;;  %v8631_v1 = vpack.c.bf16 %v8627_v22, %v18077_v5 }
0x1875   : > { %14307 = vmatpush3.bf16.msra.mxu0 %v15736_v15  ;;  %v8324_v48 = vpack.c.bf16 %v8319_v38, %v8318_v7  ;;  %v8325_v0 = vpack.c.bf16 %v18077_v5, %v8320_v46  ;;  %v8630_v40 = vpack.c.bf16 %v8320_v46, %v8319_v38  ;;  %v15760_v7 = vld [vmem:[#allocation29 + $0x8] sm:$0xff]  }
0x1876   : > { %14308 = vmatprep.subr.bf16.mxu0 %v15737_v45 }
0x1877   : > { %14300 = vmatprep.mubr.bf16.mxu0 %v8324_v48 }
0x1878   : > { %14301 = vmatmul.mubr.bf16.gmra.mrb[108].mxu0 %v8325_v0 }
0x1879   : > { %14309 = vmatpush3.bf16.msra.mxu0 %v15737_v45  ;;  %14320 = vmatprep.mubr.bf16.mxu0 %v8478_v31 }
0x187a   : > { %14310 = vmatprep.subr.bf16.mxu0 %v15738_v27 }
0x187d   : > { %14311 = vmatpush3.bf16.msra.mxu0 %v15738_v27 }
0x187e   : > { %14312 = vmatprep.subr.bf16.mxu0 %v15739_v10 }
0x1881   : > { %14313 = vmatpush3.bf16.msra.mxu0 %v15739_v10 }
0x1882   : > { %14314 = vmatprep.subr.bf16.mxu0 %v15740_v60 }
0x1885   : > { %14315 = vmatpush3.bf16.msra.mxu0 %v15740_v60  ;;  %v15761_v60 = vld [vmem:[#allocation29 + $0x10] sm:$0xff]  }
0x1886   : > { %14316 = vmatprep.subr.bf16.mxu0 %v15741_v9 }
0x1889   : > { %14317 = vmatpush3.bf16.msra.mxu0 %v15741_v9 }
0x188a   : > { %14318 = vmatprep.subr.bf16.mxu0 %v15742_v21 }
0x188d   : > { %14319 = vmatpush3.bf16.msra.mxu0 %v15742_v21 }
0x188e   : > { %14328 = vmatprep.subr.bf16.mxu0 %v15743_v36 }
0x1890   : > { %14321 = vmatmul.mubr.bf16.vlgmr.msra.gmra.mrb[104].mxu0 %v8479_v12 }
0x1891   : > { %14324 = vmatprep.mubr.bf16.mxu0 %v8480_v41  ;;  %14329 = vmatpush3.bf16.msra.mxu0 %v15743_v36  ;;  %v15763_v41 = vld [vmem:[#allocation29 + $0x20] sm:$0xff]  }
0x1892   : > { %14330 = vmatprep.subr.bf16.mxu0 %v15744_v35 }
0x1895   : > { %14331 = vmatpush3.bf16.msra.mxu0 %v15744_v35  ;;  %v15762_v35 = vld [vmem:[#allocation29 + $0x18] sm:$0xff]  }
0x1896   : > { %14332 = vmatprep.subr.bf16.mxu0 %v15745_v13 }
0x1898   : > { %14325 = vmatmul.mubr.bf16.gmra.mrb[108].mxu0 %v8481_v62  ;;  %v15765_v62 = vld [vmem:[#allocation29 + $0x30] sm:$0xff]  }
0x1899   : > { %14333 = vmatpush3.bf16.msra.mxu0 %v15745_v13  ;;  %14344 = vmatprep.mubr.bf16.mxu0 %v8628_v28  ;;  %v15764_v13 = vld [vmem:[#allocation29 + $0x28] sm:$0xff]  }
0x189a   : > { %14334 = vmatprep.subr.bf16.mxu0 %v15746_v6  ;;  %v12342_v28 = vld [vmem:[%s18635_s25 + $0x2] ss:$0 sm:$0xff] }
0x189d   : > { %14335 = vmatpush3.bf16.msra.mxu0 %v15746_v6  ;;  %v15766_v6 = vld [vmem:[#allocation29 + $0x38] sm:$0xff]  }
0x189e   : > { %14336 = vmatprep.subr.bf16.mxu0 %v15747_v29 }
0x18a1   : > { %14337 = vmatpush3.bf16.msra.mxu0 %v15747_v29 }
0x18a2   : > { %14338 = vmatprep.subr.bf16.mxu0 %v15748_v59 }
0x18a5   : > { %14339 = vmatpush3.bf16.msra.mxu0 %v15748_v59 }
0x18a6   : > { %14340 = vmatprep.subr.bf16.mxu0 %v15749_v2 }
0x18a9   : > { %14341 = vmatpush3.bf16.msra.mxu0 %v15749_v2 }
0x18aa   : > { %14342 = vmatprep.subr.bf16.mxu0 %v15750_v53 }
0x18ad   : > { %14343 = vmatpush3.bf16.msra.mxu0 %v15750_v53 }
0x18b0   : > { %14345 = vmatmul.mubr.bf16.vlgmr.msra.gmra.mrb[104].mxu0 %v8629_v34 }
0x18b1   : > { %14348 = vmatprep.mubr.bf16.mxu0 %v8630_v40 }
0x18b8   : > { %14349 = vmatmul.mubr.bf16.gmra.mrb[108].mxu0 %v8631_v1 }
0x1983   : > { %v14346_v11 = vpop.f32.mrb[104].mxu0 }
0x1984   : > { %v14800_v58 = vadd.f32 %v14346_v11, %v12308_v49  ;;  %v8731_v51 = vpop.f32.mrb[105].mxu0 }
0x1985   : > { %v14801_v42 = vadd.f32 %v12308_v49, %v8731_v51  ;;  %v14347_v44 = vpop.f32.mrb[106].mxu0 }
0x1986   : > { %v14802_v14 = vadd.f32 %v14347_v44, %v12308_v49  ;;  %v8734_v54 = vpop.f32.mrb[107].mxu0  ;;  %v8772_v30 = vmax.f32 %v14800_v58, 0.0 }
0x1987   : > { %v14803_v56 = vadd.f32 %v12308_v49, %v8734_v54  ;;  %v8770_v47 = vmax.f32 %v14801_v42, 0.0 }
0x1988   : > { %v8773_v39 = vmax.f32 %v14802_v14, 0.0 }
0x1989   : > { %v8771_v57 = vmax.f32 %v14803_v56, 0.0 }
0x198a   : > { %v8779_v26 = vpack.c.bf16 %v8773_v39, %v8772_v30 }
0x198b   : > { %v8778_v4 = vpack.c.bf16 %v8771_v57, %v8770_v47  ;;  %v14350_v15 = vpop.f32.mrb[108].mxu0 }
0x198c   : > { %v14804_v45 = vadd.f32 %v14350_v15, %v12308_v49  ;;  %v8747_v5 = vpop.f32.mrb[109].mxu0 }
0x198d   : > { %v14805_v38 = vadd.f32 %v12308_v49, %v8747_v5  ;;  %v14351_v46 = vpop.f32.mrb[110].mxu0  ;;  %14368 = vmatprep.mubr.bf16.mxu1 %v8778_v4 }
0x198e   : > { %v14806_v48 = vadd.f32 %v14351_v46, %v12308_v49  ;;  %v8750_v0 = vpop.f32.mrb[111].mxu0  ;;  %14369 = vmatmul.mubr.bf16.vlgmr.msra.gmra.mrb[64].mxu1 %v8779_v26  ;;  %v8776_v31 = vmax.f32 %v14804_v45, 0.0 }
0x198f   : > { %v14807_v27 = vadd.f32 %v12308_v49, %v8750_v0  ;;  %14377 = vmatpush3.bf16.msra.mxu1 %v15759_v33  ;;  %v8774_v9 = vmax.f32 %v14805_v38, 0.0 }
0x1990   : > { %v8777_v10 = vmax.f32 %v14806_v48, 0.0  ;;  %14378 = vmatprep.subr.bf16.mxu1 %v15760_v7 }
0x1991   : > { %v8775_v21 = vmax.f32 %v14807_v27, 0.0 }
0x1992   : > { %v8781_v36 = vpack.c.bf16 %v8777_v10, %v8776_v31 }
0x1993   : > { %v8780_v12 = vpack.c.bf16 %v8775_v21, %v8774_v9  ;;  %14379 = vmatpush3.bf16.msra.mxu1 %v15760_v7 }
0x1994   : > { %14380 = vmatprep.subr.bf16.mxu1 %v15761_v60 }
0x1995   : > { %14372 = vmatprep.mubr.bf16.mxu1 %v8780_v12 }
0x1996   : > { %14373 = vmatmul.mubr.bf16.gmra.mrb[68].mxu1 %v8781_v36 }
0x1997   : > { %14381 = vmatpush3.bf16.msra.mxu1 %v15761_v60 }
0x1998   : > { %14382 = vmatprep.subr.bf16.mxu1 %v15762_v35 }
0x199b   : > { %14383 = vmatpush3.bf16.msra.mxu1 %v15762_v35 }
0x199c   : > { %14384 = vmatprep.subr.bf16.mxu1 %v15763_v41 }
0x199f   : > { %14385 = vmatpush3.bf16.msra.mxu1 %v15763_v41 }
0x19a0   : > { %14386 = vmatprep.subr.bf16.mxu1 %v15764_v13 }
0x19a3   : > { %14387 = vmatpush3.bf16.msra.mxu1 %v15764_v13 }
0x19a4   : > { %14388 = vmatprep.subr.bf16.mxu1 %v15765_v62 }
0x19a7   : > { %14389 = vmatpush3.bf16.msra.mxu1 %v15765_v62 }
0x19a8   : > { %14390 = vmatprep.subr.bf16.mxu1 %v15766_v6 }
0x19ab   : > { %14391 = vmatpush3.bf16.msra.mxu1 %v15766_v6 }
0x1a61   : > { %v14370_v29 = vpop.f32.mrb[64].mxu1 }
0x1a62   : > { %v8898_v59 = vadd.f32 %v14370_v29, %v12342_v28  ;;  %v8889_v2 = vpop.f32.mrb[65].mxu1 }
0x1a63   : > { %v8890_v53 = vadd.f32 %v12342_v28, %v8889_v2  ;;  %v14371_v34 = vpop.f32.mrb[66].mxu1 }
0x1a64   : > { %v8922_v40 = vadd.f32 %v8898_v59, %v18036_v50  ;;  %v8901_v22 = vadd.f32 %v14371_v34, %v12342_v28  ;;  %v8892_v1 = vpop.f32.mrb[67].mxu1 }
0x1a65   : > { %v8920_v8 = vadd.f32 %v8890_v53, %v18040_v63  ;;  %v8893_v3 = vadd.f32 %v12342_v28, %v8892_v1  ;;  %v15769_v1 = vld [vmem:[#allocation30 + $0x10] sm:$0xff]  }
0x1a66   : > { %v8923_v33 = vadd.f32 %v8901_v22, %v18045_v52  ;;  %v8930_v11 = vmul.f32 %v8922_v40, %v17481_v18  ;;  %v15767_v40 = vld [vmem:[#allocation30] sm:$0xff]   ;;  %v15768_v22 = vld [vmem:[#allocation30 + $0x8] sm:$0xff]  }
0x1a67   : > { %v8921_v49 = vadd.f32 %v8893_v3, %v18049_v32  ;;  %v8928_v51 = vmul.f32 %v8920_v8, %v17479_v17  ;;  %14400 = vmatprep.subr.bf16.mxu0 %v15767_v40 }
0x1a68   : > { %v8931_v58 = vmul.f32 %v8923_v33, %v17486_v24  ;;  %14401 = vmatpush3.bf16.msra.mxu0 %v15767_v40 }
0x1a69   : > { %v8929_v42 = vmul.f32 %v8921_v49, %v17484_v20  ;;  %v14374_v44 = vpop.f32.mrb[68].mxu1  ;;  %14402 = vmatprep.subr.bf16.mxu0 %v15768_v22 }
0x1a6a   : > { %v8937_v14 = vpack.c.bf16 %v8931_v58, %v8930_v11  ;;  %v8914_v50 = vadd.f32 %v14374_v44, %v12342_v28  ;;  %v8905_v54 = vpop.f32.mrb[69].mxu1 }
0x1a6b   : > { %v8906_v56 = vadd.f32 %v12342_v28, %v8905_v54  ;;  %v14375_v30 = vpop.f32.mrb[70].mxu1  ;;  %v8936_v63 = vpack.c.bf16 %v8929_v42, %v8928_v51 }
0x1a6c   : > { %v8926_v39 = vadd.f32 %v8914_v50, %v18056_v19  ;;  %v8917_v52 = vadd.f32 %v14375_v30, %v12342_v28  ;;  %v8908_v32 = vpop.f32.mrb[71].mxu1  ;;  %14403 = vmatpush3.bf16.msra.mxu0 %v15768_v22 }
0x1a6d   : > { %v8924_v47 = vadd.f32 %v8906_v56, %v18060_v25  ;;  %v8909_v57 = vadd.f32 %v12342_v28, %v8908_v32  ;;  %14392 = vmatprep.mubr.bf16.mxu1 %v8936_v63  ;;  %v12351_v25 = vld [vmem:[%s18636_s17] ss:$0 sm:$0xff]  ;;  %14404 = vmatprep.subr.bf16.mxu0 %v15769_v1  ;;  %s18639_s17 = sld [smem:[#allocation84_spill]] }
0x1a6e   : > { %v8927_v26 = vadd.f32 %v8917_v52, %v18065_v16  ;;  %14393 = vmatmul.mubr.bf16.vlgmr.msra.gmra.mrb[72].mxu1 %v8937_v14  ;;  %v8934_v15 = vmul.f32 %v8926_v39, %v17508_v55 }
0x1a6f   : > { %v8925_v4 = vadd.f32 %v8909_v57, %v18069_v23  ;;  %v8932_v5 = vmul.f32 %v8924_v47, %v17491_v37 }
0x1a70   : > { %v8935_v45 = vmul.f32 %v8927_v26, %v17514_v61  ;;  %14405 = vmatpush3.bf16.msra.mxu0 %v15769_v1 }
0x1a71   : > { %v8933_v19 = vmul.f32 %v8925_v4, %v17500_v43 }
0x1a72   : > { %v8939_v7 = vpack.c.bf16 %v8935_v45, %v8934_v15 }
0x1a73   : > { %v8938_v38 = vpack.c.bf16 %v8933_v19, %v8932_v5 }
0x1a75   : > { %14396 = vmatprep.mubr.bf16.mxu1 %v8938_v38 }
0x1a76   : > { %14397 = vmatmul.mubr.bf16.gmra.mrb[76].mxu1 %v8939_v7 }
0x1b41   : > { %v14394_v46 = vpop.f32.mrb[72].mxu1 }
0x1b42   : > { %v9054_v48 = vadd.f32 %v14394_v46, %v12351_v25  ;;  %v9045_v16 = vpop.f32.mrb[73].mxu1 }
0x1b43   : > { %v9046_v0 = vadd.f32 %v12351_v25, %v9045_v16  ;;  %v14395_v27 = vpop.f32.mrb[74].mxu1 }
0x1b44   : > { %v9078_v23 = vmul.f32 %v9054_v48, %v17481_v18  ;;  %v9057_v31 = vadd.f32 %v14395_v27, %v12351_v25  ;;  %v9048_v10 = vpop.f32.mrb[75].mxu1  ;;  %v15771_v27 = vld [vmem:[#allocation30 + $0x20] sm:$0xff]  }
0x1b45   : > { %v9076_v60 = vmul.f32 %v9046_v0, %v17479_v17  ;;  %v9049_v9 = vadd.f32 %v12351_v25, %v9048_v10  ;;  %v15770_v0 = vld [vmem:[#allocation30 + $0x18] sm:$0xff]  }
0x1b46   : > { %9086 = vst [vmem:[%s18114_s19 + $0x10] sm:$0xff] %v9078_v23  ;;  %v9079_v21 = vmul.f32 %v9057_v31, %v17486_v24  ;;  %14406 = vmatprep.subr.bf16.mxu0 %v15770_v0  ;;  %v15773_v31 = vld [vmem:[#allocation30 + $0x30] sm:$0xff]   ;;  %v15774_v10 = vld [vmem:[#allocation30 + $0x38] sm:$0xff]  }
0x1b47   : > { %9084 = vst [vmem:[%s18114_s19] sm:$0xff] %v9076_v60  ;;  %v9077_v36 = vmul.f32 %v9049_v9, %v17484_v20  ;;  %9092 = vmax.xlane.f32.xlu1 %v9076_v60  ;;  %14407 = vmatpush3.bf16.msra.mxu0 %v15770_v0  ;;  %v15776_v9 = vld [vmem:[#allocation32 + $0x8] sm:$0xff]   ;;  %v12360_v0 = vld [vmem:[%s18637_s22] ss:$0 sm:$0xff]  ;;  %s18316_s22 = scalar_lea.vmem [#allocation36], %s17865_s3 }
0x1b48   : > { %9087 = vst [vmem:[%s18114_s19 + $0x18] sm:$0xff] %v9079_v21  ;;  %14408 = vmatprep.subr.bf16.mxu0 %v15771_v27 }
0x1b49   : > { %9085 = vst [vmem:[%s18114_s19 + $0x8] sm:$0xff] %v9077_v36  ;;  %9094 = vmax.xlane.f32.xlu0 %v9077_v36  ;;  %v14398_v12 = vpop.f32.mrb[76].mxu1 }
0x1b4a   : > { %v9070_v35 = vadd.f32 %v14398_v12, %v12351_v25  ;;  %v9061_v41 = vpop.f32.mrb[77].mxu1 }
0x1b4b   : > { %v9062_v13 = vadd.f32 %v12351_v25, %v9061_v41  ;;  %9096 = vmax.xlane.f32.xlu1 %v9078_v23  ;;  %v14399_v62 = vpop.f32.mrb[78].mxu1  ;;  %14409 = vmatpush3.bf16.msra.mxu0 %v15771_v27 }
0x1b4c   : > { %v9082_v6 = vmul.f32 %v9070_v35, %v17508_v55  ;;  %v9073_v28 = vadd.f32 %v14399_v62, %v12351_v25  ;;  %v9064_v29 = vpop.f32.mrb[79].mxu1 }
0x1b4d   : > { %v9080_v59 = vmul.f32 %v9062_v13, %v17491_v37  ;;  %v9065_v2 = vadd.f32 %v12351_v25, %v9064_v29  ;;  %9098 = vmax.xlane.f32.xlu0 %v9079_v21 }
0x1b4e   : > { %9090 = vst [vmem:[%s18114_s19 + $0x30] sm:$0xff] %v9082_v6  ;;  %v9083_v53 = vmul.f32 %v9073_v28, %v17514_v61 }
0x1b4f   : > { %9088 = vst [vmem:[%s18114_s19 + $0x20] sm:$0xff] %v9080_v59  ;;  %v9081_v34 = vmul.f32 %v9065_v2, %v17500_v43  ;;  %9100 = vmax.xlane.f32.xlu1 %v9080_v59 }
0x1b50   : > { %9091 = vst [vmem:[%s18114_s19 + $0x38] sm:$0xff] %v9083_v53 }
0x1b51   : > { %9089 = vst [vmem:[%s18114_s19 + $0x28] sm:$0xff] %v9081_v34  ;;  %9102 = vmax.xlane.f32.xlu0 %v9081_v34  ;;  %s16544_s19 = scalar_lea.vmem %s18348_s15, 1024 }
0x1b52   : > { %p16545_p12 = scmp.ne.s32.totalorder %s18348_s15, %s16544_s19 }
0x1b53   : > { %9104 = vmax.xlane.f32.xlu1 %v9082_v6 }
0x1b54   : > { %p16546_p7 = pnand %p16545_p12, %p18640_p5 }
0x1b55   : > { %9106 = vmax.xlane.f32.xlu0 %v9083_v53 }
0x1b56   : > { %p16547_p1 = pneg %p16546_p7 }
0x1bd4   : > { %v9093_v8 = vpop.xlane.xlu1 %9092 }
0x1bd5   : > { %v9108_v3 = vsub.f32 %v9076_v60, %v9093_v8  ;;  %v15775_v60 = vld [vmem:[#allocation32] sm:$0xff]  }
0x1bd6   : > { %v9095_v33 = vpop.xlane.xlu0 %9094  ;;  %14424 = vmatprep.subr.bf16.mxu1 %v15775_v60 }
0x1bd7   : > { %v9116_v49 = vmul.f32 1.442695, %v9108_v3  ;;  %v9109_v11 = vsub.f32 %v9077_v36, %v9095_v33  ;;  %14425 = vmatpush3.bf16.msra.mxu1 %v15775_v60  ;;  %v15778_v36 = vld [vmem:[#allocation32 + $0x18] sm:$0xff]  }
0x1bd8   : > { %v9097_v58 = vpop.xlane.xlu1 %9096  ;;  %14426 = vmatprep.subr.bf16.mxu1 %v15776_v9 }
0x1bd9   : > { %15911 = vpow2.f32 %v9116_v49  ;;  %v9118_v51 = vmul.f32 1.442695, %v9109_v11  ;;  %v9110_v42 = vsub.f32 %v9078_v23, %v9097_v58  ;;  %v15772_v23 = vld [vmem:[#allocation30 + $0x28] sm:$0xff]  }
0x1bda   : > { %v9099_v44 = vpop.xlane.xlu0 %9098  ;;  %14410 = vmatprep.subr.bf16.mxu0 %v15772_v23 }
0x1bdb   : > { %15913 = vpow2.f32 %v9118_v51  ;;  %v9120_v14 = vmul.f32 1.442695, %v9110_v42  ;;  %v9111_v50 = vsub.f32 %v9079_v21, %v9099_v44  ;;  %14411 = vmatpush3.bf16.msra.mxu0 %v15772_v23  ;;  %v15777_v21 = vld [vmem:[#allocation32 + $0x10] sm:$0xff]   ;;  %14427 = vmatpush3.bf16.msra.mxu1 %v15776_v9 }
0x1bdc   : > { %v9101_v54 = vpop.xlane.xlu1 %9100  ;;  %14412 = vmatprep.subr.bf16.mxu0 %v15773_v31  ;;  %14428 = vmatprep.subr.bf16.mxu1 %v15777_v21 }
0x1bdd   : > { %15915 = vpow2.f32 %v9120_v14  ;;  %v9122_v56 = vmul.f32 1.442695, %v9111_v50  ;;  %v9112_v30 = vsub.f32 %v9080_v59, %v9101_v54 }
0x1bde   : > { %v9103_v63 = vpop.xlane.xlu0 %9102 }
0x1bdf   : > { %15917 = vpow2.f32 %v9122_v56  ;;  %v9124_v39 = vmul.f32 1.442695, %v9112_v30  ;;  %v9113_v52 = vsub.f32 %v9081_v34, %v9103_v63  ;;  %14413 = vmatpush3.bf16.msra.mxu0 %v15773_v31  ;;  %14429 = vmatpush3.bf16.msra.mxu1 %v15777_v21 }
0x1be0   : > { %v9105_v32 = vpop.xlane.xlu1 %9104  ;;  %14414 = vmatprep.subr.bf16.mxu0 %v15774_v10  ;;  %14430 = vmatprep.subr.bf16.mxu1 %v15778_v36 }
0x1be1   : > { %15919 = vpow2.f32 %v9124_v39  ;;  %v9126_v47 = vmul.f32 1.442695, %v9113_v52  ;;  %v9114_v57 = vsub.f32 %v9082_v6, %v9105_v32 }
0x1be2   : > { %v9107_v26 = vpop.xlane.xlu0 %9106 }
0x1be3   : > { %v18130_v4 = vpop.eup %15911  ;;  %15921 = vpow2.f32 %v9126_v47  ;;  %v9128_v15 = vmul.f32 1.442695, %v9114_v57  ;;  %v9115_v45 = vsub.f32 %v9083_v53, %v9107_v26  ;;  %14415 = vmatpush3.bf16.msra.mxu0 %v15774_v10  ;;  %14431 = vmatpush3.bf16.msra.mxu1 %v15778_v36 }
0x1be4   : > { %9132 = vadd.xlane.f32.xlu1 %v18130_v4 }
0x1be5   : > { %v15914_v5 = vpop.eup %15913  ;;  %15923 = vpow2.f32 %v9128_v15  ;;  %v9130_v19 = vmul.f32 1.442695, %v9115_v45  ;;  %v15780_v15 = vld [vmem:[#allocation32 + $0x28] sm:$0xff]   ;;  %v15781_v45 = vld [vmem:[#allocation32 + $0x30] sm:$0xff]  }
0x1be6   : > { %9134 = vadd.xlane.f32.xlu0 %v15914_v5 }
0x1be7   : > { %v15916_v7 = vpop.eup %15915  ;;  %15925 = vpow2.f32 %v9130_v19  ;;  %v15783_v19 = vld [vmem:[#allocation32 + $0x40] sm:$0xff]  }
0x1be8   : > { %9136 = vadd.xlane.f32.xlu1 %v15916_v7 }
0x1be9   : > { %v15918_v38 = vpop.eup %15917 }
0x1bea   : > { %9138 = vadd.xlane.f32.xlu0 %v15918_v38 }
0x1beb   : > { %v18133_v25 = vpop.eup %15919 }
0x1bec   : > { %9140 = vadd.xlane.f32.xlu1 %v18133_v25 }
0x1bed   : > { %v18136_v46 = vpop.eup %15921 }
0x1bee   : > { %9142 = vadd.xlane.f32.xlu0 %v18136_v46 }
0x1bef   : > { %v18139_v48 = vpop.eup %15923 }
0x1bf0   : > { %9144 = vadd.xlane.f32.xlu1 %v18139_v48 }
0x1bf1   : > { %v18142_v16 = vpop.eup %15925 }
0x1bf2   : > { %9146 = vadd.xlane.f32.xlu0 %v18142_v16 }
0x1c71   : > { %v9133_v12 = vpop.xlane.xlu1 %9132 }
0x1c72   : > { %15927 = vrcp.f32 %v9133_v12 }
0x1c73   : > { %v9135_v35 = vpop.xlane.xlu0 %9134 }
0x1c74   : > { %15929 = vrcp.f32 %v9135_v35 }
0x1c75   : > { %v9137_v41 = vpop.xlane.xlu1 %9136 }
0x1c76   : > { %15931 = vrcp.f32 %v9137_v41 }
0x1c77   : > { %v9139_v13 = vpop.xlane.xlu0 %9138 }
0x1c78   : > { %15933 = vrcp.f32 %v9139_v13 }
0x1c79   : > { %v9141_v62 = vpop.xlane.xlu1 %9140 }
0x1c7a   : > { %15935 = vrcp.f32 %v9141_v62 }
0x1c7b   : > { %v9143_v6 = vpop.xlane.xlu0 %9142 }
0x1c7c   : > { %v15928_v28 = vpop.eup %15927  ;;  %15937 = vrcp.f32 %v9143_v6 }
0x1c7d   : > { %v9145_v29 = vpop.xlane.xlu1 %9144  ;;  %v9156_v59 = vmul.f32 %v15928_v28, %v18130_v4  ;;  %v15779_v4 = vld [vmem:[#allocation32 + $0x20] sm:$0xff]  }
0x1c7e   : > { %v15930_v2 = vpop.eup %15929  ;;  %15939 = vrcp.f32 %v9145_v29  ;;  %14432 = vmatprep.subr.bf16.mxu1 %v15779_v4 }
0x1c7f   : > { %v9147_v53 = vpop.xlane.xlu0 %9146  ;;  %v9157_v34 = vmul.f32 %v15930_v2, %v15914_v5  ;;  %v9164_v1 = vmul.f32 %v9156_v59, %v17479_v17  ;;  %14433 = vmatpush3.bf16.msra.mxu1 %v15779_v4  ;;  %v15782_v5 = vld [vmem:[#allocation32 + $0x38] sm:$0xff]  }
0x1c80   : > { %v15932_v40 = vpop.eup %15931  ;;  %15941 = vrcp.f32 %v9147_v53  ;;  %14434 = vmatprep.subr.bf16.mxu1 %v15780_v15  ;;  %v15794_v4 = vld [vmem:[#allocation32 + $0x98] sm:$0xff]  }
0x1c81   : > { %v9158_v22 = vmul.f32 %v15932_v40, %v15916_v7  ;;  %v9165_v8 = vmul.f32 %v9157_v34, %v17484_v20  ;;  %v15799_v7 = vld [vmem:[#allocation33] sm:$0xff]  }
0x1c82   : > { %v15934_v3 = vpop.eup %15933  ;;  %14496 = vmatprep.subr.bf16.mxu0 %v15799_v7 }
0x1c83   : > { %v9159_v33 = vmul.f32 %v15934_v3, %v15918_v38  ;;  %v9172_v49 = vpack.c.bf16 %v9165_v8, %v9164_v1  ;;  %v9166_v58 = vmul.f32 %v9158_v22, %v17481_v18  ;;  %14435 = vmatpush3.bf16.msra.mxu1 %v15780_v15  ;;  %v15800_v38 = vld [vmem:[#allocation33 + $0x8] sm:$0xff]   ;;  %v15785_v8 = vld [vmem:[#allocation32 + $0x50] sm:$0xff]  }
0x1c84   : > { %v15936_v11 = vpop.eup %15935  ;;  %14436 = vmatprep.subr.bf16.mxu1 %v15781_v45  ;;  %v15784_v1 = vld [vmem:[#allocation32 + $0x48] sm:$0xff]  }
0x1c85   : > { %v9167_v51 = vmul.f32 %v9159_v33, %v17486_v24  ;;  %14416 = vmatprep.mubr.bf16.mxu0 %v9172_v49  ;;  %v9160_v42 = vmul.f32 %v15936_v11, %v18133_v25  ;;  %v15801_v25 = vld [vmem:[#allocation33 + $0x10] sm:$0xff]  }
0x1c86   : > { %v15938_v44 = vpop.eup %15937 }
0x1c87   : > { %v9173_v14 = vpack.c.bf16 %v9167_v51, %v9166_v58  ;;  %v9161_v50 = vmul.f32 %v15938_v44, %v18136_v46  ;;  %v9168_v56 = vmul.f32 %v9160_v42, %v17491_v37  ;;  %14437 = vmatpush3.bf16.msra.mxu1 %v15781_v45  ;;  %v15802_v46 = vld [vmem:[#allocation33 + $0x18] sm:$0xff]   ;;  %v15795_v45 = vld [vmem:[#allocation32 + $0xa0] sm:$0xff]  }
0x1c88   : > { %v15940_v54 = vpop.eup %15939  ;;  %14438 = vmatprep.subr.bf16.mxu1 %v15782_v5  ;;  %v15786_v42 = vld [vmem:[#allocation32 + $0x58] sm:$0xff]  }
0x1c89   : > { %14417 = vmatmul.mubr.bf16.vlgmr.msra.gmra.mrb[112].mxu0 %v9173_v14  ;;  %v9169_v30 = vmul.f32 %v9161_v50, %v17500_v43  ;;  %v9162_v63 = vmul.f32 %v15940_v54, %v18139_v48  ;;  %v15803_v48 = vld [vmem:[#allocation33 + $0x20] sm:$0xff]   ;;  %v15788_v50 = vld [vmem:[#allocation32 + $0x68] sm:$0xff]   ;;  %v15789_v54 = vld [vmem:[#allocation32 + $0x70] sm:$0xff]  }
0x1c8a   : > { %v15942_v39 = vpop.eup %15941  ;;  %14497 = vmatpush3.bf16.msra.mxu0 %v15799_v7  ;;  %v15787_v14 = vld [vmem:[#allocation32 + $0x60] sm:$0xff]   ;;  %v15798_v7 = vld [vmem:[#allocation32 + $0xb8] sm:$0xff]  }
0x1c8b   : > { %v9174_v52 = vpack.c.bf16 %v9169_v30, %v9168_v56  ;;  %v9163_v32 = vmul.f32 %v15942_v39, %v18142_v16  ;;  %v9170_v47 = vmul.f32 %v9162_v63, %v17508_v55  ;;  %14439 = vmatpush3.bf16.msra.mxu1 %v15782_v5  ;;  %14498 = vmatprep.subr.bf16.mxu0 %v15800_v38  ;;  %v15804_v16 = vld [vmem:[#allocation33 + $0x28] sm:$0xff]   ;;  %v15790_v56 = vld [vmem:[#allocation32 + $0x78] sm:$0xff]   ;;  %v15791_v30 = vld [vmem:[#allocation32 + $0x80] sm:$0xff]  }
0x1c8c   : > { %14448 = vmatprep.subr.bf16.mxu1 %v15783_v19  ;;  %v15792_v39 = vld [vmem:[#allocation32 + $0x88] sm:$0xff]  }
0x1c8d   : > { %14420 = vmatprep.mubr.bf16.mxu0 %v9174_v52  ;;  %v9171_v57 = vmul.f32 %v9163_v32, %v17514_v61  ;;  %v15793_v32 = vld [vmem:[#allocation32 + $0x90] sm:$0xff]   ;;  %v15796_v5 = vld [vmem:[#allocation32 + $0xa8] sm:$0xff]  }
0x1c8e   : > { %14499 = vmatpush3.bf16.msra.mxu0 %v15800_v38 }
0x1c8f   : > { %v9175_v26 = vpack.c.bf16 %v9171_v57, %v9170_v47  ;;  %14500 = vmatprep.subr.bf16.mxu0 %v15801_v25 }
0x1c91   : > { %14421 = vmatmul.mubr.bf16.gmra.mrb[116].mxu0 %v9175_v26 }
0x1c92   : > { %14501 = vmatpush3.bf16.msra.mxu0 %v15801_v25 }
0x1c93   : > { %14502 = vmatprep.subr.bf16.mxu0 %v15802_v46 }
0x1c96   : > { %14503 = vmatpush3.bf16.msra.mxu0 %v15802_v46 }
0x1c97   : > { %14504 = vmatprep.subr.bf16.mxu0 %v15803_v48 }
0x1c9a   : > { %14505 = vmatpush3.bf16.msra.mxu0 %v15803_v48 }
0x1c9b   : > { %14506 = vmatprep.subr.bf16.mxu0 %v15804_v16 }
0x1c9e   : > { %14507 = vmatpush3.bf16.msra.mxu0 %v15804_v16 }
0x1d5c   : > { %v14418_v27 = vpop.f32.mrb[112].mxu0 }
0x1d5d   : > { %v18159_v23 = vadd.f32 %v14418_v27, %v12360_v0  ;;  %v9281_v31 = vpop.f32.mrb[113].mxu0 }
0x1d5e   : > { %v18161_v10 = vadd.f32 %v12360_v0, %v9281_v31  ;;  %v14419_v60 = vpop.f32.mrb[114].mxu0 }
0x1d5f   : > { %9314 = vst [vmem:[#allocation2 + $0x18] sm:$0xff] %v18159_v23  ;;  %v18164_v9 = vadd.f32 %v14419_v60, %v12360_v0  ;;  %v9284_v21 = vpop.f32.mrb[115].mxu0 }
0x1d60   : > { %9312 = vst [vmem:[#allocation2 + $0x8] sm:$0xff] %v18161_v10  ;;  %v18167_v36 = vadd.f32 %v12360_v0, %v9284_v21  ;;  %v15805_v21 = vld [vmem:[#allocation33 + $0x30] sm:$0xff]  }
0x1d61   : > { %9315 = vst [vmem:[#allocation2 + $0x20] sm:$0xff] %v18164_v9  ;;  %v9485_v63 = vpack.c.bf16 %v18164_v9, %v18159_v23  ;;  %14508 = vmatprep.subr.bf16.mxu0 %v15805_v21 }
0x1d62   : > { %9313 = vst [vmem:[#allocation2 + $0x10] sm:$0xff] %v18167_v36  ;;  %v9484_v44 = vpack.c.bf16 %v18167_v36, %v18161_v10  ;;  %14509 = vmatpush3.bf16.msra.mxu0 %v15805_v21 }
0x1d64   : > { %v14422_v12 = vpop.f32.mrb[116].mxu0 }
0x1d65   : > { %v18171_v35 = vadd.f32 %v14422_v12, %v12360_v0  ;;  %v9297_v41 = vpop.f32.mrb[117].mxu0  ;;  %v15806_v12 = vld [vmem:[#allocation33 + $0x38] sm:$0xff]  }
0x1d66   : > { %v18173_v13 = vadd.f32 %v12360_v0, %v9297_v41  ;;  %v14423_v62 = vpop.f32.mrb[118].mxu0  ;;  %14510 = vmatprep.subr.bf16.mxu0 %v15806_v12  ;;  %v15807_v41 = vld [vmem:[#allocation32 + $0xc0] sm:$0xff]  }
0x1d67   : > { %9318 = vst [vmem:[#allocation2 + $0x38] sm:$0xff] %v18171_v35  ;;  %v18176_v6 = vadd.f32 %v14423_v62, %v12360_v0  ;;  %v9300_v28 = vpop.f32.mrb[119].mxu0  ;;  %v9321_v2 = vld [vmem:[#allocation2 + $0x7] sm:$0xff]  ;;  %14511 = vmatpush3.bf16.msra.mxu0 %v15806_v12  ;;  %v12377_v62 = vld [vmem:[%s18638_s2] ss:$0 sm:$0xff] }
0x1d68   : > { %9316 = vst [vmem:[#allocation2 + $0x28] sm:$0xff] %v18173_v13  ;;  %v18179_v29 = vadd.f32 %v12360_v0, %v9300_v28  ;;  %v9324_v59 = vld [vmem:[#allocation2 + $0x1f] sm:$0xff]  ;;  %14520 = vmatprep.subr.bf16.mxu0 %v15807_v41 }
0x1d69   : > { %9319 = vst [vmem:[#allocation2 + $0x40] sm:$0xff] %v18176_v6  ;;  %v9322_v53 = vld [vmem:[#allocation2 + $0xf] sm:$0xff]  ;;  %v9323_v34 = vld [vmem:[#allocation2 + $0x17] sm:$0xff]  ;;  %v9487_v26 = vpack.c.bf16 %v18176_v6, %v18171_v35 }
0x1d6a   : > { %9317 = vst [vmem:[#allocation2 + $0x30] sm:$0xff] %v18179_v29  ;;  %v9329_v40 = vpack.c.bf16 %v9322_v53, %v9321_v2  ;;  %v9330_v22 = vpack.c.bf16 %v9324_v59, %v9323_v34  ;;  %v9486_v52 = vpack.c.bf16 %v18179_v29, %v18173_v13  ;;  %v9626_v47 = vld [vmem:[#allocation2 + $0x9] sm:$0xff]  ;;  %v9627_v57 = vld [vmem:[#allocation2 + $0x11] sm:$0xff]  ;;  %v9628_v48 = vld [vmem:[#allocation2 + $0x19] sm:$0xff] }
0x1d6b   : > { %v9634_v15 = vpack.c.bf16 %v9627_v57, %v9626_v47 }
0x1d6c   : > { %14440 = vmatprep.mubr.bf16.mxu1 %v9329_v40 }
0x1d6d   : > { %14441 = vmatmul.mubr.bf16.vlgmr.msra.gmra.mrb[80].mxu1 %v9330_v22 }
0x1d6e   : > { %14449 = vmatpush3.bf16.msra.mxu1 %v15783_v19  ;;  %v15797_v19 = vld [vmem:[#allocation32 + $0xb0] sm:$0xff]  }
0x1d6f   : > { %14450 = vmatprep.subr.bf16.mxu1 %v15784_v1  ;;  %v9325_v33 = vld [vmem:[#allocation2 + $0x27] sm:$0xff] }
0x1d70   : > { %v9328_v3 = vld [vmem:[#allocation2 + $0x3f] sm:$0xff] }
0x1d71   : > { %v9326_v49 = vld [vmem:[#allocation2 + $0x2f] sm:$0xff]  ;;  %v9327_v11 = vld [vmem:[#allocation2 + $0x37] sm:$0xff]  ;;  %v9629_v38 = vld [vmem:[#allocation2 + $0x21] sm:$0xff] }
0x1d72   : > { %14451 = vmatpush3.bf16.msra.mxu1 %v15784_v1  ;;  %v9331_v58 = vpack.c.bf16 %v9326_v49, %v9325_v33  ;;  %v9332_v51 = vpack.c.bf16 %v9328_v3, %v9327_v11  ;;  %v9630_v25 = vld [vmem:[#allocation2 + $0x29] sm:$0xff]  ;;  %v9631_v46 = vld [vmem:[#allocation2 + $0x31] sm:$0xff]  ;;  %v9635_v16 = vpack.c.bf16 %v9629_v38, %v9628_v48  ;;  %v9632_v27 = vld [vmem:[#allocation2 + $0x39] sm:$0xff] }
0x1d73   : > { %14452 = vmatprep.subr.bf16.mxu1 %v15785_v8  ;;  %v9636_v0 = vpack.c.bf16 %v9631_v46, %v9630_v25  ;;  %v9633_v31 = vld [vmem:[#allocation2 + $0x41] sm:$0xff]  ;;  %v15833_v48 = vld [vmem:[#allocation33 + $0x50] sm:$0xff]  }
0x1d74   : > { %14444 = vmatprep.mubr.bf16.mxu1 %v9331_v58  ;;  %v9637_v60 = vpack.c.bf16 %v9633_v31, %v9632_v27  ;;  %v18192_v38 = vld [vmem:[#allocation32 + $0x100] sm:$0xff]   ;;  %v15832_v46 = vld [vmem:[#allocation33 + $0x48] sm:$0xff]  }
0x1d75   : > { %14445 = vmatmul.mubr.bf16.gmra.mrb[84].mxu1 %v9332_v51  ;;  %v15831_v25 = vld [vmem:[#allocation33 + $0x40] sm:$0xff]   ;;  %v15836_v27 = vld [vmem:[#allocation33 + $0x68] sm:$0xff]  }
0x1d76   : > { %14453 = vmatpush3.bf16.msra.mxu1 %v15785_v8  ;;  %14464 = vmatprep.mubr.bf16.mxu1 %v9484_v44  ;;  %v12394_v31 = vld [vmem:[%s18639_s17] ss:$0 sm:$0xff] }
0x1d77   : > { %14454 = vmatprep.subr.bf16.mxu1 %v15786_v42 }
0x1d7a   : > { %14455 = vmatpush3.bf16.msra.mxu1 %v15786_v42 }
0x1d7b   : > { %14456 = vmatprep.subr.bf16.mxu1 %v15787_v14 }
0x1d7e   : > { %14457 = vmatpush3.bf16.msra.mxu1 %v15787_v14  ;;  %v15808_v14 = vld [vmem:[#allocation32 + $0xc8] sm:$0xff]  }
0x1d7f   : > { %14458 = vmatprep.subr.bf16.mxu1 %v15788_v50 }
0x1d82   : > { %14459 = vmatpush3.bf16.msra.mxu1 %v15788_v50 }
0x1d83   : > { %14460 = vmatprep.subr.bf16.mxu1 %v15789_v54 }
0x1d86   : > { %14461 = vmatpush3.bf16.msra.mxu1 %v15789_v54 }
0x1d87   : > { %14462 = vmatprep.subr.bf16.mxu1 %v15790_v56 }
0x1d8a   : > { %14463 = vmatpush3.bf16.msra.mxu1 %v15790_v56 }
0x1d8b   : > { %14472 = vmatprep.subr.bf16.mxu1 %v15791_v30 }
0x1d8d   : > { %14465 = vmatmul.mubr.bf16.vlgmr.msra.gmra.mrb[80].mxu1 %v9485_v63 }
0x1d8e   : > { %14468 = vmatprep.mubr.bf16.mxu1 %v9486_v52  ;;  %14473 = vmatpush3.bf16.msra.mxu1 %v15791_v30 }
0x1d8f   : > { %14474 = vmatprep.subr.bf16.mxu1 %v15792_v39 }
0x1d92   : > { %14475 = vmatpush3.bf16.msra.mxu1 %v15792_v39 }
0x1d93   : > { %14476 = vmatprep.subr.bf16.mxu1 %v15793_v32 }
0x1d95   : > { %14469 = vmatmul.mubr.bf16.gmra.mrb[84].mxu1 %v9487_v26 }
0x1d96   : > { %14477 = vmatpush3.bf16.msra.mxu1 %v15793_v32  ;;  %14488 = vmatprep.mubr.bf16.mxu1 %v9634_v15  ;;  %v15809_v32 = vld [vmem:[#allocation32 + $0xd0] sm:$0xff]   ;;  %v15810_v15 = vld [vmem:[#allocation32 + $0xd8] sm:$0xff]  }
0x1d97   : > { %14478 = vmatprep.subr.bf16.mxu1 %v15794_v4 }
0x1d9a   : > { %14479 = vmatpush3.bf16.msra.mxu1 %v15794_v4 }
0x1d9b   : > { %14480 = vmatprep.subr.bf16.mxu1 %v15795_v45 }
0x1d9e   : > { %14481 = vmatpush3.bf16.msra.mxu1 %v15795_v45  ;;  %v15811_v45 = vld [vmem:[#allocation32 + $0xe0] sm:$0xff]  }
0x1d9f   : > { %14482 = vmatprep.subr.bf16.mxu1 %v15796_v5 }
0x1da2   : > { %14483 = vmatpush3.bf16.msra.mxu1 %v15796_v5  ;;  %v15812_v5 = vld [vmem:[#allocation32 + $0xe8] sm:$0xff]  }
0x1da3   : > { %14484 = vmatprep.subr.bf16.mxu1 %v15797_v19 }
0x1da6   : > { %14485 = vmatpush3.bf16.msra.mxu1 %v15797_v19  ;;  %v15813_v19 = vld [vmem:[#allocation32 + $0xf0] sm:$0xff]  }
0x1da7   : > { %14486 = vmatprep.subr.bf16.mxu1 %v15798_v7 }
0x1daa   : > { %14487 = vmatpush3.bf16.msra.mxu1 %v15798_v7  ;;  %v15814_v7 = vld [vmem:[#allocation32 + $0xf8] sm:$0xff]  }
0x1dab   : > { %14592 = vmatprep.subr.bf16.mxu1 %v15831_v25 }
0x1dad   : > { %14489 = vmatmul.mubr.bf16.vlgmr.msra.gmra.mrb[80].mxu1 %v9635_v16  ;;  %v15834_v16 = vld [vmem:[#allocation33 + $0x58] sm:$0xff]  }
0x1dae   : > { %14492 = vmatprep.mubr.bf16.mxu1 %v9636_v0  ;;  %14593 = vmatpush3.bf16.msra.mxu1 %v15831_v25  ;;  %v15835_v0 = vld [vmem:[#allocation33 + $0x60] sm:$0xff]   ;;  %v15820_v25 = vld [vmem:[#allocation32 + $0x128] sm:$0xff]  }
0x1daf   : > { %14594 = vmatprep.subr.bf16.mxu1 %v15832_v46 }
0x1db2   : > { %14595 = vmatpush3.bf16.msra.mxu1 %v15832_v46  ;;  %v15821_v46 = vld [vmem:[#allocation32 + $0x130] sm:$0xff]  }
0x1db3   : > { %14596 = vmatprep.subr.bf16.mxu1 %v15833_v48 }
0x1db5   : > { %14493 = vmatmul.mubr.bf16.gmra.mrb[84].mxu1 %v9637_v60 }
0x1db6   : > { %14597 = vmatpush3.bf16.msra.mxu1 %v15833_v48  ;;  %v15822_v48 = vld [vmem:[#allocation32 + $0x138] sm:$0xff]  }
0x1db7   : > { %14598 = vmatprep.subr.bf16.mxu1 %v15834_v16 }
0x1dba   : > { %14599 = vmatpush3.bf16.msra.mxu1 %v15834_v16  ;;  %v15823_v16 = vld [vmem:[#allocation32 + $0x140] sm:$0xff]  }
0x1dbb   : > { %14600 = vmatprep.subr.bf16.mxu1 %v15835_v0 }
0x1dbe   : > { %14601 = vmatpush3.bf16.msra.mxu1 %v15835_v0 }
0x1dbf   : > { %14602 = vmatprep.subr.bf16.mxu1 %v15836_v27 }
0x1dc2   : > { %14603 = vmatpush3.bf16.msra.mxu1 %v15836_v27  ;;  %v15824_v27 = vld [vmem:[#allocation32 + $0x148] sm:$0xff]  }
0x1e80   : > { %v14490_v28 = vpop.f32.mrb[80].mxu1 }
0x1e81   : > { %v14808_v59 = vadd.f32 %v14490_v28, %v12377_v62  ;;  %v9737_v2 = vpop.f32.mrb[81].mxu1 }
0x1e82   : > { %v14809_v53 = vadd.f32 %v12377_v62, %v9737_v2  ;;  %v14491_v34 = vpop.f32.mrb[82].mxu1 }
0x1e83   : > { %v14810_v40 = vadd.f32 %v14491_v34, %v12377_v62  ;;  %v9740_v22 = vpop.f32.mrb[83].mxu1  ;;  %v9778_v8 = vmax.f32 %v14808_v59, 0.0 }
0x1e84   : > { %v14811_v1 = vadd.f32 %v12377_v62, %v9740_v22  ;;  %v9776_v33 = vmax.f32 %v14809_v53, 0.0 }
0x1e85   : > { %v9779_v3 = vmax.f32 %v14810_v40, 0.0 }
0x1e86   : > { %v9777_v49 = vmax.f32 %v14811_v1, 0.0 }
0x1e87   : > { %v9785_v11 = vpack.c.bf16 %v9779_v3, %v9778_v8 }
0x1e88   : > { %v9784_v58 = vpack.c.bf16 %v9777_v49, %v9776_v33  ;;  %v14494_v51 = vpop.f32.mrb[84].mxu1 }
0x1e89   : > { %v14812_v42 = vadd.f32 %v14494_v51, %v12377_v62  ;;  %v9753_v44 = vpop.f32.mrb[85].mxu1 }
0x1e8a   : > { %v14813_v50 = vadd.f32 %v12377_v62, %v9753_v44  ;;  %v14495_v54 = vpop.f32.mrb[86].mxu1  ;;  %14512 = vmatprep.mubr.bf16.mxu0 %v9784_v58 }
0x1e8b   : > { %v14814_v56 = vadd.f32 %v14495_v54, %v12377_v62  ;;  %v9756_v30 = vpop.f32.mrb[87].mxu1  ;;  %14513 = vmatmul.mubr.bf16.vlgmr.msra.gmra.mrb[120].mxu0 %v9785_v11  ;;  %v9782_v39 = vmax.f32 %v14812_v42, 0.0 }
0x1e8c   : > { %v14815_v63 = vadd.f32 %v12377_v62, %v9756_v30  ;;  %14521 = vmatpush3.bf16.msra.mxu0 %v15807_v41  ;;  %v9780_v47 = vmax.f32 %v14813_v50, 0.0 }
0x1e8d   : > { %v9783_v52 = vmax.f32 %v14814_v56, 0.0  ;;  %14522 = vmatprep.subr.bf16.mxu0 %v15808_v14 }
0x1e8e   : > { %v9781_v57 = vmax.f32 %v14815_v63, 0.0 }
0x1e8f   : > { %v9787_v26 = vpack.c.bf16 %v9783_v52, %v9782_v39 }
0x1e90   : > { %v9786_v4 = vpack.c.bf16 %v9781_v57, %v9780_v47  ;;  %14523 = vmatpush3.bf16.msra.mxu0 %v15808_v14  ;;  %v15817_v47 = vld [vmem:[#allocation32 + $0x110] sm:$0xff]  }
0x1e91   : > { %14524 = vmatprep.subr.bf16.mxu0 %v15809_v32 }
0x1e92   : > { %14516 = vmatprep.mubr.bf16.mxu0 %v9786_v4 }
0x1e93   : > { %14517 = vmatmul.mubr.bf16.gmra.mrb[124].mxu0 %v9787_v26 }
0x1e94   : > { %14525 = vmatpush3.bf16.msra.mxu0 %v15809_v32  ;;  %v15816_v32 = vld [vmem:[#allocation32 + $0x108] sm:$0xff]  }
0x1e95   : > { %14526 = vmatprep.subr.bf16.mxu0 %v15810_v15 }
0x1e98   : > { %14527 = vmatpush3.bf16.msra.mxu0 %v15810_v15 }
0x1e99   : > { %14528 = vmatprep.subr.bf16.mxu0 %v15811_v45 }
0x1e9c   : > { %14529 = vmatpush3.bf16.msra.mxu0 %v15811_v45 }
0x1e9d   : > { %14530 = vmatprep.subr.bf16.mxu0 %v15812_v5 }
0x1ea0   : > { %14531 = vmatpush3.bf16.msra.mxu0 %v15812_v5 }
0x1ea1   : > { %14532 = vmatprep.subr.bf16.mxu0 %v15813_v19 }
0x1ea4   : > { %14533 = vmatpush3.bf16.msra.mxu0 %v15813_v19  ;;  %v15818_v19 = vld [vmem:[#allocation32 + $0x118] sm:$0xff]  }
0x1ea5   : > { %14534 = vmatprep.subr.bf16.mxu0 %v15814_v7 }
0x1ea8   : > { %14535 = vmatpush3.bf16.msra.mxu0 %v15814_v7 }
0x1ea9   : > { %14544 = vmatprep.subr.bf16.mxu0 %v18192_v38 }
0x1f5e   : > { %v14514_v60 = vpop.f32.mrb[120].mxu0 }
0x1f5f   : > { %v9902_v21 = vadd.f32 %v14514_v60, %v12394_v31  ;;  %v9893_v12 = vpop.f32.mrb[121].mxu0  ;;  %v15825_v60 = vld [vmem:[#allocation32 + $0x150] sm:$0xff]  }
0x1f60   : > { %v9894_v41 = vadd.f32 %v12394_v31, %v9893_v12  ;;  %v14515_v62 = vpop.f32.mrb[122].mxu0 }
0x1f61   : > { %v9926_v28 = vadd.f32 %v9902_v21, %v18159_v23  ;;  %v9905_v59 = vadd.f32 %v14515_v62, %v12394_v31  ;;  %v9896_v2 = vpop.f32.mrb[123].mxu0  ;;  %v15826_v62 = vld [vmem:[#allocation32 + $0x158] sm:$0xff]  }
0x1f62   : > { %v9924_v53 = vadd.f32 %v9894_v41, %v18161_v10  ;;  %v9897_v34 = vadd.f32 %v12394_v31, %v9896_v2  ;;  %v15828_v2 = vld [vmem:[#allocation32 + $0x168] sm:$0xff]  }
0x1f63   : > { %v18199_v40 = vmul.f32 %v9926_v28, %v17481_v18  ;;  %v9927_v22 = vadd.f32 %v9905_v59, %v18164_v9  ;;  %v15827_v59 = vld [vmem:[#allocation32 + $0x160] sm:$0xff]  }
0x1f64   : > { %v18203_v1 = vmul.f32 %v9924_v53, %v17479_v17  ;;  %v9925_v8 = vadd.f32 %v9897_v34, %v18167_v36  ;;  %v15829_v53 = vld [vmem:[#allocation32 + $0x170] sm:$0xff]   ;;  %v15830_v34 = vld [vmem:[#allocation32 + $0x178] sm:$0xff]  }
0x1f65   : > { %9942 = vst [vmem:[#allocation2 + $0x18] sm:$0xff] %v18199_v40  ;;  %v18208_v3 = vmul.f32 %v9927_v22, %v17486_v24 }
0x1f66   : > { %9940 = vst [vmem:[#allocation2 + $0x8] sm:$0xff] %v18203_v1  ;;  %v18212_v23 = vmul.f32 %v9925_v8, %v17484_v20  ;;  %v14518_v10 = vpop.f32.mrb[124].mxu0 }
0x1f67   : > { %9943 = vst [vmem:[#allocation2 + $0x20] sm:$0xff] %v18208_v3  ;;  %v9918_v33 = vadd.f32 %v14518_v10, %v12394_v31  ;;  %v9909_v9 = vpop.f32.mrb[125].mxu0  ;;  %v10115_v0 = vpack.c.bf16 %v18208_v3, %v18199_v40 }
0x1f68   : > { %9941 = vst [vmem:[#allocation2 + $0x10] sm:$0xff] %v18212_v23  ;;  %v9910_v49 = vadd.f32 %v12394_v31, %v9909_v9  ;;  %v14519_v11 = vpop.f32.mrb[126].mxu0  ;;  %v10114_v7 = vpack.c.bf16 %v18212_v23, %v18203_v1 }
0x1f69   : > { %v9930_v36 = vadd.f32 %v9918_v33, %v18171_v35  ;;  %v9921_v58 = vadd.f32 %v14519_v11, %v12394_v31  ;;  %v9912_v51 = vpop.f32.mrb[127].mxu0 }
0x1f6a   : > { %v9928_v42 = vadd.f32 %v9910_v49, %v18173_v13  ;;  %v9913_v44 = vadd.f32 %v12394_v31, %v9912_v51  ;;  %v15837_v51 = vld [vmem:[#allocation33 + $0x70] sm:$0xff]  }
0x1f6b   : > { %v18219_v14 = vmul.f32 %v9930_v36, %v17508_v55  ;;  %v9931_v50 = vadd.f32 %v9921_v58, %v18176_v6  ;;  %14604 = vmatprep.subr.bf16.mxu1 %v15837_v51 }
0x1f6c   : > { %v18223_v54 = vmul.f32 %v9928_v42, %v17491_v37  ;;  %v9929_v56 = vadd.f32 %v9913_v44, %v18179_v29  ;;  %14605 = vmatpush3.bf16.msra.mxu1 %v15837_v51  ;;  %v15838_v42 = vld [vmem:[#allocation33 + $0x78] sm:$0xff]   ;;  %v15839_v44 = vld [vmem:[#allocation32 + $0x180] sm:$0xff]  }
0x1f6d   : > { %9946 = vst [vmem:[#allocation2 + $0x38] sm:$0xff] %v18219_v14  ;;  %v18228_v30 = vmul.f32 %v9931_v50, %v17514_v61  ;;  %v9950_v63 = vld [vmem:[#allocation2 + $0x6] sm:$0xff]  ;;  %14606 = vmatprep.subr.bf16.mxu1 %v15838_v42  ;;  %v12412_v50 = vld [vmem:[%s18638_s2 + $0x1] ss:$0 sm:$0xff] }
0x1f6e   : > { %9944 = vst [vmem:[#allocation2 + $0x28] sm:$0xff] %v18223_v54  ;;  %v18232_v35 = vmul.f32 %v9929_v56, %v17500_v43  ;;  %v9953_v13 = vld [vmem:[#allocation2 + $0x1e] sm:$0xff] }
0x1f6f   : > { %9947 = vst [vmem:[#allocation2 + $0x40] sm:$0xff] %v18228_v30  ;;  %v9951_v6 = vld [vmem:[#allocation2 + $0xe] sm:$0xff]  ;;  %v9952_v39 = vld [vmem:[#allocation2 + $0x16] sm:$0xff]  ;;  %v10117_v41 = vpack.c.bf16 %v18228_v30, %v18219_v14 }
0x1f70   : > { %9945 = vst [vmem:[#allocation2 + $0x30] sm:$0xff] %v18232_v35  ;;  %v9958_v52 = vpack.c.bf16 %v9951_v6, %v9950_v63  ;;  %v9959_v29 = vpack.c.bf16 %v9953_v13, %v9952_v39  ;;  %v10116_v31 = vpack.c.bf16 %v18232_v35, %v18223_v54  ;;  %v10256_v21 = vld [vmem:[#allocation2 + $0xa] sm:$0xff]  ;;  %v10257_v12 = vld [vmem:[#allocation2 + $0x12] sm:$0xff]  ;;  %v10258_v33 = vld [vmem:[#allocation2 + $0x1a] sm:$0xff]  ;;  %14607 = vmatpush3.bf16.msra.mxu1 %v15838_v42 }
0x1f71   : > { %v10264_v28 = vpack.c.bf16 %v10257_v12, %v10256_v21  ;;  %14616 = vmatprep.subr.bf16.mxu1 %v15839_v44 }
0x1f72   : > { %14536 = vmatprep.mubr.bf16.mxu0 %v9958_v52 }
0x1f73   : > { %14537 = vmatmul.mubr.bf16.vlgmr.msra.gmra.mrb[128].mxu0 %v9959_v29 }
0x1f74   : > { %14545 = vmatpush3.bf16.msra.mxu0 %v18192_v38  ;;  %v15819_v38 = vld [vmem:[#allocation32 + $0x120] sm:$0xff]  }
0x1f75   : > { %14546 = vmatprep.subr.bf16.mxu0 %v15816_v32  ;;  %v9954_v26 = vld [vmem:[#allocation2 + $0x26] sm:$0xff] }
0x1f76   : > { %v9957_v57 = vld [vmem:[#allocation2 + $0x3e] sm:$0xff] }
0x1f77   : > { %v9955_v4 = vld [vmem:[#allocation2 + $0x2e] sm:$0xff]  ;;  %v9956_v15 = vld [vmem:[#allocation2 + $0x36] sm:$0xff]  ;;  %v10259_v22 = vld [vmem:[#allocation2 + $0x22] sm:$0xff] }
0x1f78   : > { %14547 = vmatpush3.bf16.msra.mxu0 %v15816_v32  ;;  %v9960_v45 = vpack.c.bf16 %v9955_v4, %v9954_v26  ;;  %v9961_v5 = vpack.c.bf16 %v9957_v57, %v9956_v15  ;;  %v10260_v8 = vld [vmem:[#allocation2 + $0x2a] sm:$0xff]  ;;  %v10261_v10 = vld [vmem:[#allocation2 + $0x32] sm:$0xff]  ;;  %v10265_v9 = vpack.c.bf16 %v10259_v22, %v10258_v33  ;;  %v10262_v11 = vld [vmem:[#allocation2 + $0x3a] sm:$0xff] }
0x1f79   : > { %14548 = vmatprep.subr.bf16.mxu0 %v15817_v47  ;;  %v10266_v49 = vpack.c.bf16 %v10261_v10, %v10260_v8  ;;  %v10263_v36 = vld [vmem:[#allocation2 + $0x42] sm:$0xff]  ;;  %v18246_v22 = vld [vmem:[#allocation32 + $0x1c0] sm:$0xff]   ;;  %v15865_v33 = vld [vmem:[#allocation33 + $0x90] sm:$0xff]  }
0x1f7a   : > { %14540 = vmatprep.mubr.bf16.mxu0 %v9960_v45  ;;  %v10267_v58 = vpack.c.bf16 %v10263_v36, %v10262_v11  ;;  %v15863_v8 = vld [vmem:[#allocation33 + $0x80] sm:$0xff]   ;;  %v15864_v10 = vld [vmem:[#allocation33 + $0x88] sm:$0xff]  }
0x1f7b   : > { %14541 = vmatmul.mubr.bf16.gmra.mrb[132].mxu0 %v9961_v5  ;;  %v15868_v11 = vld [vmem:[#allocation33 + $0xa8] sm:$0xff]   ;;  %v12430_v36 = vld [vmem:[%s18639_s17 + $0x1] ss:$0 sm:$0xff] }
0x1f7c   : > { %14549 = vmatpush3.bf16.msra.mxu0 %v15817_v47  ;;  %14560 = vmatprep.mubr.bf16.mxu0 %v10114_v7 }
0x1f7d   : > { %14550 = vmatprep.subr.bf16.mxu0 %v15818_v19 }
0x1f80   : > { %14551 = vmatpush3.bf16.msra.mxu0 %v15818_v19 }
0x1f81   : > { %14552 = vmatprep.subr.bf16.mxu0 %v15819_v38 }
0x1f84   : > { %14553 = vmatpush3.bf16.msra.mxu0 %v15819_v38  ;;  %v15840_v38 = vld [vmem:[#allocation32 + $0x188] sm:$0xff]  }
0x1f85   : > { %14554 = vmatprep.subr.bf16.mxu0 %v15820_v25 }
0x1f88   : > { %14555 = vmatpush3.bf16.msra.mxu0 %v15820_v25 }
0x1f89   : > { %14556 = vmatprep.subr.bf16.mxu0 %v15821_v46 }
0x1f8c   : > { %14557 = vmatpush3.bf16.msra.mxu0 %v15821_v46 }
0x1f8d   : > { %14558 = vmatprep.subr.bf16.mxu0 %v15822_v48 }
0x1f90   : > { %14559 = vmatpush3.bf16.msra.mxu0 %v15822_v48 }
0x1f91   : > { %14568 = vmatprep.subr.bf16.mxu0 %v15823_v16 }
0x1f93   : > { %14561 = vmatmul.mubr.bf16.vlgmr.msra.gmra.mrb[128].mxu0 %v10115_v0 }
0x1f94   : > { %14564 = vmatprep.mubr.bf16.mxu0 %v10116_v31  ;;  %14569 = vmatpush3.bf16.msra.mxu0 %v15823_v16 }
0x1f95   : > { %14570 = vmatprep.subr.bf16.mxu0 %v15824_v27 }
0x1f98   : > { %14571 = vmatpush3.bf16.msra.mxu0 %v15824_v27 }
0x1f99   : > { %14572 = vmatprep.subr.bf16.mxu0 %v15825_v60 }
0x1f9b   : > { %14565 = vmatmul.mubr.bf16.gmra.mrb[132].mxu0 %v10117_v41 }
0x1f9c   : > { %14573 = vmatpush3.bf16.msra.mxu0 %v15825_v60  ;;  %14584 = vmatprep.mubr.bf16.mxu0 %v10264_v28  ;;  %v15841_v60 = vld [vmem:[#allocation32 + $0x190] sm:$0xff]   ;;  %v15842_v28 = vld [vmem:[#allocation32 + $0x198] sm:$0xff]  }
0x1f9d   : > { %14574 = vmatprep.subr.bf16.mxu0 %v15826_v62 }
0x1fa0   : > { %14575 = vmatpush3.bf16.msra.mxu0 %v15826_v62 }
0x1fa1   : > { %14576 = vmatprep.subr.bf16.mxu0 %v15827_v59 }
0x1fa4   : > { %14577 = vmatpush3.bf16.msra.mxu0 %v15827_v59  ;;  %v15843_v59 = vld [vmem:[#allocation32 + $0x1a0] sm:$0xff]  }
0x1fa5   : > { %14578 = vmatprep.subr.bf16.mxu0 %v15828_v2 }
0x1fa8   : > { %14579 = vmatpush3.bf16.msra.mxu0 %v15828_v2  ;;  %v15844_v2 = vld [vmem:[#allocation32 + $0x1a8] sm:$0xff]  }
0x1fa9   : > { %14580 = vmatprep.subr.bf16.mxu0 %v15829_v53 }
0x1fac   : > { %14581 = vmatpush3.bf16.msra.mxu0 %v15829_v53  ;;  %v15845_v53 = vld [vmem:[#allocation32 + $0x1b0] sm:$0xff]  }
0x1fad   : > { %14582 = vmatprep.subr.bf16.mxu0 %v15830_v34 }
0x1fb0   : > { %14583 = vmatpush3.bf16.msra.mxu0 %v15830_v34  ;;  %v15846_v34 = vld [vmem:[#allocation32 + $0x1b8] sm:$0xff]  }
0x1fb1   : > { %14688 = vmatprep.subr.bf16.mxu0 %v15863_v8 }
0x1fb3   : > { %14585 = vmatmul.mubr.bf16.vlgmr.msra.gmra.mrb[128].mxu0 %v10265_v9  ;;  %v15866_v9 = vld [vmem:[#allocation33 + $0x98] sm:$0xff]  }
0x1fb4   : > { %14588 = vmatprep.mubr.bf16.mxu0 %v10266_v49  ;;  %14689 = vmatpush3.bf16.msra.mxu0 %v15863_v8  ;;  %v15867_v49 = vld [vmem:[#allocation33 + $0xa0] sm:$0xff]   ;;  %v15852_v8 = vld [vmem:[#allocation32 + $0x1e8] sm:$0xff]  }
0x1fb5   : > { %14690 = vmatprep.subr.bf16.mxu0 %v15864_v10 }
0x1fb8   : > { %14691 = vmatpush3.bf16.msra.mxu0 %v15864_v10  ;;  %v15853_v10 = vld [vmem:[#allocation32 + $0x1f0] sm:$0xff]  }
0x1fb9   : > { %14692 = vmatprep.subr.bf16.mxu0 %v15865_v33 }
0x1fbb   : > { %14589 = vmatmul.mubr.bf16.gmra.mrb[132].mxu0 %v10267_v58 }
0x1fbc   : > { %14693 = vmatpush3.bf16.msra.mxu0 %v15865_v33  ;;  %v15854_v33 = vld [vmem:[#allocation32 + $0x1f8] sm:$0xff]  }
0x1fbd   : > { %14694 = vmatprep.subr.bf16.mxu0 %v15866_v9 }
0x1fc0   : > { %14695 = vmatpush3.bf16.msra.mxu0 %v15866_v9  ;;  %v15855_v9 = vld [vmem:[#allocation32 + $0x200] sm:$0xff]  }
0x1fc1   : > { %14696 = vmatprep.subr.bf16.mxu0 %v15867_v49 }
0x1fc4   : > { %14697 = vmatpush3.bf16.msra.mxu0 %v15867_v49 }
0x1fc5   : > { %14698 = vmatprep.subr.bf16.mxu0 %v15868_v11 }
0x1fc8   : > { %14699 = vmatpush3.bf16.msra.mxu0 %v15868_v11  ;;  %v15856_v11 = vld [vmem:[#allocation32 + $0x208] sm:$0xff]  }
0x2086   : > { %v14586_v56 = vpop.f32.mrb[128].mxu0 }
0x2087   : > { %v14816_v13 = vadd.f32 %v14586_v56, %v12412_v50  ;;  %v10367_v63 = vpop.f32.mrb[129].mxu0 }
0x2088   : > { %v14817_v6 = vadd.f32 %v12412_v50, %v10367_v63  ;;  %v14587_v39 = vpop.f32.mrb[130].mxu0 }
0x2089   : > { %v14818_v52 = vadd.f32 %v14587_v39, %v12412_v50  ;;  %v10370_v29 = vpop.f32.mrb[131].mxu0  ;;  %v10408_v47 = vmax.f32 %v14816_v13, 0.0 }
0x208a   : > { %v14819_v32 = vadd.f32 %v12412_v50, %v10370_v29  ;;  %v10406_v26 = vmax.f32 %v14817_v6, 0.0 }
0x208b   : > { %v10409_v57 = vmax.f32 %v14818_v52, 0.0 }
0x208c   : > { %v10407_v4 = vmax.f32 %v14819_v32, 0.0 }
0x208d   : > { %v10415_v15 = vpack.c.bf16 %v10409_v57, %v10408_v47 }
0x208e   : > { %v10414_v45 = vpack.c.bf16 %v10407_v4, %v10406_v26  ;;  %v14590_v5 = vpop.f32.mrb[132].mxu0 }
0x208f   : > { %v14820_v19 = vadd.f32 %v14590_v5, %v12412_v50  ;;  %v10383_v7 = vpop.f32.mrb[133].mxu0 }
0x2090   : > { %v14821_v25 = vadd.f32 %v12412_v50, %v10383_v7  ;;  %v14591_v46 = vpop.f32.mrb[134].mxu0  ;;  %14608 = vmatprep.mubr.bf16.mxu1 %v10414_v45 }
0x2091   : > { %v14822_v48 = vadd.f32 %v14591_v46, %v12412_v50  ;;  %v10386_v16 = vpop.f32.mrb[135].mxu0  ;;  %14609 = vmatmul.mubr.bf16.vlgmr.msra.gmra.mrb[88].mxu1 %v10415_v15  ;;  %v10412_v27 = vmax.f32 %v14820_v19, 0.0 }
0x2092   : > { %v14823_v0 = vadd.f32 %v12412_v50, %v10386_v16  ;;  %14617 = vmatpush3.bf16.msra.mxu1 %v15839_v44  ;;  %v10410_v21 = vmax.f32 %v14821_v25, 0.0 }
0x2093   : > { %v10413_v31 = vmax.f32 %v14822_v48, 0.0  ;;  %14618 = vmatprep.subr.bf16.mxu1 %v15840_v38 }
0x2094   : > { %v10411_v12 = vmax.f32 %v14823_v0, 0.0 }
0x2095   : > { %v10417_v41 = vpack.c.bf16 %v10413_v31, %v10412_v27 }
0x2096   : > { %v10416_v62 = vpack.c.bf16 %v10411_v12, %v10410_v21  ;;  %14619 = vmatpush3.bf16.msra.mxu1 %v15840_v38  ;;  %v15849_v21 = vld [vmem:[#allocation32 + $0x1d0] sm:$0xff]  }
0x2097   : > { %14620 = vmatprep.subr.bf16.mxu1 %v15841_v60 }
0x2098   : > { %14612 = vmatprep.mubr.bf16.mxu1 %v10416_v62 }
0x2099   : > { %14613 = vmatmul.mubr.bf16.gmra.mrb[92].mxu1 %v10417_v41 }
0x209a   : > { %14621 = vmatpush3.bf16.msra.mxu1 %v15841_v60  ;;  %v15848_v60 = vld [vmem:[#allocation32 + $0x1c8] sm:$0xff]  }
0x209b   : > { %14622 = vmatprep.subr.bf16.mxu1 %v15842_v28 }
0x209e   : > { %14623 = vmatpush3.bf16.msra.mxu1 %v15842_v28 }
0x209f   : > { %14624 = vmatprep.subr.bf16.mxu1 %v15843_v59 }
0x20a2   : > { %14625 = vmatpush3.bf16.msra.mxu1 %v15843_v59 }
0x20a3   : > { %14626 = vmatprep.subr.bf16.mxu1 %v15844_v2 }
0x20a6   : > { %14627 = vmatpush3.bf16.msra.mxu1 %v15844_v2 }
0x20a7   : > { %14628 = vmatprep.subr.bf16.mxu1 %v15845_v53 }
0x20aa   : > { %14629 = vmatpush3.bf16.msra.mxu1 %v15845_v53  ;;  %v15850_v53 = vld [vmem:[#allocation32 + $0x1d8] sm:$0xff]  }
0x20ab   : > { %14630 = vmatprep.subr.bf16.mxu1 %v15846_v34 }
0x20ae   : > { %14631 = vmatpush3.bf16.msra.mxu1 %v15846_v34 }
0x20af   : > { %14640 = vmatprep.subr.bf16.mxu1 %v18246_v22 }
0x2164   : > { %v14610_v58 = vpop.f32.mrb[88].mxu1 }
0x2165   : > { %v10534_v51 = vadd.f32 %v14610_v58, %v12430_v36  ;;  %v10525_v42 = vpop.f32.mrb[89].mxu1  ;;  %v15857_v58 = vld [vmem:[#allocation32 + $0x210] sm:$0xff]  }
0x2166   : > { %v10526_v44 = vadd.f32 %v12430_v36, %v10525_v42  ;;  %v14611_v50 = vpop.f32.mrb[90].mxu1  ;;  %v15858_v42 = vld [vmem:[#allocation32 + $0x218] sm:$0xff]  }
0x2167   : > { %v10558_v56 = vadd.f32 %v10534_v51, %v18199_v40  ;;  %v10537_v13 = vadd.f32 %v14611_v50, %v12430_v36  ;;  %v10528_v63 = vpop.f32.mrb[91].mxu1  ;;  %v15859_v50 = vld [vmem:[#allocation32 + $0x220] sm:$0xff]  }
0x2168   : > { %v10556_v6 = vadd.f32 %v10526_v44, %v18203_v1  ;;  %v10529_v39 = vadd.f32 %v12430_v36, %v10528_v63  ;;  %v15862_v63 = vld [vmem:[#allocation32 + $0x238] sm:$0xff]  }
0x2169   : > { %v18253_v52 = vmul.f32 %v10558_v56, %v17481_v18  ;;  %v10559_v29 = vadd.f32 %v10537_v13, %v18208_v3  ;;  %v15860_v56 = vld [vmem:[#allocation32 + $0x228] sm:$0xff]   ;;  %v15861_v13 = vld [vmem:[#allocation32 + $0x230] sm:$0xff]  }
0x216a   : > { %v18257_v32 = vmul.f32 %v10556_v6, %v17479_v17  ;;  %v10557_v47 = vadd.f32 %v10529_v39, %v18212_v23 }
0x216b   : > { %10574 = vst [vmem:[#allocation2 + $0x18] sm:$0xff] %v18253_v52  ;;  %v18262_v57 = vmul.f32 %v10559_v29, %v17486_v24 }
0x216c   : > { %10572 = vst [vmem:[#allocation2 + $0x8] sm:$0xff] %v18257_v32  ;;  %v18266_v40 = vmul.f32 %v10557_v47, %v17484_v20  ;;  %v14614_v1 = vpop.f32.mrb[92].mxu1 }
0x216d   : > { %10575 = vst [vmem:[#allocation2 + $0x20] sm:$0xff] %v18262_v57  ;;  %v10550_v26 = vadd.f32 %v14614_v1, %v12430_v36  ;;  %v10541_v3 = vpop.f32.mrb[93].mxu1  ;;  %v10747_v49 = vpack.c.bf16 %v18262_v57, %v18253_v52  ;;  %v15869_v1 = vld [vmem:[#allocation33 + $0xb0] sm:$0xff]  }
0x216e   : > { %10573 = vst [vmem:[#allocation2 + $0x10] sm:$0xff] %v18266_v40  ;;  %v10542_v4 = vadd.f32 %v12430_v36, %v10541_v3  ;;  %v14615_v15 = vpop.f32.mrb[94].mxu1  ;;  %v10746_v34 = vpack.c.bf16 %v18266_v40, %v18257_v32  ;;  %14700 = vmatprep.subr.bf16.mxu0 %v15869_v1  ;;  %v15871_v3 = vld [vmem:[#allocation35] sm:$0xff]  }
0x216f   : > { %v10562_v23 = vadd.f32 %v10550_v26, %v18219_v14  ;;  %v10553_v45 = vadd.f32 %v14615_v15, %v12430_v36  ;;  %v10544_v5 = vpop.f32.mrb[95].mxu1  ;;  %14701 = vmatpush3.bf16.msra.mxu0 %v15869_v1  ;;  %v15870_v26 = vld [vmem:[#allocation33 + $0xb8] sm:$0xff]  }
0x2170   : > { %v10560_v19 = vadd.f32 %v10542_v4, %v18223_v54  ;;  %v10545_v7 = vadd.f32 %v12430_v36, %v10544_v5  ;;  %14702 = vmatprep.subr.bf16.mxu0 %v15870_v26  ;;  %v12448_v4 = vld [vmem:[%s18638_s2 + $0x2] ss:$0 sm:$0xff]  ;;  %s11373_s2 = sand.u32 1, %s17028_s18   ;;  %s16806_s18 = smov [#allocation37]  }
0x2171   : > { %v18273_v38 = vmul.f32 %v10562_v23, %v17508_v55  ;;  %v10563_v25 = vadd.f32 %v10553_v45, %v18228_v30  ;;  %s16548_s20 = sshll.u32 %s16806_s18, 4  ;;  %s16549_s20 = int_to_ptr.vmem [resolvable:$false] %s16548_s20 }
0x2172   : > { %v18277_v46 = vmul.f32 %v10560_v19, %v17491_v37  ;;  %v10561_v48 = vadd.f32 %v10545_v7, %v18232_v35  ;;  %s16550_s23 = scalar_lea.vmem %s16549_s20, 2048  ;;  %p16551_p9 = scmp.lt.s32.totalorder %s18348_s15, %s16549_s20 }
0x2173   : > { %10578 = vst [vmem:[#allocation2 + $0x38] sm:$0xff] %v18273_v38  ;;  %v18282_v16 = vmul.f32 %v10563_v25, %v17514_v61  ;;  %v10582_v30 = vld [vmem:[#allocation2 + $0x4] sm:$0xff]  ;;  %14703 = vmatpush3.bf16.msra.mxu0 %v15870_v26  ;;  %p16552_p13 = scmp.lt.s32.totalorder %s16550_s23, %s16544_s19 }
0x2174   : > { %10576 = vst [vmem:[#allocation2 + $0x28] sm:$0xff] %v18277_v46  ;;  %v18286_v14 = vmul.f32 %v10561_v48, %v17500_v43  ;;  %v18288_v54 = vld [vmem:[#allocation2 + $0x1c] sm:$0xff]  ;;  %14712 = vmatprep.subr.bf16.mxu0 %v15871_v3 }
0x2175   : > { %10579 = vst [vmem:[#allocation2 + $0x40] sm:$0xff] %v18282_v16  ;;  %v10583_v0 = vld [vmem:[#allocation2 + $0xc] sm:$0xff]  ;;  %v10584_v27 = vld [vmem:[#allocation2 + $0x14] sm:$0xff]  ;;  %v10749_v51 = vpack.c.bf16 %v18282_v16, %v18273_v38  ;;  %p16553_p6 = por %p16552_p13, %p16551_p9 }
0x2176   : > { %10577 = vst [vmem:[#allocation2 + $0x30] sm:$0xff] %v18286_v14  ;;  %v10590_v35 = vpack.c.bf16 %v10583_v0, %v10582_v30  ;;  %v10591_v31 = vpack.c.bf16 %v18288_v54, %v10584_v27  ;;  %v10748_v36 = vpack.c.bf16 %v18286_v14, %v18277_v46  ;;  %v10896_v44 = vpack.c.bf16 %v10584_v27, %v10583_v0 }
0x2177   : > { %p16554_p0 = pnand %p16553_p6, %p16547_p1 }
0x2178   : > { %14632 = vmatprep.mubr.bf16.mxu1 %v10590_v35 }
0x2179   : > { %14633 = vmatmul.mubr.bf16.vlgmr.msra.gmra.mrb[96].mxu1 %v10591_v31 }
0x217a   : > { %14641 = vmatpush3.bf16.msra.mxu1 %v18246_v22  ;;  %v15851_v22 = vld [vmem:[#allocation32 + $0x1e0] sm:$0xff]  }
0x217b   : > { %14642 = vmatprep.subr.bf16.mxu1 %v15848_v60  ;;  %v10586_v41 = vld [vmem:[#allocation2 + $0x24] sm:$0xff] }
0x217c   : > { %v18294_v12 = vld [vmem:[#allocation2 + $0x3c] sm:$0xff]  ;;  %v10897_v6 = vpack.c.bf16 %v10586_v41, %v18288_v54  ;;  %v10895_v29 = vld [vmem:[#allocation2 + $0x44] sm:$0xff] }
0x217d   : > { %v10587_v62 = vld [vmem:[#allocation2 + $0x2c] sm:$0xff]  ;;  %v10588_v28 = vld [vmem:[#allocation2 + $0x34] sm:$0xff]  ;;  %v10899_v47 = vpack.c.bf16 %v10895_v29, %v18294_v12 }
0x217e   : > { %14643 = vmatpush3.bf16.msra.mxu1 %v15848_v60  ;;  %v10592_v59 = vpack.c.bf16 %v10587_v62, %v10586_v41  ;;  %v10593_v2 = vpack.c.bf16 %v18294_v12, %v10588_v28  ;;  %v10898_v39 = vpack.c.bf16 %v10588_v28, %v10587_v62  ;;  %v15872_v41 = vld [vmem:[#allocation35 + $0x8] sm:$0xff]  }
0x217f   : > { %14644 = vmatprep.subr.bf16.mxu1 %v15849_v21 }
0x2180   : > { %14636 = vmatprep.mubr.bf16.mxu1 %v10592_v59 }
0x2181   : > { %14637 = vmatmul.mubr.bf16.gmra.mrb[100].mxu1 %v10593_v2 }
0x2182   : > { %14645 = vmatpush3.bf16.msra.mxu1 %v15849_v21  ;;  %14656 = vmatprep.mubr.bf16.mxu1 %v10746_v34 }
0x2183   : > { %14646 = vmatprep.subr.bf16.mxu1 %v15850_v53 }
0x2186   : > { %14647 = vmatpush3.bf16.msra.mxu1 %v15850_v53 }
0x2187   : > { %14648 = vmatprep.subr.bf16.mxu1 %v15851_v22 }
0x218a   : > { %14649 = vmatpush3.bf16.msra.mxu1 %v15851_v22 }
0x218b   : > { %14650 = vmatprep.subr.bf16.mxu1 %v15852_v8 }
0x218e   : > { %14651 = vmatpush3.bf16.msra.mxu1 %v15852_v8  ;;  %v15873_v8 = vld [vmem:[#allocation35 + $0x10] sm:$0xff]  }
0x218f   : > { %14652 = vmatprep.subr.bf16.mxu1 %v15853_v10 }
0x2192   : > { %14653 = vmatpush3.bf16.msra.mxu1 %v15853_v10 }
0x2193   : > { %14654 = vmatprep.subr.bf16.mxu1 %v15854_v33 }
0x2196   : > { %14655 = vmatpush3.bf16.msra.mxu1 %v15854_v33 }
0x2197   : > { %14664 = vmatprep.subr.bf16.mxu1 %v15855_v9 }
0x2199   : > { %14657 = vmatmul.mubr.bf16.vlgmr.msra.gmra.mrb[96].mxu1 %v10747_v49 }
0x219a   : > { %14660 = vmatprep.mubr.bf16.mxu1 %v10748_v36  ;;  %14665 = vmatpush3.bf16.msra.mxu1 %v15855_v9  ;;  %v15875_v36 = vld [vmem:[#allocation35 + $0x20] sm:$0xff]  }
0x219b   : > { %14666 = vmatprep.subr.bf16.mxu1 %v15856_v11 }
0x219e   : > { %14667 = vmatpush3.bf16.msra.mxu1 %v15856_v11  ;;  %v15874_v11 = vld [vmem:[#allocation35 + $0x18] sm:$0xff]  }
0x219f   : > { %14668 = vmatprep.subr.bf16.mxu1 %v15857_v58 }
0x21a1   : > { %14661 = vmatmul.mubr.bf16.gmra.mrb[100].mxu1 %v10749_v51  ;;  %v15877_v51 = vld [vmem:[#allocation35 + $0x30] sm:$0xff]  }
0x21a2   : > { %14669 = vmatpush3.bf16.msra.mxu1 %v15857_v58  ;;  %14680 = vmatprep.mubr.bf16.mxu1 %v10896_v44  ;;  %v15876_v58 = vld [vmem:[#allocation35 + $0x28] sm:$0xff]  }
0x21a3   : > { %14670 = vmatprep.subr.bf16.mxu1 %v15858_v42  ;;  %v12466_v44 = vld [vmem:[%s18639_s17 + $0x2] ss:$0 sm:$0xff]  ;;  %s18354_s17 = scalar_lea.sflag [#allocation38], %s11373_s2 }
0x21a6   : > { %14671 = vmatpush3.bf16.msra.mxu1 %v15858_v42  ;;  %v15878_v42 = vld [vmem:[#allocation35 + $0x38] sm:$0xff]  }
0x21a7   : > { %14672 = vmatprep.subr.bf16.mxu1 %v15859_v50 }
0x21aa   : > { %14673 = vmatpush3.bf16.msra.mxu1 %v15859_v50 }
0x21ab   : > { %14674 = vmatprep.subr.bf16.mxu1 %v15860_v56 }
0x21ae   : > { %14675 = vmatpush3.bf16.msra.mxu1 %v15860_v56 }
0x21af   : > { %14676 = vmatprep.subr.bf16.mxu1 %v15861_v13 }
0x21b2   : > { %14677 = vmatpush3.bf16.msra.mxu1 %v15861_v13 }
0x21b3   : > { %14678 = vmatprep.subr.bf16.mxu1 %v15862_v63 }
0x21b6   : > { %14679 = vmatpush3.bf16.msra.mxu1 %v15862_v63 }
0x21b9   : > { %14681 = vmatmul.mubr.bf16.vlgmr.msra.gmra.mrb[96].mxu1 %v10897_v6 }
0x21ba   : > { %14684 = vmatprep.mubr.bf16.mxu1 %v10898_v39 }
0x21c1   : > { %14685 = vmatmul.mubr.bf16.gmra.mrb[100].mxu1 %v10899_v47 }
0x228c   : > { %v14682_v15 = vpop.f32.mrb[96].mxu1 }
0x228d   : > { %v14824_v23 = vadd.f32 %v14682_v15, %v12448_v4  ;;  %v10999_v45 = vpop.f32.mrb[97].mxu1 }
0x228e   : > { %v14825_v5 = vadd.f32 %v12448_v4, %v10999_v45  ;;  %v14683_v19 = vpop.f32.mrb[98].mxu1 }
0x228f   : > { %v14826_v7 = vadd.f32 %v14683_v19, %v12448_v4  ;;  %v11002_v25 = vpop.f32.mrb[99].mxu1  ;;  %v11040_v54 = vmax.f32 %v14824_v23, 0.0 }
0x2290   : > { %v14827_v48 = vadd.f32 %v12448_v4, %v11002_v25  ;;  %v11038_v0 = vmax.f32 %v14825_v5, 0.0 }
0x2291   : > { %v11041_v30 = vmax.f32 %v14826_v7, 0.0 }
0x2292   : > { %v11039_v27 = vmax.f32 %v14827_v48, 0.0 }
0x2293   : > { %v11047_v35 = vpack.c.bf16 %v11041_v30, %v11040_v54 }
0x2294   : > { %v11046_v31 = vpack.c.bf16 %v11039_v27, %v11038_v0  ;;  %v14686_v60 = vpop.f32.mrb[100].mxu1 }
0x2295   : > { %v14828_v21 = vadd.f32 %v14686_v60, %v12448_v4  ;;  %v11015_v12 = vpop.f32.mrb[101].mxu1 }
0x2296   : > { %v14829_v62 = vadd.f32 %v12448_v4, %v11015_v12  ;;  %v14687_v28 = vpop.f32.mrb[102].mxu1  ;;  %14704 = vmatprep.mubr.bf16.mxu0 %v11046_v31 }
0x2297   : > { %v14830_v59 = vadd.f32 %v14687_v28, %v12448_v4  ;;  %v11018_v2 = vpop.f32.mrb[103].mxu1  ;;  %14705 = vmatmul.mubr.bf16.vlgmr.msra.gmra.mrb[136].mxu0 %v11047_v35  ;;  %v11044_v34 = vmax.f32 %v14828_v21, 0.0 }
0x2298   : > { %v14831_v53 = vadd.f32 %v12448_v4, %v11018_v2  ;;  %14713 = vmatpush3.bf16.msra.mxu0 %v15871_v3  ;;  %v11042_v10 = vmax.f32 %v14829_v62, 0.0 }
0x2299   : > { %v11045_v22 = vmax.f32 %v14830_v59, 0.0  ;;  %14714 = vmatprep.subr.bf16.mxu0 %v15872_v41 }
0x229a   : > { %v11043_v33 = vmax.f32 %v14831_v53, 0.0 }
0x229b   : > { %v11049_v9 = vpack.c.bf16 %v11045_v22, %v11044_v34 }
0x229c   : > { %v11048_v49 = vpack.c.bf16 %v11043_v33, %v11042_v10  ;;  %14715 = vmatpush3.bf16.msra.mxu0 %v15872_v41 }
0x229d   : > { %14716 = vmatprep.subr.bf16.mxu0 %v15873_v8 }
0x229e   : > { %14708 = vmatprep.mubr.bf16.mxu0 %v11048_v49 }
0x229f   : > { %14709 = vmatmul.mubr.bf16.gmra.mrb[140].mxu0 %v11049_v9 }
0x22a0   : > { %14717 = vmatpush3.bf16.msra.mxu0 %v15873_v8 }
0x22a1   : > { %14718 = vmatprep.subr.bf16.mxu0 %v15874_v11 }
0x22a4   : > { %14719 = vmatpush3.bf16.msra.mxu0 %v15874_v11 }
0x22a5   : > { %14720 = vmatprep.subr.bf16.mxu0 %v15875_v36 }
0x22a8   : > { %14721 = vmatpush3.bf16.msra.mxu0 %v15875_v36 }
0x22a9   : > { %14722 = vmatprep.subr.bf16.mxu0 %v15876_v58 }
0x22ac   : > { %14723 = vmatpush3.bf16.msra.mxu0 %v15876_v58 }
0x22ad   : > { %14724 = vmatprep.subr.bf16.mxu0 %v15877_v51 }
0x22b0   : > { %14725 = vmatpush3.bf16.msra.mxu0 %v15877_v51 }
0x22b1   : > { %14726 = vmatprep.subr.bf16.mxu0 %v15878_v42 }
0x22b4   : > { %14727 = vmatpush3.bf16.msra.mxu0 %v15878_v42 }
0x236a   : > { %v14706_v50 = vpop.f32.mrb[136].mxu0 }
0x236b   : > { %v11166_v56 = vadd.f32 %v14706_v50, %v12466_v44  ;;  %v11157_v13 = vpop.f32.mrb[137].mxu0 }
0x236c   : > { %v11158_v63 = vadd.f32 %v12466_v44, %v11157_v13  ;;  %v14707_v6 = vpop.f32.mrb[138].mxu0 }
0x236d   : > { %v11190_v39 = vadd.f32 %v11166_v56, %v18253_v52  ;;  %v11169_v29 = vadd.f32 %v14707_v6, %v12466_v44  ;;  %v11160_v47 = vpop.f32.mrb[139].mxu0 }
0x236e   : > { %v11188_v1 = vadd.f32 %v11158_v63, %v18257_v32  ;;  %v11161_v26 = vadd.f32 %v12466_v44, %v11160_v47 }
0x236f   : > { %v11198_v3 = vmul.f32 %v11190_v39, %v17481_v18  ;;  %v11191_v4 = vadd.f32 %v11169_v29, %v18262_v57 }
0x2370   : > { %v11196_v15 = vmul.f32 %v11188_v1, %v17479_v17  ;;  %v11189_v23 = vadd.f32 %v11161_v26, %v18266_v40 }
0x2371   : > { %11362 = vst [vmem:[%s18316_s22 + $0x10] sm:$0xff] %v11198_v3  ;;  %v11199_v52 = vmul.f32 %v11191_v4, %v17486_v24 }
0x2372   : > { %11360 = vst [vmem:[%s18316_s22] sm:$0xff] %v11196_v15  ;;  %v11197_v32 = vmul.f32 %v11189_v23, %v17484_v20  ;;  %v14710_v45 = vpop.f32.mrb[140].mxu0 }
0x2373   : > { %v11205_v5 = vpack.c.bf16 %v11199_v52, %v11198_v3  ;;  %11363 = vst [vmem:[%s18316_s22 + $0x18] sm:$0xff] %v11199_v52  ;;  %v11182_v57 = vadd.f32 %v14710_v45, %v12466_v44  ;;  %v11173_v19 = vpop.f32.mrb[141].mxu0 }
0x2374   : > { %11361 = vst [vmem:[%s18316_s22 + $0x8] sm:$0xff] %v11197_v32  ;;  %v11174_v40 = vadd.f32 %v12466_v44, %v11173_v19  ;;  %v14711_v7 = vpop.f32.mrb[142].mxu0  ;;  %v11204_v25 = vpack.c.bf16 %v11197_v32, %v11196_v15 }
0x2375   : > { %v11194_v48 = vadd.f32 %v11182_v57, %v18273_v38  ;;  %v11185_v54 = vadd.f32 %v14711_v7, %v12466_v44  ;;  %v11176_v30 = vpop.f32.mrb[143].mxu0 }
0x2376   : > { %v11192_v0 = vadd.f32 %v11174_v40, %v18277_v46  ;;  %v11177_v27 = vadd.f32 %v12466_v44, %v11176_v30  ;;  %14728 = vmatprep.mubr.bf16.mxu0 %v11204_v25 }
0x2377   : > { %v11202_v35 = vmul.f32 %v11194_v48, %v17508_v55  ;;  %v11195_v31 = vadd.f32 %v11185_v54, %v18282_v16  ;;  %14729 = vmatmul.mubr.bf16.vlgmr.msra.gmra.mrb[144].mxu0 %v11205_v5 }
0x2378   : > { %v11200_v60 = vmul.f32 %v11192_v0, %v17491_v37  ;;  %v11193_v38 = vadd.f32 %v11177_v27, %v18286_v14 }
0x2379   : > { %11366 = vst [vmem:[%s18316_s22 + $0x30] sm:$0xff] %v11202_v35  ;;  %v11203_v21 = vmul.f32 %v11195_v31, %v17514_v61 }
0x237a   : > { %11364 = vst [vmem:[%s18316_s22 + $0x20] sm:$0xff] %v11200_v60  ;;  %v11201_v46 = vmul.f32 %v11193_v38, %v17500_v43 }
0x237b   : > { %11367 = vst [vmem:[%s18316_s22 + $0x38] sm:$0xff] %v11203_v21  ;;  %v11207_v12 = vpack.c.bf16 %v11203_v21, %v11202_v35 }
0x237c   : > { %11365 = vst [vmem:[%s18316_s22 + $0x28] sm:$0xff] %v11201_v46  ;;  %v11206_v16 = vpack.c.bf16 %v11201_v46, %v11200_v60 }
0x237e   : > { %14732 = vmatprep.mubr.bf16.mxu0 %v11206_v16 }
0x237f   : > { %14733 = vmatmul.mubr.bf16.gmra.mrb[148].mxu0 %v11207_v12 }
0x2380   : > { %16557 = shalt.err (!%p16554_p0)
}
0x2381   : > { %s16558_s28 = scalar_lea.hbm %s18345_s14, 1024  ;;  %s16562_s2 = scalar_lea.hbm %s18578_s5, 2048 }
0x2382   : > { %p16559_p2 = scmp.ne.s32.totalorder %s18345_s14, %s16558_s28  ;;  %p16563_p10 = scmp.lt.u32.totalorder %s18345_s14, %s18578_s5 }
0x2383   : > { %p16564_p3 = scmp.lt.u32.totalorder %s16562_s2, %s16558_s28  ;;  %p16566_p12 = scmp.lt.u32.totalorder %s16558_s28, %s18345_s14 }
0x2384   : > { %p16560_p8 = pnand %p16559_p2, %p18640_p5 }
0x2385   : > { %p16565_p11 = por %p16564_p3, %p16563_p10 }
0x2386   : > { %p16561_p4 = pneg %p16560_p8 }
0x2387   : > { %p16567_p7 = por %p16566_p12, %p16565_p11 }
0x2389   : > { %p16568_p1 = pnand %p16567_p7, %p16561_p4 }
0x238b   : > { %16571 = shalt.err (!%p16568_p1)
}
0x238c   : > { %s16807_s23 = smov 128   ;;  %s18641_s20 = sld [smem:[#allocation88_spill]] }
0x238d   : > { %s16808_s19 = smov 8   ;;  %s11397_s18 = sshll.u32 %s18316_s22, 4  ;;  %s18382_s18 = int_to_ptr.vmem [resolvable:$true] %s11397_s18 }
0x238e   : > { %15155 = dma.vmem_to_hbm [thread:$0]  (%p18640_p5), %s18348_s15, 1024, %s18345_s14, %s18354_s17, %s16807_s23, %s16807_s23, %s16808_s19  }
0x238f   : > { %s11369_s2 = scalar_lea.sflag [#allocation5], %s17398_s21  ;;  %s16572_s5 = scalar_lea.vmem %s18382_s18, 1024 }
0x2390   : > { %p16573_p9 = scmp.ne.s32.totalorder %s18382_s18, %s16572_s5  ;;  %s16809_s24 = smov [#allocation36]  }
0x2391   : > { %s16576_s25 = sshll.u32 %s16809_s24, 4  ;;  %s16577_s25 = int_to_ptr.vmem [resolvable:$false] %s16576_s25 }
0x2392   : > { %s18380_s28 = scalar_lea.hbm %s18641_s20, %s18341_s13  ;;  %p16574_p13 = pnand %p16573_p9, %p18640_p5 }
0x2393   : > { %s16578_s26 = scalar_lea.vmem %s16577_s25, 2048  ;;  %p16579_p0 = scmp.lt.s32.totalorder %s18382_s18, %s16577_s25 }
0x2394   : > { %p16575_p6 = pneg %p16574_p13  ;;  %p16580_p2 = scmp.lt.s32.totalorder %s16578_s26, %s16572_s5 }
0x2396   : > { %p16581_p8 = por %p16580_p2, %p16579_p0 }
0x2398   : > { %p16582_p4 = pnand %p16581_p8, %p16575_p6 }
0x239a   : > { %16585 = shalt.err (!%p16582_p4)
}
0x239b   : > { %s16586_s15 = scalar_lea.hbm %s18352_s16, 1024  ;;  %s16590_s24 = scalar_lea.hbm %s16990_s12, 2048 }
0x239c   : > { %p16587_p10 = scmp.ne.s32.totalorder %s18352_s16, %s16586_s15  ;;  %p16591_p12 = scmp.lt.u32.totalorder %s18352_s16, %s16990_s12 }
0x239d   : > { %p16592_p7 = scmp.lt.u32.totalorder %s16590_s24, %s16586_s15  ;;  %p16594_p9 = scmp.lt.u32.totalorder %s16586_s15, %s18352_s16 }
0x239e   : > { %p16588_p3 = pnand %p16587_p10, %p18640_p5 }
0x239f   : > { %p16593_p1 = por %p16592_p7, %p16591_p12 }
0x23a0   : > { %p16589_p11 = pneg %p16588_p3 }
0x23a1   : > { %p16595_p13 = por %p16594_p9, %p16593_p1 }
0x23a3   : > { %p16596_p6 = pnand %p16595_p13, %p16589_p11 }
0x23a5   : > { %16599 = shalt.err (!%p16596_p6)
}
0x23a6   : > { %15154 = dma.vmem_to_hbm [thread:$0]  (%p18640_p5), %s18382_s18, 1024, %s18352_s16, %s11369_s2, %s16807_s23, %s16807_s23, %s16808_s19  }
0x23a7   : > { %s16600_s5 = scalar_lea.vmem %s18337_s1, 1024  ;;  %s16810_s26 = smov [#allocation39]  }
0x23a8   : > { %p16601_p0 = scmp.ne.s32.totalorder %s18337_s1, %s16600_s5  ;;  %s16604_s14 = sshll.u32 %s16810_s26, 4  ;;  %s16605_s14 = int_to_ptr.vmem [resolvable:$false] %s16604_s14 }
0x23a9   : > { %s16606_s25 = scalar_lea.vmem %s16605_s14, 2048  ;;  %p16607_p4 = scmp.lt.s32.totalorder %s18337_s1, %s16605_s14 }
0x23aa   : > { %p16602_p2 = pnand %p16601_p0, %p18640_p5  ;;  %p16608_p10 = scmp.lt.s32.totalorder %s16606_s25, %s16600_s5 }
0x23ac   : > { %p16603_p8 = pneg %p16602_p2  ;;  %p16609_p3 = por %p16608_p10, %p16607_p4 }
0x23ae   : > { %p16610_p11 = pnand %p16609_p3, %p16603_p8 }
0x23b0   : > { %16613 = shalt.err (!%p16610_p11)
}
0x23b1   : > { %s16614_s16 = scalar_lea.hbm %s18380_s28, 1024  ;;  %s16618_s22 = scalar_lea.hbm %s18641_s20, 2048 }
0x23b2   : > { %p16615_p12 = scmp.ne.s32.totalorder %s18380_s28, %s16614_s16  ;;  %p16619_p9 = scmp.lt.u32.totalorder %s18380_s28, %s18641_s20 }
0x23b3   : > { %p16620_p13 = scmp.lt.u32.totalorder %s16618_s22, %s16614_s16  ;;  %p16622_p0 = scmp.lt.u32.totalorder %s16614_s16, %s18380_s28 }
0x23b4   : > { %p16616_p7 = pnand %p16615_p12, %p18640_p5 }
0x23b5   : > { %p16621_p6 = por %p16620_p13, %p16619_p9 }
0x23b6   : > { %p16617_p1 = pneg %p16616_p7 }
0x23b7   : > { %p16623_p2 = por %p16622_p0, %p16621_p6 }
0x23b9   : > { %p16624_p8 = pnand %p16623_p2, %p16617_p1 }
0x23bb   : > { %16627 = shalt.err (!%p16624_p8)
}
0x23bc   : > { %s18642_s18 = sld [smem:[#allocation86_spill]]  ;;  %s1467_s2 = scalar_lea.vmem [#allocation40], %s17865_s3 }
0x23bd   : > { %15156 = dma.vmem_to_hbm [thread:$0]  (%p18640_p5), %s18337_s1, 1024, %s18380_s28, %s18354_s17, %s16807_s23, %s16807_s23, %s16808_s19  }
0x23be   : > { %s18643_s1 = sld [smem:[#allocation89_spill]]  ;;  %s11445_s17 = sshll.u32 %s1467_s2, 4  ;;  %s18436_s17 = int_to_ptr.vmem [resolvable:$true] %s11445_s17 }
0x23bf   : > { %s11384_s28 = scalar_lea.sflag [#allocation41], %s17398_s21  ;;  %s16628_s15 = scalar_lea.vmem %s18436_s17, 1024 }
0x23c0   : > { %p16629_p4 = scmp.ne.s32.totalorder %s18436_s17, %s16628_s15  ;;  %s16811_s24 = smov [#allocation40]  }
0x23c1   : > { %s16632_s5 = sshll.u32 %s16811_s24, 4  ;;  %s16633_s5 = int_to_ptr.vmem [resolvable:$false] %s16632_s5 }
0x23c2   : > { %v12475_v14 = vld [vmem:[%s18642_s18] ss:$0 sm:$0xff]  ;;  %p16630_p10 = pnand %p16629_p4, %p18640_p5  ;;  %s16634_s26 = scalar_lea.vmem %s16633_s5, 2048 }
0x23c3   : > { %p16635_p11 = scmp.lt.s32.totalorder %s18436_s17, %s16633_s5  ;;  %p16636_p12 = scmp.lt.s32.totalorder %s16634_s26, %s16628_s15 }
0x23c4   : > { %s18442_s3 = scalar_lea.hbm %s18643_s1, %s18341_s13  ;;  %p16631_p3 = pneg %p16630_p10 }
0x23c5   : > { %p16637_p7 = por %p16636_p12, %p16635_p11 }
0x23c7   : > { %p16638_p1 = pnand %p16637_p7, %p16631_p3 }
0x244a   : > { %v14730_v41 = vpop.f32.mrb[144].mxu0 }
0x244b   : > { %v11322_v62 = vadd.f32 %v14730_v41, %v12475_v14  ;;  %v11313_v28 = vpop.f32.mrb[145].mxu0 }
0x244c   : > { %v11314_v59 = vadd.f32 %v12475_v14, %v11313_v28  ;;  %v14731_v2 = vpop.f32.mrb[146].mxu0 }
0x244d   : > { %v11346_v53 = vmul.f32 %v11322_v62, %v17481_v18  ;;  %v11325_v34 = vadd.f32 %v14731_v2, %v12475_v14  ;;  %v11316_v22 = vpop.f32.mrb[147].mxu0 }
0x244e   : > { %v11344_v8 = vmul.f32 %v11314_v59, %v17479_v17  ;;  %v11317_v10 = vadd.f32 %v12475_v14, %v11316_v22 }
0x244f   : > { %11354 = vst [vmem:[%s1467_s2 + $0x10] sm:$0xff] %v11346_v53  ;;  %v11347_v33 = vmul.f32 %v11325_v34, %v17486_v24 }
0x2450   : > { %11352 = vst [vmem:[%s1467_s2] sm:$0xff] %v11344_v8  ;;  %v11345_v9 = vmul.f32 %v11317_v10, %v17484_v20 }
0x2451   : > { %11355 = vst [vmem:[%s1467_s2 + $0x18] sm:$0xff] %v11347_v33 }
0x2452   : > { %11353 = vst [vmem:[%s1467_s2 + $0x8] sm:$0xff] %v11345_v9  ;;  %v14734_v49 = vpop.f32.mrb[148].mxu0 }
0x2453   : > { %v11338_v11 = vadd.f32 %v14734_v49, %v12475_v14  ;;  %v11329_v36 = vpop.f32.mrb[149].mxu0 }
0x2454   : > { %v11330_v18 = vadd.f32 %v12475_v14, %v11329_v36  ;;  %v14735_v58 = vpop.f32.mrb[150].mxu0 }
0x2455   : > { %v11350_v17 = vmul.f32 %v11338_v11, %v17508_v55  ;;  %v11341_v51 = vadd.f32 %v14735_v58, %v12475_v14  ;;  %v11332_v42 = vpop.f32.mrb[151].mxu0 }
0x2456   : > { %v11348_v24 = vmul.f32 %v11330_v18, %v17491_v37  ;;  %v11333_v44 = vadd.f32 %v12475_v14, %v11332_v42 }
0x2457   : > { %11358 = vst [vmem:[%s1467_s2 + $0x30] sm:$0xff] %v11350_v17  ;;  %v11351_v20 = vmul.f32 %v11341_v51, %v17514_v61 }
0x2458   : > { %11356 = vst [vmem:[%s1467_s2 + $0x20] sm:$0xff] %v11348_v24  ;;  %v11349_v50 = vmul.f32 %v11333_v44, %v17500_v43 }
0x2459   : > { %11359 = vst [vmem:[%s1467_s2 + $0x38] sm:$0xff] %v11351_v20 }
0x245a   : > { %11357 = vst [vmem:[%s1467_s2 + $0x28] sm:$0xff] %v11349_v50 }
0x245b   : > { %16641 = shalt.err (!%p16638_p1)
}
0x245c   : > { %s16642_s13 = scalar_lea.hbm %s18442_s3, 1024  ;;  %s16646_s14 = scalar_lea.hbm %s18643_s1, 2048 }
0x245d   : > { %p16643_p9 = scmp.ne.s32.totalorder %s18442_s3, %s16642_s13  ;;  %p16647_p0 = scmp.lt.u32.totalorder %s18442_s3, %s18643_s1 }
0x245e   : > { %p16648_p2 = scmp.lt.u32.totalorder %s16646_s14, %s16642_s13  ;;  %p16650_p4 = scmp.lt.u32.totalorder %s16642_s13, %s18442_s3 }
0x245f   : > { %p16644_p13 = pnand %p16643_p9, %p18640_p5 }
0x2460   : > { %p16649_p8 = por %p16648_p2, %p16647_p0 }
0x2461   : > { %p16645_p6 = pneg %p16644_p13 }
0x2462   : > { %p16651_p10 = por %p16650_p4, %p16649_p8 }
0x2464   : > { %p16652_p3 = pnand %p16651_p10, %p16645_p6 }
0x2466   : > { %16655 = shalt.err (!%p16652_p3)
}
0x2467   : > { %15157 = dma.vmem_to_hbm [thread:$0]  (%p18640_p5), %s18436_s17, 1024, %s18442_s3, %s11384_s28, %s16807_s23, %s16807_s23, %s16808_s19  }
0x2468 PF: > { %s11460_s25 = sand.u32 1, %s16730_s0   ;;  %p18644_p11 = scmp.ne.s32.totalorder %s18605_s6, 0 }
0x2469   : > { %p18645_p12 = scmp.ge.s32.totalorder %s16742_s11, 2  ;;  %s11461_s16 = scalar_lea.sflag [#allocation5], %s11460_s25 }
0x246b   : > { %p15228_p7 = pnand %p18645_p12, %p18644_p11 }
0x246d   : > { %16717 = dma.done.wait (!%p15228_p7), %s11461_s16, 1024  }
0x246e   : > { %16719 = vsyncadd (!%p15228_p7), %s11461_s16, 4294966272  ;;  %s18646_s9 = sadd.s32 4294967294, %s16742_s11  }
0x246f   : > { %s11469_s22 = sand.u32 1, %s18646_s9  }
0x2470   : > { %s11470_s18 = scalar_lea.sflag [#allocation38], %s11469_s22 }
0x2471   : > { %16721 = dma.done.wait (!%p15228_p7), %s11470_s18, 2048  }
0x2472   : > { %16723 = vsyncadd (!%p15228_p7), %s11470_s18, 4294965248  ;;  %s11488_s21 = scalar_lea.sflag [#allocation41], %s11460_s25 }
0x2473   : > { %16725 = dma.done.wait (!%p15228_p7), %s11488_s21, 1024  }
0x2474   : > { %16727 = vsyncadd (!%p15228_p7), %s11488_s21, 4294966272  ;;  %p105_p5 = scmp.ge.s32.totalorder %s17320_s8, 4   ;;  %s18647_s0 = smov %s16734_s7 }
0x2475   : > { %s18648_s7 = smov %s16738_s10  ;;  %s18649_s10 = smov %s17331_s4 }
0x2476   : > { %s18650_s11 = smov %s17320_s8  ;;  %107 = sbr.rel (!%p105_p5) target bundleno = 95 (0x5f), region = 432 }
0x247d   :  { %11493 = vsyncpa [#allocation4], 1 }
0x247e   :  { %11495 = vsyncpa [#allocation4 + $0x1], 1 }
0x247f   :  { %11496 = vsyncpa [#allocation7], 1 }
0x2480   :  { %11497 = vsyncpa [#allocation10], 1 }
0x2481   :  { %11498 = vsyncpa [#allocation13], 1 }
0x2482   :  { %11499 = vsyncpa [#allocation16], 1 }
0x2483   :  { %11500 = vsyncpa [#allocation19], 1 }
0x2484   :  { %11501 = vsyncpa [#allocation22], 1 }
0x2485   :  { %11502 = vsyncpa [#allocation25], 1 }
0x2486   :  { %11503 = vsyncpa [#allocation28], 1 }
0x2487   :  { %11504 = vsyncpa [#allocation31], 1 }
0x2488   :  { %11505 = vsyncpa [#allocation34], 1 }
0x2489   :  { %11506 = vsyncpa [#allocation5], 1 }
0x248a   :  { %11508 = vsyncpa [#allocation5 + $0x1], 1 }
0x248b   :  { %11509 = vsyncpa [#allocation38], 1 }
0x248c   :  { %11511 = vsyncpa [#allocation38 + $0x1], 1 }
0x248d   :  { %11512 = vsyncpa [#allocation41], 1 }
0x248e   :  { %11514 = vsyncpa [#allocation41 + $0x1], 1 }

</bundles_post_ra>
